<compile_context>
chip_gen: v7x
topology: tpu7x:2x2x1
jax: 0.10.0
libtpu: 0.0.40
codegen_flags: <defaults>
</compile_context>

<pallas_src>
import functools

import numpy as np
import jax
import jax.numpy as jnp
from jax import lax
from jax.experimental import pallas as pl
from jax.experimental.pallas import tpu as pltpu


# ----------------------------------------------------------------------------
# Fused Down kernel: all conv layers + halo crop for one batch element
# ----------------------------------------------------------------------------
def _make_down_kernel(meta, D, H, W, Cin, c, PL):
    """meta: list of (kind, relu, cout, koff) per layer, last entry is the
    padded (3,1,1) final conv.  Everything in meta is static Python."""
    Wp = W + 2
    GUARD = PL  # one zero guard plane on each side of the activation buffers
    # spatial 3x3 tap offsets relative to the output lane position
    sp_deltas = [(ky - 1) * Wp + (kx - 1) for ky in range(3) for kx in range(3)]

    def kernel(x_ref, mask_ref, wpk_ref, bpk_ref, out_ref, a_ref, b_ref):
        # Zero the bf16 ping-pong buffers once (guard planes + per-plane
        # halo/slack lanes must be zero), then drop the input planes in with a
        # single aligned lane-dense store.
        a_ref[...] = jnp.zeros_like(a_ref)
        b_ref[...] = jnp.zeros_like(b_ref)
        a_ref[:, GUARD:GUARD + D * PL] = x_ref[0]

        def conv_layer(src, li, kind, cout, koff, out_d):
            """One whole layer over all out_d output planes: accumulated
            per-tap MXU dots on lane-shifted views of the concatenated
            activation planes (no per-plane loop, no tap-stack scratch)."""
            L = out_d * PL
            if kind == "s":
                deltas = sp_deltas                       # same-plane 3x3 taps
            elif kind == "d":
                deltas = [kd * PL for kd in range(3)]    # valid (3,1,1)
            else:                                        # padded (3,1,1)
                deltas = [(kd - 1) * PL for kd in range(3)]
            bias = bpk_ref[:cout, li:li + 1]             # (cout, 1) f32
            acc = jnp.broadcast_to(bias, (cout, L))      # hoisted: once/layer
            for t, delta in enumerate(deltas):
                w_t = wpk_ref[:cout, koff + t * Cin:koff + (t + 1) * Cin]
                op = src[:, GUARD + delta:GUARD + delta + L]   # (Cin, L) bf16
                acc = acc + jnp.dot(w_t, op,
                                    preferred_element_type=jnp.float32)
            return acc

        bufs = (a_ref, b_ref)
        src_i = 0
        cur_d = D
        for li, (kind, relu, cout, koff) in enumerate(meta[:-1]):
            out_d = cur_d if kind == "s" else cur_d - 2
            z = conv_layer(bufs[src_i], li, kind, cout, koff, out_d)
            if relu:
                z = jnp.maximum(z, 0.0)
            L = out_d * PL
            dst = bufs[1 - src_i]
            # One lane-dense masked store per layer: keeps the zero halo/slack
            # lanes of every plane intact for the next layer, single f32->bf16
            # cast per layer.
            dst[:, GUARD:GUARD + L] = (z * mask_ref[:, :L]).astype(jnp.bfloat16)
            src_i = 1 - src_i
            cur_d = out_d

        # Final padded (3,1,1) conv.  Plane -1 is the (always-zero) front
        # guard; plane cur_d may hold stale data from an earlier, deeper
        # layer, so zero it explicitly before use.
        li = len(meta) - 1
        _, _, cout, koff = meta[-1]
        src = bufs[src_i]
        src[:, GUARD + cur_d * PL:GUARD + (cur_d + 1) * PL] = jnp.zeros(
            (Cin, PL), dtype=jnp.bfloat16)
        yf = conv_layer(src, li, "f", cout, koff, cur_d)   # (c, Dout*PL) f32

        # Fused halo crop: padded planes -> dense (c, Dout, H*W), already in
        # NCDHW order, so the wrapper needs no transpose / crop pass.
        for d in range(cur_d):
            for r in range(H):
                s0 = d * PL + (r + 1) * Wp + 1
                out_ref[0, :, d, r * W:(r + 1) * W] = yf[:, s0:s0 + W]

    return kernel


# ----------------------------------------------------------------------------
# Down.forward wrapper (single jit, single pallas_call)
# ----------------------------------------------------------------------------
@functools.partial(jax.jit, static_argnames=("m", "n", "c", "pool"))
def down_forward(x, params, m, n, c, pool=True):
    N, Cin, D, H, W = x.shape
    assert D - 2 * n >= 1, "depth too small for n valid (3,1,1) convs"
    Hp, Wp = H + 2, W + 2
    P = Hp * Wp
    PL = ((P + 127) // 128) * 128          # lane extent per plane (mult of 128)
    Dout = D - 2 * n
    NL = m + 2 * n + 1                     # number of conv layers

    # ---- input: zero halo + lane padding, channels-major, bf16 (MXU dtype).
    # TODO(synk): at production sizes DMA straight from the NCDHW input inside
    # the kernel instead of materializing this padded copy in HBM.
    xp = jnp.pad(x.astype(jnp.bfloat16),
                 ((0, 0), (0, 0), (0, 0), (1, 1), (1, 1)))   # (N,Cin,D,Hp,Wp)
    xp = xp.reshape(N, Cin, D, P)
    xp = jnp.pad(xp, ((0, 0), (0, 0), (0, 0), (0, PL - P)))
    xp = xp.reshape(N, Cin, D * PL)

    # ---- interior-validity mask (trace-time numpy constant), tiled over D
    pp = np.arange(PL)
    row, col = pp // Wp, pp % Wp
    mplane = ((pp < P) & (row >= 1) & (row <= H) & (col >= 1) & (col <= W))
    mask = jnp.asarray(np.tile(mplane.astype(np.float32), D)[None, :])

    # ---- pack every layer's weights/bias into two inputs
    def s_w(w):   # (Co,Ci,1,3,3) -> (Co, 9*Ci), tap-major (ky,kx) then ci
        co, ci = w.shape[0], w.shape[1]
        return jnp.transpose(w[:, :, 0], (0, 2, 3, 1)).reshape(co, 9 * ci)

    def d_w(w):   # (Co,Ci,3,1,1) -> (Co, 3*Ci), kd-major then ci
        co, ci = w.shape[0], w.shape[1]
        return jnp.transpose(w[:, :, :, 0, 0], (0, 2, 1)).reshape(co, 3 * ci)

    meta, wmats, bvecs = [], [], []
    koff = 0

    def add_layer(kind, relu, wm, b, cout):
        nonlocal koff
        meta.append((kind, relu, cout, koff))
        wmats.append(wm)
        bvecs.append(b)
        koff += wm.shape[1]

    for i in range(m):
        add_layer("s", True, s_w(params[f"m{i}_w"]), params[f"m{i}_b"], Cin)
    for i in range(n):
        add_layer("s", False, s_w(params[f"n{i}_sw"]), params[f"n{i}_sb"], Cin)
        add_layer("d", True, d_w(params[f"n{i}_dw"]), params[f"n{i}_db"], Cin)
    add_layer("f", False, d_w(params["f_w"]), params["f_b"], c)

    CO = max(Cin, c)
    Ktot = koff
    Kpad = ((Ktot + 127) // 128) * 128
    wpk = jnp.concatenate(
        [jnp.pad(wm, ((0, CO - wm.shape[0]), (0, 0))) for wm in wmats], axis=1)
    wpk = jnp.pad(wpk, ((0, 0), (0, Kpad - Ktot))).astype(jnp.bfloat16)
    NLpad = ((NL + 127) // 128) * 128
    bpk = jnp.stack([jnp.pad(b, (0, CO - b.shape[0])) for b in bvecs], axis=1)
    bpk = jnp.pad(bpk, ((0, 0), (0, NLpad - NL))).astype(jnp.float32)

    kernel = _make_down_kernel(meta, D, H, W, Cin, c, PL)

    y = pl.pallas_call(
        kernel,
        out_shape=jax.ShapeDtypeStruct((N, c, Dout, H * W), jnp.float32),
        grid=(N,),
        in_specs=[
            pl.BlockSpec((1, Cin, D * PL), lambda b: (b, 0, 0)),
            pl.BlockSpec((1, D * PL), lambda b: (0, 0)),
            pl.BlockSpec((CO, Kpad), lambda b: (0, 0)),
            pl.BlockSpec((CO, NLpad), lambda b: (0, 0)),
        ],
        out_specs=pl.BlockSpec((1, c, Dout, H * W), lambda b: (b, 0, 0, 0)),
        scratch_shapes=[pltpu.VMEM((Cin, (D + 2) * PL), jnp.bfloat16),
                        pltpu.VMEM((Cin, (D + 2) * PL), jnp.bfloat16)],
        compiler_params=pltpu.CompilerParams(
            dimension_semantics=("parallel",)),
    )(xp, mask, wpk, bpk)

    out = y.reshape(N, c, Dout, H, W)                       # NCDHW, no transpose
    if pool:
        # TODO(synk): fold the (1,2,2) avg-pool into the kernel epilogue for
        # production sizes (needs a stride-2 lane extraction of the dense out).
        Hv, Wv = (H // 2) * 2, (W // 2) * 2
        down = out[..., :Hv, :Wv].reshape(
            N, c, Dout, H // 2, 2, W // 2, 2).mean(axis=(4, 6))
        return out, down
    return out


# ----------------------------------------------------------------------------
# Pure-JAX reference (lax.conv, same bf16-input / f32-accumulate numerics)
# ----------------------------------------------------------------------------
def _ref_conv(x, w, b, pad):
    dn = lax.conv_dimension_numbers(x.shape, w.shape, ("NCDHW", "OIDHW", "NCDHW"))
    y = lax.conv_general_dilated(
        x.astype(jnp.bfloat16), w.astype(jnp.bfloat16),
        window_strides=(1, 1, 1), padding=[(p, p) for p in pad],
        dimension_numbers=dn, preferred_element_type=jnp.float32)
    return y + b.reshape(1, -1, 1, 1, 1)


def ref_forward(x, params, m, n, c, pool=True):
    x = x.astype(jnp.float32)
    for i in range(m):
        x = jax.nn.relu(_ref_conv(x, params[f"m{i}_w"], params[f"m{i}_b"], (0, 1, 1)))
    for i in range(n):
        x = _ref_conv(x, params[f"n{i}_sw"], params[f"n{i}_sb"], (0, 1, 1))
        x = jax.nn.relu(_ref_conv(x, params[f"n{i}_dw"], params[f"n{i}_db"], (0, 0, 0)))
    x = _ref_conv(x, params["f_w"], params["f_b"], (1, 0, 0))
    if pool:
        N, C, D, H, W = x.shape
        down = x.reshape(N, C, D, H // 2, 2, W // 2, 2).mean(axis=(4, 6))
        return x, down
    return x


# ----------------------------------------------------------------------------
if __name__ == "__main__":
    key = jax.random.PRNGKey(0)
    N, inc, D, H, W = 2, 4, 5, 16, 16
    m, n, c, pool = 1, 1, 4, True

    def conv_init(k, cout, cin, kshape):
        k1, k2 = jax.random.split(k)
        fan_in = cin * int(np.prod(kshape))
        bound = 1.0 / np.sqrt(fan_in)
        w = jax.random.uniform(k1, (cout, cin) + kshape, jnp.float32, -bound, bound)
        b = jax.random.uniform(k2, (cout,), jnp.float32, -bound, bound)
        return w, b

    keys = jax.random.split(key, m + 2 * n + 2)
    ki = 0
    params = {}
    for i in range(m):
        params[f"m{i}_w"], params[f"m{i}_b"] = conv_init(keys[ki], inc, inc, (1, 3, 3)); ki += 1
    for i in range(n):
        params[f"n{i}_sw"], params[f"n{i}_sb"] = conv_init(keys[ki], inc, inc, (1, 3, 3)); ki += 1
        params[f"n{i}_dw"], params[f"n{i}_db"] = conv_init(keys[ki], inc, inc, (3, 1, 1)); ki += 1
    params["f_w"], params["f_b"] = conv_init(keys[ki], c, inc, (3, 1, 1)); ki += 1

    x = jax.random.normal(keys[ki], (N, inc, D, H, W), jnp.float32)   # NCDHW

    out, down = down_forward(x, params, m=m, n=n, c=c, pool=pool)
    out = jax.block_until_ready(out)
    down = jax.block_until_ready(down)

    ref_out, ref_down = ref_forward(x, params, m, n, c, pool)
    assert out.shape == (N, c, D - 2 * n, H, W), out.shape
    assert down.shape == (N, c, D - 2 * n, H // 2, W // 2), down.shape
    # bf16 MXU inputs (f32 accumulate) in both kernel and reference.
    np.testing.assert_allclose(np.asarray(out), np.asarray(ref_out), rtol=2e-2, atol=2e-2)
    np.testing.assert_allclose(np.asarray(down), np.asarray(ref_down), rtol=2e-2, atol=2e-2)

    print("KERNEL_OK")
</pallas_src>

<mosaic_0001>
module attributes {stable_mosaic.version = 11 : i64} {
  func.func @kernel(%arg0: i32, %arg1: memref<1x4x1920xbf16, #tpu.memory_space<vmem>>, %arg2: memref<1x1920xf32, #tpu.memory_space<vmem>>, %arg3: memref<4x128xbf16, #tpu.memory_space<vmem>>, %arg4: memref<4x128xf32, #tpu.memory_space<vmem>>, %arg5: memref<1x4x3x256xf32, #tpu.memory_space<vmem>>, %arg6: memref<4x2688xbf16, #tpu.memory_space<vmem>>, %arg7: memref<4x2688xbf16, #tpu.memory_space<vmem>>) attributes {dimension_semantics = [#tpu.dimension_semantics<parallel>], iteration_bounds = array<i64: 2>, scalar_prefetch = 0 : i64, scratch_operands = 2 : i64, tpu.core_type = #tpu.core_type<tc>, window_params = [{transform_indices = @transform_0, window_bounds = array<i64: 1, 4, 1920>}, {pipeline_mode = #tpu.pipeline_mode<synchronous>, transform_indices = @transform_1, window_bounds = array<i64: 1, 1920>}, {pipeline_mode = #tpu.pipeline_mode<synchronous>, transform_indices = @transform_2, window_bounds = array<i64: 4, 128>}, {pipeline_mode = #tpu.pipeline_mode<synchronous>, transform_indices = @transform_3, window_bounds = array<i64: 4, 128>}, {transform_indices = @transform_4, window_bounds = array<i64: 1, 4, 3, 256>}]} {
    %cst = arith.constant 0.000000e+00 : bf16
    %0 = vector.broadcast %cst : bf16 to vector<4x2688xbf16>
    %c0 = arith.constant 0 : index
    %c0_0 = arith.constant 0 : index
    %1 = vector.load %arg6[%c0, %c0_0] : memref<4x2688xbf16, #tpu.memory_space<vmem>>, vector<4x2688xbf16>
    tpu.vector_store %arg6[%c0, %c0_0], %0 {strides = array<i32>} : memref<4x2688xbf16, #tpu.memory_space<vmem>>, vector<4x2688xbf16>,
    %cst_1 = arith.constant 0.000000e+00 : bf16
    %2 = vector.broadcast %cst_1 : bf16 to vector<4x2688xbf16>
    %c0_2 = arith.constant 0 : index
    %c0_3 = arith.constant 0 : index
    %3 = vector.load %arg7[%c0_2, %c0_3] : memref<4x2688xbf16, #tpu.memory_space<vmem>>, vector<4x2688xbf16>
    tpu.vector_store %arg7[%c0_2, %c0_3], %2 {strides = array<i32>} : memref<4x2688xbf16, #tpu.memory_space<vmem>>, vector<4x2688xbf16>,
    %c0_4 = arith.constant 0 : index
    %c0_5 = arith.constant 0 : index
    %c0_6 = arith.constant 0 : index
    %4 = vector.load %arg1[%c0_4, %c0_5, %c0_6] : memref<1x4x1920xbf16, #tpu.memory_space<vmem>>, vector<1x4x1920xbf16>
    %5 = vector.shape_cast %4 : vector<1x4x1920xbf16> to vector<4x1920xbf16>
    %c0_7 = arith.constant 0 : index
    %c384 = arith.constant 384 : index
    %6 = vector.load %arg6[%c0_7, %c384] : memref<4x2688xbf16, #tpu.memory_space<vmem>>, vector<4x1920xbf16>
    tpu.vector_store %arg6[%c0_7, %c384], %5 {strides = array<i32>} : memref<4x2688xbf16, #tpu.memory_space<vmem>>, vector<4x1920xbf16>,
    %c0_8 = arith.constant 0 : index
    %c0_9 = arith.constant 0 : index
    %7 = vector.load %arg4[%c0_8, %c0_9] : memref<4x128xf32, #tpu.memory_space<vmem>>, vector<4x1xf32>
    %8 = vector.shape_cast %7 : vector<4x1xf32> to vector<4x1xf32>
    %9 = vector.broadcast %8 : vector<4x1xf32> to vector<4x1920xf32>
    %c0_10 = arith.constant 0 : index
    %c0_11 = arith.constant 0 : index
    %10 = vector.load %arg3[%c0_10, %c0_11] : memref<4x128xbf16, #tpu.memory_space<vmem>>, vector<4x4xbf16>
    %c0_12 = arith.constant 0 : index
    %c365 = arith.constant 365 : index
    %11 = vector.load %arg6[%c0_12, %c365] : memref<4x2688xbf16, #tpu.memory_space<vmem>>, vector<4x1920xbf16>
    %cst_13 = arith.constant dense<0.000000e+00> : vector<4x1920xf32>
    %12 = tpu.matmul %10, %11, %cst_13 {dimension_numbers = #tpu.dot_dimension_numbers<[1], [0], [0], [1], [0, 0, 1, 1], [], []>} : vector<4x4xbf16>, vector<4x1920xbf16>, vector<4x1920xf32> -> vector<4x1920xf32>
    %13 = arith.addf %9, %12 : vector<4x1920xf32>
    %c0_14 = arith.constant 0 : index
    %c4 = arith.constant 4 : index
    %14 = vector.load %arg3[%c0_14, %c4] : memref<4x128xbf16, #tpu.memory_space<vmem>>, vector<4x4xbf16>
    %c0_15 = arith.constant 0 : index
    %c366 = arith.constant 366 : index
    %15 = vector.load %arg6[%c0_15, %c366] : memref<4x2688xbf16, #tpu.memory_space<vmem>>, vector<4x1920xbf16>
    %cst_16 = arith.constant dense<0.000000e+00> : vector<4x1920xf32>
    %16 = tpu.matmul %14, %15, %cst_16 {dimension_numbers = #tpu.dot_dimension_numbers<[1], [0], [0], [1], [0, 0, 1, 1], [], []>} : vector<4x4xbf16>, vector<4x1920xbf16>, vector<4x1920xf32> -> vector<4x1920xf32>
    %17 = arith.addf %13, %16 : vector<4x1920xf32>
    %c0_17 = arith.constant 0 : index
    %c8 = arith.constant 8 : index
    %18 = vector.load %arg3[%c0_17, %c8] : memref<4x128xbf16, #tpu.memory_space<vmem>>, vector<4x4xbf16>
    %c0_18 = arith.constant 0 : index
    %c367 = arith.constant 367 : index
    %19 = vector.load %arg6[%c0_18, %c367] : memref<4x2688xbf16, #tpu.memory_space<vmem>>, vector<4x1920xbf16>
    %cst_19 = arith.constant dense<0.000000e+00> : vector<4x1920xf32>
    %20 = tpu.matmul %18, %19, %cst_19 {dimension_numbers = #tpu.dot_dimension_numbers<[1], [0], [0], [1], [0, 0, 1, 1], [], []>} : vector<4x4xbf16>, vector<4x1920xbf16>, vector<4x1920xf32> -> vector<4x1920xf32>
    %21 = arith.addf %17, %20 : vector<4x1920xf32>
    %c0_20 = arith.constant 0 : index
    %c12 = arith.constant 12 : index
    %22 = vector.load %arg3[%c0_20, %c12] : memref<4x128xbf16, #tpu.memory_space<vmem>>, vector<4x4xbf16>
    %c0_21 = arith.constant 0 : index
    %c383 = arith.constant 383 : index
    %23 = vector.load %arg6[%c0_21, %c383] : memref<4x2688xbf16, #tpu.memory_space<vmem>>, vector<4x1920xbf16>
    %cst_22 = arith.constant dense<0.000000e+00> : vector<4x1920xf32>
    %24 = tpu.matmul %22, %23, %cst_22 {dimension_numbers = #tpu.dot_dimension_numbers<[1], [0], [0], [1], [0, 0, 1, 1], [], []>} : vector<4x4xbf16>, vector<4x1920xbf16>, vector<4x1920xf32> -> vector<4x1920xf32>
    %25 = arith.addf %21, %24 : vector<4x1920xf32>
    %c0_23 = arith.constant 0 : index
    %c16 = arith.constant 16 : index
    %26 = vector.load %arg3[%c0_23, %c16] : memref<4x128xbf16, #tpu.memory_space<vmem>>, vector<4x4xbf16>
    %c0_24 = arith.constant 0 : index
    %c384_25 = arith.constant 384 : index
    %27 = vector.load %arg6[%c0_24, %c384_25] : memref<4x2688xbf16, #tpu.memory_space<vmem>>, vector<4x1920xbf16>
    %cst_26 = arith.constant dense<0.000000e+00> : vector<4x1920xf32>
    %28 = tpu.matmul %26, %27, %cst_26 {dimension_numbers = #tpu.dot_dimension_numbers<[1], [0], [0], [1], [0, 0, 1, 1], [], []>} : vector<4x4xbf16>, vector<4x1920xbf16>, vector<4x1920xf32> -> vector<4x1920xf32>
    %29 = arith.addf %25, %28 : vector<4x1920xf32>
    %c0_27 = arith.constant 0 : index
    %c20 = arith.constant 20 : index
    %30 = vector.load %arg3[%c0_27, %c20] : memref<4x128xbf16, #tpu.memory_space<vmem>>, vector<4x4xbf16>
    %c0_28 = arith.constant 0 : index
    %c385 = arith.constant 385 : index
    %31 = vector.load %arg6[%c0_28, %c385] : memref<4x2688xbf16, #tpu.memory_space<vmem>>, vector<4x1920xbf16>
    %cst_29 = arith.constant dense<0.000000e+00> : vector<4x1920xf32>
    %32 = tpu.matmul %30, %31, %cst_29 {dimension_numbers = #tpu.dot_dimension_numbers<[1], [0], [0], [1], [0, 0, 1, 1], [], []>} : vector<4x4xbf16>, vector<4x1920xbf16>, vector<4x1920xf32> -> vector<4x1920xf32>
    %33 = arith.addf %29, %32 : vector<4x1920xf32>
    %c0_30 = arith.constant 0 : index
    %c24 = arith.constant 24 : index
    %34 = vector.load %arg3[%c0_30, %c24] : memref<4x128xbf16, #tpu.memory_space<vmem>>, vector<4x4xbf16>
    %c0_31 = arith.constant 0 : index
    %c401 = arith.constant 401 : index
    %35 = vector.load %arg6[%c0_31, %c401] : memref<4x2688xbf16, #tpu.memory_space<vmem>>, vector<4x1920xbf16>
    %cst_32 = arith.constant dense<0.000000e+00> : vector<4x1920xf32>
    %36 = tpu.matmul %34, %35, %cst_32 {dimension_numbers = #tpu.dot_dimension_numbers<[1], [0], [0], [1], [0, 0, 1, 1], [], []>} : vector<4x4xbf16>, vector<4x1920xbf16>, vector<4x1920xf32> -> vector<4x1920xf32>
    %37 = arith.addf %33, %36 : vector<4x1920xf32>
    %c0_33 = arith.constant 0 : index
    %c28 = arith.constant 28 : index
    %38 = vector.load %arg3[%c0_33, %c28] : memref<4x128xbf16, #tpu.memory_space<vmem>>, vector<4x4xbf16>
    %c0_34 = arith.constant 0 : index
    %c402 = arith.constant 402 : index
    %39 = vector.load %arg6[%c0_34, %c402] : memref<4x2688xbf16, #tpu.memory_space<vmem>>, vector<4x1920xbf16>
    %cst_35 = arith.constant dense<0.000000e+00> : vector<4x1920xf32>
    %40 = tpu.matmul %38, %39, %cst_35 {dimension_numbers = #tpu.dot_dimension_numbers<[1], [0], [0], [1], [0, 0, 1, 1], [], []>} : vector<4x4xbf16>, vector<4x1920xbf16>, vector<4x1920xf32> -> vector<4x1920xf32>
    %41 = arith.addf %37, %40 : vector<4x1920xf32>
    %c0_36 = arith.constant 0 : index
    %c32 = arith.constant 32 : index
    %42 = vector.load %arg3[%c0_36, %c32] : memref<4x128xbf16, #tpu.memory_space<vmem>>, vector<4x4xbf16>
    %c0_37 = arith.constant 0 : index
    %c403 = arith.constant 403 : index
    %43 = vector.load %arg6[%c0_37, %c403] : memref<4x2688xbf16, #tpu.memory_space<vmem>>, vector<4x1920xbf16>
    %cst_38 = arith.constant dense<0.000000e+00> : vector<4x1920xf32>
    %44 = tpu.matmul %42, %43, %cst_38 {dimension_numbers = #tpu.dot_dimension_numbers<[1], [0], [0], [1], [0, 0, 1, 1], [], []>} : vector<4x4xbf16>, vector<4x1920xbf16>, vector<4x1920xf32> -> vector<4x1920xf32>
    %45 = arith.addf %41, %44 : vector<4x1920xf32>
    %cst_39 = arith.constant 0.000000e+00 : f32
    %46 = vector.broadcast %cst_39 : f32 to vector<4x1920xf32>
    %47 = arith.maximumf %45, %46 : vector<4x1920xf32>
    %c0_40 = arith.constant 0 : index
    %c0_41 = arith.constant 0 : index
    %48 = vector.load %arg2[%c0_40, %c0_41] : memref<1x1920xf32, #tpu.memory_space<vmem>>, vector<1x1920xf32>
    %49 = vector.broadcast %48 : vector<1x1920xf32> to vector<4x1920xf32>
    %50 = arith.mulf %47, %49 : vector<4x1920xf32>
    %51 = arith.truncf %50 : vector<4x1920xf32> to vector<4x1920xbf16>
    %c0_42 = arith.constant 0 : index
    %c384_43 = arith.constant 384 : index
    %52 = vector.load %arg7[%c0_42, %c384_43] : memref<4x2688xbf16, #tpu.memory_space<vmem>>, vector<4x1920xbf16>
    tpu.vector_store %arg7[%c0_42, %c384_43], %51 {strides = array<i32>} : memref<4x2688xbf16, #tpu.memory_space<vmem>>, vector<4x1920xbf16>,
    %c0_44 = arith.constant 0 : index
    %c1 = arith.constant 1 : index
    %53 = vector.load %arg4[%c0_44, %c1] : memref<4x128xf32, #tpu.memory_space<vmem>>, vector<4x1xf32>
    %54 = vector.shape_cast %53 : vector<4x1xf32> to vector<4x1xf32>
    %55 = vector.broadcast %54 : vector<4x1xf32> to vector<4x1920xf32>
    %c0_45 = arith.constant 0 : index
    %c36 = arith.constant 36 : index
    %56 = vector.load %arg3[%c0_45, %c36] : memref<4x128xbf16, #tpu.memory_space<vmem>>, vector<4x4xbf16>
    %c0_46 = arith.constant 0 : index
    %c365_47 = arith.constant 365 : index
    %57 = vector.load %arg7[%c0_46, %c365_47] : memref<4x2688xbf16, #tpu.memory_space<vmem>>, vector<4x1920xbf16>
    %cst_48 = arith.constant dense<0.000000e+00> : vector<4x1920xf32>
    %58 = tpu.matmul %56, %57, %cst_48 {dimension_numbers = #tpu.dot_dimension_numbers<[1], [0], [0], [1], [0, 0, 1, 1], [], []>} : vector<4x4xbf16>, vector<4x1920xbf16>, vector<4x1920xf32> -> vector<4x1920xf32>
    %59 = arith.addf %55, %58 : vector<4x1920xf32>
    %c0_49 = arith.constant 0 : index
    %c40 = arith.constant 40 : index
    %60 = vector.load %arg3[%c0_49, %c40] : memref<4x128xbf16, #tpu.memory_space<vmem>>, vector<4x4xbf16>
    %c0_50 = arith.constant 0 : index
    %c366_51 = arith.constant 366 : index
    %61 = vector.load %arg7[%c0_50, %c366_51] : memref<4x2688xbf16, #tpu.memory_space<vmem>>, vector<4x1920xbf16>
    %cst_52 = arith.constant dense<0.000000e+00> : vector<4x1920xf32>
    %62 = tpu.matmul %60, %61, %cst_52 {dimension_numbers = #tpu.dot_dimension_numbers<[1], [0], [0], [1], [0, 0, 1, 1], [], []>} : vector<4x4xbf16>, vector<4x1920xbf16>, vector<4x1920xf32> -> vector<4x1920xf32>
    %63 = arith.addf %59, %62 : vector<4x1920xf32>
    %c0_53 = arith.constant 0 : index
    %c44 = arith.constant 44 : index
    %64 = vector.load %arg3[%c0_53, %c44] : memref<4x128xbf16, #tpu.memory_space<vmem>>, vector<4x4xbf16>
    %c0_54 = arith.constant 0 : index
    %c367_55 = arith.constant 367 : index
    %65 = vector.load %arg7[%c0_54, %c367_55] : memref<4x2688xbf16, #tpu.memory_space<vmem>>, vector<4x1920xbf16>
    %cst_56 = arith.constant dense<0.000000e+00> : vector<4x1920xf32>
    %66 = tpu.matmul %64, %65, %cst_56 {dimension_numbers = #tpu.dot_dimension_numbers<[1], [0], [0], [1], [0, 0, 1, 1], [], []>} : vector<4x4xbf16>, vector<4x1920xbf16>, vector<4x1920xf32> -> vector<4x1920xf32>
    %67 = arith.addf %63, %66 : vector<4x1920xf32>
    %c0_57 = arith.constant 0 : index
    %c48 = arith.constant 48 : index
    %68 = vector.load %arg3[%c0_57, %c48] : memref<4x128xbf16, #tpu.memory_space<vmem>>, vector<4x4xbf16>
    %c0_58 = arith.constant 0 : index
    %c383_59 = arith.constant 383 : index
    %69 = vector.load %arg7[%c0_58, %c383_59] : memref<4x2688xbf16, #tpu.memory_space<vmem>>, vector<4x1920xbf16>
    %cst_60 = arith.constant dense<0.000000e+00> : vector<4x1920xf32>
    %70 = tpu.matmul %68, %69, %cst_60 {dimension_numbers = #tpu.dot_dimension_numbers<[1], [0], [0], [1], [0, 0, 1, 1], [], []>} : vector<4x4xbf16>, vector<4x1920xbf16>, vector<4x1920xf32> -> vector<4x1920xf32>
    %71 = arith.addf %67, %70 : vector<4x1920xf32>
    %c0_61 = arith.constant 0 : index
    %c52 = arith.constant 52 : index
    %72 = vector.load %arg3[%c0_61, %c52] : memref<4x128xbf16, #tpu.memory_space<vmem>>, vector<4x4xbf16>
    %c0_62 = arith.constant 0 : index
    %c384_63 = arith.constant 384 : index
    %73 = vector.load %arg7[%c0_62, %c384_63] : memref<4x2688xbf16, #tpu.memory_space<vmem>>, vector<4x1920xbf16>
    %cst_64 = arith.constant dense<0.000000e+00> : vector<4x1920xf32>
    %74 = tpu.matmul %72, %73, %cst_64 {dimension_numbers = #tpu.dot_dimension_numbers<[1], [0], [0], [1], [0, 0, 1, 1], [], []>} : vector<4x4xbf16>, vector<4x1920xbf16>, vector<4x1920xf32> -> vector<4x1920xf32>
    %75 = arith.addf %71, %74 : vector<4x1920xf32>
    %c0_65 = arith.constant 0 : index
    %c56 = arith.constant 56 : index
    %76 = vector.load %arg3[%c0_65, %c56] : memref<4x128xbf16, #tpu.memory_space<vmem>>, vector<4x4xbf16>
    %c0_66 = arith.constant 0 : index
    %c385_67 = arith.constant 385 : index
    %77 = vector.load %arg7[%c0_66, %c385_67] : memref<4x2688xbf16, #tpu.memory_space<vmem>>, vector<4x1920xbf16>
    %cst_68 = arith.constant dense<0.000000e+00> : vector<4x1920xf32>
    %78 = tpu.matmul %76, %77, %cst_68 {dimension_numbers = #tpu.dot_dimension_numbers<[1], [0], [0], [1], [0, 0, 1, 1], [], []>} : vector<4x4xbf16>, vector<4x1920xbf16>, vector<4x1920xf32> -> vector<4x1920xf32>
    %79 = arith.addf %75, %78 : vector<4x1920xf32>
    %c0_69 = arith.constant 0 : index
    %c60 = arith.constant 60 : index
    %80 = vector.load %arg3[%c0_69, %c60] : memref<4x128xbf16, #tpu.memory_space<vmem>>, vector<4x4xbf16>
    %c0_70 = arith.constant 0 : index
    %c401_71 = arith.constant 401 : index
    %81 = vector.load %arg7[%c0_70, %c401_71] : memref<4x2688xbf16, #tpu.memory_space<vmem>>, vector<4x1920xbf16>
    %cst_72 = arith.constant dense<0.000000e+00> : vector<4x1920xf32>
    %82 = tpu.matmul %80, %81, %cst_72 {dimension_numbers = #tpu.dot_dimension_numbers<[1], [0], [0], [1], [0, 0, 1, 1], [], []>} : vector<4x4xbf16>, vector<4x1920xbf16>, vector<4x1920xf32> -> vector<4x1920xf32>
    %83 = arith.addf %79, %82 : vector<4x1920xf32>
    %c0_73 = arith.constant 0 : index
    %c64 = arith.constant 64 : index
    %84 = vector.load %arg3[%c0_73, %c64] : memref<4x128xbf16, #tpu.memory_space<vmem>>, vector<4x4xbf16>
    %c0_74 = arith.constant 0 : index
    %c402_75 = arith.constant 402 : index
    %85 = vector.load %arg7[%c0_74, %c402_75] : memref<4x2688xbf16, #tpu.memory_space<vmem>>, vector<4x1920xbf16>
    %cst_76 = arith.constant dense<0.000000e+00> : vector<4x1920xf32>
    %86 = tpu.matmul %84, %85, %cst_76 {dimension_numbers = #tpu.dot_dimension_numbers<[1], [0], [0], [1], [0, 0, 1, 1], [], []>} : vector<4x4xbf16>, vector<4x1920xbf16>, vector<4x1920xf32> -> vector<4x1920xf32>
    %87 = arith.addf %83, %86 : vector<4x1920xf32>
    %c0_77 = arith.constant 0 : index
    %c68 = arith.constant 68 : index
    %88 = vector.load %arg3[%c0_77, %c68] : memref<4x128xbf16, #tpu.memory_space<vmem>>, vector<4x4xbf16>
    %c0_78 = arith.constant 0 : index
    %c403_79 = arith.constant 403 : index
    %89 = vector.load %arg7[%c0_78, %c403_79] : memref<4x2688xbf16, #tpu.memory_space<vmem>>, vector<4x1920xbf16>
    %cst_80 = arith.constant dense<0.000000e+00> : vector<4x1920xf32>
    %90 = tpu.matmul %88, %89, %cst_80 {dimension_numbers = #tpu.dot_dimension_numbers<[1], [0], [0], [1], [0, 0, 1, 1], [], []>} : vector<4x4xbf16>, vector<4x1920xbf16>, vector<4x1920xf32> -> vector<4x1920xf32>
    %91 = arith.addf %87, %90 : vector<4x1920xf32>
    %c0_81 = arith.constant 0 : index
    %c0_82 = arith.constant 0 : index
    %92 = vector.load %arg2[%c0_81, %c0_82] : memref<1x1920xf32, #tpu.memory_space<vmem>>, vector<1x1920xf32>
    %93 = vector.broadcast %92 : vector<1x1920xf32> to vector<4x1920xf32>
    %94 = arith.mulf %91, %93 : vector<4x1920xf32>
    %95 = arith.truncf %94 : vector<4x1920xf32> to vector<4x1920xbf16>
    %c0_83 = arith.constant 0 : index
    %c384_84 = arith.constant 384 : index
    %96 = vector.load %arg6[%c0_83, %c384_84] : memref<4x2688xbf16, #tpu.memory_space<vmem>>, vector<4x1920xbf16>
    tpu.vector_store %arg6[%c0_83, %c384_84], %95 {strides = array<i32>} : memref<4x2688xbf16, #tpu.memory_space<vmem>>, vector<4x1920xbf16>,
    %c0_85 = arith.constant 0 : index
    %c2 = arith.constant 2 : index
    %97 = vector.load %arg4[%c0_85, %c2] : memref<4x128xf32, #tpu.memory_space<vmem>>, vector<4x1xf32>
    %98 = vector.shape_cast %97 : vector<4x1xf32> to vector<4x1xf32>
    %99 = vector.broadcast %98 : vector<4x1xf32> to vector<4x1152xf32>
    %c0_86 = arith.constant 0 : index
    %c72 = arith.constant 72 : index
    %100 = vector.load %arg3[%c0_86, %c72] : memref<4x128xbf16, #tpu.memory_space<vmem>>, vector<4x4xbf16>
    %c0_87 = arith.constant 0 : index
    %c384_88 = arith.constant 384 : index
    %101 = vector.load %arg6[%c0_87, %c384_88] : memref<4x2688xbf16, #tpu.memory_space<vmem>>, vector<4x1152xbf16>
    %cst_89 = arith.constant dense<0.000000e+00> : vector<4x1152xf32>
    %102 = tpu.matmul %100, %101, %cst_89 {dimension_numbers = #tpu.dot_dimension_numbers<[1], [0], [0], [1], [0, 0, 1, 1], [], []>} : vector<4x4xbf16>, vector<4x1152xbf16>, vector<4x1152xf32> -> vector<4x1152xf32>
    %103 = arith.addf %99, %102 : vector<4x1152xf32>
    %c0_90 = arith.constant 0 : index
    %c76 = arith.constant 76 : index
    %104 = vector.load %arg3[%c0_90, %c76] : memref<4x128xbf16, #tpu.memory_space<vmem>>, vector<4x4xbf16>
    %c0_91 = arith.constant 0 : index
    %c768 = arith.constant 768 : index
    %105 = vector.load %arg6[%c0_91, %c768] : memref<4x2688xbf16, #tpu.memory_space<vmem>>, vector<4x1152xbf16>
    %cst_92 = arith.constant dense<0.000000e+00> : vector<4x1152xf32>
    %106 = tpu.matmul %104, %105, %cst_92 {dimension_numbers = #tpu.dot_dimension_numbers<[1], [0], [0], [1], [0, 0, 1, 1], [], []>} : vector<4x4xbf16>, vector<4x1152xbf16>, vector<4x1152xf32> -> vector<4x1152xf32>
    %107 = arith.addf %103, %106 : vector<4x1152xf32>
    %c0_93 = arith.constant 0 : index
    %c80 = arith.constant 80 : index
    %108 = vector.load %arg3[%c0_93, %c80] : memref<4x128xbf16, #tpu.memory_space<vmem>>, vector<4x4xbf16>
    %c0_94 = arith.constant 0 : index
    %c1152 = arith.constant 1152 : index
    %109 = vector.load %arg6[%c0_94, %c1152] : memref<4x2688xbf16, #tpu.memory_space<vmem>>, vector<4x1152xbf16>
    %cst_95 = arith.constant dense<0.000000e+00> : vector<4x1152xf32>
    %110 = tpu.matmul %108, %109, %cst_95 {dimension_numbers = #tpu.dot_dimension_numbers<[1], [0], [0], [1], [0, 0, 1, 1], [], []>} : vector<4x4xbf16>, vector<4x1152xbf16>, vector<4x1152xf32> -> vector<4x1152xf32>
    %111 = arith.addf %107, %110 : vector<4x1152xf32>
    %cst_96 = arith.constant 0.000000e+00 : f32
    %112 = vector.broadcast %cst_96 : f32 to vector<4x1152xf32>
    %113 = arith.maximumf %111, %112 : vector<4x1152xf32>
    %c0_97 = arith.constant 0 : index
    %c0_98 = arith.constant 0 : index
    %114 = vector.load %arg2[%c0_97, %c0_98] : memref<1x1920xf32, #tpu.memory_space<vmem>>, vector<1x1152xf32>
    %115 = vector.broadcast %114 : vector<1x1152xf32> to vector<4x1152xf32>
    %116 = arith.mulf %113, %115 : vector<4x1152xf32>
    %117 = arith.truncf %116 : vector<4x1152xf32> to vector<4x1152xbf16>
    %c0_99 = arith.constant 0 : index
    %c384_100 = arith.constant 384 : index
    %118 = vector.load %arg7[%c0_99, %c384_100] : memref<4x2688xbf16, #tpu.memory_space<vmem>>, vector<4x1152xbf16>
    tpu.vector_store %arg7[%c0_99, %c384_100], %117 {strides = array<i32>} : memref<4x2688xbf16, #tpu.memory_space<vmem>>, vector<4x1152xbf16>,
    %cst_101 = arith.constant 0.000000e+00 : bf16
    %119 = vector.broadcast %cst_101 : bf16 to vector<4x384xbf16>
    %c0_102 = arith.constant 0 : index
    %c1536 = arith.constant 1536 : index
    %120 = vector.load %arg7[%c0_102, %c1536] : memref<4x2688xbf16, #tpu.memory_space<vmem>>, vector<4x384xbf16>
    tpu.vector_store %arg7[%c0_102, %c1536], %119 {strides = array<i32>} : memref<4x2688xbf16, #tpu.memory_space<vmem>>, vector<4x384xbf16>,
    %c0_103 = arith.constant 0 : index
    %c3 = arith.constant 3 : index
    %121 = vector.load %arg4[%c0_103, %c3] : memref<4x128xf32, #tpu.memory_space<vmem>>, vector<4x1xf32>
    %122 = vector.shape_cast %121 : vector<4x1xf32> to vector<4x1xf32>
    %123 = vector.broadcast %122 : vector<4x1xf32> to vector<4x1152xf32>
    %c0_104 = arith.constant 0 : index
    %c84 = arith.constant 84 : index
    %124 = vector.load %arg3[%c0_104, %c84] : memref<4x128xbf16, #tpu.memory_space<vmem>>, vector<4x4xbf16>
    %c0_105 = arith.constant 0 : index
    %c0_106 = arith.constant 0 : index
    %125 = vector.load %arg7[%c0_105, %c0_106] : memref<4x2688xbf16, #tpu.memory_space<vmem>>, vector<4x1152xbf16>
    %cst_107 = arith.constant dense<0.000000e+00> : vector<4x1152xf32>
    %126 = tpu.matmul %124, %125, %cst_107 {dimension_numbers = #tpu.dot_dimension_numbers<[1], [0], [0], [1], [0, 0, 1, 1], [], []>} : vector<4x4xbf16>, vector<4x1152xbf16>, vector<4x1152xf32> -> vector<4x1152xf32>
    %127 = arith.addf %123, %126 : vector<4x1152xf32>
    %c0_108 = arith.constant 0 : index
    %c88 = arith.constant 88 : index
    %128 = vector.load %arg3[%c0_108, %c88] : memref<4x128xbf16, #tpu.memory_space<vmem>>, vector<4x4xbf16>
    %c0_109 = arith.constant 0 : index
    %c384_110 = arith.constant 384 : index
    %129 = vector.load %arg7[%c0_109, %c384_110] : memref<4x2688xbf16, #tpu.memory_space<vmem>>, vector<4x1152xbf16>
    %cst_111 = arith.constant dense<0.000000e+00> : vector<4x1152xf32>
    %130 = tpu.matmul %128, %129, %cst_111 {dimension_numbers = #tpu.dot_dimension_numbers<[1], [0], [0], [1], [0, 0, 1, 1], [], []>} : vector<4x4xbf16>, vector<4x1152xbf16>, vector<4x1152xf32> -> vector<4x1152xf32>
    %131 = arith.addf %127, %130 : vector<4x1152xf32>
    %c0_112 = arith.constant 0 : index
    %c92 = arith.constant 92 : index
    %132 = vector.load %arg3[%c0_112, %c92] : memref<4x128xbf16, #tpu.memory_space<vmem>>, vector<4x4xbf16>
    %c0_113 = arith.constant 0 : index
    %c768_114 = arith.constant 768 : index
    %133 = vector.load %arg7[%c0_113, %c768_114] : memref<4x2688xbf16, #tpu.memory_space<vmem>>, vector<4x1152xbf16>
    %cst_115 = arith.constant dense<0.000000e+00> : vector<4x1152xf32>
    %134 = tpu.matmul %132, %133, %cst_115 {dimension_numbers = #tpu.dot_dimension_numbers<[1], [0], [0], [1], [0, 0, 1, 1], [], []>} : vector<4x4xbf16>, vector<4x1152xbf16>, vector<4x1152xf32> -> vector<4x1152xf32>
    %135 = arith.addf %131, %134 : vector<4x1152xf32>
    %136 = vector.extract_strided_slice %135 {offsets = [0, 19], sizes = [4, 16], strides = [1, 1]} : vector<4x1152xf32> to vector<4x16xf32>
    %c0_116 = arith.constant 0 : index
    %c0_117 = arith.constant 0 : index
    %c0_118 = arith.constant 0 : index
    %c0_119 = arith.constant 0 : index
    %137 = vector.load %arg5[%c0_116, %c0_117, %c0_118, %c0_119] : memref<1x4x3x256xf32, #tpu.memory_space<vmem>>, vector<1x4x1x16xf32>
    %138 = vector.shape_cast %137 : vector<1x4x1x16xf32> to vector<4x16xf32>
    %139 = vector.shape_cast %136 : vector<4x16xf32> to vector<1x4x1x16xf32>
    tpu.vector_store %arg5[%c0_116, %c0_117, %c0_118, %c0_119], %139 {strides = array<i32>} : memref<1x4x3x256xf32, #tpu.memory_space<vmem>>, vector<1x4x1x16xf32>,
    %140 = vector.extract_strided_slice %135 {offsets = [0, 37], sizes = [4, 16], strides = [1, 1]} : vector<4x1152xf32> to vector<4x16xf32>
    %c0_120 = arith.constant 0 : index
    %c0_121 = arith.constant 0 : index
    %c0_122 = arith.constant 0 : index
    %c16_123 = arith.constant 16 : index
    %141 = vector.load %arg5[%c0_120, %c0_121, %c0_122, %c16_123] : memref<1x4x3x256xf32, #tpu.memory_space<vmem>>, vector<1x4x1x16xf32>
    %142 = vector.shape_cast %141 : vector<1x4x1x16xf32> to vector<4x16xf32>
    %143 = vector.shape_cast %140 : vector<4x16xf32> to vector<1x4x1x16xf32>
    tpu.vector_store %arg5[%c0_120, %c0_121, %c0_122, %c16_123], %143 {strides = array<i32>} : memref<1x4x3x256xf32, #tpu.memory_space<vmem>>, vector<1x4x1x16xf32>,
    %144 = vector.extract_strided_slice %135 {offsets = [0, 55], sizes = [4, 16], strides = [1, 1]} : vector<4x1152xf32> to vector<4x16xf32>
    %c0_124 = arith.constant 0 : index
    %c0_125 = arith.constant 0 : index
    %c0_126 = arith.constant 0 : index
    %c32_127 = arith.constant 32 : index
    %145 = vector.load %arg5[%c0_124, %c0_125, %c0_126, %c32_127] : memref<1x4x3x256xf32, #tpu.memory_space<vmem>>, vector<1x4x1x16xf32>
    %146 = vector.shape_cast %145 : vector<1x4x1x16xf32> to vector<4x16xf32>
    %147 = vector.shape_cast %144 : vector<4x16xf32> to vector<1x4x1x16xf32>
    tpu.vector_store %arg5[%c0_124, %c0_125, %c0_126, %c32_127], %147 {strides = array<i32>} : memref<1x4x3x256xf32, #tpu.memory_space<vmem>>, vector<1x4x1x16xf32>,
    %148 = vector.extract_strided_slice %135 {offsets = [0, 73], sizes = [4, 16], strides = [1, 1]} : vector<4x1152xf32> to vector<4x16xf32>
    %c0_128 = arith.constant 0 : index
    %c0_129 = arith.constant 0 : index
    %c0_130 = arith.constant 0 : index
    %c48_131 = arith.constant 48 : index
    %149 = vector.load %arg5[%c0_128, %c0_129, %c0_130, %c48_131] : memref<1x4x3x256xf32, #tpu.memory_space<vmem>>, vector<1x4x1x16xf32>
    %150 = vector.shape_cast %149 : vector<1x4x1x16xf32> to vector<4x16xf32>
    %151 = vector.shape_cast %148 : vector<4x16xf32> to vector<1x4x1x16xf32>
    tpu.vector_store %arg5[%c0_128, %c0_129, %c0_130, %c48_131], %151 {strides = array<i32>} : memref<1x4x3x256xf32, #tpu.memory_space<vmem>>, vector<1x4x1x16xf32>,
    %152 = vector.extract_strided_slice %135 {offsets = [0, 91], sizes = [4, 16], strides = [1, 1]} : vector<4x1152xf32> to vector<4x16xf32>
    %c0_132 = arith.constant 0 : index
    %c0_133 = arith.constant 0 : index
    %c0_134 = arith.constant 0 : index
    %c64_135 = arith.constant 64 : index
    %153 = vector.load %arg5[%c0_132, %c0_133, %c0_134, %c64_135] : memref<1x4x3x256xf32, #tpu.memory_space<vmem>>, vector<1x4x1x16xf32>
    %154 = vector.shape_cast %153 : vector<1x4x1x16xf32> to vector<4x16xf32>
    %155 = vector.shape_cast %152 : vector<4x16xf32> to vector<1x4x1x16xf32>
    tpu.vector_store %arg5[%c0_132, %c0_133, %c0_134, %c64_135], %155 {strides = array<i32>} : memref<1x4x3x256xf32, #tpu.memory_space<vmem>>, vector<1x4x1x16xf32>,
    %156 = vector.extract_strided_slice %135 {offsets = [0, 109], sizes = [4, 16], strides = [1, 1]} : vector<4x1152xf32> to vector<4x16xf32>
    %c0_136 = arith.constant 0 : index
    %c0_137 = arith.constant 0 : index
    %c0_138 = arith.constant 0 : index
    %c80_139 = arith.constant 80 : index
    %157 = vector.load %arg5[%c0_136, %c0_137, %c0_138, %c80_139] : memref<1x4x3x256xf32, #tpu.memory_space<vmem>>, vector<1x4x1x16xf32>
    %158 = vector.shape_cast %157 : vector<1x4x1x16xf32> to vector<4x16xf32>
    %159 = vector.shape_cast %156 : vector<4x16xf32> to vector<1x4x1x16xf32>
    tpu.vector_store %arg5[%c0_136, %c0_137, %c0_138, %c80_139], %159 {strides = array<i32>} : memref<1x4x3x256xf32, #tpu.memory_space<vmem>>, vector<1x4x1x16xf32>,
    %160 = vector.extract_strided_slice %135 {offsets = [0, 127], sizes = [4, 16], strides = [1, 1]} : vector<4x1152xf32> to vector<4x16xf32>
    %c0_140 = arith.constant 0 : index
    %c0_141 = arith.constant 0 : index
    %c0_142 = arith.constant 0 : index
    %c96 = arith.constant 96 : index
    %161 = vector.load %arg5[%c0_140, %c0_141, %c0_142, %c96] : memref<1x4x3x256xf32, #tpu.memory_space<vmem>>, vector<1x4x1x16xf32>
    %162 = vector.shape_cast %161 : vector<1x4x1x16xf32> to vector<4x16xf32>
    %163 = vector.shape_cast %160 : vector<4x16xf32> to vector<1x4x1x16xf32>
    tpu.vector_store %arg5[%c0_140, %c0_141, %c0_142, %c96], %163 {strides = array<i32>} : memref<1x4x3x256xf32, #tpu.memory_space<vmem>>, vector<1x4x1x16xf32>,
    %164 = vector.extract_strided_slice %135 {offsets = [0, 145], sizes = [4, 16], strides = [1, 1]} : vector<4x1152xf32> to vector<4x16xf32>
    %c0_143 = arith.constant 0 : index
    %c0_144 = arith.constant 0 : index
    %c0_145 = arith.constant 0 : index
    %c112 = arith.constant 112 : index
    %165 = vector.load %arg5[%c0_143, %c0_144, %c0_145, %c112] : memref<1x4x3x256xf32, #tpu.memory_space<vmem>>, vector<1x4x1x16xf32>
    %166 = vector.shape_cast %165 : vector<1x4x1x16xf32> to vector<4x16xf32>
    %167 = vector.shape_cast %164 : vector<4x16xf32> to vector<1x4x1x16xf32>
    tpu.vector_store %arg5[%c0_143, %c0_144, %c0_145, %c112], %167 {strides = array<i32>} : memref<1x4x3x256xf32, #tpu.memory_space<vmem>>, vector<1x4x1x16xf32>,
    %168 = vector.extract_strided_slice %135 {offsets = [0, 163], sizes = [4, 16], strides = [1, 1]} : vector<4x1152xf32> to vector<4x16xf32>
    %c0_146 = arith.constant 0 : index
    %c0_147 = arith.constant 0 : index
    %c0_148 = arith.constant 0 : index
    %c128 = arith.constant 128 : index
    %169 = vector.load %arg5[%c0_146, %c0_147, %c0_148, %c128] : memref<1x4x3x256xf32, #tpu.memory_space<vmem>>, vector<1x4x1x16xf32>
    %170 = vector.shape_cast %169 : vector<1x4x1x16xf32> to vector<4x16xf32>
    %171 = vector.shape_cast %168 : vector<4x16xf32> to vector<1x4x1x16xf32>
    tpu.vector_store %arg5[%c0_146, %c0_147, %c0_148, %c128], %171 {strides = array<i32>} : memref<1x4x3x256xf32, #tpu.memory_space<vmem>>, vector<1x4x1x16xf32>,
    %172 = vector.extract_strided_slice %135 {offsets = [0, 181], sizes = [4, 16], strides = [1, 1]} : vector<4x1152xf32> to vector<4x16xf32>
    %c0_149 = arith.constant 0 : index
    %c0_150 = arith.constant 0 : index
    %c0_151 = arith.constant 0 : index
    %c144 = arith.constant 144 : index
    %173 = vector.load %arg5[%c0_149, %c0_150, %c0_151, %c144] : memref<1x4x3x256xf32, #tpu.memory_space<vmem>>, vector<1x4x1x16xf32>
    %174 = vector.shape_cast %173 : vector<1x4x1x16xf32> to vector<4x16xf32>
    %175 = vector.shape_cast %172 : vector<4x16xf32> to vector<1x4x1x16xf32>
    tpu.vector_store %arg5[%c0_149, %c0_150, %c0_151, %c144], %175 {strides = array<i32>} : memref<1x4x3x256xf32, #tpu.memory_space<vmem>>, vector<1x4x1x16xf32>,
    %176 = vector.extract_strided_slice %135 {offsets = [0, 199], sizes = [4, 16], strides = [1, 1]} : vector<4x1152xf32> to vector<4x16xf32>
    %c0_152 = arith.constant 0 : index
    %c0_153 = arith.constant 0 : index
    %c0_154 = arith.constant 0 : index
    %c160 = arith.constant 160 : index
    %177 = vector.load %arg5[%c0_152, %c0_153, %c0_154, %c160] : memref<1x4x3x256xf32, #tpu.memory_space<vmem>>, vector<1x4x1x16xf32>
    %178 = vector.shape_cast %177 : vector<1x4x1x16xf32> to vector<4x16xf32>
    %179 = vector.shape_cast %176 : vector<4x16xf32> to vector<1x4x1x16xf32>
    tpu.vector_store %arg5[%c0_152, %c0_153, %c0_154, %c160], %179 {strides = array<i32>} : memref<1x4x3x256xf32, #tpu.memory_space<vmem>>, vector<1x4x1x16xf32>,
    %180 = vector.extract_strided_slice %135 {offsets = [0, 217], sizes = [4, 16], strides = [1, 1]} : vector<4x1152xf32> to vector<4x16xf32>
    %c0_155 = arith.constant 0 : index
    %c0_156 = arith.constant 0 : index
    %c0_157 = arith.constant 0 : index
    %c176 = arith.constant 176 : index
    %181 = vector.load %arg5[%c0_155, %c0_156, %c0_157, %c176] : memref<1x4x3x256xf32, #tpu.memory_space<vmem>>, vector<1x4x1x16xf32>
    %182 = vector.shape_cast %181 : vector<1x4x1x16xf32> to vector<4x16xf32>
    %183 = vector.shape_cast %180 : vector<4x16xf32> to vector<1x4x1x16xf32>
    tpu.vector_store %arg5[%c0_155, %c0_156, %c0_157, %c176], %183 {strides = array<i32>} : memref<1x4x3x256xf32, #tpu.memory_space<vmem>>, vector<1x4x1x16xf32>,
    %184 = vector.extract_strided_slice %135 {offsets = [0, 235], sizes = [4, 16], strides = [1, 1]} : vector<4x1152xf32> to vector<4x16xf32>
    %c0_158 = arith.constant 0 : index
    %c0_159 = arith.constant 0 : index
    %c0_160 = arith.constant 0 : index
    %c192 = arith.constant 192 : index
    %185 = vector.load %arg5[%c0_158, %c0_159, %c0_160, %c192] : memref<1x4x3x256xf32, #tpu.memory_space<vmem>>, vector<1x4x1x16xf32>
    %186 = vector.shape_cast %185 : vector<1x4x1x16xf32> to vector<4x16xf32>
    %187 = vector.shape_cast %184 : vector<4x16xf32> to vector<1x4x1x16xf32>
    tpu.vector_store %arg5[%c0_158, %c0_159, %c0_160, %c192], %187 {strides = array<i32>} : memref<1x4x3x256xf32, #tpu.memory_space<vmem>>, vector<1x4x1x16xf32>,
    %188 = vector.extract_strided_slice %135 {offsets = [0, 253], sizes = [4, 16], strides = [1, 1]} : vector<4x1152xf32> to vector<4x16xf32>
    %c0_161 = arith.constant 0 : index
    %c0_162 = arith.constant 0 : index
    %c0_163 = arith.constant 0 : index
    %c208 = arith.constant 208 : index
    %189 = vector.load %arg5[%c0_161, %c0_162, %c0_163, %c208] : memref<1x4x3x256xf32, #tpu.memory_space<vmem>>, vector<1x4x1x16xf32>
    %190 = vector.shape_cast %189 : vector<1x4x1x16xf32> to vector<4x16xf32>
    %191 = vector.shape_cast %188 : vector<4x16xf32> to vector<1x4x1x16xf32>
    tpu.vector_store %arg5[%c0_161, %c0_162, %c0_163, %c208], %191 {strides = array<i32>} : memref<1x4x3x256xf32, #tpu.memory_space<vmem>>, vector<1x4x1x16xf32>,
    %192 = vector.extract_strided_slice %135 {offsets = [0, 271], sizes = [4, 16], strides = [1, 1]} : vector<4x1152xf32> to vector<4x16xf32>
    %c0_164 = arith.constant 0 : index
    %c0_165 = arith.constant 0 : index
    %c0_166 = arith.constant 0 : index
    %c224 = arith.constant 224 : index
    %193 = vector.load %arg5[%c0_164, %c0_165, %c0_166, %c224] : memref<1x4x3x256xf32, #tpu.memory_space<vmem>>, vector<1x4x1x16xf32>
    %194 = vector.shape_cast %193 : vector<1x4x1x16xf32> to vector<4x16xf32>
    %195 = vector.shape_cast %192 : vector<4x16xf32> to vector<1x4x1x16xf32>
    tpu.vector_store %arg5[%c0_164, %c0_165, %c0_166, %c224], %195 {strides = array<i32>} : memref<1x4x3x256xf32, #tpu.memory_space<vmem>>, vector<1x4x1x16xf32>,
    %196 = vector.extract_strided_slice %135 {offsets = [0, 289], sizes = [4, 16], strides = [1, 1]} : vector<4x1152xf32> to vector<4x16xf32>
    %c0_167 = arith.constant 0 : index
    %c0_168 = arith.constant 0 : index
    %c0_169 = arith.constant 0 : index
    %c240 = arith.constant 240 : index
    %197 = vector.load %arg5[%c0_167, %c0_168, %c0_169, %c240] : memref<1x4x3x256xf32, #tpu.memory_space<vmem>>, vector<1x4x1x16xf32>
    %198 = vector.shape_cast %197 : vector<1x4x1x16xf32> to vector<4x16xf32>
    %199 = vector.shape_cast %196 : vector<4x16xf32> to vector<1x4x1x16xf32>
    tpu.vector_store %arg5[%c0_167, %c0_168, %c0_169, %c240], %199 {strides = array<i32>} : memref<1x4x3x256xf32, #tpu.memory_space<vmem>>, vector<1x4x1x16xf32>,
    %200 = vector.extract_strided_slice %135 {offsets = [0, 403], sizes = [4, 16], strides = [1, 1]} : vector<4x1152xf32> to vector<4x16xf32>
    %c0_170 = arith.constant 0 : index
    %c0_171 = arith.constant 0 : index
    %c1_172 = arith.constant 1 : index
    %c0_173 = arith.constant 0 : index
    %201 = vector.load %arg5[%c0_170, %c0_171, %c1_172, %c0_173] : memref<1x4x3x256xf32, #tpu.memory_space<vmem>>, vector<1x4x1x16xf32>
    %202 = vector.shape_cast %201 : vector<1x4x1x16xf32> to vector<4x16xf32>
    %203 = vector.shape_cast %200 : vector<4x16xf32> to vector<1x4x1x16xf32>
    tpu.vector_store %arg5[%c0_170, %c0_171, %c1_172, %c0_173], %203 {strides = array<i32>} : memref<1x4x3x256xf32, #tpu.memory_space<vmem>>, vector<1x4x1x16xf32>,
    %204 = vector.extract_strided_slice %135 {offsets = [0, 421], sizes = [4, 16], strides = [1, 1]} : vector<4x1152xf32> to vector<4x16xf32>
    %c0_174 = arith.constant 0 : index
    %c0_175 = arith.constant 0 : index
    %c1_176 = arith.constant 1 : index
    %c16_177 = arith.constant 16 : index
    %205 = vector.load %arg5[%c0_174, %c0_175, %c1_176, %c16_177] : memref<1x4x3x256xf32, #tpu.memory_space<vmem>>, vector<1x4x1x16xf32>
    %206 = vector.shape_cast %205 : vector<1x4x1x16xf32> to vector<4x16xf32>
    %207 = vector.shape_cast %204 : vector<4x16xf32> to vector<1x4x1x16xf32>
    tpu.vector_store %arg5[%c0_174, %c0_175, %c1_176, %c16_177], %207 {strides = array<i32>} : memref<1x4x3x256xf32, #tpu.memory_space<vmem>>, vector<1x4x1x16xf32>,
    %208 = vector.extract_strided_slice %135 {offsets = [0, 439], sizes = [4, 16], strides = [1, 1]} : vector<4x1152xf32> to vector<4x16xf32>
    %c0_178 = arith.constant 0 : index
    %c0_179 = arith.constant 0 : index
    %c1_180 = arith.constant 1 : index
    %c32_181 = arith.constant 32 : index
    %209 = vector.load %arg5[%c0_178, %c0_179, %c1_180, %c32_181] : memref<1x4x3x256xf32, #tpu.memory_space<vmem>>, vector<1x4x1x16xf32>
    %210 = vector.shape_cast %209 : vector<1x4x1x16xf32> to vector<4x16xf32>
    %211 = vector.shape_cast %208 : vector<4x16xf32> to vector<1x4x1x16xf32>
    tpu.vector_store %arg5[%c0_178, %c0_179, %c1_180, %c32_181], %211 {strides = array<i32>} : memref<1x4x3x256xf32, #tpu.memory_space<vmem>>, vector<1x4x1x16xf32>,
    %212 = vector.extract_strided_slice %135 {offsets = [0, 457], sizes = [4, 16], strides = [1, 1]} : vector<4x1152xf32> to vector<4x16xf32>
    %c0_182 = arith.constant 0 : index
    %c0_183 = arith.constant 0 : index
    %c1_184 = arith.constant 1 : index
    %c48_185 = arith.constant 48 : index
    %213 = vector.load %arg5[%c0_182, %c0_183, %c1_184, %c48_185] : memref<1x4x3x256xf32, #tpu.memory_space<vmem>>, vector<1x4x1x16xf32>
    %214 = vector.shape_cast %213 : vector<1x4x1x16xf32> to vector<4x16xf32>
    %215 = vector.shape_cast %212 : vector<4x16xf32> to vector<1x4x1x16xf32>
    tpu.vector_store %arg5[%c0_182, %c0_183, %c1_184, %c48_185], %215 {strides = array<i32>} : memref<1x4x3x256xf32, #tpu.memory_space<vmem>>, vector<1x4x1x16xf32>,
    %216 = vector.extract_strided_slice %135 {offsets = [0, 475], sizes = [4, 16], strides = [1, 1]} : vector<4x1152xf32> to vector<4x16xf32>
    %c0_186 = arith.constant 0 : index
    %c0_187 = arith.constant 0 : index
    %c1_188 = arith.constant 1 : index
    %c64_189 = arith.constant 64 : index
    %217 = vector.load %arg5[%c0_186, %c0_187, %c1_188, %c64_189] : memref<1x4x3x256xf32, #tpu.memory_space<vmem>>, vector<1x4x1x16xf32>
    %218 = vector.shape_cast %217 : vector<1x4x1x16xf32> to vector<4x16xf32>
    %219 = vector.shape_cast %216 : vector<4x16xf32> to vector<1x4x1x16xf32>
    tpu.vector_store %arg5[%c0_186, %c0_187, %c1_188, %c64_189], %219 {strides = array<i32>} : memref<1x4x3x256xf32, #tpu.memory_space<vmem>>, vector<1x4x1x16xf32>,
    %220 = vector.extract_strided_slice %135 {offsets = [0, 493], sizes = [4, 16], strides = [1, 1]} : vector<4x1152xf32> to vector<4x16xf32>
    %c0_190 = arith.constant 0 : index
    %c0_191 = arith.constant 0 : index
    %c1_192 = arith.constant 1 : index
    %c80_193 = arith.constant 80 : index
    %221 = vector.load %arg5[%c0_190, %c0_191, %c1_192, %c80_193] : memref<1x4x3x256xf32, #tpu.memory_space<vmem>>, vector<1x4x1x16xf32>
    %222 = vector.shape_cast %221 : vector<1x4x1x16xf32> to vector<4x16xf32>
    %223 = vector.shape_cast %220 : vector<4x16xf32> to vector<1x4x1x16xf32>
    tpu.vector_store %arg5[%c0_190, %c0_191, %c1_192, %c80_193], %223 {strides = array<i32>} : memref<1x4x3x256xf32, #tpu.memory_space<vmem>>, vector<1x4x1x16xf32>,
    %224 = vector.extract_strided_slice %135 {offsets = [0, 511], sizes = [4, 16], strides = [1, 1]} : vector<4x1152xf32> to vector<4x16xf32>
    %c0_194 = arith.constant 0 : index
    %c0_195 = arith.constant 0 : index
    %c1_196 = arith.constant 1 : index
    %c96_197 = arith.constant 96 : index
    %225 = vector.load %arg5[%c0_194, %c0_195, %c1_196, %c96_197] : memref<1x4x3x256xf32, #tpu.memory_space<vmem>>, vector<1x4x1x16xf32>
    %226 = vector.shape_cast %225 : vector<1x4x1x16xf32> to vector<4x16xf32>
    %227 = vector.shape_cast %224 : vector<4x16xf32> to vector<1x4x1x16xf32>
    tpu.vector_store %arg5[%c0_194, %c0_195, %c1_196, %c96_197], %227 {strides = array<i32>} : memref<1x4x3x256xf32, #tpu.memory_space<vmem>>, vector<1x4x1x16xf32>,
    %228 = vector.extract_strided_slice %135 {offsets = [0, 529], sizes = [4, 16], strides = [1, 1]} : vector<4x1152xf32> to vector<4x16xf32>
    %c0_198 = arith.constant 0 : index
    %c0_199 = arith.constant 0 : index
    %c1_200 = arith.constant 1 : index
    %c112_201 = arith.constant 112 : index
    %229 = vector.load %arg5[%c0_198, %c0_199, %c1_200, %c112_201] : memref<1x4x3x256xf32, #tpu.memory_space<vmem>>, vector<1x4x1x16xf32>
    %230 = vector.shape_cast %229 : vector<1x4x1x16xf32> to vector<4x16xf32>
    %231 = vector.shape_cast %228 : vector<4x16xf32> to vector<1x4x1x16xf32>
    tpu.vector_store %arg5[%c0_198, %c0_199, %c1_200, %c112_201], %231 {strides = array<i32>} : memref<1x4x3x256xf32, #tpu.memory_space<vmem>>, vector<1x4x1x16xf32>,
    %232 = vector.extract_strided_slice %135 {offsets = [0, 547], sizes = [4, 16], strides = [1, 1]} : vector<4x1152xf32> to vector<4x16xf32>
    %c0_202 = arith.constant 0 : index
    %c0_203 = arith.constant 0 : index
    %c1_204 = arith.constant 1 : index
    %c128_205 = arith.constant 128 : index
    %233 = vector.load %arg5[%c0_202, %c0_203, %c1_204, %c128_205] : memref<1x4x3x256xf32, #tpu.memory_space<vmem>>, vector<1x4x1x16xf32>
    %234 = vector.shape_cast %233 : vector<1x4x1x16xf32> to vector<4x16xf32>
    %235 = vector.shape_cast %232 : vector<4x16xf32> to vector<1x4x1x16xf32>
    tpu.vector_store %arg5[%c0_202, %c0_203, %c1_204, %c128_205], %235 {strides = array<i32>} : memref<1x4x3x256xf32, #tpu.memory_space<vmem>>, vector<1x4x1x16xf32>,
    %236 = vector.extract_strided_slice %135 {offsets = [0, 565], sizes = [4, 16], strides = [1, 1]} : vector<4x1152xf32> to vector<4x16xf32>
    %c0_206 = arith.constant 0 : index
    %c0_207 = arith.constant 0 : index
    %c1_208 = arith.constant 1 : index
    %c144_209 = arith.constant 144 : index
    %237 = vector.load %arg5[%c0_206, %c0_207, %c1_208, %c144_209] : memref<1x4x3x256xf32, #tpu.memory_space<vmem>>, vector<1x4x1x16xf32>
    %238 = vector.shape_cast %237 : vector<1x4x1x16xf32> to vector<4x16xf32>
    %239 = vector.shape_cast %236 : vector<4x16xf32> to vector<1x4x1x16xf32>
    tpu.vector_store %arg5[%c0_206, %c0_207, %c1_208, %c144_209], %239 {strides = array<i32>} : memref<1x4x3x256xf32, #tpu.memory_space<vmem>>, vector<1x4x1x16xf32>,
    %240 = vector.extract_strided_slice %135 {offsets = [0, 583], sizes = [4, 16], strides = [1, 1]} : vector<4x1152xf32> to vector<4x16xf32>
    %c0_210 = arith.constant 0 : index
    %c0_211 = arith.constant 0 : index
    %c1_212 = arith.constant 1 : index
    %c160_213 = arith.constant 160 : index
    %241 = vector.load %arg5[%c0_210, %c0_211, %c1_212, %c160_213] : memref<1x4x3x256xf32, #tpu.memory_space<vmem>>, vector<1x4x1x16xf32>
    %242 = vector.shape_cast %241 : vector<1x4x1x16xf32> to vector<4x16xf32>
    %243 = vector.shape_cast %240 : vector<4x16xf32> to vector<1x4x1x16xf32>
    tpu.vector_store %arg5[%c0_210, %c0_211, %c1_212, %c160_213], %243 {strides = array<i32>} : memref<1x4x3x256xf32, #tpu.memory_space<vmem>>, vector<1x4x1x16xf32>,
    %244 = vector.extract_strided_slice %135 {offsets = [0, 601], sizes = [4, 16], strides = [1, 1]} : vector<4x1152xf32> to vector<4x16xf32>
    %c0_214 = arith.constant 0 : index
    %c0_215 = arith.constant 0 : index
    %c1_216 = arith.constant 1 : index
    %c176_217 = arith.constant 176 : index
    %245 = vector.load %arg5[%c0_214, %c0_215, %c1_216, %c176_217] : memref<1x4x3x256xf32, #tpu.memory_space<vmem>>, vector<1x4x1x16xf32>
    %246 = vector.shape_cast %245 : vector<1x4x1x16xf32> to vector<4x16xf32>
    %247 = vector.shape_cast %244 : vector<4x16xf32> to vector<1x4x1x16xf32>
    tpu.vector_store %arg5[%c0_214, %c0_215, %c1_216, %c176_217], %247 {strides = array<i32>} : memref<1x4x3x256xf32, #tpu.memory_space<vmem>>, vector<1x4x1x16xf32>,
    %248 = vector.extract_strided_slice %135 {offsets = [0, 619], sizes = [4, 16], strides = [1, 1]} : vector<4x1152xf32> to vector<4x16xf32>
    %c0_218 = arith.constant 0 : index
    %c0_219 = arith.constant 0 : index
    %c1_220 = arith.constant 1 : index
    %c192_221 = arith.constant 192 : index
    %249 = vector.load %arg5[%c0_218, %c0_219, %c1_220, %c192_221] : memref<1x4x3x256xf32, #tpu.memory_space<vmem>>, vector<1x4x1x16xf32>
    %250 = vector.shape_cast %249 : vector<1x4x1x16xf32> to vector<4x16xf32>
    %251 = vector.shape_cast %248 : vector<4x16xf32> to vector<1x4x1x16xf32>
    tpu.vector_store %arg5[%c0_218, %c0_219, %c1_220, %c192_221], %251 {strides = array<i32>} : memref<1x4x3x256xf32, #tpu.memory_space<vmem>>, vector<1x4x1x16xf32>,
    %252 = vector.extract_strided_slice %135 {offsets = [0, 637], sizes = [4, 16], strides = [1, 1]} : vector<4x1152xf32> to vector<4x16xf32>
    %c0_222 = arith.constant 0 : index
    %c0_223 = arith.constant 0 : index
    %c1_224 = arith.constant 1 : index
    %c208_225 = arith.constant 208 : index
    %253 = vector.load %arg5[%c0_222, %c0_223, %c1_224, %c208_225] : memref<1x4x3x256xf32, #tpu.memory_space<vmem>>, vector<1x4x1x16xf32>
    %254 = vector.shape_cast %253 : vector<1x4x1x16xf32> to vector<4x16xf32>
    %255 = vector.shape_cast %252 : vector<4x16xf32> to vector<1x4x1x16xf32>
    tpu.vector_store %arg5[%c0_222, %c0_223, %c1_224, %c208_225], %255 {strides = array<i32>} : memref<1x4x3x256xf32, #tpu.memory_space<vmem>>, vector<1x4x1x16xf32>,
    %256 = vector.extract_strided_slice %135 {offsets = [0, 655], sizes = [4, 16], strides = [1, 1]} : vector<4x1152xf32> to vector<4x16xf32>
    %c0_226 = arith.constant 0 : index
    %c0_227 = arith.constant 0 : index
    %c1_228 = arith.constant 1 : index
    %c224_229 = arith.constant 224 : index
    %257 = vector.load %arg5[%c0_226, %c0_227, %c1_228, %c224_229] : memref<1x4x3x256xf32, #tpu.memory_space<vmem>>, vector<1x4x1x16xf32>
    %258 = vector.shape_cast %257 : vector<1x4x1x16xf32> to vector<4x16xf32>
    %259 = vector.shape_cast %256 : vector<4x16xf32> to vector<1x4x1x16xf32>
    tpu.vector_store %arg5[%c0_226, %c0_227, %c1_228, %c224_229], %259 {strides = array<i32>} : memref<1x4x3x256xf32, #tpu.memory_space<vmem>>, vector<1x4x1x16xf32>,
    %260 = vector.extract_strided_slice %135 {offsets = [0, 673], sizes = [4, 16], strides = [1, 1]} : vector<4x1152xf32> to vector<4x16xf32>
    %c0_230 = arith.constant 0 : index
    %c0_231 = arith.constant 0 : index
    %c1_232 = arith.constant 1 : index
    %c240_233 = arith.constant 240 : index
    %261 = vector.load %arg5[%c0_230, %c0_231, %c1_232, %c240_233] : memref<1x4x3x256xf32, #tpu.memory_space<vmem>>, vector<1x4x1x16xf32>
    %262 = vector.shape_cast %261 : vector<1x4x1x16xf32> to vector<4x16xf32>
    %263 = vector.shape_cast %260 : vector<4x16xf32> to vector<1x4x1x16xf32>
    tpu.vector_store %arg5[%c0_230, %c0_231, %c1_232, %c240_233], %263 {strides = array<i32>} : memref<1x4x3x256xf32, #tpu.memory_space<vmem>>, vector<1x4x1x16xf32>,
    %264 = vector.extract_strided_slice %135 {offsets = [0, 787], sizes = [4, 16], strides = [1, 1]} : vector<4x1152xf32> to vector<4x16xf32>
    %c0_234 = arith.constant 0 : index
    %c0_235 = arith.constant 0 : index
    %c2_236 = arith.constant 2 : index
    %c0_237 = arith.constant 0 : index
    %265 = vector.load %arg5[%c0_234, %c0_235, %c2_236, %c0_237] : memref<1x4x3x256xf32, #tpu.memory_space<vmem>>, vector<1x4x1x16xf32>
    %266 = vector.shape_cast %265 : vector<1x4x1x16xf32> to vector<4x16xf32>
    %267 = vector.shape_cast %264 : vector<4x16xf32> to vector<1x4x1x16xf32>
    tpu.vector_store %arg5[%c0_234, %c0_235, %c2_236, %c0_237], %267 {strides = array<i32>} : memref<1x4x3x256xf32, #tpu.memory_space<vmem>>, vector<1x4x1x16xf32>,
    %268 = vector.extract_strided_slice %135 {offsets = [0, 805], sizes = [4, 16], strides = [1, 1]} : vector<4x1152xf32> to vector<4x16xf32>
    %c0_238 = arith.constant 0 : index
    %c0_239 = arith.constant 0 : index
    %c2_240 = arith.constant 2 : index
    %c16_241 = arith.constant 16 : index
    %269 = vector.load %arg5[%c0_238, %c0_239, %c2_240, %c16_241] : memref<1x4x3x256xf32, #tpu.memory_space<vmem>>, vector<1x4x1x16xf32>
    %270 = vector.shape_cast %269 : vector<1x4x1x16xf32> to vector<4x16xf32>
    %271 = vector.shape_cast %268 : vector<4x16xf32> to vector<1x4x1x16xf32>
    tpu.vector_store %arg5[%c0_238, %c0_239, %c2_240, %c16_241], %271 {strides = array<i32>} : memref<1x4x3x256xf32, #tpu.memory_space<vmem>>, vector<1x4x1x16xf32>,
    %272 = vector.extract_strided_slice %135 {offsets = [0, 823], sizes = [4, 16], strides = [1, 1]} : vector<4x1152xf32> to vector<4x16xf32>
    %c0_242 = arith.constant 0 : index
    %c0_243 = arith.constant 0 : index
    %c2_244 = arith.constant 2 : index
    %c32_245 = arith.constant 32 : index
    %273 = vector.load %arg5[%c0_242, %c0_243, %c2_244, %c32_245] : memref<1x4x3x256xf32, #tpu.memory_space<vmem>>, vector<1x4x1x16xf32>
    %274 = vector.shape_cast %273 : vector<1x4x1x16xf32> to vector<4x16xf32>
    %275 = vector.shape_cast %272 : vector<4x16xf32> to vector<1x4x1x16xf32>
    tpu.vector_store %arg5[%c0_242, %c0_243, %c2_244, %c32_245], %275 {strides = array<i32>} : memref<1x4x3x256xf32, #tpu.memory_space<vmem>>, vector<1x4x1x16xf32>,
    %276 = vector.extract_strided_slice %135 {offsets = [0, 841], sizes = [4, 16], strides = [1, 1]} : vector<4x1152xf32> to vector<4x16xf32>
    %c0_246 = arith.constant 0 : index
    %c0_247 = arith.constant 0 : index
    %c2_248 = arith.constant 2 : index
    %c48_249 = arith.constant 48 : index
    %277 = vector.load %arg5[%c0_246, %c0_247, %c2_248, %c48_249] : memref<1x4x3x256xf32, #tpu.memory_space<vmem>>, vector<1x4x1x16xf32>
    %278 = vector.shape_cast %277 : vector<1x4x1x16xf32> to vector<4x16xf32>
    %279 = vector.shape_cast %276 : vector<4x16xf32> to vector<1x4x1x16xf32>
    tpu.vector_store %arg5[%c0_246, %c0_247, %c2_248, %c48_249], %279 {strides = array<i32>} : memref<1x4x3x256xf32, #tpu.memory_space<vmem>>, vector<1x4x1x16xf32>,
    %280 = vector.extract_strided_slice %135 {offsets = [0, 859], sizes = [4, 16], strides = [1, 1]} : vector<4x1152xf32> to vector<4x16xf32>
    %c0_250 = arith.constant 0 : index
    %c0_251 = arith.constant 0 : index
    %c2_252 = arith.constant 2 : index
    %c64_253 = arith.constant 64 : index
    %281 = vector.load %arg5[%c0_250, %c0_251, %c2_252, %c64_253] : memref<1x4x3x256xf32, #tpu.memory_space<vmem>>, vector<1x4x1x16xf32>
    %282 = vector.shape_cast %281 : vector<1x4x1x16xf32> to vector<4x16xf32>
    %283 = vector.shape_cast %280 : vector<4x16xf32> to vector<1x4x1x16xf32>
    tpu.vector_store %arg5[%c0_250, %c0_251, %c2_252, %c64_253], %283 {strides = array<i32>} : memref<1x4x3x256xf32, #tpu.memory_space<vmem>>, vector<1x4x1x16xf32>,
    %284 = vector.extract_strided_slice %135 {offsets = [0, 877], sizes = [4, 16], strides = [1, 1]} : vector<4x1152xf32> to vector<4x16xf32>
    %c0_254 = arith.constant 0 : index
    %c0_255 = arith.constant 0 : index
    %c2_256 = arith.constant 2 : index
    %c80_257 = arith.constant 80 : index
    %285 = vector.load %arg5[%c0_254, %c0_255, %c2_256, %c80_257] : memref<1x4x3x256xf32, #tpu.memory_space<vmem>>, vector<1x4x1x16xf32>
    %286 = vector.shape_cast %285 : vector<1x4x1x16xf32> to vector<4x16xf32>
    %287 = vector.shape_cast %284 : vector<4x16xf32> to vector<1x4x1x16xf32>
    tpu.vector_store %arg5[%c0_254, %c0_255, %c2_256, %c80_257], %287 {strides = array<i32>} : memref<1x4x3x256xf32, #tpu.memory_space<vmem>>, vector<1x4x1x16xf32>,
    %288 = vector.extract_strided_slice %135 {offsets = [0, 895], sizes = [4, 16], strides = [1, 1]} : vector<4x1152xf32> to vector<4x16xf32>
    %c0_258 = arith.constant 0 : index
    %c0_259 = arith.constant 0 : index
    %c2_260 = arith.constant 2 : index
    %c96_261 = arith.constant 96 : index
    %289 = vector.load %arg5[%c0_258, %c0_259, %c2_260, %c96_261] : memref<1x4x3x256xf32, #tpu.memory_space<vmem>>, vector<1x4x1x16xf32>
    %290 = vector.shape_cast %289 : vector<1x4x1x16xf32> to vector<4x16xf32>
    %291 = vector.shape_cast %288 : vector<4x16xf32> to vector<1x4x1x16xf32>
    tpu.vector_store %arg5[%c0_258, %c0_259, %c2_260, %c96_261], %291 {strides = array<i32>} : memref<1x4x3x256xf32, #tpu.memory_space<vmem>>, vector<1x4x1x16xf32>,
    %292 = vector.extract_strided_slice %135 {offsets = [0, 913], sizes = [4, 16], strides = [1, 1]} : vector<4x1152xf32> to vector<4x16xf32>
    %c0_262 = arith.constant 0 : index
    %c0_263 = arith.constant 0 : index
    %c2_264 = arith.constant 2 : index
    %c112_265 = arith.constant 112 : index
    %293 = vector.load %arg5[%c0_262, %c0_263, %c2_264, %c112_265] : memref<1x4x3x256xf32, #tpu.memory_space<vmem>>, vector<1x4x1x16xf32>
    %294 = vector.shape_cast %293 : vector<1x4x1x16xf32> to vector<4x16xf32>
    %295 = vector.shape_cast %292 : vector<4x16xf32> to vector<1x4x1x16xf32>
    tpu.vector_store %arg5[%c0_262, %c0_263, %c2_264, %c112_265], %295 {strides = array<i32>} : memref<1x4x3x256xf32, #tpu.memory_space<vmem>>, vector<1x4x1x16xf32>,
    %296 = vector.extract_strided_slice %135 {offsets = [0, 931], sizes = [4, 16], strides = [1, 1]} : vector<4x1152xf32> to vector<4x16xf32>
    %c0_266 = arith.constant 0 : index
    %c0_267 = arith.constant 0 : index
    %c2_268 = arith.constant 2 : index
    %c128_269 = arith.constant 128 : index
    %297 = vector.load %arg5[%c0_266, %c0_267, %c2_268, %c128_269] : memref<1x4x3x256xf32, #tpu.memory_space<vmem>>, vector<1x4x1x16xf32>
    %298 = vector.shape_cast %297 : vector<1x4x1x16xf32> to vector<4x16xf32>
    %299 = vector.shape_cast %296 : vector<4x16xf32> to vector<1x4x1x16xf32>
    tpu.vector_store %arg5[%c0_266, %c0_267, %c2_268, %c128_269], %299 {strides = array<i32>} : memref<1x4x3x256xf32, #tpu.memory_space<vmem>>, vector<1x4x1x16xf32>,
    %300 = vector.extract_strided_slice %135 {offsets = [0, 949], sizes = [4, 16], strides = [1, 1]} : vector<4x1152xf32> to vector<4x16xf32>
    %c0_270 = arith.constant 0 : index
    %c0_271 = arith.constant 0 : index
    %c2_272 = arith.constant 2 : index
    %c144_273 = arith.constant 144 : index
    %301 = vector.load %arg5[%c0_270, %c0_271, %c2_272, %c144_273] : memref<1x4x3x256xf32, #tpu.memory_space<vmem>>, vector<1x4x1x16xf32>
    %302 = vector.shape_cast %301 : vector<1x4x1x16xf32> to vector<4x16xf32>
    %303 = vector.shape_cast %300 : vector<4x16xf32> to vector<1x4x1x16xf32>
    tpu.vector_store %arg5[%c0_270, %c0_271, %c2_272, %c144_273], %303 {strides = array<i32>} : memref<1x4x3x256xf32, #tpu.memory_space<vmem>>, vector<1x4x1x16xf32>,
    %304 = vector.extract_strided_slice %135 {offsets = [0, 967], sizes = [4, 16], strides = [1, 1]} : vector<4x1152xf32> to vector<4x16xf32>
    %c0_274 = arith.constant 0 : index
    %c0_275 = arith.constant 0 : index
    %c2_276 = arith.constant 2 : index
    %c160_277 = arith.constant 160 : index
    %305 = vector.load %arg5[%c0_274, %c0_275, %c2_276, %c160_277] : memref<1x4x3x256xf32, #tpu.memory_space<vmem>>, vector<1x4x1x16xf32>
    %306 = vector.shape_cast %305 : vector<1x4x1x16xf32> to vector<4x16xf32>
    %307 = vector.shape_cast %304 : vector<4x16xf32> to vector<1x4x1x16xf32>
    tpu.vector_store %arg5[%c0_274, %c0_275, %c2_276, %c160_277], %307 {strides = array<i32>} : memref<1x4x3x256xf32, #tpu.memory_space<vmem>>, vector<1x4x1x16xf32>,
    %308 = vector.extract_strided_slice %135 {offsets = [0, 985], sizes = [4, 16], strides = [1, 1]} : vector<4x1152xf32> to vector<4x16xf32>
    %c0_278 = arith.constant 0 : index
    %c0_279 = arith.constant 0 : index
    %c2_280 = arith.constant 2 : index
    %c176_281 = arith.constant 176 : index
    %309 = vector.load %arg5[%c0_278, %c0_279, %c2_280, %c176_281] : memref<1x4x3x256xf32, #tpu.memory_space<vmem>>, vector<1x4x1x16xf32>
    %310 = vector.shape_cast %309 : vector<1x4x1x16xf32> to vector<4x16xf32>
    %311 = vector.shape_cast %308 : vector<4x16xf32> to vector<1x4x1x16xf32>
    tpu.vector_store %arg5[%c0_278, %c0_279, %c2_280, %c176_281], %311 {strides = array<i32>} : memref<1x4x3x256xf32, #tpu.memory_space<vmem>>, vector<1x4x1x16xf32>,
    %312 = vector.extract_strided_slice %135 {offsets = [0, 1003], sizes = [4, 16], strides = [1, 1]} : vector<4x1152xf32> to vector<4x16xf32>
    %c0_282 = arith.constant 0 : index
    %c0_283 = arith.constant 0 : index
    %c2_284 = arith.constant 2 : index
    %c192_285 = arith.constant 192 : index
    %313 = vector.load %arg5[%c0_282, %c0_283, %c2_284, %c192_285] : memref<1x4x3x256xf32, #tpu.memory_space<vmem>>, vector<1x4x1x16xf32>
    %314 = vector.shape_cast %313 : vector<1x4x1x16xf32> to vector<4x16xf32>
    %315 = vector.shape_cast %312 : vector<4x16xf32> to vector<1x4x1x16xf32>
    tpu.vector_store %arg5[%c0_282, %c0_283, %c2_284, %c192_285], %315 {strides = array<i32>} : memref<1x4x3x256xf32, #tpu.memory_space<vmem>>, vector<1x4x1x16xf32>,
    %316 = vector.extract_strided_slice %135 {offsets = [0, 1021], sizes = [4, 16], strides = [1, 1]} : vector<4x1152xf32> to vector<4x16xf32>
    %c0_286 = arith.constant 0 : index
    %c0_287 = arith.constant 0 : index
    %c2_288 = arith.constant 2 : index
    %c208_289 = arith.constant 208 : index
    %317 = vector.load %arg5[%c0_286, %c0_287, %c2_288, %c208_289] : memref<1x4x3x256xf32, #tpu.memory_space<vmem>>, vector<1x4x1x16xf32>
    %318 = vector.shape_cast %317 : vector<1x4x1x16xf32> to vector<4x16xf32>
    %319 = vector.shape_cast %316 : vector<4x16xf32> to vector<1x4x1x16xf32>
    tpu.vector_store %arg5[%c0_286, %c0_287, %c2_288, %c208_289], %319 {strides = array<i32>} : memref<1x4x3x256xf32, #tpu.memory_space<vmem>>, vector<1x4x1x16xf32>,
    %320 = vector.extract_strided_slice %135 {offsets = [0, 1039], sizes = [4, 16], strides = [1, 1]} : vector<4x1152xf32> to vector<4x16xf32>
    %c0_290 = arith.constant 0 : index
    %c0_291 = arith.constant 0 : index
    %c2_292 = arith.constant 2 : index
    %c224_293 = arith.constant 224 : index
    %321 = vector.load %arg5[%c0_290, %c0_291, %c2_292, %c224_293] : memref<1x4x3x256xf32, #tpu.memory_space<vmem>>, vector<1x4x1x16xf32>
    %322 = vector.shape_cast %321 : vector<1x4x1x16xf32> to vector<4x16xf32>
    %323 = vector.shape_cast %320 : vector<4x16xf32> to vector<1x4x1x16xf32>
    tpu.vector_store %arg5[%c0_290, %c0_291, %c2_292, %c224_293], %323 {strides = array<i32>} : memref<1x4x3x256xf32, #tpu.memory_space<vmem>>, vector<1x4x1x16xf32>,
    %324 = vector.extract_strided_slice %135 {offsets = [0, 1057], sizes = [4, 16], strides = [1, 1]} : vector<4x1152xf32> to vector<4x16xf32>
    %c0_294 = arith.constant 0 : index
    %c0_295 = arith.constant 0 : index
    %c2_296 = arith.constant 2 : index
    %c240_297 = arith.constant 240 : index
    %325 = vector.load %arg5[%c0_294, %c0_295, %c2_296, %c240_297] : memref<1x4x3x256xf32, #tpu.memory_space<vmem>>, vector<1x4x1x16xf32>
    %326 = vector.shape_cast %325 : vector<1x4x1x16xf32> to vector<4x16xf32>
    %327 = vector.shape_cast %324 : vector<4x16xf32> to vector<1x4x1x16xf32>
    tpu.vector_store %arg5[%c0_294, %c0_295, %c2_296, %c240_297], %327 {strides = array<i32>} : memref<1x4x3x256xf32, #tpu.memory_space<vmem>>, vector<1x4x1x16xf32>,
    return
  }
  func.func @transform_0(%arg0: i32) -> (i32, i32, i32) {
    %c0_i32 = arith.constant 0 : i32
    %c0_i32_0 = arith.constant 0 : i32
    %c0_i32_1 = arith.constant 0 : i32
    return %arg0, %c0_i32, %c0_i32_0 : i32, i32, i32
  }
  func.func @transform_1(%arg0: i32) -> (i32, i32) {
    %c0_i32 = arith.constant 0 : i32
    %c0_i32_0 = arith.constant 0 : i32
    %c0_i32_1 = arith.constant 0 : i32
    return %c0_i32, %c0_i32_0 : i32, i32
  }
  func.func @transform_2(%arg0: i32) -> (i32, i32) {
    %c0_i32 = arith.constant 0 : i32
    %c0_i32_0 = arith.constant 0 : i32
    %c0_i32_1 = arith.constant 0 : i32
    return %c0_i32, %c0_i32_0 : i32, i32
  }
  func.func @transform_3(%arg0: i32) -> (i32, i32) {
    %c0_i32 = arith.constant 0 : i32
    %c0_i32_0 = arith.constant 0 : i32
    %c0_i32_1 = arith.constant 0 : i32
    return %c0_i32, %c0_i32_0 : i32, i32
  }
  func.func @transform_4(%arg0: i32) -> (i32, i32, i32, i32) {
    %c0_i32 = arith.constant 0 : i32
    %c0_i32_0 = arith.constant 0 : i32
    %c0_i32_1 = arith.constant 0 : i32
    %c0_i32_2 = arith.constant 0 : i32
    return %arg0, %c0_i32, %c0_i32_0, %c0_i32_1 : i32, i32, i32, i32
  }
}

</mosaic_0001>

<bundles_post_ra>
// kernel: down_forward.1
= control target key start
LH: loop header
LB: loop body
LE: loop exit
PB: predicated region body
PF: predicated region fallthrough
CT: control target
= control target key end

     0   :  { %s15011_s15 = smov 0   ;;  %s18721_s0 = inlined_call_operand.vmem [shape: bf16[2,4,1920], index: 0, kind: input, shape index: {}]   ;;  %s18722_s1 = inlined_call_operand.vmem [shape: f32[1,1920], index: 1, kind: input, shape index: {}]   ;;  %s18723_s2 = inlined_call_operand.vmem [shape: bf16[4,128], index: 2, kind: input, shape index: {}]   ;;  %s18724_s3 = inlined_call_operand.vmem [shape: f32[4,128], index: 3, kind: input, shape index: {}]   ;;  %s18725_s4 = inlined_call_operand.vmem [shape: f32[2,4,3,256], index: 4, kind: output, shape index: {}]  }
   0x1 LB: > { %s13607_s16 = sadd.s32 4294967295, %s14929_s15   ;;  %p13611_p0 = scmp.ge.s32.totalorder %s14929_s15, 1  ;;  %s14929_s15 = sphi %s15011_s15, %s14_s15  }
   0x2   : > { %p162_p1 = scmp.lt.s32.totalorder %s14929_s15, 3 }
   0x4   : > { %p163_p2 = pnand %p13611_p0, %p162_p1 }
   0x5   : > { %p15019_p3 = scmp.lt.s32.totalorder (!%p163_p2), %s13607_s16, 1  ;;  %v14931_v0 = vmov (!%p163_p2), 0   ;;  %v14932_v1 = vmov (!%p163_p2), 1983009808   ;;  %v238_v3 = vlaneseq (!%p163_p2)  ;;  %s14933_s22 = smov (!%p163_p2), 19   ;;  %v14934_v34 = vmov (!%p163_p2), 0.0  }
   0x6   : > { %166 = sbr.rel (%p163_p2) target bundleno = 2333 (0x91d), region = 36  ;;  %199 = vst [vmem:[#allocation2] sm:$0xff] (!%p163_p2), %v14931_v0  ;;  %200 = vst [vmem:[#allocation2 + $0x8] sm:$0xff] (!%p163_p2), %v14931_v0  ;;  %432 = vmatprep.mubr.bf16.mxu0 (!%p163_p2), %v14931_v0  ;;  %14881 = vset.pattern.permute.xlu0 (!%p163_p2), %v14931_v0  ;;  %v236_v2 = vunpack.c.l.s4 (!%p163_p2), %v14932_v1  ;;  %vm14935_vm0 = vmmov (!%p163_p2), 0   ;;  %s14936_s23 = smov (!%p163_p2), 18   ;;  %vm334_vm1 = vcmask (!%p163_p2), 154624  }
   0x7   : > { %201 = vst [vmem:[#allocation2 + $0x10] sm:$0xff] (!%p163_p2), %v14931_v0  ;;  %202 = vst [vmem:[#allocation2 + $0x18] sm:$0xff] (!%p163_p2), %v14931_v0  ;;  %v15050_v8 = vshrl.u32 (!%p163_p2), %v238_v3, 7  ;;  %14039 = vmatprep.subr.bf16.mxu1 (!%p163_p2), %v14934_v34  ;;  %14041 = vmatprep.mubr.msk.bf16.mxu1 (!%p163_p2), %vm14935_vm0, %v14934_v34  ;;  %s14937_s26 = smov (!%p163_p2), 124   ;;  %s14938_s27 = smov (!%p163_p2), 17   ;;  %vm354_vm2 = vcmask (!%p163_p2), 1041408  }
   0x8   : > { %203 = vst [vmem:[#allocation2 + $0x20] sm:$0xff] (!%p163_p2), %v14931_v0  ;;  %205 = vst [vmem:[#allocation3] sm:$0xff] (!%p163_p2), %v14931_v0  ;;  %v237_v7 = vunpack.c.0.s8 (!%p163_p2), %v236_v2  ;;  %v15159_v36 = vld.sshfl [vmem:[%s18723_s2] sm:$0x3 pattern:$0x76325410] (!%p163_p2) }
   0x9   : > { %206 = vst [vmem:[#allocation3 + $0x8] sm:$0xff] (!%p163_p2), %v14931_v0  ;;  %207 = vst [vmem:[#allocation3 + $0x10] sm:$0xff] (!%p163_p2), %v14931_v0  ;;  %s14939_s28 = smov (!%p163_p2), 120   ;;  %s14940_s29 = smov (!%p163_p2), 1   ;;  %v15247_v44 = vld [vmem:[%s18723_s2] sm:$0x3] (!%p163_p2) }
   0xa   : > { %208 = vst [vmem:[#allocation3 + $0x18] sm:$0xff] (!%p163_p2), %v14931_v0  ;;  %209 = vst [vmem:[#allocation3 + $0x20] sm:$0xff] (!%p163_p2), %v14931_v0  ;;  %v15055_v10 = vsub.s32 (!%p163_p2), %v237_v7, %v15050_v8  ;;  %s14941_s30 = smov (!%p163_p2), 116   ;;  %vm350_vm3 = vcmask (!%p163_p2), 31744   ;;  %s14942_s7 = smov (!%p163_p2), 112   ;;  %vm861_vm4 = vcmask (!%p163_p2), 146432  }
   0xb   : > { %s14943_s8 = smov (!%p163_p2), 127   ;;  %s14944_s9 = smov (!%p163_p2), 108   ;;  %vm1386_vm5 = vcmask (!%p163_p2), 138240   ;;  %vm1911_vm6 = vcmask (!%p163_p2), 7168   ;;  %vm2912_vm7 = vcmask (!%p163_p2), 1039360   ;;  %vm3437_vm8 = vcmask (!%p163_p2), 908288  }
   0xc   : > { %s14945_s10 = smov (!%p163_p2), 111   ;;  %s14946_s11 = smov (!%p163_p2), 104   ;;  %vm3962_vm9 = vcmask (!%p163_p2), 900096   ;;  %vm4487_vm10 = vcmask (!%p163_p2), 891904   ;;  %vm11996_vm11 = vcmask (!%p163_p2), 122880   ;;  %vm12013_vm12 = vcmask (!%p163_p2), 254080  }
   0xd   : > { %s18735_s16 = smov (!%p15019_p3, %s13607_s16), 1  ;;  %s14947_s12 = smov 110   ;;  %vm12030_vm13 = vcmask 385280   ;;  %vm12047_vm14 = vcmask 516480   ;;  %vm12064_vm15 = vcmask 647680  }
   0xe   : > { %s14817_s18 = smul.u32 30, %s18735_s16  ;;  %s14948_s13 = smov 100  }
   0xf   : > { %s14949_s14 = smov 109   ;;  %s14950_s19 = smov 96  }
  0x10   : > { %s192_s21 = scalar_lea.vmem %s18721_s0, %s14817_s18  ;;  %s14959_s17 = smov 60  }
  0x11   : > { %v15043_v4 = vld [vmem:[%s192_s21] sm:$0xff]  ;;  %v15045_v5 = vld [vmem:[%s192_s21 + $0x8] sm:$0xff]  ;;  %v15047_v6 = vld [vmem:[%s192_s21 + $0x10] sm:$0xff]  ;;  %s14961_s20 = smov 56   ;;  %s14963_s24 = smov 48  }
  0x12   : > { %215 = vst [vmem:[#allocation2 + $0x6] sm:$0xff] %v15043_v4  ;;  %216 = vst [vmem:[#allocation2 + $0xe] sm:$0xff] %v15045_v5  ;;  %v214_v9 = vld [vmem:[%s192_s21 + $0x18] sm:$0x3f]  ;;  %v15277_v58 = vrot.slane %v15043_v4, %v15055_v10  ;;  %v2812_v59 = vcombine.high %v15043_v4, %v15043_v4  ;;  %s14962_s21 = smov 52   ;;  %s14965_s5 = smov 44  }
  0x13   : > { %217 = vst [vmem:[#allocation2 + $0x16] sm:$0xff] %v15047_v6  ;;  %218 = vst [vmem:[#allocation2 + $0x1e] sm:$0x3f] %v214_v9  ;;  %s14966_s6 = smov 40   ;;  %s14974_s18 = smov 105  }
  0x14   : > { %v15286_v61 = vcombine.high %v15277_v58, %v15277_v58  ;;  %v15291_v63 = vrot.slane %v2812_v59, %v15055_v10  ;;  %s14979_s25 = smov 85  }
  0x16   : > { %v15300_v3 = vcombine.high %v15291_v63, %v15291_v63 }
  0x19   : > { %v226_v11 = vld [vmem:[#allocation2 + $0x4] sm:$0xff]  ;;  %v227_v14 = vld [vmem:[#allocation2 + $0xc] sm:$0xff] }
  0x1a   : > { %v15058_v12 = vrot.slane %v226_v11, %v15055_v10  ;;  %v234_v13 = vcombine.high %v226_v11, %v226_v11  ;;  %v15076_v18 = vrot.slane %v227_v14, %v15055_v10  ;;  %v251_v19 = vcombine.high %v227_v14, %v227_v14  ;;  %v228_v22 = vld [vmem:[#allocation2 + $0x14] sm:$0xff]  ;;  %v229_v28 = vld [vmem:[#allocation2 + $0x1c] sm:$0xff] }
  0x1b   : > { %v15098_v24 = vrot.slane %v228_v22, %v15055_v10  ;;  %v268_v25 = vcombine.high %v228_v22, %v228_v22  ;;  %v15120_v30 = vrot.slane %v229_v28, %v15055_v10  ;;  %v285_v31 = vcombine.high %v229_v28, %v229_v28 }
  0x1c   : > { %302 = vrot.lane.b32.xlu0 %v15058_v12, %s14933_s22  ;;  %v15064_v15 = vcombine.high %v15058_v12, %v15058_v12  ;;  %v15067_v16 = vrot.slane %v234_v13, %v15055_v10  ;;  %v15084_v20 = vcombine.high %v15076_v18, %v15076_v18  ;;  %v15087_v21 = vrot.slane %v251_v19, %v15055_v10 }
  0x1d   : > { %v15106_v26 = vcombine.high %v15098_v24, %v15098_v24  ;;  %v15109_v27 = vrot.slane %v268_v25, %v15055_v10  ;;  %v15128_v32 = vcombine.high %v15120_v30, %v15120_v30  ;;  %v15131_v33 = vrot.slane %v285_v31, %v15055_v10  ;;  %v2797_v31 = vld [vmem:[#allocation2 + $0x1e] sm:$0xff] }
  0x1e   : > { %306 = vrot.lane.b32.xlu1 %v15067_v16, %s14933_s22  ;;  %v15073_v17 = vcombine.high %v15067_v16, %v15067_v16  ;;  %v15095_v23 = vcombine.high %v15087_v21, %v15087_v21  ;;  %v15312_v11 = vrot.slane %v15045_v5, %v15055_v10  ;;  %v2846_v25 = vcombine.high %v15047_v6, %v15047_v6 }
  0x1f   : > { %v15117_v29 = vcombine.high %v15109_v27, %v15109_v27  ;;  %v15140_v35 = vcombine.high %v15131_v33, %v15131_v33 }
  0x20   : > { %304 = vrot.lane.b32.xlu0 %v15064_v15, %s14933_s22  ;;  %v15368_v28 = vrot.slane %v2846_v25, %v15055_v10 }
  0x22   : > { %308 = vrot.lane.b32.xlu1 %v15073_v17, %s14933_s22 }
  0x24   : > { %310 = vrot.lane.b32.xlu0 %v15076_v18, %s14933_s22 }
  0x26   : > { %312 = vrot.lane.b32.xlu1 %v15084_v20, %s14933_s22 }
  0x28   : > { %314 = vrot.lane.b32.xlu0 %v15087_v21, %s14933_s22 }
  0x2a   : > { %316 = vrot.lane.b32.xlu1 %v15095_v23, %s14933_s22 }
  0x2c   : > { %318 = vrot.lane.b32.xlu0 %v15098_v24, %s14933_s22 }
  0x2e   : > { %320 = vrot.lane.b32.xlu1 %v15106_v26, %s14933_s22 }
  0x30   : > { %322 = vrot.lane.b32.xlu0 %v15109_v27, %s14933_s22 }
  0x32   : > { %324 = vrot.lane.b32.xlu1 %v15117_v29, %s14933_s22 }
  0x34   : > { %326 = vrot.lane.b32.xlu0 %v15120_v30, %s14933_s22 }
  0x36   : > { %328 = vrot.lane.b32.xlu1 %v15128_v32, %s14933_s22 }
  0x38   : > { %330 = vrot.lane.b32.xlu0 %v15131_v33, %s14933_s22 }
  0x3a   : > { %332 = vrot.lane.b32.xlu1 %v15140_v35, %s14933_s22 }
  0x3c   : > { %829 = vrot.lane.b32.xlu0 %v15058_v12, %s14936_s23 }
  0x3e   : > { %831 = vrot.lane.b32.xlu1 %v15064_v15, %s14936_s23 }
  0x40   : > { %833 = vrot.lane.b32.xlu0 %v15067_v16, %s14936_s23 }
  0x42   : > { %835 = vrot.lane.b32.xlu1 %v15073_v17, %s14936_s23 }
  0x44   : > { %837 = vrot.lane.b32.xlu0 %v15076_v18, %s14936_s23 }
  0x46   : > { %755 = vrot.lane.b32.xlu1 %v15159_v36, %s14937_s26  ;;  %s14951_s26 = smov 92  }
  0x48   : > { %839 = vrot.lane.b32.xlu0 %v15084_v20, %s14936_s23 }
  0x4a   : > { %841 = vrot.lane.b32.xlu1 %v15087_v21, %s14936_s23 }
  0x4c   : > { %843 = vrot.lane.b32.xlu0 %v15095_v23, %s14936_s23 }
  0x4e   : > { %845 = vrot.lane.b32.xlu1 %v15098_v24, %s14936_s23 }
  0x50   : > { %847 = vrot.lane.b32.xlu0 %v15106_v26, %s14936_s23 }
  0x52   : > { %849 = vrot.lane.b32.xlu1 %v15109_v27, %s14936_s23 }
  0x54   : > { %851 = vrot.lane.b32.xlu0 %v15117_v29, %s14936_s23 }
  0x56   : > { %853 = vrot.lane.b32.xlu1 %v15120_v30, %s14936_s23 }
  0x58   : > { %855 = vrot.lane.b32.xlu0 %v15128_v32, %s14936_s23 }
  0x5a   : > { %857 = vrot.lane.b32.xlu1 %v15131_v33, %s14936_s23 }
  0x5c   : > { %859 = vrot.lane.b32.xlu0 %v15140_v35, %s14936_s23 }
  0x5e   : > { %1354 = vrot.lane.b32.xlu1 %v15058_v12, %s14938_s27 }
  0x60   : > { %1356 = vrot.lane.b32.xlu0 %v15064_v15, %s14938_s27 }
  0x62   : > { %1358 = vrot.lane.b32.xlu1 %v15067_v16, %s14938_s27 }
  0x64   : > { %1360 = vrot.lane.b32.xlu0 %v15073_v17, %s14938_s27 }
  0x66   : > { %1362 = vrot.lane.b32.xlu1 %v15076_v18, %s14938_s27 }
  0x68   : > { %1280 = vrot.lane.b32.xlu0 %v15159_v36, %s14939_s28  ;;  %s14981_s28 = smov 95  }
  0x6a   : > { %1364 = vrot.lane.b32.xlu1 %v15084_v20, %s14938_s27 }
  0x6c   : > { %1366 = vrot.lane.b32.xlu0 %v15087_v21, %s14938_s27 }
  0x6e   : > { %1368 = vrot.lane.b32.xlu1 %v15095_v23, %s14938_s27 }
  0x70   : > { %1370 = vrot.lane.b32.xlu0 %v15098_v24, %s14938_s27 }
  0x72   : > { %1372 = vrot.lane.b32.xlu1 %v15106_v26, %s14938_s27 }
  0x74   : > { %1374 = vrot.lane.b32.xlu0 %v15109_v27, %s14938_s27 }
  0x76   : > { %1376 = vrot.lane.b32.xlu1 %v15117_v29, %s14938_s27 }
  0x78   : > { %1378 = vrot.lane.b32.xlu0 %v15120_v30, %s14938_s27 }
  0x7a   : > { %1380 = vrot.lane.b32.xlu1 %v15128_v32, %s14938_s27 }
  0x7c   : > { %1382 = vrot.lane.b32.xlu0 %v15131_v33, %s14938_s27 }
  0x7e   : > { %1384 = vrot.lane.b32.xlu1 %v15140_v35, %s14938_s27 }
  0x80   : > { %1879 = vrot.lane.b32.xlu0 %v15058_v12, %s14940_s29  ;;  %v2829_v12 = vcombine.high %v15045_v5, %v15045_v5 }
  0x82   : > { %1881 = vrot.lane.b32.xlu1 %v15064_v15, %s14940_s29  ;;  %v15324_v15 = vcombine.high %v15312_v11, %v15312_v11 }
  0x84   : > { %1883 = vrot.lane.b32.xlu0 %v15067_v16, %s14940_s29  ;;  %v15327_v16 = vrot.slane %v2829_v12, %v15055_v10 }
  0x86   : > { %1885 = vrot.lane.b32.xlu1 %v15073_v17, %s14940_s29 }
  0x88   : > { %1887 = vrot.lane.b32.xlu0 %v15076_v18, %s14940_s29 }
  0x8a   : > { %1805 = vrot.lane.b32.xlu1 %v15159_v36, %s14941_s30  ;;  %s14982_s30 = smov 97  }
  0x8c   : > { %1889 = vrot.lane.b32.xlu0 %v15084_v20, %s14940_s29 }
  0x8e   : > { %v303_v37 = vpop.permute.xlu0 %302  ;;  %1891 = vrot.lane.b32.xlu1 %v15087_v21, %s14940_s29 }
  0x90   : > { %1893 = vrot.lane.b32.xlu0 %v15095_v23, %s14940_s29  ;;  %v307_v38 = vpop.permute.xlu1 %306  ;;  %v15346_v23 = vcombine.high %v15327_v16, %v15327_v16 }
  0x92   : > { %v305_v39 = vpop.permute.xlu0 %304  ;;  %1895 = vrot.lane.b32.xlu1 %v15098_v24, %s14940_s29  ;;  %v15350_v24 = vrot.slane %v15047_v6, %v15055_v10 }
  0x93   : > { %v336_v40 = vsel %vm334_vm1, %v305_v39, %v307_v38  ;;  %v335_v41 = vsel %vm334_vm1, %v303_v37, %v305_v39 }
  0x94   : > { %1897 = vrot.lane.b32.xlu0 %v15106_v26, %s14940_s29  ;;  %13615 = vmatprep.subr.msk.bf16.mxu0 %vm354_vm2, %v336_v40  ;;  %v309_v42 = vpop.permute.xlu1 %308  ;;  %v356_v43 = vsel %vm354_vm2, %v335_v41, 0  ;;  %v15365_v6 = vcombine.high %v15350_v24, %v15350_v24  ;;  %v15390_v40 = vcombine.high %v15368_v28, %v15368_v28  ;;  %v15393_v41 = vrot.slane %v2797_v31, %v15055_v10 }
  0x95   : > { %401 = vmatpush1.bf16.msra.mxu0 %v356_v43  ;;  %v337_v45 = vsel %vm334_vm1, %v307_v38, %v309_v42 }
  0x96   : > { %v311_v46 = vpop.permute.xlu0 %310  ;;  %1899 = vrot.lane.b32.xlu1 %v15109_v27, %s14940_s29  ;;  %v362_v49 = vsel %vm354_vm2, %v337_v45, 0 }
  0x97   : > { %v338_v47 = vsel %vm334_vm1, %v309_v42, %v311_v46  ;;  %v2863_v42 = vcombine.high %v2797_v31, %v2797_v31 }
  0x98   : > { %1901 = vrot.lane.b32.xlu0 %v15117_v29, %s14940_s29  ;;  %13616 = vmatmul.mubr.msk.bf16.vlgmr.msra.gmra.mrb[0].mxu0 %vm350_vm3, %v15247_v44  ;;  %v313_v48 = vpop.permute.xlu1 %312 }
  0x99   : > { %13617 = vmatprep.subr.msk.bf16.mxu0 %vm354_vm2, %v338_v47  ;;  %473 = vmatprep.mubr.bf16.mxu0 %v14931_v0  ;;  %v339_v53 = vsel %vm334_vm1, %v311_v46, %v313_v48  ;;  %v15404_v46 = vcombine.high %v15393_v41, %v15393_v41  ;;  %v15407_v47 = vrot.slane %v2863_v42, %v15055_v10 }
  0x9a   : > { %442 = vmatpush1.bf16.msra.mxu0 %v362_v49  ;;  %v315_v50 = vpop.permute.xlu0 %314  ;;  %1903 = vrot.lane.b32.xlu1 %v15120_v30, %s14940_s29  ;;  %v368_v56 = vsel %vm354_vm2, %v339_v53, 0 }
  0x9b   : > { %v340_v51 = vsel %vm334_vm1, %v313_v48, %v315_v50 }
  0x9c   : > { %1905 = vrot.lane.b32.xlu0 %v15128_v32, %s14940_s29  ;;  %v317_v52 = vpop.permute.xlu1 %316  ;;  %13619 = vmatprep.subr.msk.bf16.mxu0 %vm354_vm2, %v340_v51 }
  0x9d   : > { %v341_v1 = vsel %vm334_vm1, %v315_v50, %v317_v52 }
  0x9e   : > { %v319_v54 = vpop.permute.xlu0 %318  ;;  %1907 = vrot.lane.b32.xlu1 %v15131_v33, %s14940_s29  ;;  %v374_v7 = vsel %vm354_vm2, %v341_v1, 0 }
  0x9f   : > { %v342_v55 = vsel %vm334_vm1, %v317_v52, %v319_v54 }
  0xa0   : > { %1909 = vrot.lane.b32.xlu0 %v15140_v35, %s14940_s29  ;;  %13618 = vmatmul.mubr.msk.bf16.vlgmr.msra.gmra.mrb[4].mxu0 %vm350_vm3, %v15247_v44  ;;  %v321_v57 = vpop.permute.xlu1 %320 }
  0xa1   : > { %483 = vmatpush1.bf16.msra.mxu0 %v368_v56  ;;  %514 = vmatprep.mubr.bf16.mxu0 %v14931_v0  ;;  %v343_v5 = vsel %vm334_vm1, %v319_v54, %v321_v57 }
  0xa2   : > { %v323_v60 = vpop.permute.xlu0 %322  ;;  %13621 = vmatprep.subr.msk.bf16.mxu0 %vm354_vm2, %v342_v55  ;;  %2330 = vrot.lane.b32.xlu1 %v15159_v36, %s14942_s7  ;;  %v380_v21 = vsel %vm354_vm2, %v343_v5, 0  ;;  %v15428_v55 = vcombine.high %v15407_v47, %v15407_v47  ;;  %s14952_s7 = smov 88  }
  0xa3   : > { %v344_v4 = vsel %vm334_vm1, %v321_v57, %v323_v60 }
  0xa4   : > { %2880 = vrot.lane.b32.xlu0 %v15277_v58, %s14943_s8  ;;  %v325_v62 = vpop.permute.xlu1 %324 }
  0xa5   : > { %v345_v29 = vsel %vm334_vm1, %v323_v60, %v325_v62 }
  0xa6   : > { %v15294_v2 = vpop.permute.xlu0 %326  ;;  %2882 = vrot.lane.b32.xlu1 %v15286_v61, %s14943_s8  ;;  %v386_v38 = vsel %vm354_vm2, %v345_v29, 0 }
  0xa7   : > { %v346_v20 = vsel %vm334_vm1, %v325_v62, %v15294_v2 }
  0xa8   : > { %2884 = vrot.lane.b32.xlu0 %v15291_v63, %s14943_s8  ;;  %13620 = vmatmul.mubr.msk.bf16.vlgmr.msra.gmra.mrb[8].mxu0 %vm350_vm3, %v15247_v44  ;;  %v15308_v9 = vpop.permute.xlu1 %328 }
  0xa9   : > { %524 = vmatpush1.bf16.msra.mxu0 %v374_v7  ;;  %555 = vmatprep.mubr.bf16.mxu0 %v14931_v0  ;;  %v347_v48 = vsel %vm334_vm1, %v15294_v2, %v15308_v9 }
  0xaa   : > { %v331_v13 = vpop.permute.xlu0 %330  ;;  %13623 = vmatprep.subr.msk.bf16.mxu0 %vm354_vm2, %v344_v4  ;;  %2886 = vrot.lane.b32.xlu1 %v15300_v3, %s14943_s8  ;;  %v392_v52 = vsel %vm354_vm2, %v347_v48, 0 }
  0xab   : > { %v348_v33 = vsel %vm334_vm1, %v15308_v9, %v331_v13 }
  0xac   : > { %2888 = vrot.lane.b32.xlu0 %v15312_v11, %s14943_s8  ;;  %v333_v14 = vpop.permute.xlu1 %332 }
  0xad   : > { %v349_v17 = vsel %vm334_vm1, %v331_v13, %v333_v14 }
  0xae   : > { %v15331_v18 = vpop.permute.xlu0 %829  ;;  %v398_v19 = vsel %vm354_vm2, %v349_v17, 0  ;;  %2806 = vrot.lane.b32.xlu1 %v15159_v36, %s14944_s9  ;;  %s14957_s9 = smov 68  }
  0xaf   : > { %14040 = vmatpush3.bf16.msra.mxu1 %v398_v19 }
  0xb0   : > { %2890 = vrot.lane.b32.xlu0 %v15324_v15, %s14943_s8  ;;  %13622 = vmatmul.mubr.msk.bf16.vlgmr.msra.gmra.mrb[12].mxu0 %vm350_vm3, %v15247_v44  ;;  %v15342_v22 = vpop.permute.xlu1 %831 }
  0xb1   : > { %565 = vmatpush1.bf16.msra.mxu0 %v380_v21  ;;  %596 = vmatprep.mubr.bf16.mxu0 %v14931_v0  ;;  %v862_v60 = vsel %vm861_vm4, %v15331_v18, %v15342_v22 }
  0xb2   : > { %v834_v26 = vpop.permute.xlu0 %833  ;;  %13625 = vmatprep.subr.msk.bf16.mxu0 %vm354_vm2, %v346_v20  ;;  %14042 = vmatmul.mubr.msk.bf16.vlgmr.msra.gmra.mrb[0].mxu1 %vm350_vm3, %v15247_v44  ;;  %v881_v4 = vsel %vm354_vm2, %v862_v60, 0 }
  0xb3   : > { %998 = vmatprep.mubr.bf16.mxu1 %v14931_v0  ;;  %2892 = vrot.lane.b32.xlu1 %v15327_v16, %s14943_s8  ;;  %v863_v51 = vsel %vm861_vm4, %v15342_v22, %v834_v26 }
  0xb4   : > { %2894 = vrot.lane.b32.xlu0 %v15346_v23, %s14943_s8  ;;  %v836_v27 = vpop.permute.xlu1 %835 }
  0xb5   : > { %v864_v30 = vsel %vm861_vm4, %v834_v26, %v836_v27 }
  0xb6   : > { %v15372_v32 = vpop.permute.xlu0 %837  ;;  %v887_v37 = vsel %vm354_vm2, %v864_v30, 0 }
  0xb7   : > { %v865_v35 = vsel %vm861_vm4, %v836_v27, %v15372_v32  ;;  %2896 = vrot.lane.b32.xlu1 %v15350_v24, %s14943_s8 }
  0xb8   : > { %2898 = vrot.lane.b32.xlu0 %v15365_v6, %s14943_s8  ;;  %13624 = vmatmul.mubr.msk.bf16.vlgmr.msra.gmra.mrb[16].mxu0 %vm350_vm3, %v15247_v44  ;;  %v15386_v39 = vpop.permute.xlu1 %755 }
  0xb9   : > { %606 = vmatpush1.bf16.msra.mxu0 %v386_v38  ;;  %13633 = vmatprep.subr.msk.bf16.mxu1 %vm354_vm2, %v865_v35 }
  0xba   : > { %13627 = vmatprep.subr.msk.bf16.mxu0 %vm354_vm2, %v348_v33  ;;  %v840_v43 = vpop.permute.xlu0 %839  ;;  %967 = vmatpush1.bf16.msra.mxu1 %v887_v37 }
  0xbb   : > { %637 = vmatprep.mubr.bf16.mxu0 %v14931_v0  ;;  %2900 = vrot.lane.b32.xlu1 %v15368_v28, %s14943_s8  ;;  %v866_v14 = vsel %vm861_vm4, %v15372_v32, %v840_v43 }
  0xbc   : > { %2902 = vrot.lane.b32.xlu0 %v15390_v40, %s14943_s8  ;;  %v842_v45 = vpop.permute.xlu1 %841  ;;  %v893_v20 = vsel %vm354_vm2, %v866_v14, 0 }
  0xbd   : > { %13634 = vmatmul.mubr.msk.bf16.vlgmr.msra.gmra.mrb[4].mxu1 %vm350_vm3, %v15386_v39  ;;  %v867_v2 = vsel %vm861_vm4, %v840_v43, %v842_v45 }
  0xbe   : > { %v844_v49 = vpop.permute.xlu0 %843  ;;  %1080 = vmatprep.mubr.bf16.mxu1 %v14931_v0 }
  0xbf   : > { %v868_v50 = vsel %vm861_vm4, %v842_v45, %v844_v49  ;;  %2904 = vrot.lane.b32.xlu1 %v15393_v41, %s14943_s8 }
  0xc0   : > { %2906 = vrot.lane.b32.xlu0 %v15404_v46, %s14943_s8  ;;  %13626 = vmatmul.mubr.msk.bf16.vlgmr.msra.gmra.mrb[20].mxu0 %vm350_vm3, %v15247_v44  ;;  %v846_v53 = vpop.permute.xlu1 %845  ;;  %v899_v54 = vsel %vm354_vm2, %v868_v50, 0 }
  0xc1   : > { %647 = vmatpush1.bf16.msra.mxu0 %v392_v52  ;;  %v869_v56 = vsel %vm861_vm4, %v844_v49, %v846_v53  ;;  %678 = vmatprep.mubr.bf16.mxu0 %v14931_v0 }
  0xc2   : > { %13631 = vmatprep.subr.msk.bf16.mxu0 %vm354_vm2, %v863_v51  ;;  %v848_v57 = vpop.permute.xlu0 %847  ;;  %13637 = vmatprep.subr.msk.bf16.mxu1 %vm354_vm2, %v869_v56 }
  0xc3   : > { %1049 = vmatpush1.bf16.msra.mxu1 %v899_v54  ;;  %2908 = vrot.lane.b32.xlu1 %v15407_v47, %s14943_s8  ;;  %v870_v26 = vsel %vm861_vm4, %v846_v53, %v848_v57 }
  0xc4   : > { %2910 = vrot.lane.b32.xlu0 %v15428_v55, %s14943_s8  ;;  %v850_v59 = vpop.permute.xlu1 %849  ;;  %v905_v31 = vsel %vm354_vm2, %v870_v26, 0 }
  0xc5   : > { %v871_v18 = vsel %vm861_vm4, %v848_v57, %v850_v59 }
  0xc6   : > { %v852_v62 = vpop.permute.xlu0 %851  ;;  %13638 = vmatmul.mubr.msk.bf16.vlgmr.msra.gmra.mrb[8].mxu1 %vm350_vm3, %v15386_v39 }
  0xc7   : > { %v872_v1 = vsel %vm861_vm4, %v850_v59, %v852_v62  ;;  %1162 = vmatprep.mubr.bf16.mxu1 %v14931_v0  ;;  %3405 = vrot.lane.b32.xlu1 %v15277_v58, %s14945_s10 }
  0xc8   : > { %3407 = vrot.lane.b32.xlu0 %v15286_v61, %s14945_s10  ;;  %13628 = vmatmul.mubr.msk.bf16.vlgmr.msra.gmra.mrb[24].mxu0 %vm350_vm3, %v15247_v44  ;;  %v854_v7 = vpop.permute.xlu1 %853  ;;  %v911_v9 = vsel %vm354_vm2, %v872_v1, 0 }
  0xc9   : > { %926 = vmatpush1.bf16.msra.mxu0 %v881_v4  ;;  %v873_v12 = vsel %vm861_vm4, %v852_v62, %v854_v7  ;;  %957 = vmatprep.mubr.bf16.mxu0 %v14931_v0 }
  0xca   : > { %v856_v13 = vpop.permute.xlu0 %855  ;;  %13641 = vmatprep.subr.msk.bf16.mxu1 %vm354_vm2, %v873_v12  ;;  %13635 = vmatprep.subr.msk.bf16.mxu0 %vm354_vm2, %v867_v2 }
  0xcb   : > { %1131 = vmatpush1.bf16.msra.mxu1 %v911_v9  ;;  %3409 = vrot.lane.b32.xlu1 %v15291_v63, %s14945_s10  ;;  %v874_v42 = vsel %vm861_vm4, %v854_v7, %v856_v13 }
  0xcc   : > { %3411 = vrot.lane.b32.xlu0 %v15300_v3, %s14945_s10  ;;  %v858_v44 = vpop.permute.xlu1 %857  ;;  %14045 = vmatprep.subr.bf16.mxu1 %v14934_v34  ;;  %v917_v48 = vsel %vm354_vm2, %v874_v42, 0 }
  0xcd   : > { %v875_v30 = vsel %vm861_vm4, %v856_v13, %v858_v44 }
  0xce   : > { %v860_v5 = vpop.permute.xlu0 %859  ;;  %13642 = vmatmul.mubr.msk.bf16.vlgmr.msra.gmra.mrb[12].mxu1 %vm350_vm3, %v15386_v39 }
  0xcf   : > { %v876_v17 = vsel %vm861_vm4, %v858_v44, %v860_v5  ;;  %14047 = vmatprep.mubr.msk.bf16.mxu1 %vm14935_vm0, %v14934_v34  ;;  %3413 = vrot.lane.b32.xlu1 %v15312_v11, %s14945_s10 }
  0xd0   : > { %v923_v19 = vsel %vm354_vm2, %v876_v17, 0  ;;  %3331 = vrot.lane.b32.xlu0 %v15159_v36, %s14946_s11  ;;  %13632 = vmatmul.mubr.msk.bf16.vlgmr.msra.gmra.mrb[0].mxu0 %vm350_vm3, %v15386_v39  ;;  %v1355_v21 = vpop.permute.xlu1 %1354  ;;  %s14958_s11 = smov 64  }
  0xd1   : > { %1008 = vmatpush1.bf16.msra.mxu0 %v893_v20  ;;  %14046 = vmatpush3.bf16.msra.mxu1 %v923_v19 }
  0xd2   : > { %v1357_v22 = vpop.permute.xlu0 %1356  ;;  %13639 = vmatprep.subr.msk.bf16.mxu0 %vm354_vm2, %v871_v18  ;;  %1039 = vmatprep.mubr.bf16.mxu0 %v14931_v0 }
  0xd3   : > { %3415 = vrot.lane.b32.xlu1 %v15324_v15, %s14945_s10  ;;  %v1387_v56 = vsel %vm1386_vm5, %v1355_v21, %v1357_v22 }
  0xd4   : > { %3417 = vrot.lane.b32.xlu0 %v15327_v16, %s14945_s10  ;;  %v1359_v25 = vpop.permute.xlu1 %1358  ;;  %v1406_v60 = vsel %vm354_vm2, %v1387_v56, 0  ;;  %v4370_v56 = vld [vmem:[#allocation2 + $0xe] sm:$0xff] }
  0xd5   : > { %v1388_v45 = vsel %vm1386_vm5, %v1357_v22, %v1359_v25 }
  0xd6   : > { %v1361_v27 = vpop.permute.xlu0 %1360  ;;  %14048 = vmatmul.mubr.msk.bf16.vlgmr.msra.gmra.mrb[0].mxu1 %vm350_vm3, %v15386_v39 }
  0xd7   : > { %v1389_v29 = vsel %vm1386_vm5, %v1359_v25, %v1361_v27  ;;  %1523 = vmatprep.mubr.bf16.mxu1 %v14931_v0  ;;  %3419 = vrot.lane.b32.xlu1 %v15346_v23, %s14945_s10 }
  0xd8   : > { %3421 = vrot.lane.b32.xlu0 %v15350_v24, %s14945_s10  ;;  %13636 = vmatmul.mubr.msk.bf16.vlgmr.msra.gmra.mrb[8].mxu0 %vm350_vm3, %v15386_v39  ;;  %v1363_v32 = vpop.permute.xlu1 %1362  ;;  %v1412_v33 = vsel %vm354_vm2, %v1389_v29, 0 }
  0xd9   : > { %1090 = vmatpush1.bf16.msra.mxu0 %v905_v31  ;;  %v1390_v35 = vsel %vm1386_vm5, %v1361_v27, %v1363_v32  ;;  %1121 = vmatprep.mubr.bf16.mxu0 %v14931_v0  ;;  %v4369_v27 = vld [vmem:[#allocation2 + $0x6] sm:$0xff] }
  0xda   : > { %v15500_v37 = vpop.permute.xlu0 %1280  ;;  %13643 = vmatprep.subr.msk.bf16.mxu0 %vm354_vm2, %v875_v30  ;;  %13649 = vmatprep.subr.msk.bf16.mxu1 %vm354_vm2, %v1390_v35  ;;  %v15616_v31 = vrot.slane %v4369_v27, %v15055_v10 }
  0xdb   : > { %1492 = vmatpush1.bf16.msra.mxu1 %v1412_v33  ;;  %3423 = vrot.lane.b32.xlu1 %v15365_v6, %s14945_s10 }
  0xdc   : > { %3425 = vrot.lane.b32.xlu0 %v15368_v28, %s14945_s10  ;;  %v1365_v38 = vpop.permute.xlu1 %1364 }
  0xdd   : > { %v1391_v7 = vsel %vm1386_vm5, %v1363_v32, %v1365_v38  ;;  %v4387_v32 = vcombine.high %v4369_v27, %v4369_v27 }
  0xde   : > { %v1367_v43 = vpop.permute.xlu0 %1366  ;;  %13650 = vmatmul.mubr.msk.bf16.vlgmr.msra.gmra.mrb[4].mxu1 %vm350_vm3, %v15500_v37 }
  0xdf   : > { %1605 = vmatprep.mubr.bf16.mxu1 %v14931_v0  ;;  %3427 = vrot.lane.b32.xlu1 %v15390_v40, %s14945_s10  ;;  %v1392_v59 = vsel %vm1386_vm5, %v1365_v38, %v1367_v43 }
  0xe0   : > { %3429 = vrot.lane.b32.xlu0 %v15393_v41, %s14945_s10  ;;  %13640 = vmatmul.mubr.msk.bf16.vlgmr.msra.gmra.mrb[16].mxu0 %vm350_vm3, %v15386_v39  ;;  %v1369_v49 = vpop.permute.xlu1 %1368 }
  0xe1   : > { %1172 = vmatpush1.bf16.msra.mxu0 %v917_v48  ;;  %v1393_v50 = vsel %vm1386_vm5, %v1367_v43, %v1369_v49  ;;  %1203 = vmatprep.mubr.bf16.mxu0 %v14931_v0  ;;  %v4401_v48 = vrot.slane %v4387_v32, %v15055_v10 }
  0xe2   : > { %v1371_v51 = vpop.permute.xlu0 %1370  ;;  %13647 = vmatprep.subr.msk.bf16.mxu0 %vm354_vm2, %v1388_v45  ;;  %v1424_v52 = vsel %vm354_vm2, %v1393_v50, 0  ;;  %v15631_v45 = vcombine.high %v15616_v31, %v15616_v31 }
  0xe3   : > { %v1394_v53 = vsel %vm1386_vm5, %v1369_v49, %v1371_v51  ;;  %3431 = vrot.lane.b32.xlu1 %v15404_v46, %s14945_s10 }
  0xe4   : > { %3433 = vrot.lane.b32.xlu0 %v15407_v47, %s14945_s10  ;;  %13653 = vmatprep.subr.msk.bf16.mxu1 %vm354_vm2, %v1394_v53  ;;  %v1373_v54 = vpop.permute.xlu1 %1372 }
  0xe5   : > { %1574 = vmatpush1.bf16.msra.mxu1 %v1424_v52  ;;  %v4403_v52 = vcombine.high %v4401_v48, %v4401_v48 }
  0xe6   : > { %v1375_v57 = vpop.permute.xlu0 %1374 }
  0xe7   : > { %3435 = vrot.lane.b32.xlu1 %v15428_v55, %s14945_s10  ;;  %v1396_v12 = vsel %vm1386_vm5, %v1373_v54, %v1375_v57 }
  0xe8   : > { %3930 = vrot.lane.b32.xlu0 %v15277_v58, %s14947_s12  ;;  %13644 = vmatmul.mubr.msk.bf16.vlgmr.msra.gmra.mrb[24].mxu0 %vm350_vm3, %v15386_v39  ;;  %v1377_v62 = vpop.permute.xlu1 %1376 }
  0xe9   : > { %1451 = vmatpush1.bf16.msra.mxu0 %v1406_v60  ;;  %13654 = vmatmul.mubr.msk.bf16.vlgmr.msra.gmra.mrb[8].mxu1 %vm350_vm3, %v15500_v37  ;;  %v1397_v1 = vsel %vm1386_vm5, %v1375_v57, %v1377_v62 }
  0xea   : > { %v1379_v2 = vpop.permute.xlu0 %1378  ;;  %13651 = vmatprep.subr.msk.bf16.mxu0 %vm354_vm2, %v1392_v59  ;;  %v1436_v4 = vsel %vm354_vm2, %v1397_v1, 0  ;;  %1482 = vmatprep.mubr.bf16.mxu0 %v14931_v0  ;;  %v4404_v1 = vcombine.high %v4370_v56, %v4370_v56 }
  0xeb   : > { %v1398_v58 = vsel %vm1386_vm5, %v1377_v62, %v1379_v2  ;;  %1687 = vmatprep.mubr.bf16.mxu1 %v14931_v0  ;;  %3932 = vrot.lane.b32.xlu1 %v15286_v61, %s14947_s12  ;;  %v1418_v61 = vsel %vm354_vm2, %v1391_v7, 0 }
  0xec   : > { %3934 = vrot.lane.b32.xlu0 %v15291_v63, %s14947_s12  ;;  %13657 = vmatprep.subr.msk.bf16.mxu1 %vm354_vm2, %v1398_v58  ;;  %v1381_v39 = vpop.permute.xlu1 %1380  ;;  %v4418_v7 = vrot.slane %v4404_v1, %v15055_v10 }
  0xed   : > { %1656 = vmatpush1.bf16.msra.mxu1 %v1436_v4  ;;  %v1399_v22 = vsel %vm1386_vm5, %v1379_v2, %v1381_v39  ;;  %v13742_v2 = vld.sshfl [vmem:[%s18723_s2] sm:$0x3 pattern:$0x76325410] }
  0xee   : > { %v1383_v9 = vpop.permute.xlu0 %1382  ;;  %14051 = vmatprep.subr.bf16.mxu1 %v14934_v34 }
  0xef   : > { %3936 = vrot.lane.b32.xlu1 %v15300_v3, %s14947_s12  ;;  %v1400_v17 = vsel %vm1386_vm5, %v1381_v39, %v1383_v9 }
  0xf0   : > { %3938 = vrot.lane.b32.xlu0 %v15312_v11, %s14947_s12  ;;  %13648 = vmatmul.mubr.msk.bf16.vlgmr.msra.gmra.mrb[0].mxu0 %vm350_vm3, %v15500_v37  ;;  %v1385_v63 = vpop.permute.xlu1 %1384  ;;  %v1395_v11 = vsel %vm1386_vm5, %v1371_v51, %v1373_v54 }
  0xf1   : > { %1533 = vmatpush1.bf16.msra.mxu0 %v1418_v61  ;;  %13658 = vmatmul.mubr.msk.bf16.vlgmr.msra.gmra.mrb[12].mxu1 %vm350_vm3, %v15500_v37  ;;  %v1401_v13 = vsel %vm1386_vm5, %v1383_v9, %v1385_v63  ;;  %v1430_v18 = vsel %vm354_vm2, %v1395_v11, 0  ;;  %v4371_v9 = vld [vmem:[#allocation2 + $0x16] sm:$0xff]  ;;  %v2369_v11 = vcombine.high %v4418_v7, %v4418_v7 }
  0xf2   : > { %v1448_v44 = vsel %vm354_vm2, %v1401_v13, 0  ;;  %v1880_v14 = vpop.permute.xlu0 %1879  ;;  %13655 = vmatprep.subr.msk.bf16.mxu0 %vm354_vm2, %v1396_v12  ;;  %1564 = vmatprep.mubr.bf16.mxu0 %v14931_v0  ;;  %v15676_v63 = vrot.slane %v4371_v9, %v15055_v10 }
  0xf3   : > { %14052 = vmatpush3.bf16.msra.mxu1 %v1448_v44  ;;  %14053 = vmatprep.mubr.msk.bf16.mxu1 %vm14935_vm0, %v14934_v34 }
  0xf4   : > { %3940 = vrot.lane.b32.xlu0 %v15324_v15, %s14947_s12  ;;  %v1882_v3 = vpop.permute.xlu1 %1881  ;;  %3856 = vrot.lane.b32.xlu1 %v15159_v36, %s14948_s13  ;;  %s14972_s13 = smov 107  }
  0xf5   : > { %v1912_v33 = vsel %vm1911_vm6, %v1880_v14, %v1882_v3  ;;  %v2413_v14 = vsel %vm354_vm2, %v4401_v48, 0 }
  0xf6   : > { %v1884_v5 = vpop.permute.xlu0 %1883  ;;  %v1931_v42 = vsel %vm354_vm2, %v1912_v33, 0  ;;  %v219_v33 = vld [vmem:[%s18724_s3] sm:$0xf] }
  0xf7   : > { %v1913_v26 = vsel %vm1911_vm6, %v1882_v3, %v1884_v5  ;;  %v4421_v3 = vcombine.high %v4371_v9, %v4371_v9 }
  0xf8   : > { %3944 = vrot.lane.b32.xlu0 %v15346_v23, %s14947_s12  ;;  %13652 = vmatmul.mubr.msk.bf16.vlgmr.msra.gmra.mrb[8].mxu0 %vm350_vm3, %v15500_v37  ;;  %v1886_v19 = vpop.permute.xlu1 %1885 }
  0xf9   : > { %1615 = vmatpush1.bf16.msra.mxu0 %v1430_v18  ;;  %14054 = vmatmul.mubr.msk.bf16.vlgmr.msra.gmra.mrb[0].mxu1 %vm350_vm3, %v15500_v37  ;;  %v1914_v36 = vsel %vm1911_vm6, %v1884_v5, %v1886_v19  ;;  %v4411_v18 = vrot.slane %v4370_v56, %v15055_v10 }
  0xfa   : > { %v1888_v15 = vpop.permute.xlu0 %1887  ;;  %13659 = vmatprep.subr.msk.bf16.mxu0 %vm354_vm2, %v1400_v17  ;;  %1646 = vmatprep.mubr.bf16.mxu0 %v14931_v0  ;;  %v1937_v20 = vsel %vm354_vm2, %v1914_v36, 0  ;;  %v15686_v17 = vld [vmem:[#allocation3] sm:$0xff]  ;;  %v4435_v36 = vrot.slane %v4421_v3, %v15055_v10 }
  0xfb   : > { %v1915_v23 = vsel %vm1911_vm6, %v1886_v19, %v1888_v15  ;;  %2048 = vmatprep.mubr.bf16.mxu1 %v14931_v0  ;;  %3942 = vrot.lane.b32.xlu1 %v15327_v16, %s14947_s12  ;;  %v1442_v16 = vsel %vm354_vm2, %v1399_v22, 0 }
  0xfc   : > { %3948 = vrot.lane.b32.xlu0 %v15365_v6, %s14947_s12  ;;  %v15592_v21 = vpop.permute.xlu1 %1805  ;;  %13665 = vmatprep.subr.msk.bf16.mxu1 %vm354_vm2, %v1915_v23  ;;  %v2437_v32 = vsel %vm354_vm2, %v4435_v36, 0 }
  0xfd   : > { %2017 = vmatpush1.bf16.msra.mxu1 %v1937_v20 }
  0xfe   : > { %v1890_v25 = vpop.permute.xlu0 %1889 }
  0xff   : > { %3946 = vrot.lane.b32.xlu1 %v15350_v24, %s14947_s12  ;;  %v1916_v53 = vsel %vm1911_vm6, %v1888_v15, %v1890_v25 }
 0x100   : > { %3952 = vrot.lane.b32.xlu0 %v15390_v40, %s14947_s12  ;;  %13656 = vmatmul.mubr.msk.bf16.vlgmr.msra.gmra.mrb[16].mxu0 %vm350_vm3, %v15500_v37  ;;  %v1892_v6 = vpop.permute.xlu1 %1891  ;;  %v1943_v59 = vsel %vm354_vm2, %v1916_v53, 0 }
 0x101   : > { %1697 = vmatpush1.bf16.msra.mxu0 %v1442_v16  ;;  %13666 = vmatmul.mubr.msk.bf16.vlgmr.msra.gmra.mrb[4].mxu1 %vm350_vm3, %v15592_v21 }
 0x102   : > { %v1894_v29 = vpop.permute.xlu0 %1893  ;;  %13663 = vmatprep.subr.msk.bf16.mxu0 %vm354_vm2, %v1913_v26  ;;  %1728 = vmatprep.mubr.bf16.mxu0 %v14931_v0  ;;  %v4419_v26 = vcombine.high %v4411_v18, %v4411_v18 }
 0x103   : > { %v1918_v24 = vsel %vm1911_vm6, %v1892_v6, %v1894_v29  ;;  %2130 = vmatprep.mubr.bf16.mxu1 %v14931_v0  ;;  %3950 = vrot.lane.b32.xlu1 %v15368_v28, %s14947_s12  ;;  %v1917_v28 = vsel %vm1911_vm6, %v1890_v25, %v1892_v6  ;;  %v2425_v25 = vsel %vm354_vm2, %v4418_v7, 0  ;;  %v2386_v6 = vcombine.high %v4435_v36, %v4435_v36 }
 0x104   : > { %3956 = vrot.lane.b32.xlu0 %v15404_v46, %s14947_s12  ;;  %v1896_v40 = vpop.permute.xlu1 %1895  ;;  %v1949_v30 = vsel %vm354_vm2, %v1918_v24, 0 }
 0x105   : > { %v1919_v35 = vsel %vm1911_vm6, %v1894_v29, %v1896_v40  ;;  %v2321_v29 = vld [vmem:[#allocation2 + $0x1e] sm:$0x3f] }
 0x106   : > { %13669 = vmatprep.subr.msk.bf16.mxu1 %vm354_vm2, %v1919_v35  ;;  %v1898_v38 = vpop.permute.xlu0 %1897 }
 0x107   : > { %2099 = vmatpush1.bf16.msra.mxu1 %v1949_v30  ;;  %3954 = vrot.lane.b32.xlu1 %v15393_v41, %s14947_s12 }
 0x108   : > { %3960 = vrot.lane.b32.xlu0 %v15428_v55, %s14947_s12  ;;  %13660 = vmatmul.mubr.msk.bf16.vlgmr.msra.gmra.mrb[24].mxu0 %vm350_vm3, %v15500_v37  ;;  %v1900_v43 = vpop.permute.xlu1 %1899 }
 0x109   : > { %1976 = vmatpush1.bf16.msra.mxu0 %v1931_v42  ;;  %2007 = vmatprep.mubr.bf16.mxu0 %v14931_v0  ;;  %v1921_v62 = vsel %vm1911_vm6, %v1898_v38, %v1900_v43 }
 0x10a   : > { %13670 = vmatmul.mubr.msk.bf16.vlgmr.msra.gmra.mrb[8].mxu1 %vm350_vm3, %v15592_v21  ;;  %v1902_v49 = vpop.permute.xlu0 %1901  ;;  %13667 = vmatprep.subr.msk.bf16.mxu0 %vm354_vm2, %v1917_v28  ;;  %v2419_v28 = vsel %vm354_vm2, %v4411_v18, 0 }
 0x10b   : > { %v1922_v37 = vsel %vm1911_vm6, %v1900_v43, %v1902_v49  ;;  %2212 = vmatprep.mubr.bf16.mxu1 %v14931_v0  ;;  %3958 = vrot.lane.b32.xlu1 %v15407_v47, %s14947_s12 }
 0x10c   : > { %4457 = vrot.lane.b32.xlu0 %v15631_v45, %s14949_s14  ;;  %v1904_v50 = vpop.permute.xlu1 %1903  ;;  %v1961_v51 = vsel %vm354_vm2, %v1922_v37, 0  ;;  %v2394_v37 = vrot.slane %v2321_v29, %v15055_v10 }
 0x10d   : > { %v1923_v54 = vsel %vm1911_vm6, %v1902_v49, %v1904_v50 }
 0x10e   : > { %13673 = vmatprep.subr.msk.bf16.mxu1 %vm354_vm2, %v1923_v54  ;;  %v1906_v57 = vpop.permute.xlu0 %1905  ;;  %v2402_v53 = vcombine.high %v2394_v37, %v2394_v37  ;;  %v2443_v1 = vsel %vm354_vm2, %v2394_v37, 0 }
 0x10f   : > { %2181 = vmatpush1.bf16.msra.mxu1 %v1961_v51  ;;  %4455 = vrot.lane.b32.xlu1 %v15616_v31, %s14949_s14  ;;  %v1924_v20 = vsel %vm1911_vm6, %v1904_v50, %v1906_v57 }
 0x110   : > { %4461 = vrot.lane.b32.xlu0 %v4403_v52, %s14949_s14  ;;  %13664 = vmatmul.mubr.msk.bf16.vlgmr.msra.gmra.mrb[0].mxu0 %vm350_vm3, %v15592_v21  ;;  %v1908_v60 = vpop.permute.xlu1 %1907  ;;  %v1967_v22 = vsel %vm354_vm2, %v1924_v20, 0 }
 0x111   : > { %2058 = vmatpush1.bf16.msra.mxu0 %v1943_v59  ;;  %14057 = vmatprep.subr.bf16.mxu1 %v14934_v34  ;;  %v1925_v13 = vsel %vm1911_vm6, %v1906_v57, %v1908_v60 }
 0x112   : > { %13674 = vmatmul.mubr.msk.bf16.vlgmr.msra.gmra.mrb[12].mxu1 %vm350_vm3, %v15592_v21  ;;  %v1910_v4 = vpop.permute.xlu0 %1909  ;;  %2089 = vmatprep.mubr.bf16.mxu0 %v14931_v0  ;;  %v1920_v0 = vsel %vm1911_vm6, %v1896_v40, %v1898_v38  ;;  %v2407_v40 = vsel %vm354_vm2, %v15616_v31, 0 }
 0x113   : > { %v1926_v58 = vsel %vm1911_vm6, %v1908_v60, %v1910_v4  ;;  %13671 = vmatprep.subr.msk.bf16.mxu0 %vm354_vm2, %v1921_v62  ;;  %14059 = vmatprep.mubr.msk.bf16.mxu1 %vm14935_vm0, %v14934_v34  ;;  %v1955_v44 = vsel %vm354_vm2, %v1920_v0, 0 }
 0x114   : > { %4381 = vrot.lane.b32.xlu0 %v13742_v2, %s14950_s19  ;;  %v1973_v39 = vsel %vm354_vm2, %v1926_v58, 0  ;;  %v15668_v12 = vpop.permute.xlu1 %2330  ;;  %4459 = vrot.lane.b32.xlu1 %v4401_v48, %s14949_s14  ;;  %s14975_s19 = smov 89  }
 0x115   : > { %14058 = vmatpush3.bf16.msra.mxu1 %v1973_v39 }
 0x116   : > { %13681 = vmatprep.subr.msk.bf16.mxu1 %vm354_vm2, %v4403_v52  ;;  %v15673_v61 = vpop.permute.xlu0 %2880  ;;  %v2431_v52 = vsel %vm354_vm2, %v15676_v63, 0 }
 0x118   : > { %4467 = vrot.lane.b32.xlu0 %v4418_v7, %s14949_s14  ;;  %13668 = vmatmul.mubr.msk.bf16.vlgmr.msra.gmra.mrb[8].mxu0 %vm350_vm3, %v15592_v21  ;;  %v15684_v5 = vpop.permute.xlu1 %2882 }
 0x119   : > { %2140 = vmatpush1.bf16.msra.mxu0 %v1955_v44  ;;  %2171 = vmatprep.mubr.bf16.mxu0 %v15686_v17  ;;  %v2913_v9 = vsel %vm2912_vm7, %v15673_v61, %v15684_v5 }
 0x11a   : > { %14060 = vmatmul.mubr.msk.bf16.vlgmr.msra.gmra.mrb[0].mxu1 %vm350_vm3, %v15592_v21  ;;  %13675 = vmatprep.subr.msk.bf16.mxu0 %vm354_vm2, %v1925_v13  ;;  %v15693_v19 = vpop.permute.xlu0 %2884 }
 0x11b   : > { %2493 = vmatpush1.bf16.msra.mxu1 %v2413_v14  ;;  %2524 = vmatprep.mubr.bf16.mxu1 %v15686_v17  ;;  %v2914_v4 = vsel %vm2912_vm7, %v15684_v5, %v15693_v19  ;;  %v2932_v14 = vsel %vm354_vm2, %v2913_v9, 0 }
 0x11c   : > { %4471 = vrot.lane.b32.xlu0 %v15676_v63, %s14949_s14  ;;  %13685 = vmatprep.subr.msk.bf16.mxu1 %vm354_vm2, %v2369_v11  ;;  %v15700_v15 = vpop.permute.xlu1 %2886 }
 0x11d   : > { %4463 = vrot.lane.b32.xlu1 %v4411_v18, %s14949_s14  ;;  %v2915_v50 = vsel %vm2912_vm7, %v15693_v19, %v15700_v15 }
 0x11e   : > { %v15704_v23 = vpop.permute.xlu0 %2888  ;;  %v2938_v56 = vsel %vm354_vm2, %v2915_v50, 0 }
 0x120   : > { %4475 = vrot.lane.b32.xlu0 %v4435_v36, %s14949_s14  ;;  %13672 = vmatmul.mubr.msk.bf16.vlgmr.msra.gmra.mrb[16].mxu0 %vm350_vm3, %v15592_v21  ;;  %v15711_v16 = vpop.permute.xlu1 %2806 }
 0x121   : > { %2222 = vmatpush1.bf16.msra.mxu0 %v1967_v22  ;;  %2253 = vmatprep.mubr.bf16.mxu0 %v15686_v17 }
 0x122   : > { %13682 = vmatmul.mubr.msk.bf16.vlgmr.msra.gmra.mrb[4].mxu1 %vm350_vm3, %v15668_v12  ;;  %13679 = vmatprep.subr.msk.bf16.mxu0 %vm354_vm2, %v15631_v45  ;;  %v15718_v27 = vpop.permute.xlu0 %2890  ;;  %v2916_v45 = vsel %vm2912_vm7, %v15700_v15, %v15704_v23 }
 0x123   : > { %2575 = vmatpush1.bf16.msra.mxu1 %v2425_v25  ;;  %2606 = vmatprep.mubr.bf16.mxu1 %v15686_v17 }
 0x124   : > { %4479 = vrot.lane.b32.xlu0 %v15393_v41, %s14949_s14  ;;  %4465 = vrot.lane.b32.xlu1 %v4419_v26, %s14949_s14  ;;  %v2387_v41 = vcombine.high %v2321_v29, %v2321_v29 }
 0x125   : > { %13689 = vmatprep.subr.msk.bf16.mxu1 %vm354_vm2, %v2386_v6  ;;  %v15725_v24 = vpop.permute.xlu1 %2892 }
 0x126   : > { %v2895_v30 = vpop.permute.xlu0 %2894  ;;  %v2401_v31 = vrot.slane %v2387_v41, %v15055_v10  ;;  %v2918_v44 = vsel %vm2912_vm7, %v15718_v27, %v15725_v24 }
 0x127   : > { %v2919_v60 = vsel %vm2912_vm7, %v15725_v24, %v2895_v30 }
 0x128   : > { %4483 = vrot.lane.b32.xlu0 %v15407_v47, %s14949_s14  ;;  %13676 = vmatmul.mubr.msk.bf16.vlgmr.msra.gmra.mrb[24].mxu0 %vm350_vm3, %v15592_v21  ;;  %v4436_v47 = vcombine.high %v15676_v63, %v15676_v63  ;;  %v2449_v43 = vsel %vm354_vm2, %v2401_v31, 0  ;;  %v2950_v58 = vsel %vm354_vm2, %v2919_v60, 0 }
 0x129   : > { %2452 = vmatpush1.bf16.msra.mxu0 %v2407_v40  ;;  %2483 = vmatprep.mubr.bf16.mxu0 %v15686_v17  ;;  %v15738_v35 = vpop.permute.xlu1 %2896 }
 0x12a   : > { %13686 = vmatmul.mubr.msk.bf16.vlgmr.msra.gmra.mrb[8].mxu1 %vm350_vm3, %v15668_v12  ;;  %4469 = vrot.lane.b32.xlu1 %v2369_v11, %s14949_s14  ;;  %v15745_v21 = vpop.permute.xlu0 %2898  ;;  %v2920_v57 = vsel %vm2912_vm7, %v2895_v30, %v15738_v35 }
 0x12b   : > { %2657 = vmatpush1.bf16.msra.mxu1 %v2437_v32  ;;  %2688 = vmatprep.mubr.bf16.mxu1 %v15686_v17 }
 0x12c   : > { %222 = vperm.xlu0 %14881, %v219_v33   ;;  %13683 = vmatprep.subr.msk.bf16.mxu0 %vm354_vm2, %v4419_v26  ;;  %v2921_v26 = vsel %vm2912_vm7, %v15738_v35, %v15745_v21 }
 0x12d   : > { %14063 = vmatprep.subr.bf16.mxu1 %v14934_v34  ;;  %v15751_v38 = vpop.permute.xlu1 %2900  ;;  %v2956_v40 = vsel %vm354_vm2, %v2921_v26, 0 }
 0x12e   : > { %4473 = vrot.lane.b32.xlu1 %v4436_v47, %s14949_s14  ;;  %v2903_v42 = vpop.permute.xlu0 %2902  ;;  %v2922_v36 = vsel %vm2912_vm7, %v15745_v21, %v15751_v38 }
 0x12f   : > { %v2923_v0 = vsel %vm2912_vm7, %v15751_v38, %v2903_v42 }
 0x130   : > { %13680 = vmatmul.mubr.msk.bf16.vlgmr.msra.gmra.mrb[0].mxu0 %vm350_vm3, %v15668_v12  ;;  %v2962_v3 = vsel %vm354_vm2, %v2923_v0, 0 }
 0x131   : > { %2534 = vmatpush1.bf16.msra.mxu0 %v2419_v28  ;;  %2565 = vmatprep.mubr.bf16.mxu0 %v15686_v17  ;;  %v15762_v48 = vpop.permute.xlu1 %2904 }
 0x132   : > { %13690 = vmatmul.mubr.msk.bf16.vlgmr.msra.gmra.mrb[12].mxu1 %vm350_vm3, %v15668_v12  ;;  %4477 = vrot.lane.b32.xlu1 %v2386_v6, %s14949_s14  ;;  %v15767_v49 = vpop.permute.xlu0 %2906 }
 0x133   : > { %14064 = vmatpush3.bf16.msra.mxu1 %v2449_v43  ;;  %14065 = vmatprep.mubr.msk.bf16.mxu1 %vm14935_vm0, %v14934_v34  ;;  %v2925_v35 = vsel %vm2912_vm7, %v15762_v48, %v15767_v49 }
 0x134   : > { %13687 = vmatprep.subr.msk.bf16.mxu0 %vm354_vm2, %v4436_v47  ;;  %13697 = vmatprep.subr.msk.bf16.mxu1 %vm354_vm2, %v2916_v45  ;;  %v2968_v28 = vsel %vm354_vm2, %v2925_v35, 0 }
 0x135   : > { %v15777_v51 = vpop.permute.xlu1 %2908 }
 0x136   : > { %4481 = vrot.lane.b32.xlu1 %v15404_v46, %s14949_s14  ;;  %v2911_v54 = vpop.permute.xlu0 %2910  ;;  %v2926_v24 = vsel %vm2912_vm7, %v15767_v49, %v15777_v51 }
 0x137   : > { %v2927_v5 = vsel %vm2912_vm7, %v15777_v51, %v2911_v54 }
 0x138   : > { %13684 = vmatmul.mubr.msk.bf16.vlgmr.msra.gmra.mrb[8].mxu0 %vm350_vm3, %v15668_v12  ;;  %v2974_v20 = vsel %vm354_vm2, %v2927_v5, 0 }
 0x139   : > { %2616 = vmatpush1.bf16.msra.mxu0 %v2431_v52  ;;  %2647 = vmatprep.mubr.bf16.mxu0 %v15686_v17  ;;  %v15789_v59 = vpop.permute.xlu1 %3405 }
 0x13a   : > { %14066 = vmatmul.mubr.msk.bf16.vlgmr.msra.gmra.mrb[0].mxu1 %vm350_vm3, %v15668_v12  ;;  %13691 = vmatprep.subr.msk.bf16.mxu0 %vm354_vm2, %v2402_v53  ;;  %v15794_v46 = vpop.permute.xlu0 %3407 }
 0x13b   : > { %3018 = vmatpush1.bf16.msra.mxu1 %v2938_v56  ;;  %3049 = vmatprep.mubr.bf16.mxu1 %v15686_v17  ;;  %v3438_v49 = vsel %vm3437_vm8, %v15789_v59, %v15794_v46 }
 0x13c   : > { %4485 = vrot.lane.b32.xlu1 %v15428_v55, %s14949_s14  ;;  %13701 = vmatprep.subr.msk.bf16.mxu1 %vm354_vm2, %v2920_v57  ;;  %v2924_v55 = vsel %vm2912_vm7, %v2903_v42, %v15762_v48  ;;  %v3457_v53 = vsel %vm354_vm2, %v3438_v49, 0 }
 0x13d   : > { %v15802_v62 = vpop.permute.xlu1 %3409 }
 0x13e   : > { %v3412_v2 = vpop.permute.xlu0 %3411  ;;  %v3439_v38 = vsel %vm3437_vm8, %v15794_v46, %v15802_v62 }
 0x13f   : > { %v3440_v6 = vsel %vm3437_vm8, %v15802_v62, %v3412_v2 }
 0x140   : > { %13688 = vmatmul.mubr.msk.bf16.vlgmr.msra.gmra.mrb[16].mxu0 %vm350_vm3, %v15668_v12  ;;  %v3463_v30 = vsel %vm354_vm2, %v3440_v6, 0 }
 0x141   : > { %2698 = vmatpush1.bf16.msra.mxu0 %v2443_v1  ;;  %2729 = vmatprep.mubr.bf16.mxu0 %v15686_v17  ;;  %v15814_v39 = vpop.permute.xlu1 %3413 }
 0x142   : > { %13695 = vmatprep.subr.msk.bf16.mxu0 %vm354_vm2, %v2914_v4  ;;  %13698 = vmatmul.mubr.msk.bf16.vlgmr.msra.gmra.mrb[4].mxu1 %vm350_vm3, %v15711_v16  ;;  %v15819_v7 = vpop.permute.xlu0 %3331 }
 0x143   : > { %3100 = vmatpush1.bf16.msra.mxu1 %v2950_v58  ;;  %3131 = vmatprep.mubr.bf16.mxu1 %v15686_v17 }
 0x144   : > { %13705 = vmatprep.subr.msk.bf16.mxu1 %vm354_vm2, %v2924_v55 }
 0x145   : > { %v15828_v63 = vpop.permute.xlu1 %3415 }
 0x146   : > { %v15830_v13 = vpop.permute.xlu0 %3417 }
 0x147   : > { %v3443_v51 = vsel %vm3437_vm8, %v15828_v63, %v15830_v13 }
 0x148   : > { %13692 = vmatmul.mubr.msk.bf16.vlgmr.msra.gmra.mrb[24].mxu0 %vm350_vm3, %v15668_v12  ;;  %v2917_v12 = vsel %vm2912_vm7, %v15704_v23, %v15718_v27  ;;  %v3441_v23 = vsel %vm3437_vm8, %v3412_v2, %v15814_v39 }
 0x149   : > { %2977 = vmatpush1.bf16.msra.mxu0 %v2932_v14  ;;  %3008 = vmatprep.mubr.bf16.mxu0 %v15686_v17  ;;  %v3420_v61 = vpop.permute.xlu1 %3419  ;;  %v2944_v15 = vsel %vm354_vm2, %v2917_v12, 0 }
 0x14a   : > { %13699 = vmatprep.subr.msk.bf16.mxu0 %vm354_vm2, %v2918_v44  ;;  %13702 = vmatmul.mubr.msk.bf16.vlgmr.msra.gmra.mrb[8].mxu1 %vm350_vm3, %v15711_v16  ;;  %v15843_v11 = vpop.permute.xlu0 %3421  ;;  %v3444_v47 = vsel %vm3437_vm8, %v15830_v13, %v3420_v61 }
 0x14b   : > { %3182 = vmatpush1.bf16.msra.mxu1 %v2962_v3  ;;  %3213 = vmatprep.mubr.bf16.mxu1 %v15686_v17  ;;  %v3445_v32 = vsel %vm3437_vm8, %v3420_v61, %v15843_v11  ;;  %v3475_v42 = vsel %vm354_vm2, %v3444_v47, 0 }
 0x14c   : > { %14069 = vmatprep.subr.bf16.mxu1 %v14934_v34 }
 0x14d   : > { %v15852_v18 = vpop.permute.xlu1 %3423 }
 0x14e   : > { %v15854_v19 = vpop.permute.xlu0 %3425  ;;  %v3446_v9 = vsel %vm3437_vm8, %v15843_v11, %v15852_v18 }
 0x14f   : > { %v3447_v60 = vsel %vm3437_vm8, %v15852_v18, %v15854_v19  ;;  %v3481_v61 = vsel %vm354_vm2, %v3446_v9, 0 }
 0x150   : > { %13696 = vmatmul.mubr.msk.bf16.vlgmr.msra.gmra.mrb[0].mxu0 %vm350_vm3, %v15711_v16 }
 0x151   : > { %3059 = vmatpush1.bf16.msra.mxu0 %v2944_v15  ;;  %3090 = vmatprep.mubr.bf16.mxu0 %v15686_v17  ;;  %v3428_v22 = vpop.permute.xlu1 %3427 }
 0x152   : > { %13703 = vmatprep.subr.msk.bf16.mxu0 %vm354_vm2, %v2922_v36  ;;  %13706 = vmatmul.mubr.msk.bf16.vlgmr.msra.gmra.mrb[12].mxu1 %vm350_vm3, %v15711_v16  ;;  %v15869_v25 = vpop.permute.xlu0 %3429  ;;  %v3448_v37 = vsel %vm3437_vm8, %v15854_v19, %v3428_v22 }
 0x153   : > { %14070 = vmatpush3.bf16.msra.mxu1 %v2974_v20  ;;  %14071 = vmatprep.mubr.msk.bf16.mxu1 %vm14935_vm0, %v14934_v34  ;;  %v3449_v43 = vsel %vm3437_vm8, %v3428_v22, %v15869_v25  ;;  %v3487_v54 = vsel %vm354_vm2, %v3448_v37, 0 }
 0x154   : > { %13713 = vmatprep.subr.msk.bf16.mxu1 %vm354_vm2, %v3441_v23 }
 0x155   : > { %v15879_v27 = vpop.permute.xlu1 %3431 }
 0x156   : > { %v15881_v29 = vpop.permute.xlu0 %3433  ;;  %v3450_v19 = vsel %vm3437_vm8, %v15869_v25, %v15879_v27 }
 0x157   : > { %v3451_v3 = vsel %vm3437_vm8, %v15879_v27, %v15881_v29  ;;  %v3493_v23 = vsel %vm354_vm2, %v3450_v19, 0 }
 0x158   : > { %13700 = vmatmul.mubr.msk.bf16.vlgmr.msra.gmra.mrb[8].mxu0 %vm350_vm3, %v15711_v16 }
 0x159   : > { %3141 = vmatpush1.bf16.msra.mxu0 %v2956_v40  ;;  %3172 = vmatprep.mubr.bf16.mxu0 %v15686_v17  ;;  %v3436_v41 = vpop.permute.xlu1 %3435 }
 0x15a   : > { %13707 = vmatprep.subr.msk.bf16.mxu0 %vm354_vm2, %v2926_v24  ;;  %14072 = vmatmul.mubr.msk.bf16.vlgmr.msra.gmra.mrb[0].mxu1 %vm350_vm3, %v15711_v16  ;;  %v15896_v33 = vpop.permute.xlu0 %3930  ;;  %v3452_v57 = vsel %vm3437_vm8, %v15881_v29, %v3436_v41 }
 0x15b   : > { %3543 = vmatpush1.bf16.msra.mxu1 %v3463_v30  ;;  %3574 = vmatprep.mubr.bf16.mxu1 %v15686_v17  ;;  %v3499_v1 = vsel %vm354_vm2, %v3452_v57, 0 }
 0x15c   : > { %13717 = vmatprep.subr.msk.bf16.mxu1 %vm354_vm2, %v3445_v32 }
 0x15d   : > { %v15905_v21 = vpop.permute.xlu1 %3932 }
 0x15e   : > { %v15907_v31 = vpop.permute.xlu0 %3934  ;;  %v3963_v24 = vsel %vm3962_vm9, %v15896_v33, %v15905_v21 }
 0x15f   : > { %v3964_v20 = vsel %vm3962_vm9, %v15905_v21, %v15907_v31  ;;  %v3982_v47 = vsel %vm354_vm2, %v3963_v24, 0 }
 0x160   : > { %13704 = vmatmul.mubr.msk.bf16.vlgmr.msra.gmra.mrb[16].mxu0 %vm350_vm3, %v15711_v16 }
 0x161   : > { %3223 = vmatpush1.bf16.msra.mxu0 %v2968_v28  ;;  %3254 = vmatprep.mubr.bf16.mxu0 %v15686_v17  ;;  %v3937_v45 = vpop.permute.xlu1 %3936 }
 0x162   : > { %13711 = vmatprep.subr.msk.bf16.mxu0 %vm354_vm2, %v3439_v38  ;;  %13714 = vmatmul.mubr.msk.bf16.vlgmr.msra.gmra.mrb[4].mxu1 %vm350_vm3, %v15819_v7  ;;  %v15922_v48 = vpop.permute.xlu0 %3938 }
 0x163   : > { %3625 = vmatpush1.bf16.msra.mxu1 %v3475_v42  ;;  %3656 = vmatprep.mubr.bf16.mxu1 %v15686_v17  ;;  %v3966_v2 = vsel %vm3962_vm9, %v3937_v45, %v15922_v48 }
 0x164   : > { %13721 = vmatprep.subr.msk.bf16.mxu1 %vm354_vm2, %v3449_v43 }
 0x166   : > { %v15931_v50 = vpop.permute.xlu0 %3940  ;;  %v15936_v52 = vpop.permute.xlu1 %3856 }
 0x168   : > { %13708 = vmatmul.mubr.msk.bf16.vlgmr.msra.gmra.mrb[24].mxu0 %vm350_vm3, %v15711_v16  ;;  %v3442_v16 = vsel %vm3437_vm8, %v15814_v39, %v15828_v63  ;;  %v3965_v63 = vsel %vm3962_vm9, %v15907_v31, %v3937_v45 }
 0x169   : > { %3502 = vmatpush1.bf16.msra.mxu0 %v3457_v53  ;;  %3533 = vmatprep.mubr.bf16.mxu0 %v15686_v17  ;;  %v3469_v62 = vsel %vm354_vm2, %v3442_v16, 0  ;;  %v3988_v12 = vsel %vm354_vm2, %v3965_v63, 0 }
 0x16a   : > { %13718 = vmatmul.mubr.msk.bf16.vlgmr.msra.gmra.mrb[8].mxu1 %vm350_vm3, %v15819_v7  ;;  %13715 = vmatprep.subr.msk.bf16.mxu0 %vm354_vm2, %v3443_v51  ;;  %v3945_v56 = vpop.permute.xlu0 %3944 }
 0x16b   : > { %3707 = vmatpush1.bf16.msra.mxu1 %v3487_v54  ;;  %3738 = vmatprep.mubr.bf16.mxu1 %v15686_v17 }
 0x16c   : > { %14075 = vmatprep.subr.bf16.mxu1 %v14934_v34 }
 0x16d   : > { %v15953_v59 = vpop.permute.xlu1 %3942 }
 0x16e   : > { %v15955_v46 = vpop.permute.xlu0 %3948  ;;  %v3969_v36 = vsel %vm3962_vm9, %v15953_v59, %v3945_v56  ;;  %v3968_v35 = vsel %vm3962_vm9, %v15931_v50, %v15953_v59 }
 0x16f   : > { %v4000_v22 = vsel %vm354_vm2, %v3969_v36, 0 }
 0x170   : > { %13712 = vmatmul.mubr.msk.bf16.vlgmr.msra.gmra.mrb[0].mxu0 %vm350_vm3, %v15819_v7 }
 0x171   : > { %3584 = vmatpush1.bf16.msra.mxu0 %v3469_v62  ;;  %3615 = vmatprep.mubr.bf16.mxu0 %v15686_v17  ;;  %v15967_v4 = vpop.permute.xlu1 %3946 }
 0x172   : > { %13722 = vmatmul.mubr.msk.bf16.vlgmr.msra.gmra.mrb[12].mxu1 %vm350_vm3, %v15819_v7  ;;  %13719 = vmatprep.subr.msk.bf16.mxu0 %vm354_vm2, %v3447_v60  ;;  %v3953_v58 = vpop.permute.xlu0 %3952  ;;  %v3970_v11 = vsel %vm3962_vm9, %v3945_v56, %v15967_v4  ;;  %v3971_v51 = vsel %vm3962_vm9, %v15967_v4, %v15955_v46 }
 0x173   : > { %v15972_v55 = vpop.f32.mrb[4].mxu0  ;;  %14076 = vmatpush3.bf16.msra.mxu1 %v3499_v1  ;;  %14077 = vmatprep.mubr.msk.bf16.mxu1 %vm14935_vm0, %v14934_v34  ;;  %v4006_v59 = vsel %vm354_vm2, %v3971_v51, 0 }
 0x174   : > { %v15976_v39 = vpop.f32.mrb[5].mxu0  ;;  %13729 = vmatprep.subr.msk.bf16.mxu1 %vm354_vm2, %v3966_v2 }
 0x175   : > { %v479_v0 = vpop.f32.mrb[6].mxu0  ;;  %v3951_v13 = vpop.permute.xlu1 %3950 }
 0x176   : > { %v480_v44 = vpop.f32.mrb[7].mxu0  ;;  %v15984_v14 = vpop.permute.xlu0 %3956  ;;  %v3973_v30 = vsel %vm3962_vm9, %v3951_v13, %v3953_v58  ;;  %v3972_v28 = vsel %vm3962_vm9, %v15955_v46, %v3951_v13 }
 0x177   : > { %v4012_v31 = vsel %vm354_vm2, %v3973_v30, 0 }
 0x178   : > { %13716 = vmatmul.mubr.msk.bf16.vlgmr.msra.gmra.mrb[8].mxu0 %vm350_vm3, %v15819_v7 }
 0x179   : > { %3666 = vmatpush1.bf16.msra.mxu0 %v3481_v61  ;;  %3697 = vmatprep.mubr.bf16.mxu0 %v15686_v17  ;;  %v15996_v5 = vpop.permute.xlu1 %3954 }
 0x17a   : > { %14078 = vmatmul.mubr.msk.bf16.vlgmr.msra.gmra.mrb[0].mxu1 %vm350_vm3, %v15819_v7  ;;  %13723 = vmatprep.subr.msk.bf16.mxu0 %vm354_vm2, %v3451_v3  ;;  %v3961_v18 = vpop.permute.xlu0 %3960  ;;  %v3974_v25 = vsel %vm3962_vm9, %v3953_v58, %v15996_v5  ;;  %v3975_v1 = vsel %vm3962_vm9, %v15996_v5, %v15984_v14 }
 0x17b   : > { %4068 = vmatpush1.bf16.msra.mxu1 %v3988_v12  ;;  %4099 = vmatprep.mubr.bf16.mxu1 %v15686_v17  ;;  %v4018_v0 = vsel %vm354_vm2, %v3975_v1, 0 }
 0x17c   : > { %13733 = vmatprep.subr.msk.bf16.mxu1 %vm354_vm2, %v3970_v11 }
 0x17d   : > { %v3959_v15 = vpop.permute.xlu1 %3958 }
 0x17e   : > { %v16015_v26 = vpop.permute.xlu0 %4457  ;;  %v3977_v38 = vsel %vm3962_vm9, %v3959_v15, %v3961_v18  ;;  %v3976_v57 = vsel %vm3962_vm9, %v15984_v14, %v3959_v15 }
 0x17f   : > { %v4024_v45 = vsel %vm354_vm2, %v3977_v38, 0 }
 0x180   : > { %13720 = vmatmul.mubr.msk.bf16.vlgmr.msra.gmra.mrb[16].mxu0 %vm350_vm3, %v15819_v7 }
 0x181   : > { %3748 = vmatpush1.bf16.msra.mxu0 %v3493_v23  ;;  %3779 = vmatprep.mubr.bf16.mxu0 %v15686_v17  ;;  %v16026_v27 = vpop.permute.xlu1 %4455 }
 0x182   : > { %13730 = vmatmul.mubr.msk.bf16.vlgmr.msra.gmra.mrb[4].mxu1 %vm350_vm3, %v15936_v52  ;;  %13727 = vmatprep.subr.msk.bf16.mxu0 %vm354_vm2, %v3964_v20  ;;  %v4462_v41 = vpop.permute.xlu0 %4461  ;;  %v4488_v3 = vsel %vm4487_vm10, %v16026_v27, %v16015_v26 }
 0x183   : > { %v16023_v6 = vpop.f32.mrb[12].mxu0  ;;  %4150 = vmatpush1.bf16.msra.mxu1 %v4000_v22  ;;  %4181 = vmatprep.mubr.bf16.mxu1 %v15686_v17  ;;  %v4507_v5 = vsel %vm354_vm2, %v4488_v3, 0  ;;  %v16205_v3 = vld [vmem:[%s18722_s1 + $0x8] sm:$0xff] }
 0x184   : > { %v16028_v29 = vpop.f32.mrb[13].mxu0  ;;  %13737 = vmatprep.subr.msk.bf16.mxu1 %vm354_vm2, %v3974_v25 }
 0x185   : > { %v561_v40 = vpop.f32.mrb[14].mxu0 }
 0x186   : > { %v562_v32 = vpop.f32.mrb[15].mxu0  ;;  %v4460_v33 = vpop.permute.xlu1 %4459 }
 0x187   : > { %v16047_v21 = vpop.permute.xlu0 %4381  ;;  %v4490_v54 = vsel %vm4487_vm10, %v4460_v33, %v4462_v41  ;;  %v4489_v9 = vsel %vm4487_vm10, %v16015_v26, %v4460_v33  ;;  %v16159_v32 = vld.sshfl [vmem:[%s18723_s2] sm:$0x3 pattern:$0x76325410] }
 0x188   : > { %13724 = vmatmul.mubr.msk.bf16.vlgmr.msra.gmra.mrb[24].mxu0 %vm350_vm3, %v15819_v7  ;;  %v3967_v7 = vsel %vm3962_vm9, %v15922_v48, %v15931_v50  ;;  %v4513_v62 = vsel %vm354_vm2, %v4490_v54, 0  ;;  %5126 = vrot.lane.b32.xlu1 %v16159_v32, %s14951_s26  ;;  %s14980_s26 = smov 99  }
 0x189   : > { %4027 = vmatpush1.bf16.msra.mxu0 %v3982_v47  ;;  %4058 = vmatprep.mubr.bf16.mxu0 %v15686_v17  ;;  %v3994_v43 = vsel %vm354_vm2, %v3967_v7, 0  ;;  %v16170_v47 = vld [vmem:[%s18722_s1] sm:$0xff] }
 0x18a   : > { %13734 = vmatmul.mubr.msk.bf16.vlgmr.msra.gmra.mrb[8].mxu1 %vm350_vm3, %v15936_v52  ;;  %13731 = vmatprep.subr.msk.bf16.mxu0 %vm354_vm2, %v3968_v35  ;;  %v16165_v35 = vsub.s32 2, %v15050_v8 }
 0x18b   : > { %4232 = vmatpush1.bf16.msra.mxu1 %v4012_v31  ;;  %4263 = vmatprep.mubr.bf16.mxu1 %v15686_v17  ;;  %v4468_v49 = vpop.permute.xlu0 %4467  ;;  %v16173_v31 = vsub.s32 3, %v15050_v8 }
 0x18c   : > { %14081 = vmatprep.subr.bf16.mxu1 %v14934_v34 }
 0x18f   : > { %v16056_v42 = vpop.permute.xlu1 %4463  ;;  %v4472_v60 = vpop.permute.xlu0 %4471 }
 0x190   : > { %13728 = vmatmul.mubr.msk.bf16.vlgmr.msra.gmra.mrb[0].mxu0 %vm350_vm3, %v15936_v52  ;;  %v4491_v48 = vsel %vm4487_vm10, %v4462_v41, %v16056_v42 }
 0x191   : > { %4109 = vmatpush1.bf16.msra.mxu0 %v3994_v43  ;;  %4140 = vmatprep.mubr.bf16.mxu0 %v15686_v17 }
 0x192   : > { %13738 = vmatmul.mubr.msk.bf16.vlgmr.msra.gmra.mrb[12].mxu1 %vm350_vm3, %v15936_v52  ;;  %13735 = vmatprep.subr.msk.bf16.mxu0 %vm354_vm2, %v3972_v28  ;;  %v4923_v28 = vrot.slane %v16170_v47, %v16165_v35 }
 0x193   : > { %v16068_v37 = vpop.f32.mrb[20].mxu0  ;;  %14082 = vmatpush3.bf16.msra.mxu1 %v4024_v45  ;;  %14083 = vmatprep.mubr.msk.bf16.mxu1 %vm14935_vm0, %v14934_v34  ;;  %v4476_v58 = vpop.permute.xlu0 %4475  ;;  %v4927_v45 = vrot.slane %v16170_v47, %v16173_v31 }
 0x194   : > { %v16072_v50 = vpop.f32.mrb[21].mxu0  ;;  %13745 = vmatprep.subr.msk.bf16.mxu1 %vm354_vm2, %v4491_v48 }
 0x195   : > { %v643_v53 = vpop.f32.mrb[22].mxu0 }
 0x196   : > { %v644_v56 = vpop.f32.mrb[23].mxu0  ;;  %v4466_v16 = vpop.permute.xlu1 %4465 }
 0x197   : > { %v4480_v44 = vpop.permute.xlu0 %4479  ;;  %v4493_v11 = vsel %vm4487_vm10, %v4466_v16, %v4468_v49  ;;  %v4492_v36 = vsel %vm4487_vm10, %v16056_v42, %v4466_v16 }
 0x198   : > { %13732 = vmatmul.mubr.msk.bf16.vlgmr.msra.gmra.mrb[8].mxu0 %vm350_vm3, %v15936_v52  ;;  %v4519_v22 = vsel %vm354_vm2, %v4492_v36, 0 }
 0x199   : > { %4191 = vmatpush1.bf16.msra.mxu0 %v4006_v59  ;;  %4222 = vmatprep.mubr.bf16.mxu0 %v15686_v17 }
 0x19a   : > { %14084 = vmatmul.mubr.msk.bf16.vlgmr.msra.gmra.mrb[0].mxu1 %vm350_vm3, %v15936_v52  ;;  %13739 = vmatprep.subr.msk.bf16.mxu0 %vm354_vm2, %v3976_v57 }
 0x19b   : > { %4593 = vmatpush1.bf16.msra.mxu1 %v4513_v62  ;;  %4624 = vmatprep.mubr.bf16.mxu1 %v15686_v17 }
 0x19c   : > { %v4470_v46 = vpop.permute.xlu1 %4469 }
 0x19d   : > { %v4494_v2 = vsel %vm4487_vm10, %v4468_v49, %v4470_v46  ;;  %v4495_v4 = vsel %vm4487_vm10, %v4470_v46, %v4472_v60 }
 0x19e   : > { %13749 = vmatprep.subr.msk.bf16.mxu1 %vm354_vm2, %v4495_v4  ;;  %v4525_v63 = vsel %vm354_vm2, %v4494_v2, 0 }
 0x1a0   : > { %13736 = vmatmul.mubr.msk.bf16.vlgmr.msra.gmra.mrb[16].mxu0 %vm350_vm3, %v15936_v52  ;;  %v4474_v13 = vpop.permute.xlu1 %4473 }
 0x1a1   : > { %4273 = vmatpush1.bf16.msra.mxu0 %v4018_v0  ;;  %4304 = vmatprep.mubr.bf16.mxu0 %v15686_v17  ;;  %v4497_v23 = vsel %vm4487_vm10, %v4474_v13, %v4476_v58  ;;  %v4496_v25 = vsel %vm4487_vm10, %v4472_v60, %v4474_v13  ;;  %v16200_v13 = vsub.s32 1, %v15050_v8 }
 0x1a2   : > { %13746 = vmatmul.mubr.msk.bf16.vlgmr.msra.gmra.mrb[4].mxu1 %vm350_vm3, %v16047_v21  ;;  %13743 = vmatprep.subr.msk.bf16.mxu0 %vm354_vm2, %v4489_v9  ;;  %v4531_v27 = vsel %vm354_vm2, %v4496_v25, 0 }
 0x1a3   : > { %4675 = vmatpush1.bf16.msra.mxu1 %v4525_v63  ;;  %4706 = vmatprep.mubr.bf16.mxu1 %v15686_v17  ;;  %v4919_v36 = vrot.slane %v16170_v47, %v16200_v13 }
 0x1a4   : > { %v4478_v14 = vpop.permute.xlu1 %4477 }
 0x1a5   : > { %v4498_v61 = vsel %vm4487_vm10, %v4476_v58, %v4478_v14  ;;  %v4499_v12 = vsel %vm4487_vm10, %v4478_v14, %v4480_v44 }
 0x1a6   : > { %13753 = vmatprep.subr.msk.bf16.mxu1 %vm354_vm2, %v4499_v12  ;;  %v4537_v18 = vsel %vm354_vm2, %v4498_v61, 0 }
 0x1a8   : > { %13740 = vmatmul.mubr.msk.bf16.vlgmr.msra.gmra.mrb[24].mxu0 %vm350_vm3, %v15936_v52  ;;  %v4482_v19 = vpop.permute.xlu1 %4481  ;;  %v4484_v52 = vpop.permute.xlu0 %4483 }
 0x1a9   : > { %4552 = vmatpush1.bf16.msra.mxu0 %v4507_v5  ;;  %4583 = vmatprep.mubr.bf16.mxu0 %v15686_v17  ;;  %v4501_v24 = vsel %vm4487_vm10, %v4482_v19, %v4484_v52  ;;  %v4500_v40 = vsel %vm4487_vm10, %v4480_v44, %v4482_v19 }
 0x1aa   : > { %13750 = vmatmul.mubr.msk.bf16.vlgmr.msra.gmra.mrb[8].mxu1 %vm350_vm3, %v16047_v21  ;;  %13747 = vmatprep.subr.msk.bf16.mxu0 %vm354_vm2, %v4493_v11  ;;  %v4543_v30 = vsel %vm354_vm2, %v4500_v40, 0  ;;  %v4959_v40 = vrot.slane %v16205_v3, %v16173_v31 }
 0x1ab   : > { %4757 = vmatpush1.bf16.msra.mxu1 %v4537_v18  ;;  %4788 = vmatprep.mubr.bf16.mxu1 %v15686_v17 }
 0x1ac   : > { %14087 = vmatprep.subr.bf16.mxu1 %v14934_v34  ;;  %v16162_v41 = vpop.permute.xlu0 %222 }
 0x1ad   : > { %v729_v33 = vadd.f32 %v15972_v55, %v16162_v41  ;;  %v730_v7 = vadd.f32 %v15976_v39, %v16162_v41  ;;  %v16184_v55 = vsub.s32 6, %v15050_v8  ;;  %v4942_v39 = vsub.s32 7, %v15050_v8 }
 0x1ae   : > { %v4486_v15 = vpop.permute.xlu1 %4485  ;;  %v733_v16 = vadd.f32 %v16023_v6, %v16162_v41  ;;  %v734_v60 = vadd.f32 %v16028_v29, %v16162_v41  ;;  %v16197_v6 = vsub.s32 0, %v15050_v8  ;;  %v737_v5 = vadd.f32 %v16068_v37, %v16162_v41 }
 0x1af   : > { %v4502_v20 = vsel %vm4487_vm10, %v4484_v52, %v4486_v15  ;;  %v4939_v46 = vrot.slane %v16170_v47, %v16184_v55  ;;  %v4943_v4 = vrot.slane %v16170_v47, %v4942_v39 }
 0x1b0   : > { %13744 = vmatmul.mubr.msk.bf16.vlgmr.msra.gmra.mrb[0].mxu0 %vm350_vm3, %v16047_v21  ;;  %v4549_v26 = vsel %vm354_vm2, %v4502_v20, 0  ;;  %v4915_v12 = vrot.slane %v16170_v47, %v16197_v6  ;;  %v738_v20 = vadd.f32 %v16072_v50, %v16162_v41  ;;  %v16225_v50 = vsub.s32 5, %v15050_v8 }
 0x1b1   : > { %4634 = vmatpush1.bf16.msra.mxu0 %v4519_v22  ;;  %4665 = vmatprep.mubr.bf16.mxu0 %v15686_v17 }
 0x1b2   : > { %13754 = vmatmul.mubr.msk.bf16.vlgmr.msra.gmra.mrb[12].mxu1 %vm350_vm3, %v16047_v21  ;;  %13751 = vmatprep.subr.msk.bf16.mxu0 %vm354_vm2, %v4497_v23 }
 0x1b3   : > { %14088 = vmatpush3.bf16.msra.mxu1 %v4549_v26  ;;  %14089 = vmatprep.mubr.msk.bf16.mxu1 %vm14935_vm0, %v14934_v34  ;;  %v4955_v26 = vrot.slane %v16205_v3, %v16165_v35 }
 0x1b8   : > { %13748 = vmatmul.mubr.msk.bf16.vlgmr.msra.gmra.mrb[8].mxu0 %vm350_vm3, %v16047_v21 }
 0x1b9   : > { %4716 = vmatpush1.bf16.msra.mxu0 %v4531_v27  ;;  %4747 = vmatprep.mubr.bf16.mxu0 %v15686_v17 }
 0x1ba   : > { %14090 = vmatmul.mubr.msk.bf16.vlgmr.msra.gmra.mrb[0].mxu1 %vm350_vm3, %v16047_v21  ;;  %13755 = vmatprep.subr.msk.bf16.mxu0 %vm354_vm2, %v4501_v24 }
 0x1bb   : > { %5368 = vmatprep.mubr.bf16.mxu1 %v15686_v17 }
 0x1c0   : > { %13752 = vmatmul.mubr.msk.bf16.vlgmr.msra.gmra.mrb[16].mxu0 %vm350_vm3, %v16047_v21 }
 0x1c1   : > { %4798 = vmatpush1.bf16.msra.mxu0 %v4543_v30  ;;  %4829 = vmatprep.mubr.bf16.mxu0 %v15686_v17 }
 0x1c8   : > { %13756 = vmatmul.mubr.msk.bf16.vlgmr.msra.gmra.mrb[24].mxu0 %vm350_vm3, %v16047_v21 }
 0x1c9   : > { %5327 = vmatprep.mubr.bf16.mxu0 %v15686_v17 }
 0x275   : > { %v4626_v21 = vpop.f32.mrb[4].mxu1 }
 0x276   : > { %v14186_v38 = vadd.f32 %v4626_v21, %v729_v33  ;;  %v4628_v42 = vpop.f32.mrb[5].mxu1 }
 0x277   : > { %v14188_v43 = vadd.f32 %v4628_v42, %v730_v7  ;;  %v4630_v48 = vpop.f32.mrb[6].mxu1 }
 0x278   : > { %v4895_v49 = vmax.f32 %v14186_v38, 0.0  ;;  %v4631_v51 = vpop.f32.mrb[7].mxu1  ;;  %v16222_v38 = vsub.s32 4, %v15050_v8 }
 0x279   : > { %v4896_v53 = vmax.f32 %v14188_v43, 0.0 }
 0x27a   : > { %v4989_v54 = vmul.f32 %v4923_v28, %v4895_v49 }
 0x27b   : > { %v4990_v56 = vmul.f32 %v4927_v45, %v4896_v53  ;;  %v4931_v53 = vrot.slane %v16170_v47, %v16222_v38 }
 0x27d   : > { %v13759_v57 = vpack.c.bf16 %v4990_v56, %v4989_v54  ;;  %v4708_v59 = vpop.f32.mrb[8].mxu1  ;;  %v4935_v56 = vrot.slane %v16170_v47, %v16225_v50 }
 0x27e   : > { %v14192_v62 = vadd.f32 %v4708_v59, %v733_v16  ;;  %v4710_v1 = vpop.f32.mrb[9].mxu1 }
 0x27f   : > { %v14194_v2 = vadd.f32 %v4710_v1, %v734_v60  ;;  %v4712_v58 = vpop.f32.mrb[10].mxu1  ;;  %v16233_v16 = vrot.slane %v13759_v57, %v15055_v10 }
 0x280   : > { %v4899_v9 = vmax.f32 %v14192_v62, 0.0  ;;  %v4713_v0 = vpop.f32.mrb[11].mxu1 }
 0x281   : > { %v4900_v63 = vmax.f32 %v14194_v2, 0.0 }
 0x282   : > { %v4993_v29 = vmul.f32 %v4939_v46, %v4899_v9 }
 0x283   : > { %v4994_v44 = vmul.f32 %v4943_v4, %v4900_v63  ;;  %v4585_v14 = vpop.f32.mrb[0].mxu0 }
 0x284   : > { %v14183_v61 = vadd.f32 %v4585_v14, %v16162_v41  ;;  %v4587_v11 = vpop.f32.mrb[1].mxu0 }
 0x285   : > { %v13761_v18 = vpack.c.bf16 %v4994_v44, %v4993_v29  ;;  %v14184_v19 = vadd.f32 %v4587_v11, %v16162_v41  ;;  %v4589_v52 = vpop.f32.mrb[2].mxu0  ;;  %v4790_v15 = vpop.f32.mrb[12].mxu1 }
 0x286   : > { %v4893_v23 = vmax.f32 %v14183_v61, 0.0  ;;  %v14198_v22 = vadd.f32 %v4790_v15, %v737_v5  ;;  %v4590_v25 = vpop.f32.mrb[3].mxu0  ;;  %v4792_v27 = vpop.f32.mrb[13].mxu1  ;;  %v4951_v5 = vrot.slane %v16205_v3, %v16200_v13 }
 0x287   : > { %v4894_v24 = vmax.f32 %v14184_v19, 0.0  ;;  %v14200_v37 = vadd.f32 %v4792_v27, %v738_v20  ;;  %v4794_v30 = vpop.f32.mrb[14].mxu1  ;;  %v16247_v19 = vrot.slane %v13761_v18, %v15055_v10  ;;  %v4971_v27 = vrot.slane %v16205_v3, %v16184_v55 }
 0x288   : > { %v4987_v33 = vmul.f32 %v4915_v12, %v4893_v23  ;;  %v4903_v21 = vmax.f32 %v14198_v22, 0.0  ;;  %v4795_v7 = vpop.f32.mrb[15].mxu1  ;;  %v4947_v12 = vrot.slane %v16205_v3, %v16197_v6 }
 0x289   : > { %v4988_v28 = vmul.f32 %v4919_v36, %v4894_v24  ;;  %v4904_v42 = vmax.f32 %v14200_v37, 0.0 }
 0x28a   : > { %v4997_v43 = vmul.f32 %v4955_v26, %v4903_v21 }
 0x28b   : > { %v13758_v45 = vpack.c.bf16 %v4988_v28, %v4987_v33  ;;  %v4998_v48 = vmul.f32 %v4959_v40, %v4904_v42  ;;  %v4667_v49 = vpop.f32.mrb[8].mxu0 }
 0x28c   : > { %v14189_v51 = vadd.f32 %v4667_v49, %v16162_v41  ;;  %v4669_v54 = vpop.f32.mrb[9].mxu0 }
 0x28d   : > { %v5040_v59 = vrot.slane %v13758_v45, %v15055_v10  ;;  %v13763_v60 = vpack.c.bf16 %v4998_v48, %v4997_v43  ;;  %v14190_v62 = vadd.f32 %v4669_v54, %v16162_v41  ;;  %v4671_v46 = vpop.f32.mrb[10].mxu0  ;;  %v4872_v1 = vpop.f32.mrb[0].mxu1  ;;  %v4963_v43 = vrot.slane %v16205_v3, %v16222_v38 }
 0x28e   : > { %v4897_v2 = vmax.f32 %v14189_v51, 0.0  ;;  %v4672_v4 = vpop.f32.mrb[11].mxu0  ;;  %v14091_v58 = vpop.f32.mrb[1].mxu1  ;;  %v14203_v52 = vadd.f32 %v4872_v1, %v16162_v41  ;;  %v4967_v48 = vrot.slane %v16205_v3, %v16225_v50 }
 0x28f   : > { %v16238_v9 = vcombine.low %v5040_v59, %v16233_v16  ;;  %v4898_v0 = vmax.f32 %v14190_v62, 0.0  ;;  %v4875_v63 = vpop.f32.mrb[2].mxu1  ;;  %v16272_v49 = vrot.slane %v13763_v60, %v15055_v10 }
 0x290   : > { %v4991_v29 = vmul.f32 %v4931_v53, %v4897_v2  ;;  %v14092_v47 = vpop.f32.mrb[3].mxu1  ;;  %v4907_v18 = vmax.f32 %v14203_v52, 0.0 }
 0x291   : > { %5103 = vst [vmem:[#allocation3 + $0x6] sm:$0xff] %v16238_v9  ;;  %v4992_v57 = vmul.f32 %v4935_v56, %v4898_v0 }
 0x292   : > { %v5001_v51 = vmul.f32 %v4971_v27, %v4907_v18 }
 0x293   : > { %v13760_v44 = vpack.c.bf16 %v4992_v57, %v4991_v29  ;;  %v4749_v14 = vpop.f32.mrb[16].mxu0 }
 0x294   : > { %v14195_v61 = vadd.f32 %v4749_v14, %v16162_v41  ;;  %v4751_v11 = vpop.f32.mrb[17].mxu0 }
 0x295   : > { %v5057_v36 = vrot.slane %v13760_v44, %v15055_v10  ;;  %v14196_v15 = vadd.f32 %v4751_v11, %v16162_v41  ;;  %v4753_v20 = vpop.f32.mrb[18].mxu0 }
 0x296   : > { %v4901_v23 = vmax.f32 %v14195_v61, 0.0  ;;  %v4754_v22 = vpop.f32.mrb[19].mxu0 }
 0x297   : > { %v16253_v26 = vcombine.low %v5057_v36, %v16247_v19  ;;  %v4902_v25 = vmax.f32 %v14196_v15, 0.0 }
 0x298   : > { %v4995_v24 = vmul.f32 %v4947_v12, %v4901_v23  ;;  %v5114_v37 = vld [vmem:[#allocation3 + $0x4] sm:$0xff] }
 0x299   : > { %5104 = vst [vmem:[#allocation3 + $0xe] sm:$0xff] %v16253_v26  ;;  %v4996_v40 = vmul.f32 %v4951_v5, %v4902_v25  ;;  %v16259_v30 = vrot.slane %v5114_v37, %v15055_v10  ;;  %v5132_v33 = vcombine.high %v5114_v37, %v5114_v37 }
 0x29b   : > { %v13762_v21 = vpack.c.bf16 %v4996_v40, %v4995_v24  ;;  %5200 = vrot.lane.b32.xlu1 %v16259_v30, %s14933_s22  ;;  %v4831_v7 = vpop.f32.mrb[24].mxu0  ;;  %v16264_v28 = vrot.slane %v5132_v33, %v15055_v10  ;;  %v16285_v3 = vcombine.high %v16259_v30, %v16259_v30  ;;  %v16441_v40 = vpop.permute.xlu1 %5126 }
 0x29c   : > { %v14201_v42 = vadd.f32 %v4831_v7, %v16162_v41  ;;  %v4833_v45 = vpop.f32.mrb[25].mxu0 }
 0x29d   : > { %v5074_v53 = vrot.slane %v13762_v21, %v15055_v10  ;;  %v14202_v54 = vadd.f32 %v4833_v45, %v16162_v41  ;;  %5204 = vrot.lane.b32.xlu0 %v16264_v28, %s14933_s22  ;;  %v4835_v56 = vpop.f32.mrb[26].mxu0  ;;  %v5016_v41 = vpack.c.bf16 %v5001_v51, %v5001_v51  ;;  %v16301_v57 = vcombine.high %v16264_v28, %v16264_v28 }
 0x29e   : > { %v4905_v59 = vmax.f32 %v14201_v42, 0.0  ;;  %v4836_v62 = vpop.f32.mrb[27].mxu0 }
 0x29f   : > { %v16279_v46 = vcombine.low %v5074_v53, %v16272_v49  ;;  %v4906_v1 = vmax.f32 %v14202_v54, 0.0  ;;  %5724 = vrot.lane.b32.xlu1 %v16259_v30, %s14936_s23  ;;  %v5097_v29 = vrot.slane %v5016_v41, %v15055_v10  ;;  %v16487_v41 = vrot.slane %v16238_v9, %v15055_v10 }
 0x2a0   : > { %v4999_v60 = vmul.f32 %v4963_v43, %v4905_v59  ;;  %v5115_v2 = vld [vmem:[#allocation3 + $0xc] sm:$0xff] }
 0x2a1   : > { %5105 = vst [vmem:[#allocation3 + $0x16] sm:$0xff] %v16279_v46  ;;  %v5000_v4 = vmul.f32 %v4967_v48, %v4906_v1  ;;  %5726 = vrot.lane.b32.xlu0 %v16285_v3, %s14936_s23  ;;  %v16293_v0 = vrot.slane %v5115_v2, %v15055_v10  ;;  %v5149_v63 = vcombine.high %v5115_v2, %v5115_v2 }
 0x2a3   : > { %v13764_v58 = vpack.c.bf16 %v5000_v4, %v4999_v60  ;;  %5202 = vrot.lane.b32.xlu1 %v16285_v3, %s14933_s22  ;;  %v16307_v14 = vcombine.high %v16293_v0, %v16293_v0  ;;  %v16310_v61 = vrot.slane %v5149_v63, %v15055_v10  ;;  %v14916_v4 = vcombine.low %v16233_v16, %v16233_v16 }
 0x2a4   : > { %v16503_v16 = vcombine.high %v16487_v41, %v16487_v41 }
 0x2a5   : > { %v5090_v47 = vrot.slane %v13764_v58, %v15055_v10  ;;  %5208 = vrot.lane.b32.xlu0 %v16293_v0, %s14933_s22  ;;  %v16318_v11 = vcombine.high %v16310_v61, %v16310_v61  ;;  %v16506_v9 = vrot.slane %v14916_v4, %v15055_v10 }
 0x2a7   : > { %v5098_v44 = vcombine.low %v5090_v47, %v5097_v29  ;;  %5206 = vrot.lane.b32.xlu1 %v16301_v57, %s14933_s22 }
 0x2a8   : > { %v5116_v12 = vld [vmem:[#allocation3 + $0x14] sm:$0xff] }
 0x2a9   : > { %5106 = vst [vmem:[#allocation3 + $0x1e] sm:$0x3f] %v5098_v44  ;;  %5210 = vrot.lane.b32.xlu0 %v16307_v14, %s14933_s22  ;;  %v16321_v5 = vrot.slane %v5116_v12, %v15055_v10  ;;  %v5166_v36 = vcombine.high %v5116_v12, %v5116_v12  ;;  %v16334_v23 = vld [vmem:[#allocation3 + $0x16] sm:$0xff] }
 0x2ab   : > { %5212 = vrot.lane.b32.xlu1 %v16310_v61, %s14933_s22  ;;  %v16329_v52 = vcombine.high %v16321_v5, %v16321_v5  ;;  %v16332_v15 = vrot.slane %v5166_v36, %v15055_v10 }
 0x2ad   : > { %5214 = vrot.lane.b32.xlu0 %v16318_v11, %s14933_s22  ;;  %v16343_v22 = vcombine.high %v16332_v15, %v16332_v15 }
 0x2af   : > { %5216 = vrot.lane.b32.xlu1 %v16321_v5, %s14933_s22 }
 0x2b0   : > { %v5117_v20 = vld [vmem:[#allocation3 + $0x1c] sm:$0xff] }
 0x2b1   : > { %5218 = vrot.lane.b32.xlu0 %v16329_v52, %s14933_s22  ;;  %11021 = vst [vmem:[#allocation3 + $0x18] sm:$0x3f] %v15686_v17  ;;  %v16348_v25 = vrot.slane %v5117_v20, %v15055_v10  ;;  %v5183_v27 = vcombine.high %v5117_v20, %v5117_v20 }
 0x2b3   : > { %5220 = vrot.lane.b32.xlu1 %v16332_v15, %s14933_s22  ;;  %v16358_v24 = vcombine.high %v16348_v25, %v16348_v25  ;;  %v16361_v37 = vrot.slane %v5183_v27, %v15055_v10 }
 0x2b5   : > { %5222 = vrot.lane.b32.xlu0 %v16343_v22, %s14933_s22  ;;  %v16369_v18 = vcombine.high %v16361_v37, %v16361_v37 }
 0x2b7   : > { %5224 = vrot.lane.b32.xlu1 %v16348_v25, %s14933_s22 }
 0x2b9   : > { %5730 = vrot.lane.b32.xlu0 %v16301_v57, %s14936_s23 }
 0x2bb   : > { %5728 = vrot.lane.b32.xlu1 %v16264_v28, %s14936_s23 }
 0x2bd   : > { %5226 = vrot.lane.b32.xlu0 %v16358_v24, %s14933_s22 }
 0x2bf   : > { %5228 = vrot.lane.b32.xlu1 %v16361_v37, %s14933_s22 }
 0x2c1   : > { %5230 = vrot.lane.b32.xlu0 %v16369_v18, %s14933_s22  ;;  %s14953_s22 = smov 84  }
 0x2c3   : > { %5732 = vrot.lane.b32.xlu1 %v16293_v0, %s14936_s23 }
 0x2c5   : > { %5650 = vrot.lane.b32.xlu0 %v16159_v32, %s14952_s7  ;;  %s14967_s7 = smov 36  }
 0x2c7   : > { %5734 = vrot.lane.b32.xlu1 %v16307_v14, %s14936_s23 }
 0x2c9   : > { %5736 = vrot.lane.b32.xlu0 %v16310_v61, %s14936_s23 }
 0x2cb   : > { %5738 = vrot.lane.b32.xlu1 %v16318_v11, %s14936_s23 }
 0x2cd   : > { %5740 = vrot.lane.b32.xlu0 %v16321_v5, %s14936_s23 }
 0x2cf   : > { %5742 = vrot.lane.b32.xlu1 %v16329_v52, %s14936_s23 }
 0x2d1   : > { %5744 = vrot.lane.b32.xlu0 %v16332_v15, %s14936_s23 }
 0x2d3   : > { %5746 = vrot.lane.b32.xlu1 %v16343_v22, %s14936_s23 }
 0x2d5   : > { %5748 = vrot.lane.b32.xlu0 %v16348_v25, %s14936_s23 }
 0x2d7   : > { %5750 = vrot.lane.b32.xlu1 %v16358_v24, %s14936_s23 }
 0x2d9   : > { %5752 = vrot.lane.b32.xlu0 %v16361_v37, %s14936_s23 }
 0x2db   : > { %6250 = vrot.lane.b32.xlu1 %v16285_v3, %s14938_s27 }
 0x2dd   : > { %6248 = vrot.lane.b32.xlu0 %v16259_v30, %s14938_s27 }
 0x2df   : > { %5754 = vrot.lane.b32.xlu1 %v16369_v18, %s14936_s23  ;;  %s14954_s23 = smov 80  }
 0x2e1   : > { %6252 = vrot.lane.b32.xlu0 %v16264_v28, %s14938_s27 }
 0x2e3   : > { %6254 = vrot.lane.b32.xlu1 %v16301_v57, %s14938_s27 }
 0x2e5   : > { %6256 = vrot.lane.b32.xlu0 %v16293_v0, %s14938_s27 }
 0x2e7   : > { %6174 = vrot.lane.b32.xlu1 %v16159_v32, %s14953_s22 }
 0x2e9   : > { %6258 = vrot.lane.b32.xlu0 %v16307_v14, %s14938_s27 }
 0x2eb   : > { %6260 = vrot.lane.b32.xlu1 %v16310_v61, %s14938_s27 }
 0x2ed   : > { %6262 = vrot.lane.b32.xlu0 %v16318_v11, %s14938_s27 }
 0x2ef   : > { %6264 = vrot.lane.b32.xlu1 %v16321_v5, %s14938_s27 }
 0x2f1   : > { %6266 = vrot.lane.b32.xlu0 %v16329_v52, %s14938_s27 }
 0x2f3   : > { %6268 = vrot.lane.b32.xlu1 %v16332_v15, %s14938_s27 }
 0x2f5   : > { %6270 = vrot.lane.b32.xlu0 %v16343_v22, %s14938_s27 }
 0x2f7   : > { %6272 = vrot.lane.b32.xlu1 %v16348_v25, %s14938_s27 }
 0x2f9   : > { %6274 = vrot.lane.b32.xlu0 %v16358_v24, %s14938_s27 }
 0x2fb   : > { %6276 = vrot.lane.b32.xlu1 %v16361_v37, %s14938_s27 }
 0x2fd   : > { %6774 = vrot.lane.b32.xlu0 %v16285_v3, %s14940_s29 }
 0x2ff   : > { %6772 = vrot.lane.b32.xlu1 %v16259_v30, %s14940_s29 }
 0x301   : > { %6278 = vrot.lane.b32.xlu0 %v16369_v18, %s14938_s27  ;;  %s14955_s27 = smov 76  }
 0x303   : > { %6776 = vrot.lane.b32.xlu1 %v16264_v28, %s14940_s29 }
 0x305   : > { %6778 = vrot.lane.b32.xlu0 %v16301_v57, %s14940_s29 }
 0x307   : > { %6780 = vrot.lane.b32.xlu1 %v16293_v0, %s14940_s29 }
 0x309   : > { %6698 = vrot.lane.b32.xlu0 %v16159_v32, %s14954_s23  ;;  %s14984_s23 = smov 79  }
 0x30b   : > { %6782 = vrot.lane.b32.xlu1 %v16307_v14, %s14940_s29 }
 0x30d   : > { %6784 = vrot.lane.b32.xlu0 %v16310_v61, %s14940_s29  ;;  %v5201_v30 = vpop.permute.xlu1 %5200 }
 0x30f   : > { %v5205_v33 = vpop.permute.xlu0 %5204  ;;  %6786 = vrot.lane.b32.xlu1 %v16318_v11, %s14940_s29  ;;  %v16521_v11 = vcombine.high %v16506_v9, %v16506_v9 }
 0x311   : > { %6788 = vrot.lane.b32.xlu0 %v16321_v5, %s14940_s29  ;;  %v16452_v21 = vpop.permute.xlu1 %5724 }
 0x313   : > { %v16454_v7 = vpop.permute.xlu0 %5726  ;;  %6790 = vrot.lane.b32.xlu1 %v16329_v52, %s14940_s29  ;;  %v16530_v52 = vrot.slane %v16253_v26, %v15055_v10 }
 0x315   : > { %6792 = vrot.lane.b32.xlu0 %v16332_v15, %s14940_s29  ;;  %v5203_v28 = vpop.permute.xlu1 %5202  ;;  %v14917_v15 = vcombine.low %v16247_v19, %v16247_v19  ;;  %v16546_v26 = vcombine.high %v16530_v52, %v16530_v52 }
 0x316   : > { %v5232_v42 = vsel %vm334_vm1, %v5201_v30, %v5203_v28  ;;  %v5233_v43 = vsel %vm334_vm1, %v5203_v28, %v5205_v33  ;;  %v14918_v28 = vcombine.low %v16272_v49, %v16272_v49 }
 0x317   : > { %v5209_v45 = vpop.permute.xlu0 %5208  ;;  %6794 = vrot.lane.b32.xlu1 %v16343_v22, %s14940_s29  ;;  %13766 = vmatprep.subr.msk.bf16.mxu0 %vm354_vm2, %v5233_v43  ;;  %v5251_v48 = vsel %vm354_vm2, %v5232_v42, 0  ;;  %v16549_v27 = vrot.slane %v14917_v15, %v15055_v10 }
 0x318   : > { %5296 = vmatpush1.bf16.msra.mxu0 %v5251_v48 }
 0x319   : > { %6796 = vrot.lane.b32.xlu0 %v16348_v25, %s14940_s29  ;;  %v5207_v51 = vpop.permute.xlu1 %5206  ;;  %v16561_v30 = vcombine.high %v16549_v27, %v16549_v27 }
 0x31a   : > { %v5234_v53 = vsel %vm334_vm1, %v5205_v33, %v5207_v51  ;;  %v5235_v54 = vsel %vm334_vm1, %v5207_v51, %v5209_v45  ;;  %v16565_v33 = vrot.slane %v16279_v46, %v15055_v10  ;;  %v5756_v46 = vsel %vm861_vm4, %v16452_v21, %v16454_v7 }
 0x31b   : > { %v5211_v56 = vpop.permute.xlu0 %5210  ;;  %6798 = vrot.lane.b32.xlu1 %v16358_v24, %s14940_s29  ;;  %13767 = vmatmul.mubr.msk.bf16.vlgmr.msra.gmra.mrb[28].mxu0 %vm350_vm3, %v16441_v40  ;;  %v5257_v59 = vsel %vm354_vm2, %v5234_v53, 0  ;;  %v16591_v21 = vrot.slane %v14918_v28, %v15055_v10 }
 0x31c   : > { %v5236_v62 = vsel %vm334_vm1, %v5209_v45, %v5211_v56  ;;  %13768 = vmatprep.subr.msk.bf16.mxu1 %vm354_vm2, %v5235_v54  ;;  %5409 = vmatprep.mubr.bf16.mxu0 %v15686_v17  ;;  %v16588_v54 = vcombine.high %v16565_v33, %v16565_v33 }
 0x31d   : > { %5337 = vmatpush1.bf16.msra.mxu1 %v5257_v59  ;;  %6800 = vrot.lane.b32.xlu0 %v16361_v37, %s14940_s29  ;;  %v5213_v1 = vpop.permute.xlu1 %5212  ;;  %v5263_v2 = vsel %vm354_vm2, %v5236_v62, 0  ;;  %v7689_v59 = vld [vmem:[#allocation3 + $0x1e] sm:$0xff] }
 0x31e   : > { %v5237_v3 = vsel %vm334_vm1, %v5211_v56, %v5213_v1  ;;  %v16613_v4 = vrot.slane %v7689_v59, %v15055_v10 }
 0x31f   : > { %v5215_v60 = vpop.permute.xlu0 %5214  ;;  %6802 = vrot.lane.b32.xlu1 %v16369_v18, %s14940_s29  ;;  %13770 = vmatprep.subr.msk.bf16.mxu0 %vm354_vm2, %v5237_v3  ;;  %s14956_s29 = smov 72  }
 0x320   : > { %13769 = vmatmul.mubr.msk.bf16.vlgmr.msra.gmra.mrb[16].mxu1 %vm350_vm3, %v16441_v40  ;;  %5378 = vmatpush1.bf16.msra.mxu0 %v5263_v2  ;;  %v5238_v58 = vsel %vm334_vm1, %v5213_v1, %v5215_v60  ;;  %v5775_v1 = vsel %vm354_vm2, %v5756_v46, 0  ;;  %v16610_v2 = vcombine.high %v16591_v21, %v16591_v21 }
 0x321   : > { %7222 = vrot.lane.b32.xlu0 %v16159_v32, %s14955_s27  ;;  %v5217_v0 = vpop.permute.xlu1 %5216  ;;  %5450 = vmatprep.mubr.bf16.mxu1 %v15686_v17  ;;  %v5269_v57 = vsel %vm354_vm2, %v5238_v58, 0  ;;  %s14985_s27 = smov 83  }
 0x322   : > { %v5239_v63 = vsel %vm334_vm1, %v5215_v60, %v5217_v0 }
 0x323   : > { %v5219_v29 = vpop.permute.xlu0 %5218  ;;  %7772 = vrot.lane.b32.xlu1 %v16487_v41, %s14943_s8  ;;  %13771 = vmatmul.mubr.msk.bf16.vlgmr.msra.gmra.mrb[32].mxu0 %vm350_vm3, %v16441_v40 }
 0x324   : > { %v5240_v47 = vsel %vm334_vm1, %v5217_v0, %v5219_v29  ;;  %13772 = vmatprep.subr.msk.bf16.mxu1 %vm354_vm2, %v5239_v63  ;;  %5491 = vmatprep.mubr.bf16.mxu0 %v15686_v17 }
 0x325   : > { %5419 = vmatpush1.bf16.msra.mxu1 %v5269_v57  ;;  %7774 = vrot.lane.b32.xlu0 %v16503_v16, %s14943_s8  ;;  %v5221_v44 = vpop.permute.xlu1 %5220  ;;  %v5275_v12 = vsel %vm354_vm2, %v5240_v47, 0  ;;  %v16626_v47 = vcombine.high %v16613_v4, %v16613_v4 }
 0x326   : > { %v5241_v14 = vsel %vm334_vm1, %v5219_v29, %v5221_v44 }
 0x327   : > { %v5223_v61 = vpop.permute.xlu0 %5222  ;;  %7776 = vrot.lane.b32.xlu1 %v16506_v9, %s14943_s8  ;;  %13774 = vmatprep.subr.msk.bf16.mxu0 %vm354_vm2, %v5241_v14 }
 0x328   : > { %13773 = vmatmul.mubr.msk.bf16.vlgmr.msra.gmra.mrb[20].mxu1 %vm350_vm3, %v16441_v40  ;;  %5460 = vmatpush1.bf16.msra.mxu0 %v5275_v12  ;;  %v5242_v5 = vsel %vm334_vm1, %v5221_v44, %v5223_v61 }
 0x329   : > { %7778 = vrot.lane.b32.xlu0 %v16521_v11, %s14943_s8  ;;  %v5225_v36 = vpop.permute.xlu1 %5224  ;;  %5532 = vmatprep.mubr.bf16.mxu1 %v15686_v17  ;;  %v5281_v25 = vsel %vm354_vm2, %v5242_v5, 0 }
 0x32a   : > { %v5243_v20 = vsel %vm334_vm1, %v5223_v61, %v5225_v36 }
 0x32b   : > { %v5731_v22 = vpop.permute.xlu0 %5730  ;;  %7780 = vrot.lane.b32.xlu1 %v16530_v52, %s14943_s8  ;;  %13775 = vmatmul.mubr.msk.bf16.vlgmr.msra.gmra.mrb[36].mxu0 %vm350_vm3, %v16441_v40 }
 0x32c   : > { %13776 = vmatprep.subr.msk.bf16.mxu1 %vm354_vm2, %v5243_v20  ;;  %5573 = vmatprep.mubr.bf16.mxu0 %v15686_v17 }
 0x32d   : > { %5501 = vmatpush1.bf16.msra.mxu1 %v5281_v25  ;;  %7698 = vrot.lane.b32.xlu0 %v16159_v32, %s14956_s29  ;;  %v5729_v19 = vpop.permute.xlu1 %5728 }
 0x32e   : > { %14093 = vmatprep.subr.bf16.mxu1 %v14934_v34  ;;  %v5757_v49 = vsel %vm861_vm4, %v16454_v7, %v5729_v19  ;;  %v5758_v56 = vsel %vm861_vm4, %v5729_v19, %v5731_v22 }
 0x32f   : > { %v5227_v24 = vpop.permute.xlu0 %5226  ;;  %7782 = vrot.lane.b32.xlu1 %v16546_v26, %s14943_s8  ;;  %v5781_v60 = vsel %vm354_vm2, %v5758_v56, 0 }
 0x330   : > { %v5244_v37 = vsel %vm334_vm1, %v5225_v36, %v5227_v24  ;;  %13777 = vmatmul.mubr.msk.bf16.vlgmr.msra.gmra.mrb[24].mxu1 %vm350_vm3, %v16441_v40 }
 0x331   : > { %7784 = vrot.lane.b32.xlu0 %v16549_v27, %s14943_s8  ;;  %v5229_v18 = vpop.permute.xlu1 %5228  ;;  %14095 = vmatprep.mubr.msk.bf16.mxu1 %vm14935_vm0, %v14934_v34  ;;  %v5287_v45 = vsel %vm354_vm2, %v5244_v37, 0 }
 0x332   : > { %v5245_v42 = vsel %vm334_vm1, %v5227_v24, %v5229_v18 }
 0x333   : > { %7786 = vrot.lane.b32.xlu1 %v16561_v30, %s14943_s8  ;;  %v5231_v43 = vpop.permute.xlu0 %5230  ;;  %13778 = vmatprep.subr.msk.bf16.mxu0 %vm354_vm2, %v5245_v42 }
 0x334   : > { %v5246_v48 = vsel %vm334_vm1, %v5229_v18, %v5231_v43  ;;  %5542 = vmatpush1.bf16.msra.mxu0 %v5287_v45  ;;  %vm12152_vm1 = vcmask 793600  }
 0x335   : > { %v5293_v51 = vsel %vm354_vm2, %v5246_v48, 0  ;;  %7788 = vrot.lane.b32.xlu0 %v16565_v33, %s14943_s8  ;;  %13782 = vmatprep.subr.msk.bf16.mxu0 %vm354_vm2, %v5757_v49  ;;  %v5733_v53 = vpop.permute.xlu1 %5732 }
 0x336   : > { %14094 = vmatpush3.bf16.msra.mxu1 %v5293_v51  ;;  %v5759_v7 = vsel %vm861_vm4, %v5731_v22, %v5733_v53 }
 0x337   : > { %7790 = vrot.lane.b32.xlu1 %v16588_v54, %s14943_s8  ;;  %v16597_v62 = vpop.permute.xlu0 %5650  ;;  %13779 = vmatmul.mubr.msk.bf16.vlgmr.msra.gmra.mrb[40].mxu0 %vm350_vm3, %v16441_v40 }
 0x338   : > { %13784 = vmatprep.subr.msk.bf16.mxu1 %vm354_vm2, %v5759_v7  ;;  %5820 = vmatpush1.bf16.msra.mxu0 %v5775_v1 }
 0x339   : > { %7792 = vrot.lane.b32.xlu0 %v16591_v21, %s14943_s8  ;;  %14096 = vmatmul.mubr.msk.bf16.vlgmr.msra.gmra.mrb[28].mxu1 %vm350_vm3, %v16441_v40  ;;  %v5735_v3 = vpop.permute.xlu1 %5734  ;;  %v7755_v40 = vcombine.high %v7689_v59, %v7689_v59 }
 0x33a   : > { %5861 = vmatpush1.bf16.msra.mxu1 %v5781_v60  ;;  %5851 = vmatprep.mubr.bf16.mxu0 %v15686_v17  ;;  %v5760_v0 = vsel %vm861_vm4, %v5733_v53, %v5735_v3 }
 0x33b   : > { %7794 = vrot.lane.b32.xlu1 %v16610_v2, %s14943_s8  ;;  %v5737_v58 = vpop.permute.xlu0 %5736  ;;  %5892 = vmatprep.mubr.bf16.mxu1 %v15686_v17  ;;  %v5787_v14 = vsel %vm354_vm2, %v5760_v0, 0  ;;  %v16635_v61 = vrot.slane %v7755_v40, %v15055_v10 }
 0x33c   : > { %v5761_v63 = vsel %vm861_vm4, %v5735_v3, %v5737_v58  ;;  %v8734_v3 = vld [vmem:[#allocation3 + $0x6] sm:$0xff] }
 0x33d   : > { %7796 = vrot.lane.b32.xlu0 %v16613_v4, %s14943_s8  ;;  %13786 = vmatprep.subr.msk.bf16.mxu0 %vm354_vm2, %v5761_v63  ;;  %v5739_v29 = vpop.permute.xlu1 %5738  ;;  %v16728_v40 = vrot.slane %v8734_v3, %v15055_v10 }
 0x33e   : > { %v5762_v57 = vsel %vm861_vm4, %v5737_v58, %v5739_v29 }
 0x33f   : > { %7798 = vrot.lane.b32.xlu1 %v16626_v47, %s14943_s8  ;;  %v5741_v44 = vpop.permute.xlu0 %5740  ;;  %13783 = vmatmul.mubr.msk.bf16.vlgmr.msra.gmra.mrb[28].mxu0 %vm350_vm3, %v16597_v62  ;;  %v5793_v36 = vsel %vm354_vm2, %v5762_v57, 0 }
 0x340   : > { %5902 = vmatpush1.bf16.msra.mxu0 %v5787_v14  ;;  %v5763_v12 = vsel %vm861_vm4, %v5739_v29, %v5741_v44  ;;  %5933 = vmatprep.mubr.bf16.mxu0 %v15686_v17  ;;  %v8752_v14 = vcombine.high %v8734_v3, %v8734_v3 }
 0x341   : > { %7800 = vrot.lane.b32.xlu0 %v16635_v61, %s14943_s8  ;;  %13785 = vmatmul.mubr.msk.bf16.vlgmr.msra.gmra.mrb[16].mxu1 %vm350_vm3, %v16597_v62  ;;  %v5743_v5 = vpop.permute.xlu1 %5742 }
 0x342   : > { %13788 = vmatprep.subr.msk.bf16.mxu1 %vm354_vm2, %v5763_v12  ;;  %5974 = vmatprep.mubr.bf16.mxu1 %v15686_v17  ;;  %v5764_v20 = vsel %vm861_vm4, %v5741_v44, %v5743_v5  ;;  %v16745_v44 = vcombine.high %v16728_v40, %v16728_v40 }
 0x343   : > { %5943 = vmatpush1.bf16.msra.mxu1 %v5793_v36  ;;  %8298 = vrot.lane.b32.xlu1 %v16503_v16, %s14945_s10  ;;  %v5745_v15 = vpop.permute.xlu0 %5744  ;;  %v5799_v16 = vsel %vm354_vm2, %v5764_v20, 0  ;;  %v16757_v20 = vrot.slane %v8752_v14, %v15055_v10 }
 0x344   : > { %v5765_v22 = vsel %vm861_vm4, %v5743_v5, %v5745_v15 }
 0x345   : > { %8296 = vrot.lane.b32.xlu0 %v16487_v41, %s14945_s10  ;;  %13790 = vmatprep.subr.msk.bf16.mxu0 %vm354_vm2, %v5765_v22  ;;  %v5747_v25 = vpop.permute.xlu1 %5746 }
 0x346   : > { %v5766_v19 = vsel %vm861_vm4, %v5745_v15, %v5747_v25 }
 0x347   : > { %8302 = vrot.lane.b32.xlu1 %v16521_v11, %s14945_s10  ;;  %v5749_v24 = vpop.permute.xlu0 %5748  ;;  %13787 = vmatmul.mubr.msk.bf16.vlgmr.msra.gmra.mrb[32].mxu0 %vm350_vm3, %v16597_v62  ;;  %v16667_v11 = vcombine.high %v16635_v61, %v16635_v61  ;;  %v5805_v18 = vsel %vm354_vm2, %v5766_v19, 0 }
 0x348   : > { %5984 = vmatpush1.bf16.msra.mxu0 %v5799_v16  ;;  %v5767_v37 = vsel %vm861_vm4, %v5747_v25, %v5749_v24  ;;  %6015 = vmatprep.mubr.bf16.mxu0 %v15686_v17 }
 0x349   : > { %8300 = vrot.lane.b32.xlu0 %v16506_v9, %s14945_s10  ;;  %13789 = vmatmul.mubr.msk.bf16.vlgmr.msra.gmra.mrb[20].mxu1 %vm350_vm3, %v16597_v62  ;;  %v5751_v41 = vpop.permute.xlu1 %5750 }
 0x34a   : > { %13792 = vmatprep.subr.msk.bf16.mxu1 %vm354_vm2, %v5767_v37  ;;  %6056 = vmatprep.mubr.bf16.mxu1 %v15686_v17  ;;  %v5768_v9 = vsel %vm861_vm4, %v5749_v24, %v5751_v41  ;;  %v8735_v24 = vld [vmem:[#allocation3 + $0xe] sm:$0xff] }
 0x34b   : > { %6025 = vmatpush1.bf16.msra.mxu1 %v5805_v18  ;;  %7802 = vrot.lane.b32.xlu1 %v16667_v11, %s14943_s8  ;;  %v5753_v28 = vpop.permute.xlu0 %5752  ;;  %v5811_v46 = vsel %vm354_vm2, %v5768_v9, 0  ;;  %v16774_v18 = vcombine.high %v16757_v20, %v16757_v20 }
 0x34c   : > { %v5769_v42 = vsel %vm861_vm4, %v5751_v41, %v5753_v28  ;;  %14099 = vmatprep.subr.bf16.mxu1 %v14934_v34 }
 0x34d   : > { %8304 = vrot.lane.b32.xlu0 %v16530_v52, %s14945_s10  ;;  %13794 = vmatprep.subr.msk.bf16.mxu0 %vm354_vm2, %v5769_v42  ;;  %v6251_v43 = vpop.permute.xlu1 %6250 }
 0x34f   : > { %8222 = vrot.lane.b32.xlu1 %v16159_v32, %s14957_s9  ;;  %v6249_v45 = vpop.permute.xlu0 %6248  ;;  %13791 = vmatmul.mubr.msk.bf16.vlgmr.msra.gmra.mrb[36].mxu0 %vm350_vm3, %v16597_v62 }
 0x350   : > { %6066 = vmatpush1.bf16.msra.mxu0 %v5811_v46  ;;  %6097 = vmatprep.mubr.bf16.mxu0 %v15686_v17  ;;  %v6280_v51 = vsel %vm1386_vm5, %v6249_v45, %v6251_v43 }
 0x351   : > { %8306 = vrot.lane.b32.xlu0 %v16546_v26, %s14945_s10  ;;  %13793 = vmatmul.mubr.msk.bf16.vlgmr.msra.gmra.mrb[24].mxu1 %vm350_vm3, %v16597_v62  ;;  %v5755_v52 = vpop.permute.xlu1 %5754  ;;  %v6299_v56 = vsel %vm354_vm2, %v6280_v51, 0 }
 0x352   : > { %v5770_v48 = vsel %vm861_vm4, %v5753_v28, %v5755_v52  ;;  %14101 = vmatprep.mubr.msk.bf16.mxu1 %vm14935_vm0, %v14934_v34  ;;  %v8769_v28 = vcombine.high %v8735_v24, %v8735_v24  ;;  %vm12381_vm4 = vcmask 678912  }
 0x353   : > { %v5817_v32 = vsel %vm354_vm2, %v5770_v48, 0  ;;  %8308 = vrot.lane.b32.xlu1 %v16549_v27, %s14945_s10  ;;  %v6253_v49 = vpop.permute.xlu0 %6252 }
 0x354   : > { %14100 = vmatpush3.bf16.msra.mxu1 %v5817_v32  ;;  %v6281_v26 = vsel %vm1386_vm5, %v6251_v43, %v6253_v49  ;;  %v16781_v43 = vrot.slane %v8735_v24, %v15055_v10  ;;  %v16792_v48 = vrot.slane %v8769_v28, %v15055_v10  ;;  %v14915_v32 = vld.sshfl [vmem:[%s18723_s2] sm:$0x3 pattern:$0x76325410] }
 0x355   : > { %8310 = vrot.lane.b32.xlu0 %v16561_v30, %s14945_s10  ;;  %13798 = vmatprep.subr.msk.bf16.mxu0 %vm354_vm2, %v6281_v26  ;;  %v6255_v53 = vpop.permute.xlu1 %6254 }
 0x356   : > { %v6282_v7 = vsel %vm1386_vm5, %v6253_v49, %v6255_v53  ;;  %v16800_v51 = vcombine.high %v16781_v43, %v16781_v43 }
 0x357   : > { %8312 = vrot.lane.b32.xlu1 %v16565_v33, %s14945_s10  ;;  %v6257_v27 = vpop.permute.xlu0 %6256  ;;  %13795 = vmatmul.mubr.msk.bf16.vlgmr.msra.gmra.mrb[40].mxu0 %vm350_vm3, %v16597_v62  ;;  %v6305_v33 = vsel %vm354_vm2, %v6282_v7, 0 }
 0x358   : > { %6344 = vmatpush1.bf16.msra.mxu0 %v6299_v56  ;;  %v6283_v59 = vsel %vm1386_vm5, %v6255_v53, %v6257_v27  ;;  %6375 = vmatprep.mubr.bf16.mxu0 %v15686_v17  ;;  %v16811_v56 = vcombine.high %v16792_v48, %v16792_v48 }
 0x359   : > { %8314 = vrot.lane.b32.xlu0 %v16588_v54, %s14945_s10  ;;  %14102 = vmatmul.mubr.msk.bf16.vlgmr.msra.gmra.mrb[28].mxu1 %vm350_vm3, %v16597_v62  ;;  %v16712_v30 = vpop.permute.xlu1 %6174 }
 0x35a   : > { %13800 = vmatprep.subr.msk.bf16.mxu1 %vm354_vm2, %v6283_v59  ;;  %6416 = vmatprep.mubr.bf16.mxu1 %v15686_v17 }
 0x35b   : > { %6385 = vmatpush1.bf16.msra.mxu1 %v6305_v33  ;;  %v6259_v1 = vpop.permute.xlu0 %6258  ;;  %8316 = vrot.lane.b32.xlu1 %v16591_v21, %s14945_s10  ;;  %v16819_v33 = vrot.slane %v16334_v23, %v15055_v10 }
 0x35c   : > { %v6284_v60 = vsel %vm1386_vm5, %v6257_v27, %v6259_v1 }
 0x35d   : > { %8318 = vrot.lane.b32.xlu0 %v16610_v2, %s14945_s10  ;;  %v6261_v54 = vpop.permute.xlu1 %6260  ;;  %v6311_v0 = vsel %vm354_vm2, %v6284_v60, 0 }
 0x35e   : > { %v6285_v62 = vsel %vm1386_vm5, %v6259_v1, %v6261_v54  ;;  %v8786_v1 = vcombine.high %v16334_v23, %v16334_v23 }
 0x35f   : > { %v6263_v58 = vpop.permute.xlu0 %6262  ;;  %8320 = vrot.lane.b32.xlu1 %v16613_v4, %s14945_s10  ;;  %13799 = vmatmul.mubr.msk.bf16.vlgmr.msra.gmra.mrb[28].mxu0 %vm350_vm3, %v16712_v30 }
 0x360   : > { %v6286_v21 = vsel %vm1386_vm5, %v6261_v54, %v6263_v58  ;;  %13802 = vmatprep.subr.msk.bf16.mxu0 %vm354_vm2, %v6285_v62  ;;  %6457 = vmatprep.mubr.bf16.mxu0 %v15686_v17 }
 0x361   : > { %6426 = vmatpush1.bf16.msra.mxu0 %v6311_v0  ;;  %8322 = vrot.lane.b32.xlu0 %v16626_v47, %s14945_s10  ;;  %v6265_v2 = vpop.permute.xlu1 %6264  ;;  %v6317_v57 = vsel %vm354_vm2, %v6286_v21, 0  ;;  %v16839_v21 = vrot.slane %v8786_v1, %v15055_v10 }
 0x362   : > { %13801 = vmatmul.mubr.msk.bf16.vlgmr.msra.gmra.mrb[16].mxu1 %vm350_vm3, %v16712_v30  ;;  %v6287_v63 = vsel %vm1386_vm5, %v6263_v58, %v6265_v2  ;;  %v16836_v58 = vcombine.high %v16819_v33, %v16819_v33 }
 0x363   : > { %v6267_v29 = vpop.permute.xlu0 %6266  ;;  %8324 = vrot.lane.b32.xlu1 %v16635_v61, %s14945_s10  ;;  %13804 = vmatprep.subr.msk.bf16.mxu1 %vm354_vm2, %v6287_v63 }
 0x364   : > { %6467 = vmatpush1.bf16.msra.mxu1 %v6317_v57  ;;  %6498 = vmatprep.mubr.bf16.mxu1 %v15686_v17  ;;  %v6288_v12 = vsel %vm1386_vm5, %v6265_v2, %v6267_v29 }
 0x365   : > { %8822 = vrot.lane.b32.xlu0 %v16745_v44, %s14947_s12  ;;  %v6269_v5 = vpop.permute.xlu1 %6268  ;;  %v6323_v25 = vsel %vm354_vm2, %v6288_v12, 0 }
 0x366   : > { %v6289_v36 = vsel %vm1386_vm5, %v6267_v29, %v6269_v5 }
 0x367   : > { %v6271_v15 = vpop.permute.xlu0 %6270  ;;  %8820 = vrot.lane.b32.xlu1 %v16728_v40, %s14947_s12  ;;  %13803 = vmatmul.mubr.msk.bf16.vlgmr.msra.gmra.mrb[32].mxu0 %vm350_vm3, %v16712_v30 }
 0x368   : > { %v6290_v22 = vsel %vm1386_vm5, %v6269_v5, %v6271_v15  ;;  %13806 = vmatprep.subr.msk.bf16.mxu0 %vm354_vm2, %v6289_v36  ;;  %6539 = vmatprep.mubr.bf16.mxu0 %v15686_v17 }
 0x369   : > { %6508 = vmatpush1.bf16.msra.mxu0 %v6323_v25  ;;  %8326 = vrot.lane.b32.xlu0 %v16667_v11, %s14945_s10  ;;  %v6273_v19 = vpop.permute.xlu1 %6272  ;;  %v6329_v41 = vsel %vm354_vm2, %v6290_v22, 0 }
 0x36a   : > { %13805 = vmatmul.mubr.msk.bf16.vlgmr.msra.gmra.mrb[20].mxu1 %vm350_vm3, %v16712_v30  ;;  %v6291_v16 = vsel %vm1386_vm5, %v6271_v15, %v6273_v19 }
 0x36b   : > { %v6275_v37 = vpop.permute.xlu0 %6274  ;;  %8824 = vrot.lane.b32.xlu1 %v16757_v20, %s14947_s12  ;;  %13808 = vmatprep.subr.msk.bf16.mxu1 %vm354_vm2, %v6291_v16 }
 0x36c   : > { %6549 = vmatpush1.bf16.msra.mxu1 %v6329_v41  ;;  %6580 = vmatprep.mubr.bf16.mxu1 %v15686_v17  ;;  %v6292_v9 = vsel %vm1386_vm5, %v6273_v19, %v6275_v37 }
 0x36d   : > { %8826 = vrot.lane.b32.xlu0 %v16774_v18, %s14947_s12  ;;  %v6277_v42 = vpop.permute.xlu1 %6276  ;;  %14105 = vmatprep.subr.bf16.mxu1 %v14934_v34  ;;  %v6335_v52 = vsel %vm354_vm2, %v6292_v9, 0 }
 0x36e   : > { %v6293_v45 = vsel %vm1386_vm5, %v6275_v37, %v6277_v42 }
 0x36f   : > { %v6775_v46 = vpop.permute.xlu0 %6774  ;;  %8828 = vrot.lane.b32.xlu1 %v16781_v43, %s14947_s12  ;;  %13807 = vmatmul.mubr.msk.bf16.vlgmr.msra.gmra.mrb[36].mxu0 %vm350_vm3, %v16712_v30 }
 0x370   : > { %13810 = vmatprep.subr.msk.bf16.mxu0 %vm354_vm2, %v6293_v45  ;;  %6621 = vmatprep.mubr.bf16.mxu0 %v15686_v17 }
 0x371   : > { %6590 = vmatpush1.bf16.msra.mxu0 %v6335_v52  ;;  %8746 = vrot.lane.b32.xlu0 %v14915_v32, %s14958_s11  ;;  %v6773_v49 = vpop.permute.xlu1 %6772 }
 0x372   : > { %13809 = vmatmul.mubr.msk.bf16.vlgmr.msra.gmra.mrb[24].mxu1 %vm350_vm3, %v16712_v30  ;;  %v6804_v7 = vsel %vm1911_vm6, %v6773_v49, %v6775_v46 }
 0x373   : > { %v6279_v26 = vpop.permute.xlu0 %6278  ;;  %8830 = vrot.lane.b32.xlu1 %v16800_v51, %s14947_s12  ;;  %14107 = vmatprep.mubr.msk.bf16.mxu1 %vm14935_vm0, %v14934_v34  ;;  %v6823_v54 = vsel %vm354_vm2, %v6804_v7, 0  ;;  %v16910_v7 = vld.sshfl [vmem:[%s18723_s2] sm:$0x3 pattern:$0x76325410] }
 0x374   : > { %v6294_v53 = vsel %vm1386_vm5, %v6277_v42, %v6279_v26 }
 0x375   : > { %v6341_v27 = vsel %vm354_vm2, %v6294_v53, 0  ;;  %8832 = vrot.lane.b32.xlu0 %v16792_v48, %s14947_s12  ;;  %v6777_v59 = vpop.permute.xlu1 %6776 }
 0x376   : > { %14106 = vmatpush3.bf16.msra.mxu1 %v6341_v27  ;;  %v6805_v3 = vsel %vm1911_vm6, %v6775_v46, %v6777_v59 }
 0x377   : > { %v6779_v60 = vpop.permute.xlu0 %6778  ;;  %8834 = vrot.lane.b32.xlu1 %v16811_v56, %s14947_s12  ;;  %13811 = vmatmul.mubr.msk.bf16.vlgmr.msra.gmra.mrb[40].mxu0 %vm350_vm3, %v16712_v30 }
 0x378   : > { %v6806_v62 = vsel %vm1911_vm6, %v6777_v59, %v6779_v60  ;;  %13814 = vmatprep.subr.msk.bf16.mxu0 %vm354_vm2, %v6805_v3  ;;  %6899 = vmatprep.mubr.bf16.mxu0 %v15686_v17 }
 0x379   : > { %6868 = vmatpush1.bf16.msra.mxu0 %v6823_v54  ;;  %8836 = vrot.lane.b32.xlu0 %v16819_v33, %s14947_s12  ;;  %v6781_v23 = vpop.permute.xlu1 %6780  ;;  %v6829_v63 = vsel %vm354_vm2, %v6806_v62, 0 }
 0x37a   : > { %14108 = vmatmul.mubr.msk.bf16.vlgmr.msra.gmra.mrb[28].mxu1 %vm350_vm3, %v16712_v30  ;;  %v6807_v0 = vsel %vm1911_vm6, %v6779_v60, %v6781_v23  ;;  %v16855_v30 = vcombine.high %v16839_v21, %v16839_v21 }
 0x37b   : > { %v16844_v2 = vpop.permute.xlu0 %6698  ;;  %8838 = vrot.lane.b32.xlu1 %v16836_v58, %s14947_s12  ;;  %13816 = vmatprep.subr.msk.bf16.mxu1 %vm354_vm2, %v6807_v0 }
 0x37c   : > { %6909 = vmatpush1.bf16.msra.mxu1 %v6829_v63  ;;  %6940 = vmatprep.mubr.bf16.mxu1 %v15686_v17  ;;  %v7317_v63 = vsel %vm354_vm2, %v16792_v48, 0 }
 0x37d   : > { %8840 = vrot.lane.b32.xlu0 %v16839_v21, %s14947_s12  ;;  %v6783_v29 = vpop.permute.xlu1 %6782 }
 0x37e   : > { %v6808_v57 = vsel %vm1911_vm6, %v6781_v23, %v6783_v29  ;;  %v7305_v23 = vsel %vm354_vm2, %v16757_v20, 0 }
 0x37f   : > { %v6785_v14 = vpop.permute.xlu0 %6784  ;;  %8842 = vrot.lane.b32.xlu1 %v16855_v30, %s14947_s12  ;;  %13815 = vmatmul.mubr.msk.bf16.vlgmr.msra.gmra.mrb[28].mxu0 %vm350_vm3, %v16844_v2  ;;  %v6835_v36 = vsel %vm354_vm2, %v6808_v57, 0 }
 0x380   : > { %v6809_v12 = vsel %vm1911_vm6, %v6783_v29, %v6785_v14  ;;  %6981 = vmatprep.mubr.bf16.mxu0 %v15686_v17 }
 0x381   : > { %8844 = vrot.lane.b32.xlu0 %v16613_v4, %s14947_s12  ;;  %13818 = vmatprep.subr.msk.bf16.mxu0 %vm354_vm2, %v6809_v12  ;;  %v6787_v5 = vpop.permute.xlu1 %6786 }
 0x382   : > { %13817 = vmatmul.mubr.msk.bf16.vlgmr.msra.gmra.mrb[16].mxu1 %vm350_vm3, %v16844_v2  ;;  %v6810_v15 = vsel %vm1911_vm6, %v6785_v14, %v6787_v5  ;;  %6950 = vmatpush1.bf16.msra.mxu0 %v6835_v36 }
 0x383   : > { %v6789_v22 = vpop.permute.xlu0 %6788  ;;  %8846 = vrot.lane.b32.xlu1 %v16626_v47, %s14947_s12  ;;  %7022 = vmatprep.mubr.bf16.mxu1 %v15686_v17  ;;  %v6841_v24 = vsel %vm354_vm2, %v6810_v15, 0 }
 0x384   : > { %v6811_v25 = vsel %vm1911_vm6, %v6787_v5, %v6789_v22 }
 0x385   : > { %8848 = vrot.lane.b32.xlu0 %v16635_v61, %s14947_s12  ;;  %13820 = vmatprep.subr.msk.bf16.mxu1 %vm354_vm2, %v6811_v25  ;;  %v6791_v19 = vpop.permute.xlu1 %6790 }
 0x386   : > { %v6812_v16 = vsel %vm1911_vm6, %v6789_v22, %v6791_v19  ;;  %6991 = vmatpush1.bf16.msra.mxu1 %v6841_v24 }
 0x387   : > { %v6793_v37 = vpop.permute.xlu0 %6792  ;;  %9346 = vrot.lane.b32.xlu1 %v16745_v44, %s14949_s14  ;;  %13819 = vmatmul.mubr.msk.bf16.vlgmr.msra.gmra.mrb[32].mxu0 %vm350_vm3, %v16844_v2  ;;  %v6847_v9 = vsel %vm354_vm2, %v6812_v16, 0 }
 0x388   : > { %v6813_v41 = vsel %vm1911_vm6, %v6791_v19, %v6793_v37  ;;  %7063 = vmatprep.mubr.bf16.mxu0 %v15686_v17 }
 0x389   : > { %9344 = vrot.lane.b32.xlu0 %v16728_v40, %s14949_s14  ;;  %13822 = vmatprep.subr.msk.bf16.mxu0 %vm354_vm2, %v6813_v41  ;;  %v6795_v28 = vpop.permute.xlu1 %6794 }
 0x38a   : > { %13821 = vmatmul.mubr.msk.bf16.vlgmr.msra.gmra.mrb[20].mxu1 %vm350_vm3, %v16844_v2  ;;  %v6814_v42 = vsel %vm1911_vm6, %v6793_v37, %v6795_v28  ;;  %7032 = vmatpush1.bf16.msra.mxu0 %v6847_v9 }
 0x38b   : > { %v6797_v45 = vpop.permute.xlu0 %6796  ;;  %8850 = vrot.lane.b32.xlu1 %v16667_v11, %s14947_s12  ;;  %7104 = vmatprep.mubr.bf16.mxu1 %v15686_v17  ;;  %v6853_v32 = vsel %vm354_vm2, %v6814_v42, 0  ;;  %s14971_s12 = smov 93  }
 0x38c   : > { %v6815_v46 = vsel %vm1911_vm6, %v6795_v28, %v6797_v45 }
 0x38d   : > { %9348 = vrot.lane.b32.xlu0 %v16757_v20, %s14949_s14  ;;  %13824 = vmatprep.subr.msk.bf16.mxu1 %vm354_vm2, %v6815_v46  ;;  %v6799_v52 = vpop.permute.xlu1 %6798  ;;  %v7311_v20 = vsel %vm354_vm2, %v16781_v43, 0 }
 0x38e   : > { %v6816_v49 = vsel %vm1911_vm6, %v6797_v45, %v6799_v52  ;;  %7073 = vmatpush1.bf16.msra.mxu1 %v6853_v32  ;;  %v5107_v45 = vld [vmem:[%s18724_s3] sm:$0xf] }
 0x38f   : > { %v6801_v26 = vpop.permute.xlu0 %6800  ;;  %9350 = vrot.lane.b32.xlu1 %v16774_v18, %s14949_s14  ;;  %13823 = vmatmul.mubr.msk.bf16.vlgmr.msra.gmra.mrb[36].mxu0 %vm350_vm3, %v16844_v2  ;;  %v6859_v59 = vsel %vm354_vm2, %v6816_v49, 0  ;;  %v14960_v49 = vmov 1  }
 0x390   : > { %v6817_v53 = vsel %vm1911_vm6, %v6799_v52, %v6801_v26  ;;  %14111 = vmatprep.subr.bf16.mxu1 %v14934_v34  ;;  %7145 = vmatprep.mubr.bf16.mxu0 %v15686_v17 }
 0x391   : > { %9352 = vrot.lane.b32.xlu0 %v16781_v43, %s14949_s14  ;;  %13826 = vmatprep.subr.msk.bf16.mxu0 %vm354_vm2, %v6817_v53  ;;  %v6803_v27 = vpop.permute.xlu1 %6802 }
 0x392   : > { %13825 = vmatmul.mubr.msk.bf16.vlgmr.msra.gmra.mrb[24].mxu1 %vm350_vm3, %v16844_v2  ;;  %v6818_v1 = vsel %vm1911_vm6, %v6801_v26, %v6803_v27  ;;  %7114 = vmatpush1.bf16.msra.mxu0 %v6859_v59 }
 0x393   : > { %v6865_v3 = vsel %vm354_vm2, %v6818_v1, 0  ;;  %v16922_v60 = vpop.permute.xlu0 %7222  ;;  %9270 = vrot.lane.b32.xlu1 %v16910_v7, %s14959_s17  ;;  %13830 = vmatprep.subr.msk.bf16.mxu0 %vm354_vm2, %v16745_v44  ;;  %v7299_v44 = vsel %vm354_vm2, %v16728_v40, 0  ;;  %s14973_s17 = smov 91  }
 0x394   : > { %14112 = vmatpush3.bf16.msra.mxu1 %v6865_v3  ;;  %14113 = vmatprep.mubr.msk.bf16.mxu1 %vm14935_vm0, %v14934_v34 }
 0x395   : > { %9354 = vrot.lane.b32.xlu0 %v16800_v51, %s14949_s14  ;;  %13832 = vmatprep.subr.msk.bf16.mxu1 %vm354_vm2, %v16774_v18  ;;  %v16933_v54 = vpop.permute.xlu1 %7772 }
 0x396   : > { %14882 = vset.pattern.permute.xlu1 %v14960_v49 }
 0x397   : > { %v16935_v62 = vpop.permute.xlu0 %7774  ;;  %9356 = vrot.lane.b32.xlu1 %v16792_v48, %s14949_s14  ;;  %13827 = vmatmul.mubr.msk.bf16.vlgmr.msra.gmra.mrb[40].mxu0 %vm350_vm3, %v16844_v2 }
 0x398   : > { %7344 = vmatpush1.bf16.msra.mxu0 %v7299_v44  ;;  %7375 = vmatprep.mubr.bf16.mxu0 %v15686_v17  ;;  %v7804_v19 = vsel %vm2912_vm7, %v16933_v54, %v16935_v62 }
 0x399   : > { %13834 = vmatprep.subr.msk.bf16.mxu0 %vm354_vm2, %v16800_v51  ;;  %9358 = vrot.lane.b32.xlu0 %v16811_v56, %s14949_s14  ;;  %v16948_v18 = vpop.permute.xlu1 %7776  ;;  %v7823_v41 = vsel %vm354_vm2, %v7804_v19, 0 }
 0x39a   : > { %14114 = vmatmul.mubr.msk.bf16.vlgmr.msra.gmra.mrb[28].mxu1 %vm350_vm3, %v16844_v2 }
 0x39b   : > { %7385 = vmatpush1.bf16.msra.mxu1 %v7305_v23  ;;  %v16954_v0 = vpop.permute.xlu0 %7778  ;;  %9360 = vrot.lane.b32.xlu1 %v16819_v33, %s14949_s14 }
 0x39c   : > { %13836 = vmatprep.subr.msk.bf16.mxu1 %vm354_vm2, %v16811_v56  ;;  %7416 = vmatprep.mubr.bf16.mxu1 %v15686_v17  ;;  %v7213_v56 = vld [vmem:[#allocation3 + $0x1e] sm:$0x3f]  ;;  %v7806_v16 = vsel %vm2912_vm7, %v16948_v18, %v16954_v0 }
 0x39d   : > { %9362 = vrot.lane.b32.xlu0 %v16836_v58, %s14949_s14  ;;  %v16963_v40 = vpop.permute.xlu1 %7780  ;;  %v7286_v29 = vrot.slane %v7213_v56, %v15055_v10  ;;  %v7829_v42 = vsel %vm354_vm2, %v7806_v16, 0 }
 0x39e   : > { %v7807_v22 = vsel %vm2912_vm7, %v16954_v0, %v16963_v40 }
 0x39f   : > { %v16965_v51 = vpop.permute.xlu0 %7698  ;;  %9364 = vrot.lane.b32.xlu1 %v16839_v21, %s14949_s14  ;;  %13831 = vmatmul.mubr.msk.bf16.vlgmr.msra.gmra.mrb[28].mxu0 %vm350_vm3, %v16922_v60  ;;  %v7294_v48 = vcombine.high %v7286_v29, %v7286_v29  ;;  %v7335_v5 = vsel %vm354_vm2, %v7286_v29, 0 }
 0x3a0   : > { %7426 = vmatpush1.bf16.msra.mxu0 %v7311_v20  ;;  %7457 = vmatprep.mubr.bf16.mxu0 %v15686_v17 }
 0x3a1   : > { %13838 = vmatprep.subr.msk.bf16.mxu0 %vm354_vm2, %v16836_v58  ;;  %9366 = vrot.lane.b32.xlu0 %v16855_v30, %s14949_s14  ;;  %v16978_v2 = vpop.permute.xlu1 %7782 }
 0x3a2   : > { %13833 = vmatmul.mubr.msk.bf16.vlgmr.msra.gmra.mrb[16].mxu1 %vm350_vm3, %v16922_v60  ;;  %v7808_v32 = vsel %vm2912_vm7, %v16963_v40, %v16978_v2 }
 0x3a3   : > { %7467 = vmatpush1.bf16.msra.mxu1 %v7317_v63  ;;  %v16984_v43 = vpop.permute.xlu0 %7784  ;;  %9368 = vrot.lane.b32.xlu1 %v16613_v4, %s14949_s14  ;;  %v7323_v4 = vsel %vm354_vm2, %v16819_v33, 0  ;;  %v7835_v59 = vsel %vm354_vm2, %v7808_v32, 0 }
 0x3a4   : > { %13840 = vmatprep.subr.msk.bf16.mxu1 %vm354_vm2, %v16855_v30  ;;  %7498 = vmatprep.mubr.bf16.mxu1 %v15686_v17  ;;  %v7279_v30 = vcombine.high %v7213_v56, %v7213_v56  ;;  %v7809_v28 = vsel %vm2912_vm7, %v16978_v2, %v16984_v43 }
 0x3a5   : > { %9370 = vrot.lane.b32.xlu0 %v16626_v47, %s14949_s14  ;;  %v7787_v58 = vpop.permute.xlu1 %7786 }
 0x3a6   : > { %v7810_v53 = vsel %vm2912_vm7, %v16984_v43, %v7787_v58 }
 0x3a7   : > { %v16994_v57 = vpop.permute.xlu0 %7788  ;;  %9372 = vrot.lane.b32.xlu1 %v16635_v61, %s14949_s14  ;;  %13835 = vmatmul.mubr.msk.bf16.vlgmr.msra.gmra.mrb[32].mxu0 %vm350_vm3, %v16922_v60  ;;  %v7329_v61 = vsel %vm354_vm2, %v16839_v21, 0  ;;  %v7805_v21 = vsel %vm2912_vm7, %v16935_v62, %v16948_v18 }
 0x3a8   : > { %7508 = vmatpush1.bf16.msra.mxu0 %v7323_v4  ;;  %7539 = vmatprep.mubr.bf16.mxu0 %v15686_v17  ;;  %v7811_v46 = vsel %vm2912_vm7, %v7787_v58, %v16994_v57 }
 0x3a9   : > { %13842 = vmatprep.subr.msk.bf16.mxu0 %vm354_vm2, %v7294_v48  ;;  %9374 = vrot.lane.b32.xlu0 %v16667_v11, %s14949_s14  ;;  %v17006_v47 = vpop.permute.xlu1 %7790  ;;  %v7293_v11 = vrot.slane %v7279_v30, %v15055_v10 }
 0x3aa   : > { %13837 = vmatmul.mubr.msk.bf16.vlgmr.msra.gmra.mrb[20].mxu1 %vm350_vm3, %v16922_v60  ;;  %v7812_v44 = vsel %vm2912_vm7, %v16994_v57, %v17006_v47 }
 0x3ab   : > { %7549 = vmatpush1.bf16.msra.mxu1 %v7329_v61  ;;  %v17012_v33 = vpop.permute.xlu0 %7792  ;;  %7580 = vmatprep.mubr.bf16.mxu1 %v15686_v17  ;;  %v7341_v15 = vsel %vm354_vm2, %v7293_v11, 0  ;;  %v7847_v0 = vsel %vm354_vm2, %v7812_v44, 0 }
 0x3ac   : > { %14117 = vmatprep.subr.bf16.mxu1 %v14934_v34  ;;  %5110 = vperm.xlu1 %14882, %v5107_v45   ;;  %v7813_v1 = vsel %vm2912_vm7, %v17006_v47, %v17012_v33 }
 0x3ad   : > { %v17016_v14 = vpop.permute.xlu1 %7794  ;;  %9998 = vrot.lane.b32.xlu0 %v16910_v7, %s14961_s20  ;;  %s14976_s20 = smov 103  }
 0x3ae   : > { %v7814_v23 = vsel %vm2912_vm7, %v17012_v33, %v17016_v14 }
 0x3af   : > { %v17019_v12 = vpop.permute.xlu0 %7796  ;;  %13839 = vmatmul.mubr.msk.bf16.vlgmr.msra.gmra.mrb[36].mxu0 %vm350_vm3, %v16922_v60  ;;  %v7853_v56 = vsel %vm354_vm2, %v7814_v23, 0 }
 0x3b0   : > { %7590 = vmatpush1.bf16.msra.mxu0 %v7335_v5  ;;  %7621 = vmatprep.mubr.bf16.mxu0 %v15686_v17  ;;  %v7815_v54 = vsel %vm2912_vm7, %v17016_v14, %v17019_v12 }
 0x3b1   : > { %13846 = vmatprep.subr.msk.bf16.mxu0 %vm354_vm2, %v7805_v21  ;;  %v17029_v36 = vpop.permute.xlu1 %7798  ;;  %10299 = vrot.lane.b32.xlu1 %v16910_v7, %s14962_s21  ;;  %s14977_s21 = smov 87  }
 0x3b2   : > { %13841 = vmatmul.mubr.msk.bf16.vlgmr.msra.gmra.mrb[24].mxu1 %vm350_vm3, %v16922_v60  ;;  %10600 = vrot.lane.b32.xlu0 %v16910_v7, %s14963_s24  ;;  %v7816_v63 = vsel %vm2912_vm7, %v17019_v12, %v17029_v36  ;;  %s14978_s24 = smov 101  }
 0x3b3   : > { %14118 = vmatpush3.bf16.msra.mxu1 %v7341_v15  ;;  %v17037_v25 = vpop.permute.xlu0 %7800  ;;  %14119 = vmatprep.mubr.msk.bf16.mxu1 %vm14935_vm0, %v14934_v34  ;;  %v7859_v57 = vsel %vm354_vm2, %v7816_v63, 0 }
 0x3b4   : > { %13848 = vmatprep.subr.msk.bf16.mxu1 %vm354_vm2, %v7807_v22  ;;  %v7817_v40 = vsel %vm2912_vm7, %v17029_v36, %v17037_v25 }
 0x3b5   : > { %v17045_v24 = vpop.permute.xlu1 %8298 }
 0x3b7   : > { %v17050_v37 = vpop.permute.xlu0 %8296  ;;  %13843 = vmatmul.mubr.msk.bf16.vlgmr.msra.gmra.mrb[40].mxu0 %vm350_vm3, %v16922_v60 }
 0x3b8   : > { %7868 = vmatpush1.bf16.msra.mxu0 %v7823_v41  ;;  %7899 = vmatprep.mubr.bf16.mxu0 %v15686_v17  ;;  %v8328_v33 = vsel %vm3437_vm8, %v17050_v37, %v17045_v24 }
 0x3b9   : > { %13850 = vmatprep.subr.msk.bf16.mxu0 %vm354_vm2, %v7809_v28  ;;  %v17060_v9 = vpop.permute.xlu1 %8302  ;;  %v8347_v11 = vsel %vm354_vm2, %v8328_v33, 0 }
 0x3ba   : > { %14120 = vmatmul.mubr.msk.bf16.vlgmr.msra.gmra.mrb[28].mxu1 %vm350_vm3, %v16922_v60  ;;  %v7841_v60 = vsel %vm354_vm2, %v7810_v53, 0 }
 0x3bb   : > { %7909 = vmatpush1.bf16.msra.mxu1 %v7829_v42  ;;  %v17070_v52 = vpop.permute.xlu0 %8300  ;;  %7940 = vmatprep.mubr.bf16.mxu1 %v15686_v17 }
 0x3bc   : > { %13852 = vmatprep.subr.msk.bf16.mxu1 %vm354_vm2, %v7811_v46  ;;  %v8329_v4 = vsel %vm3437_vm8, %v17045_v24, %v17070_v52  ;;  %v8330_v12 = vsel %vm3437_vm8, %v17070_v52, %v17060_v9 }
 0x3bd   : > { %v7803_v26 = vpop.permute.xlu1 %7802  ;;  %v8353_v15 = vsel %vm354_vm2, %v8330_v12, 0 }
 0x3be   : > { %v7818_v29 = vsel %vm2912_vm7, %v17037_v25, %v7803_v26 }
 0x3bf   : > { %v17080_v27 = vpop.permute.xlu0 %8304  ;;  %13847 = vmatmul.mubr.msk.bf16.vlgmr.msra.gmra.mrb[28].mxu0 %vm350_vm3, %v16965_v51  ;;  %v7865_v47 = vsel %vm354_vm2, %v7818_v29, 0 }
 0x3c0   : > { %7950 = vmatpush1.bf16.msra.mxu0 %v7835_v59  ;;  %7981 = vmatprep.mubr.bf16.mxu0 %v15686_v17  ;;  %v8331_v61 = vsel %vm3437_vm8, %v17060_v9, %v17080_v27 }
 0x3c1   : > { %13854 = vmatprep.subr.msk.bf16.mxu0 %vm354_vm2, %v7813_v1  ;;  %v17090_v3 = vpop.permute.xlu1 %8222 }
 0x3c2   : > { %13849 = vmatmul.mubr.msk.bf16.vlgmr.msra.gmra.mrb[16].mxu1 %vm350_vm3, %v16965_v51 }
 0x3c3   : > { %7991 = vmatpush1.bf16.msra.mxu1 %v7841_v60  ;;  %v8307_v62 = vpop.permute.xlu0 %8306  ;;  %8022 = vmatprep.mubr.bf16.mxu1 %v15686_v17 }
 0x3c4   : > { %13856 = vmatprep.subr.msk.bf16.mxu1 %vm354_vm2, %v7815_v54  ;;  %v8332_v19 = vsel %vm3437_vm8, %v17080_v27, %v8307_v62 }
 0x3c5   : > { %v8309_v18 = vpop.permute.xlu1 %8308 }
 0x3c6   : > { %v8333_v21 = vsel %vm3437_vm8, %v8307_v62, %v8309_v18 }
 0x3c7   : > { %v8311_v7 = vpop.permute.xlu0 %8310  ;;  %13851 = vmatmul.mubr.msk.bf16.vlgmr.msra.gmra.mrb[32].mxu0 %vm350_vm3, %v16965_v51 }
 0x3c8   : > { %8032 = vmatpush1.bf16.msra.mxu0 %v7847_v0  ;;  %8063 = vmatprep.mubr.bf16.mxu0 %v15686_v17  ;;  %v8334_v16 = vsel %vm3437_vm8, %v8309_v18, %v8311_v7 }
 0x3c9   : > { %13858 = vmatprep.subr.msk.bf16.mxu0 %vm354_vm2, %v7817_v40  ;;  %v8313_v20 = vpop.permute.xlu1 %8312  ;;  %v8365_v9 = vsel %vm354_vm2, %v8334_v16, 0 }
 0x3ca   : > { %13853 = vmatmul.mubr.msk.bf16.vlgmr.msra.gmra.mrb[20].mxu1 %vm350_vm3, %v16965_v51  ;;  %v8335_v22 = vsel %vm3437_vm8, %v8311_v7, %v8313_v20 }
 0x3cb   : > { %8073 = vmatpush1.bf16.msra.mxu1 %v7853_v56  ;;  %v8315_v2 = vpop.permute.xlu0 %8314  ;;  %8104 = vmatprep.mubr.bf16.mxu1 %v15686_v17 }
 0x3cc   : > { %14123 = vmatprep.subr.bf16.mxu1 %v14934_v34  ;;  %v8336_v46 = vsel %vm3437_vm8, %v8313_v20, %v8315_v2 }
 0x3cd   : > { %v8317_v43 = vpop.permute.xlu1 %8316  ;;  %v8371_v26 = vsel %vm354_vm2, %v8336_v46, 0 }
 0x3ce   : > { %v8337_v41 = vsel %vm3437_vm8, %v8315_v2, %v8317_v43 }
 0x3cf   : > { %v8319_v58 = vpop.permute.xlu0 %8318  ;;  %13855 = vmatmul.mubr.msk.bf16.vlgmr.msra.gmra.mrb[36].mxu0 %vm350_vm3, %v16965_v51 }
 0x3d0   : > { %8114 = vmatpush1.bf16.msra.mxu0 %v7859_v57  ;;  %8145 = vmatprep.mubr.bf16.mxu0 %v15686_v17  ;;  %v8338_v32 = vsel %vm3437_vm8, %v8317_v43, %v8319_v58 }
 0x3d1   : > { %13862 = vmatprep.subr.msk.bf16.mxu0 %vm354_vm2, %v8329_v4  ;;  %v8321_v48 = vpop.permute.xlu1 %8320  ;;  %v8377_v59 = vsel %vm354_vm2, %v8338_v32, 0 }
 0x3d2   : > { %13857 = vmatmul.mubr.msk.bf16.vlgmr.msra.gmra.mrb[24].mxu1 %vm350_vm3, %v16965_v51  ;;  %v8339_v42 = vsel %vm3437_vm8, %v8319_v58, %v8321_v48 }
 0x3d3   : > { %14124 = vmatpush3.bf16.msra.mxu1 %v7865_v47  ;;  %v8323_v30 = vpop.permute.xlu0 %8322  ;;  %14125 = vmatprep.mubr.msk.bf16.mxu1 %vm14935_vm0, %v14934_v34 }
 0x3d4   : > { %13864 = vmatprep.subr.msk.bf16.mxu1 %vm354_vm2, %v8331_v61  ;;  %v8340_v60 = vsel %vm3437_vm8, %v8321_v48, %v8323_v30 }
 0x3d5   : > { %v8325_v14 = vpop.permute.xlu1 %8324  ;;  %v8383_v18 = vsel %vm354_vm2, %v8340_v60, 0 }
 0x3d6   : > { %v8341_v53 = vsel %vm3437_vm8, %v8323_v30, %v8325_v14 }
 0x3d7   : > { %v17150_v5 = vpop.permute.xlu0 %8822  ;;  %13859 = vmatmul.mubr.msk.bf16.vlgmr.msra.gmra.mrb[40].mxu0 %vm350_vm3, %v16965_v51 }
 0x3d8   : > { %8392 = vmatpush1.bf16.msra.mxu0 %v8347_v11  ;;  %8423 = vmatprep.mubr.bf16.mxu0 %v15686_v17 }
 0x3d9   : > { %13866 = vmatprep.subr.msk.bf16.mxu0 %vm354_vm2, %v8333_v21  ;;  %v8821_v36 = vpop.permute.xlu1 %8820 }
 0x3da   : > { %14126 = vmatmul.mubr.msk.bf16.vlgmr.msra.gmra.mrb[28].mxu1 %vm350_vm3, %v16965_v51  ;;  %v8359_v51 = vsel %vm354_vm2, %v8332_v19, 0  ;;  %v8852_v56 = vsel %vm3962_vm9, %v8821_v36, %v17150_v5 }
 0x3db   : > { %8433 = vmatpush1.bf16.msra.mxu1 %v8353_v15  ;;  %v8327_v25 = vpop.permute.xlu0 %8326  ;;  %8464 = vmatprep.mubr.bf16.mxu1 %v15686_v17  ;;  %v8871_v63 = vsel %vm354_vm2, %v8852_v56, 0 }
 0x3dc   : > { %13868 = vmatprep.subr.msk.bf16.mxu1 %vm354_vm2, %v8335_v22  ;;  %v8342_v62 = vsel %vm3437_vm8, %v8325_v14, %v8327_v25 }
 0x3dd   : > { %v8825_v24 = vpop.permute.xlu1 %8824  ;;  %v8389_v0 = vsel %vm354_vm2, %v8342_v62, 0 }
 0x3de   : > { %v8853_v23 = vsel %vm3962_vm9, %v17150_v5, %v8825_v24 }
 0x3df   : > { %v8827_v37 = vpop.permute.xlu0 %8826  ;;  %13863 = vmatmul.mubr.msk.bf16.vlgmr.msra.gmra.mrb[28].mxu0 %vm350_vm3, %v17090_v3 }
 0x3e0   : > { %8474 = vmatpush1.bf16.msra.mxu0 %v8359_v51  ;;  %8505 = vmatprep.mubr.bf16.mxu0 %v15686_v17  ;;  %v8854_v43 = vsel %vm3962_vm9, %v8825_v24, %v8827_v37 }
 0x3e1   : > { %13870 = vmatprep.subr.msk.bf16.mxu0 %vm354_vm2, %v8337_v41  ;;  %v8829_v28 = vpop.permute.xlu1 %8828  ;;  %v8877_v4 = vsel %vm354_vm2, %v8854_v43, 0 }
 0x3e2   : > { %13865 = vmatmul.mubr.msk.bf16.vlgmr.msra.gmra.mrb[16].mxu1 %vm350_vm3, %v17090_v3  ;;  %v8855_v40 = vsel %vm3962_vm9, %v8827_v37, %v8829_v28 }
 0x3e3   : > { %8515 = vmatpush1.bf16.msra.mxu1 %v8365_v9  ;;  %v17176_v45 = vpop.permute.xlu0 %8746  ;;  %8546 = vmatprep.mubr.bf16.mxu1 %v15686_v17 }
 0x3e4   : > { %13872 = vmatprep.subr.msk.bf16.mxu1 %vm354_vm2, %v8339_v42 }
 0x3e5   : > { %v8831_v52 = vpop.permute.xlu1 %8830 }
 0x3e6   : > { %v8856_v47 = vsel %vm3962_vm9, %v8829_v28, %v8831_v52 }
 0x3e7   : > { %v8833_v49 = vpop.permute.xlu0 %8832  ;;  %13867 = vmatmul.mubr.msk.bf16.vlgmr.msra.gmra.mrb[32].mxu0 %vm350_vm3, %v17090_v3 }
 0x3e8   : > { %8556 = vmatpush1.bf16.msra.mxu0 %v8371_v26  ;;  %8587 = vmatprep.mubr.bf16.mxu0 %v15686_v17  ;;  %v8857_v58 = vsel %vm3962_vm9, %v8831_v52, %v8833_v49 }
 0x3e9   : > { %13874 = vmatprep.subr.msk.bf16.mxu0 %vm354_vm2, %v8341_v53  ;;  %v8835_v27 = vpop.permute.xlu1 %8834 }
 0x3ea   : > { %13869 = vmatmul.mubr.msk.bf16.vlgmr.msra.gmra.mrb[20].mxu1 %vm350_vm3, %v17090_v3  ;;  %v8858_v33 = vsel %vm3962_vm9, %v8833_v49, %v8835_v27 }
 0x3eb   : > { %8597 = vmatpush1.bf16.msra.mxu1 %v8377_v59  ;;  %v8837_v1 = vpop.permute.xlu0 %8836  ;;  %8628 = vmatprep.mubr.bf16.mxu1 %v15686_v17  ;;  %v8889_v5 = vsel %vm354_vm2, %v8858_v33, 0  ;;  %v9980_v33 = vld [vmem:[%s18724_s3] sm:$0xf] }
 0x3ec   : > { %14129 = vmatprep.subr.bf16.mxu1 %v14934_v34  ;;  %v8859_v48 = vsel %vm3962_vm9, %v8835_v27, %v8837_v1 }
 0x3ed   : > { %v8839_v54 = vpop.permute.xlu1 %8838 }
 0x3ee   : > { %v8860_v36 = vsel %vm3962_vm9, %v8837_v1, %v8839_v54 }
 0x3ef   : > { %v8841_v44 = vpop.permute.xlu0 %8840  ;;  %13871 = vmatmul.mubr.msk.bf16.vlgmr.msra.gmra.mrb[36].mxu0 %vm350_vm3, %v17090_v3  ;;  %v8895_v25 = vsel %vm354_vm2, %v8860_v36, 0 }
 0x3f0   : > { %8638 = vmatpush1.bf16.msra.mxu0 %v8383_v18  ;;  %8669 = vmatprep.mubr.bf16.mxu0 %v15686_v17  ;;  %v8861_v14 = vsel %vm3962_vm9, %v8839_v54, %v8841_v44 }
 0x3f1   : > { %13878 = vmatprep.subr.msk.bf16.mxu0 %vm354_vm2, %v8853_v23  ;;  %v8843_v7 = vpop.permute.xlu1 %8842 }
 0x3f2   : > { %13873 = vmatmul.mubr.msk.bf16.vlgmr.msra.gmra.mrb[24].mxu1 %vm350_vm3, %v17090_v3  ;;  %v8862_v15 = vsel %vm3962_vm9, %v8841_v44, %v8843_v7 }
 0x3f3   : > { %14130 = vmatpush3.bf16.msra.mxu1 %v8389_v0  ;;  %v8845_v20 = vpop.permute.xlu0 %8844  ;;  %14131 = vmatprep.mubr.msk.bf16.mxu1 %vm14935_vm0, %v14934_v34  ;;  %v8901_v16 = vsel %vm354_vm2, %v8862_v15, 0 }
 0x3f4   : > { %13880 = vmatprep.subr.msk.bf16.mxu1 %vm354_vm2, %v8855_v40  ;;  %v8863_v21 = vsel %vm3962_vm9, %v8843_v7, %v8845_v20 }
 0x3f5   : > { %v8847_v2 = vpop.permute.xlu1 %8846 }
 0x3f6   : > { %v8864_v37 = vsel %vm3962_vm9, %v8845_v20, %v8847_v2 }
 0x3f7   : > { %v8849_v29 = vpop.permute.xlu0 %8848  ;;  %13875 = vmatmul.mubr.msk.bf16.vlgmr.msra.gmra.mrb[40].mxu0 %vm350_vm3, %v17090_v3  ;;  %v8907_v9 = vsel %vm354_vm2, %v8864_v37, 0 }
 0x3f8   : > { %8916 = vmatpush1.bf16.msra.mxu0 %v8871_v63  ;;  %8947 = vmatprep.mubr.bf16.mxu0 %v15686_v17  ;;  %v8865_v24 = vsel %vm3962_vm9, %v8847_v2, %v8849_v29 }
 0x3f9   : > { %13882 = vmatprep.subr.msk.bf16.mxu0 %vm354_vm2, %v8857_v58  ;;  %v9347_v57 = vpop.permute.xlu1 %9346 }
 0x3fa   : > { %14132 = vmatmul.mubr.msk.bf16.vlgmr.msra.gmra.mrb[28].mxu1 %vm350_vm3, %v17090_v3  ;;  %v8883_v3 = vsel %vm354_vm2, %v8856_v47, 0 }
 0x3fb   : > { %8957 = vmatpush1.bf16.msra.mxu1 %v8877_v4  ;;  %8988 = vmatprep.mubr.bf16.mxu1 %v15686_v17  ;;  %v9345_v61 = vpop.permute.xlu0 %9344 }
 0x3fc   : > { %13884 = vmatprep.subr.msk.bf16.mxu1 %vm354_vm2, %v8859_v48  ;;  %v9376_v49 = vsel %vm4487_vm10, %v9345_v61, %v9347_v57 }
 0x3fd   : > { %v8851_v30 = vpop.permute.xlu1 %8850  ;;  %v9395_v53 = vsel %vm354_vm2, %v9376_v49, 0 }
 0x3fe   : > { %v8866_v28 = vsel %vm3962_vm9, %v8849_v29, %v8851_v30 }
 0x3ff   : > { %13879 = vmatmul.mubr.msk.bf16.vlgmr.msra.gmra.mrb[28].mxu0 %vm350_vm3, %v17176_v45  ;;  %v9349_v12 = vpop.permute.xlu0 %9348  ;;  %v8913_v46 = vsel %vm354_vm2, %v8866_v28, 0 }
 0x400   : > { %8998 = vmatpush1.bf16.msra.mxu0 %v8883_v3  ;;  %9029 = vmatprep.mubr.bf16.mxu0 %v15686_v17  ;;  %v9377_v42 = vsel %vm4487_vm10, %v9347_v57, %v9349_v12  ;;  %v14964_v3 = vmov 2  }
 0x401   : > { %13886 = vmatprep.subr.msk.bf16.mxu0 %vm354_vm2, %v8861_v14  ;;  %v9351_v11 = vpop.permute.xlu1 %9350  ;;  %14883 = vset.pattern.permute.xlu1 %v14964_v3  ;;  %v13955_v14 = vld.sshfl [vmem:[%s18723_s2] sm:$0x3 pattern:$0x76325410] }
 0x402   : > { %13881 = vmatmul.mubr.msk.bf16.vlgmr.msra.gmra.mrb[16].mxu1 %vm350_vm3, %v17176_v45  ;;  %v9378_v27 = vsel %vm4487_vm10, %v9349_v12, %v9351_v11  ;;  %9983 = vperm.xlu1 %14883, %v9980_v33  }
 0x403   : > { %9039 = vmatpush1.bf16.msra.mxu1 %v8889_v5  ;;  %9070 = vmatprep.mubr.bf16.mxu1 %v15686_v17  ;;  %v9353_v19 = vpop.permute.xlu0 %9352  ;;  %v9401_v54 = vsel %vm354_vm2, %v9378_v27, 0 }
 0x404   : > { %13888 = vmatprep.subr.msk.bf16.mxu1 %vm354_vm2, %v8863_v21  ;;  %v9379_v32 = vsel %vm4487_vm10, %v9351_v11, %v9353_v19  ;;  %11040 = vrot.lane.b32.xlu0 %v13955_v14, %s14965_s5  ;;  %v9781_v11 = vld [vmem:[%s18722_s1] sm:$0xff]  ;;  %s13990_s5 = sshll.u32 %s18735_s16, 5  ;;  %s14983_s16 = smov 81  }
 0x405   : > { %v17240_v22 = vpop.permute.xlu1 %9270  ;;  %v17338_v5 = vrot.slane %v9781_v11, %v16197_v6  ;;  %v17341_v36 = vrot.slane %v9781_v11, %v16200_v13  ;;  %v17358_v27 = vrot.slane %v9781_v11, %v16222_v38  ;;  %s18007_s22 = scalar_lea.vmem %s18725_s4, %s13990_s5 }
 0x406   : > { %11341 = vrot.lane.b32.xlu1 %v13955_v14, %s14966_s6 }
 0x407   : > { %13883 = vmatmul.mubr.msk.bf16.vlgmr.msra.gmra.mrb[32].mxu0 %vm350_vm3, %v17176_v45  ;;  %v9355_v41 = vpop.permute.xlu0 %9354 }
 0x408   : > { %9080 = vmatpush1.bf16.msra.mxu0 %v8895_v25  ;;  %9111 = vmatprep.mubr.bf16.mxu0 %v15686_v17  ;;  %v9380_v44 = vsel %vm4487_vm10, %v9353_v19, %v9355_v41 }
 0x409   : > { %13890 = vmatprep.subr.msk.bf16.mxu0 %vm354_vm2, %v8865_v24  ;;  %v9357_v51 = vpop.permute.xlu1 %9356  ;;  %v9407_v7 = vsel %vm354_vm2, %v9380_v44, 0  ;;  %v17346_v24 = vrot.slane %v9781_v11, %v16165_v35 }
 0x40a   : > { %13885 = vmatmul.mubr.msk.bf16.vlgmr.msra.gmra.mrb[20].mxu1 %vm350_vm3, %v17176_v45  ;;  %v9381_v59 = vsel %vm4487_vm10, %v9355_v41, %v9357_v51  ;;  %11642 = vrot.lane.b32.xlu1 %v13955_v14, %s14967_s7  ;;  %v17350_v41 = vrot.slane %v9781_v11, %v16173_v31 }
 0x40b   : > { %9121 = vmatpush1.bf16.msra.mxu1 %v8901_v16  ;;  %9152 = vmatprep.mubr.bf16.mxu1 %v15686_v17  ;;  %v9359_v26 = vpop.permute.xlu0 %9358 }
 0x40c   : > { %14135 = vmatprep.subr.bf16.mxu1 %v14934_v34  ;;  %v9382_v18 = vsel %vm4487_vm10, %v9357_v51, %v9359_v26 }
 0x40d   : > { %v9361_v52 = vpop.permute.xlu1 %9360  ;;  %v9413_v40 = vsel %vm354_vm2, %v9382_v18, 0 }
 0x40e   : > { %v9383_v62 = vsel %vm4487_vm10, %v9359_v26, %v9361_v52 }
 0x40f   : > { %13887 = vmatmul.mubr.msk.bf16.vlgmr.msra.gmra.mrb[36].mxu0 %vm350_vm3, %v17176_v45  ;;  %v9363_v60 = vpop.permute.xlu0 %9362 }
 0x410   : > { %9162 = vmatpush1.bf16.msra.mxu0 %v8907_v9  ;;  %9193 = vmatprep.mubr.bf16.mxu0 %v15686_v17  ;;  %v9384_v56 = vsel %vm4487_vm10, %v9361_v52, %v9363_v60 }
 0x411   : > { %13894 = vmatprep.subr.msk.bf16.mxu0 %vm354_vm2, %v9377_v42  ;;  %v9365_v1 = vpop.permute.xlu1 %9364  ;;  %v9419_v29 = vsel %vm354_vm2, %v9384_v56, 0  ;;  %v17373_v56 = vrot.slane %v9781_v11, %v4942_v39 }
 0x412   : > { %13889 = vmatmul.mubr.msk.bf16.vlgmr.msra.gmra.mrb[24].mxu1 %vm350_vm3, %v17176_v45  ;;  %v9385_v0 = vsel %vm4487_vm10, %v9363_v60, %v9365_v1 }
 0x413   : > { %14136 = vmatpush3.bf16.msra.mxu1 %v8913_v46  ;;  %14137 = vmatprep.mubr.msk.bf16.mxu1 %vm14935_vm0, %v14934_v34 }
 0x414   : > { %13896 = vmatprep.subr.msk.bf16.mxu1 %vm354_vm2, %v9379_v32 }
 0x415   : > { %v9369_v23 = vpop.permute.xlu1 %9368 }
 0x417   : > { %13891 = vmatmul.mubr.msk.bf16.vlgmr.msra.gmra.mrb[40].mxu0 %vm350_vm3, %v17176_v45 }
 0x418   : > { %9440 = vmatpush1.bf16.msra.mxu0 %v9395_v53  ;;  %9471 = vmatprep.mubr.bf16.mxu0 %v15686_v17 }
 0x419   : > { %13898 = vmatprep.subr.msk.bf16.mxu0 %vm354_vm2, %v9381_v59  ;;  %v9373_v2 = vpop.permute.xlu1 %9372 }
 0x41a   : > { %14138 = vmatmul.mubr.msk.bf16.vlgmr.msra.gmra.mrb[28].mxu1 %vm350_vm3, %v17176_v45  ;;  %v9367_v45 = vpop.permute.xlu0 %9366 }
 0x41b   : > { %9481 = vmatpush1.bf16.msra.mxu1 %v9401_v54  ;;  %9512 = vmatprep.mubr.bf16.mxu1 %v15686_v17  ;;  %v9387_v20 = vsel %vm4487_vm10, %v9367_v45, %v9369_v23  ;;  %v9386_v43 = vsel %vm4487_vm10, %v9365_v1, %v9367_v45  ;;  %v17361_v1 = vrot.slane %v9781_v11, %v16225_v50 }
 0x41c   : > { %13900 = vmatprep.subr.msk.bf16.mxu1 %vm354_vm2, %v9383_v62  ;;  %v9425_v57 = vsel %vm354_vm2, %v9386_v43, 0 }
 0x41e   : > { %v9371_v63 = vpop.permute.xlu0 %9370 }
 0x41f   : > { %13895 = vmatmul.mubr.msk.bf16.vlgmr.msra.gmra.mrb[28].mxu0 %vm350_vm3, %v17240_v22  ;;  %v9389_v58 = vsel %vm4487_vm10, %v9371_v63, %v9373_v2  ;;  %v9388_v4 = vsel %vm4487_vm10, %v9369_v23, %v9371_v63  ;;  %v17366_v23 = vrot.slane %v9781_v11, %v16184_v55 }
 0x420   : > { %9522 = vmatpush1.bf16.msra.mxu0 %v9407_v7  ;;  %9553 = vmatprep.mubr.bf16.mxu0 %v15686_v17  ;;  %v9431_v61 = vsel %vm354_vm2, %v9388_v4, 0 }
 0x421   : > { %13902 = vmatprep.subr.msk.bf16.mxu0 %vm354_vm2, %v9385_v0 }
 0x422   : > { %13897 = vmatmul.mubr.msk.bf16.vlgmr.msra.gmra.mrb[16].mxu1 %vm350_vm3, %v17240_v22  ;;  %v9375_v48 = vpop.permute.xlu0 %9374 }
 0x423   : > { %9563 = vmatpush1.bf16.msra.mxu1 %v9413_v40  ;;  %9594 = vmatprep.mubr.bf16.mxu1 %v15686_v17  ;;  %v9390_v47 = vsel %vm4487_vm10, %v9373_v2, %v9375_v48 }
 0x424   : > { %13904 = vmatprep.subr.msk.bf16.mxu1 %vm354_vm2, %v9387_v20  ;;  %v9437_v30 = vsel %vm354_vm2, %v9390_v47, 0 }
 0x427   : > { %13899 = vmatmul.mubr.msk.bf16.vlgmr.msra.gmra.mrb[32].mxu0 %vm350_vm3, %v17240_v22 }
 0x428   : > { %9604 = vmatpush1.bf16.msra.mxu0 %v9419_v29  ;;  %9635 = vmatprep.mubr.bf16.mxu0 %v15686_v17  ;;  %v17380_v29 = vld [vmem:[%s18722_s1 + $0x8] sm:$0xff] }
 0x429   : > { %13906 = vmatprep.subr.msk.bf16.mxu0 %vm354_vm2, %v9389_v58  ;;  %v9824_v11 = vrot.slane %v17380_v29, %v16200_v13 }
 0x42a   : > { %13901 = vmatmul.mubr.msk.bf16.vlgmr.msra.gmra.mrb[20].mxu1 %vm350_vm3, %v17240_v22 }
 0x42b   : > { %9645 = vmatpush1.bf16.msra.mxu1 %v9425_v57  ;;  %9676 = vmatprep.mubr.bf16.mxu1 %v15686_v17  ;;  %v17335_v12 = vpop.permute.xlu1 %5110 }
 0x42c   : > { %14141 = vmatprep.subr.bf16.mxu1 %v14934_v34 }
 0x42f   : > { %13903 = vmatmul.mubr.msk.bf16.vlgmr.msra.gmra.mrb[36].mxu0 %vm350_vm3, %v17240_v22 }
 0x430   : > { %9686 = vmatpush1.bf16.msra.mxu0 %v9431_v61  ;;  %9717 = vmatprep.mubr.bf16.mxu0 %v15686_v17 }
 0x432   : > { %13905 = vmatmul.mubr.msk.bf16.vlgmr.msra.gmra.mrb[24].mxu1 %vm350_vm3, %v17240_v22 }
 0x433   : > { %14142 = vmatpush3.bf16.msra.mxu1 %v9437_v30  ;;  %14143 = vmatprep.mubr.msk.bf16.mxu1 %vm14935_vm0, %v14934_v34  ;;  %v9820_v30 = vrot.slane %v17380_v29, %v16197_v6  ;;  %v9832_v6 = vrot.slane %v17380_v29, %v16173_v31  ;;  %v17402_v31 = vpop.permute.xlu0 %9998 }
 0x437   : > { %13907 = vmatmul.mubr.msk.bf16.vlgmr.msra.gmra.mrb[40].mxu0 %vm350_vm3, %v17240_v22 }
 0x438   : > { %10106 = vmatprep.mubr.bf16.mxu0 %v15686_v17 }
 0x43a   : > { %14144 = vmatmul.mubr.msk.bf16.vlgmr.msra.gmra.mrb[28].mxu1 %vm350_vm3, %v17240_v22 }
 0x43b   : > { %10147 = vmatprep.mubr.bf16.mxu1 %v15686_v17 }
 0x4f2   : > { %v9473_v21 = vpop.f32.mrb[28].mxu0 }
 0x4f3   : > { %v9475_v15 = vpop.f32.mrb[29].mxu0  ;;  %v14204_v22 = vadd.f32 %v9473_v21, %v17335_v12 }
 0x4f4   : > { %v14205_v25 = vadd.f32 %v9475_v15, %v17335_v12  ;;  %v9477_v19 = vpop.f32.mrb[30].mxu0 }
 0x4f5   : > { %v9860_v16 = vmul.f32 %v14204_v22, %v17338_v5  ;;  %v9514_v37 = vpop.f32.mrb[16].mxu1  ;;  %v9478_v51 = vpop.f32.mrb[31].mxu0 }
 0x4f6   : > { %v9861_v28 = vmul.f32 %v14205_v25, %v17341_v36  ;;  %v14206_v9 = vadd.f32 %v9514_v37, %v17335_v12  ;;  %v9516_v42 = vpop.f32.mrb[17].mxu1  ;;  %v9828_v37 = vrot.slane %v17380_v29, %v16165_v35 }
 0x4f7   : > { %v14207_v46 = vadd.f32 %v9516_v42, %v17335_v12  ;;  %v9518_v52 = vpop.f32.mrb[18].mxu1 }
 0x4f8   : > { %v13909_v32 = vpack.c.bf16 %v9861_v28, %v9860_v16  ;;  %v9862_v49 = vmul.f32 %v14206_v9, %v17346_v24  ;;  %v9519_v26 = vpop.f32.mrb[19].mxu1 }
 0x4f9   : > { %v9863_v53 = vmul.f32 %v14207_v46, %v17350_v41 }
 0x4fa   : > { %v9555_v59 = vpop.f32.mrb[32].mxu0  ;;  %v9913_v7 = vrot.slane %v13909_v32, %v15055_v10 }
 0x4fb   : > { %v13910_v60 = vpack.c.bf16 %v9863_v53, %v9862_v49  ;;  %v14208_v54 = vadd.f32 %v9555_v59, %v17335_v12  ;;  %v9557_v62 = vpop.f32.mrb[33].mxu0 }
 0x4fc   : > { %v14209_v44 = vadd.f32 %v9557_v62, %v17335_v12  ;;  %v9559_v18 = vpop.f32.mrb[34].mxu0 }
 0x4fd   : > { %v9920_v45 = vrot.slane %v13910_v60, %v15055_v10  ;;  %v9864_v0 = vmul.f32 %v14208_v54, %v17358_v27  ;;  %v9596_v40 = vpop.f32.mrb[20].mxu1  ;;  %v9560_v20 = vpop.f32.mrb[35].mxu0  ;;  %v9836_v18 = vrot.slane %v17380_v29, %v16222_v38 }
 0x4fe   : > { %v9865_v2 = vmul.f32 %v14209_v44, %v17361_v1  ;;  %v14210_v63 = vadd.f32 %v9596_v40, %v17335_v12  ;;  %v9598_v43 = vpop.f32.mrb[21].mxu1 }
 0x4ff   : > { %v9921_v58 = vcombine.low %v9913_v7, %v9920_v45  ;;  %v14211_v57 = vadd.f32 %v9598_v43, %v17335_v12  ;;  %v9600_v4 = vpop.f32.mrb[22].mxu1  ;;  %v14919_v3 = vcombine.low %v9920_v45, %v9920_v45 }
 0x500   : > { %v13911_v48 = vpack.c.bf16 %v9865_v2, %v9864_v0  ;;  %v9866_v47 = vmul.f32 %v14210_v63, %v17366_v23  ;;  %v9601_v61 = vpop.f32.mrb[23].mxu1  ;;  %v9840_v2 = vrot.slane %v17380_v29, %v16225_v50 }
 0x501   : > { %9976 = vst [vmem:[#allocation2 + $0x6] sm:$0xff] %v9921_v58  ;;  %v9867_v39 = vmul.f32 %v14211_v57, %v17373_v56  ;;  %v10010_v33 = vrot.slane %v9921_v58, %v15055_v10  ;;  %v10017_v51 = vrot.slane %v14919_v3, %v15055_v10 }
 0x502   : > { %v9637_v14 = vpop.f32.mrb[36].mxu0  ;;  %v9930_v28 = vrot.slane %v13911_v48, %v15055_v10  ;;  %v9844_v48 = vrot.slane %v17380_v29, %v16184_v55 }
 0x503   : > { %v13912_v21 = vpack.c.bf16 %v9867_v39, %v9866_v47  ;;  %v14212_v15 = vadd.f32 %v9637_v14, %v17335_v12  ;;  %v9639_v22 = vpop.f32.mrb[37].mxu0  ;;  %v10018_v25 = vcombine.high %v10010_v33, %v10010_v33  ;;  %v10048_v52 = vsel %vm354_vm2, %v10010_v33, 0 }
 0x504   : > { %v14213_v19 = vadd.f32 %v9639_v22, %v17335_v12  ;;  %v9641_v16 = vpop.f32.mrb[38].mxu0  ;;  %v10019_v26 = vcombine.high %v10017_v51, %v10017_v51  ;;  %v10054_v7 = vsel %vm354_vm2, %v10017_v51, 0 }
 0x505   : > { %v9937_v13 = vrot.slane %v13912_v21, %v15055_v10  ;;  %v9868_v9 = vmul.f32 %v14212_v15, %v9820_v30  ;;  %v9678_v42 = vpop.f32.mrb[24].mxu1  ;;  %v9642_v46 = vpop.f32.mrb[39].mxu0  ;;  %13918 = vmatprep.subr.msk.bf16.mxu0 %vm354_vm2, %v10018_v25 }
 0x506   : > { %v9869_v32 = vmul.f32 %v14213_v19, %v9824_v11  ;;  %v14214_v49 = vadd.f32 %v9678_v42, %v17335_v12  ;;  %v9680_v35 = vpop.f32.mrb[25].mxu1  ;;  %10075 = vmatpush1.bf16.msra.mxu0 %v10048_v52  ;;  %13920 = vmatprep.subr.msk.bf16.mxu1 %vm354_vm2, %v10019_v26 }
 0x507   : > { %v9938_v53 = vcombine.low %v9930_v28, %v9937_v13  ;;  %v14215_v59 = vadd.f32 %v9680_v35, %v17335_v12  ;;  %v9682_v60 = vpop.f32.mrb[26].mxu1  ;;  %10116 = vmatpush1.bf16.msra.mxu1 %v10054_v7  ;;  %v14920_v40 = vcombine.low %v9937_v13, %v9937_v13 }
 0x508   : > { %v13913_v54 = vpack.c.bf16 %v9869_v32, %v9868_v9  ;;  %v9870_v62 = vmul.f32 %v14214_v49, %v9828_v37  ;;  %v9683_v44 = vpop.f32.mrb[27].mxu1 }
 0x509   : > { %9977 = vst [vmem:[#allocation2 + $0xe] sm:$0xff] %v9938_v53  ;;  %v9871_v45 = vmul.f32 %v14215_v59, %v9832_v6  ;;  %13919 = vmatmul.mubr.msk.bf16.vlgmr.msra.gmra.mrb[44].mxu0 %vm350_vm3, %v17402_v31  ;;  %v10027_v0 = vrot.slane %v9938_v53, %v15055_v10  ;;  %v10034_v47 = vrot.slane %v14920_v40, %v15055_v10 }
 0x50a   : > { %v9719_v20 = vpop.f32.mrb[40].mxu0  ;;  %10188 = vmatprep.mubr.bf16.mxu0 %v15686_v17  ;;  %13921 = vmatmul.mubr.msk.bf16.vlgmr.msra.gmra.mrb[32].mxu1 %vm350_vm3, %v17402_v31  ;;  %v9947_v50 = vrot.slane %v13913_v54, %v15055_v10  ;;  %v10300_v54 = vpop.permute.xlu1 %10299 }
 0x50b   : > { %v13914_v38 = vpack.c.bf16 %v9871_v45, %v9870_v62  ;;  %v14216_v63 = vadd.f32 %v9719_v20, %v17335_v12  ;;  %v9721_v43 = vpop.f32.mrb[41].mxu0  ;;  %v10035_v58 = vcombine.high %v10027_v0, %v10027_v0  ;;  %v10060_v3 = vsel %vm354_vm2, %v10027_v0, 0  ;;  %10229 = vmatprep.mubr.bf16.mxu1 %v15686_v17 }
 0x50c   : > { %v14217_v57 = vadd.f32 %v9721_v43, %v17335_v12  ;;  %v9723_v4 = vpop.f32.mrb[42].mxu0  ;;  %v10036_v11 = vcombine.high %v10034_v47, %v10034_v47  ;;  %v10066_v16 = vsel %vm354_vm2, %v10034_v47, 0 }
 0x50d   : > { %v9954_v61 = vrot.slane %v13914_v38, %v15055_v10  ;;  %v9872_v39 = vmul.f32 %v14216_v63, %v9836_v18  ;;  %v9760_v30 = vpop.f32.mrb[28].mxu1  ;;  %v9724_v33 = vpop.f32.mrb[43].mxu0  ;;  %13922 = vmatprep.subr.msk.bf16.mxu0 %vm354_vm2, %v10035_v58 }
 0x50e   : > { %v9873_v14 = vmul.f32 %v14217_v57, %v9840_v2  ;;  %v14218_v55 = vadd.f32 %v9760_v30, %v17335_v12  ;;  %v14145_v29 = vpop.f32.mrb[29].mxu1  ;;  %10157 = vmatpush1.bf16.msra.mxu0 %v10060_v3  ;;  %13924 = vmatprep.subr.msk.bf16.mxu1 %vm354_vm2, %v10036_v11  ;;  %v10601_v57 = vpop.permute.xlu0 %10600 }
 0x50f   : > { %v9955_v21 = vcombine.low %v9947_v50, %v9954_v61  ;;  %v9763_v15 = vpop.f32.mrb[30].mxu1  ;;  %14147 = vmatprep.subr.bf16.mxu0 %v14934_v34  ;;  %10198 = vmatpush1.bf16.msra.mxu1 %v10066_v16  ;;  %v9984_v29 = vpop.permute.xlu1 %9983 }
 0x510   : > { %v13915_v22 = vpack.c.bf16 %v9873_v14, %v9872_v39  ;;  %v9874_v25 = vmul.f32 %v14218_v55, %v9844_v48  ;;  %v14146_v19 = vpop.f32.mrb[31].mxu1  ;;  %v10288_v37 = vld [vmem:[#allocation2 + $0xc] sm:$0xff] }
 0x511   : > { %9978 = vst [vmem:[#allocation2 + $0x16] sm:$0xff] %v9955_v21  ;;  %13923 = vmatmul.mubr.msk.bf16.vlgmr.msra.gmra.mrb[48].mxu0 %vm350_vm3, %v17402_v31  ;;  %v10304_v12 = vcombine.high %v10288_v37, %v10288_v37  ;;  %v10311_v9 = vrot.slane %v10288_v37, %v15055_v10 }
 0x512   : > { %v9963_v6 = vrot.slane %v13915_v22, %v15055_v10  ;;  %v9889_v51 = vpack.c.bf16 %v9874_v25, %v9874_v25  ;;  %14149 = vmatprep.mubr.msk.bf16.mxu0 %vm14935_vm0, %v14934_v34  ;;  %13925 = vmatmul.mubr.msk.bf16.vlgmr.msra.gmra.mrb[36].mxu1 %vm350_vm3, %v17402_v31 }
 0x513   : > { %v10318_v28 = vrot.slane %v10304_v12, %v15055_v10  ;;  %10448 = vmatprep.mubr.bf16.mxu1 %v15686_v17  ;;  %v10319_v49 = vcombine.high %v10311_v9, %v10311_v9  ;;  %v10349_v45 = vsel %vm354_vm2, %v10311_v9, 0  ;;  %v14968_v9 = vmov 3  }
 0x514   : > { %v9970_v13 = vrot.slane %v9889_v51, %v15055_v10  ;;  %v11022_v51 = vld [vmem:[%s18724_s3] sm:$0xf]  ;;  %14884 = vset.pattern.permute.xlu0 %v14968_v9 }
 0x515   : > { %v10320_v42 = vcombine.high %v10318_v28, %v10318_v28  ;;  %v10355_v52 = vsel %vm354_vm2, %v10318_v28, 0  ;;  %11025 = vperm.xlu0 %14884, %v11022_v51  }
 0x516   : > { %v9971_v46 = vcombine.low %v9963_v6, %v9970_v13 }
 0x517   : > { %13931 = vmatprep.subr.msk.bf16.mxu1 %vm354_vm2, %v10320_v42 }
 0x518   : > { %9979 = vst [vmem:[#allocation2 + $0x1e] sm:$0x3f] %v9971_v46  ;;  %v13917_v32 = vld.sshfl [vmem:[#allocation2 + $0x16] sm:$0x3 pattern:$0x76325410]  ;;  %10417 = vmatpush1.bf16.msra.mxu1 %v10355_v52 }
 0x519   : > { %v10289_v35 = vld [vmem:[#allocation2 + $0x14] sm:$0xff]  ;;  %v10072_v53 = vsel %vm354_vm2, %v13917_v32, 0  ;;  %v13928_v48 = vld.sshfl [vmem:[#allocation2 + $0x1c] sm:$0x3 pattern:$0x76325410] }
 0x51a   : > { %v10589_v26 = vld [vmem:[#allocation2 + $0x12] sm:$0xff]  ;;  %v10321_v59 = vcombine.high %v10289_v35, %v10289_v35  ;;  %v10328_v60 = vrot.slane %v10289_v35, %v15055_v10  ;;  %14148 = vmatpush3.bf16.msra.mxu0 %v10072_v53  ;;  %v10373_v50 = vsel %vm354_vm2, %v13928_v48, 0 }
 0x51b   : > { %v10605_v62 = vcombine.high %v10589_v26, %v10589_v26  ;;  %13929 = vmatprep.subr.msk.bf16.mxu0 %vm354_vm2, %v10319_v49  ;;  %13932 = vmatmul.mubr.msk.bf16.vlgmr.msra.gmra.mrb[32].mxu1 %vm350_vm3, %v10300_v54  ;;  %v10612_v4 = vrot.slane %v10589_v26, %v15055_v10 }
 0x51c   : > { %v10335_v44 = vrot.slane %v10321_v59, %v15055_v10  ;;  %v10336_v0 = vcombine.high %v10328_v60, %v10328_v60  ;;  %10530 = vmatprep.mubr.bf16.mxu1 %v15686_v17  ;;  %v10361_v58 = vsel %vm354_vm2, %v10328_v60, 0 }
 0x51d   : > { %v10619_v18 = vrot.slane %v10605_v62, %v15055_v10  ;;  %14150 = vmatmul.mubr.msk.bf16.vlgmr.msra.gmra.mrb[52].mxu0 %vm350_vm3, %v17402_v31  ;;  %v10620_v61 = vcombine.high %v10612_v4, %v10612_v4  ;;  %v10650_v30 = vsel %vm354_vm2, %v10612_v4, 0 }
 0x51e   : > { %v10337_v7 = vcombine.high %v10335_v44, %v10335_v44  ;;  %10376 = vmatpush1.bf16.msra.mxu0 %v10349_v45  ;;  %10407 = vmatprep.mubr.bf16.mxu0 %v15686_v17  ;;  %v10367_v40 = vsel %vm354_vm2, %v10335_v44, 0 }
 0x51f   : > { %13933 = vmatprep.subr.msk.bf16.mxu0 %vm354_vm2, %v10336_v0  ;;  %v10621_v20 = vcombine.high %v10619_v18, %v10619_v18  ;;  %v10590_v2 = vld [vmem:[#allocation2 + $0x1a] sm:$0xff]  ;;  %v10656_v63 = vsel %vm354_vm2, %v10619_v18, 0  ;;  %v13939_v14 = vld.sshfl [vmem:[#allocation2 + $0x22] sm:$0x3 pattern:$0x76325410] }
 0x520   : > { %13935 = vmatprep.subr.msk.bf16.mxu1 %vm354_vm2, %v10337_v7  ;;  %v10622_v38 = vcombine.high %v10590_v2, %v10590_v2  ;;  %v10629_v39 = vrot.slane %v10590_v2, %v15055_v10  ;;  %v10674_v55 = vsel %vm354_vm2, %v13939_v14, 0 }
 0x521   : > { %10499 = vmatpush1.bf16.msra.mxu1 %v10367_v40 }
 0x522   : > { %13942 = vmatprep.subr.msk.bf16.mxu1 %vm354_vm2, %v10621_v20  ;;  %v10636_v31 = vrot.slane %v10622_v38, %v15055_v10  ;;  %v10637_v33 = vcombine.high %v10629_v39, %v10629_v39  ;;  %v10662_v3 = vsel %vm354_vm2, %v10629_v39, 0 }
 0x524   : > { %13936 = vmatmul.mubr.msk.bf16.vlgmr.msra.gmra.mrb[36].mxu1 %vm350_vm3, %v10300_v54  ;;  %v10638_v43 = vcombine.high %v10636_v31, %v10636_v31  ;;  %v10668_v47 = vsel %vm354_vm2, %v10636_v31, 0 }
 0x525   : > { %13930 = vmatmul.mubr.msk.bf16.vlgmr.msra.gmra.mrb[44].mxu0 %vm350_vm3, %v10300_v54  ;;  %10718 = vmatpush1.bf16.msra.mxu1 %v10656_v63 }
 0x526   : > { %10458 = vmatpush1.bf16.msra.mxu0 %v10361_v58  ;;  %13946 = vmatprep.subr.msk.bf16.mxu1 %vm354_vm2, %v10638_v43 }
 0x527   : > { %10489 = vmatprep.mubr.bf16.mxu0 %v15686_v17  ;;  %14153 = vmatprep.subr.bf16.mxu0 %v14934_v34 }
 0x528   : > { %10749 = vmatprep.mubr.bf16.mxu1 %v15686_v17 }
 0x52c   : > { %13943 = vmatmul.mubr.msk.bf16.vlgmr.msra.gmra.mrb[32].mxu1 %vm350_vm3, %v10601_v57 }
 0x52d   : > { %13934 = vmatmul.mubr.msk.bf16.vlgmr.msra.gmra.mrb[48].mxu0 %vm350_vm3, %v10300_v54  ;;  %10800 = vmatpush1.bf16.msra.mxu1 %v10668_v47 }
 0x52e   : > { %14154 = vmatpush3.bf16.msra.mxu0 %v10373_v50  ;;  %14155 = vmatprep.mubr.msk.bf16.mxu0 %vm14935_vm0, %v14934_v34 }
 0x52f   : > { %13940 = vmatprep.subr.msk.bf16.mxu0 %vm354_vm2, %v10620_v61  ;;  %10831 = vmatprep.mubr.bf16.mxu1 %v15686_v17 }
 0x534   : > { %13947 = vmatmul.mubr.msk.bf16.vlgmr.msra.gmra.mrb[36].mxu1 %vm350_vm3, %v10601_v57 }
 0x535   : > { %14156 = vmatmul.mubr.msk.bf16.vlgmr.msra.gmra.mrb[52].mxu0 %vm350_vm3, %v10300_v54  ;;  %11148 = vmatprep.mubr.bf16.mxu1 %v15686_v17 }
 0x536   : > { %10677 = vmatpush1.bf16.msra.mxu0 %v10650_v30  ;;  %10708 = vmatprep.mubr.bf16.mxu0 %v15686_v17 }
 0x537   : > { %13944 = vmatprep.subr.msk.bf16.mxu0 %vm354_vm2, %v10637_v33 }
 0x53d   : > { %13941 = vmatmul.mubr.msk.bf16.vlgmr.msra.gmra.mrb[44].mxu0 %vm350_vm3, %v10601_v57 }
 0x53e   : > { %10759 = vmatpush1.bf16.msra.mxu0 %v10662_v3  ;;  %10790 = vmatprep.mubr.bf16.mxu0 %v15686_v17  ;;  %v13949_v3 = vld [vmem:[%s18722_s1 + $0x8] ss:$0 sm:$0xff] }
 0x53f   : > { %14159 = vmatprep.subr.bf16.mxu0 %v14934_v34 }
 0x545   : > { %13945 = vmatmul.mubr.msk.bf16.vlgmr.msra.gmra.mrb[48].mxu0 %vm350_vm3, %v10601_v57 }
 0x546   : > { %14160 = vmatpush3.bf16.msra.mxu0 %v10674_v55  ;;  %14161 = vmatprep.mubr.msk.bf16.mxu0 %vm14935_vm0, %v14934_v34 }
 0x54d   : > { %14162 = vmatmul.mubr.msk.bf16.vlgmr.msra.gmra.mrb[52].mxu0 %vm350_vm3, %v10601_v57 }
 0x54e   : > { %11271 = vmatprep.mubr.bf16.mxu0 %v15686_v17 }
 0x5ff   : > { %v10751_v11 = vpop.f32.mrb[32].mxu1 }
 0x600   : > { %v10753_v21 = vpop.f32.mrb[33].mxu1  ;;  %v14221_v15 = vadd.f32 %v10751_v11, %v9984_v29 }
 0x601   : > { %v14222_v22 = vadd.f32 %v10753_v21, %v9984_v29  ;;  %v10755_v25 = vpop.f32.mrb[34].mxu1 }
 0x602   : > { %v10891_v19 = vmax.f32 %v14221_v15, 0.0  ;;  %v10756_v16 = vpop.f32.mrb[35].mxu1 }
 0x603   : > { %v10892_v37 = vmax.f32 %v14222_v22, 0.0 }
 0x604   : > { %v10949_v12 = vmul.f32 %v10891_v19, %v17346_v24 }
 0x605   : > { %v10950_v6 = vmul.f32 %v10892_v37, %v17350_v41 }
 0x607   : > { %v13951_v28 = vpack.c.bf16 %v10950_v6, %v10949_v12  ;;  %v10833_v13 = vpop.f32.mrb[36].mxu1  ;;  %v11041_v12 = vpop.permute.xlu0 %11040 }
 0x608   : > { %v14225_v42 = vadd.f32 %v10833_v13, %v9984_v29  ;;  %v10835_v46 = vpop.f32.mrb[37].mxu1 }
 0x609   : > { %v14226_v52 = vadd.f32 %v10835_v46, %v9984_v29  ;;  %v10837_v32 = vpop.f32.mrb[38].mxu1 }
 0x60a   : > { %v10895_v49 = vmax.f32 %v14225_v42, 0.0  ;;  %v10838_v35 = vpop.f32.mrb[39].mxu1 }
 0x60b   : > { %v10896_v26 = vmax.f32 %v14226_v52, 0.0 }
 0x60c   : > { %v10953_v24 = vmul.f32 %v10895_v49, %v17366_v23  ;;  %v17504_v23 = vrot.slane %v13951_v28, %v15055_v10 }
 0x60d   : > { %v10954_v41 = vmul.f32 %v10896_v26, %v17373_v56 }
 0x60f   : > { %v13953_v53 = vpack.c.bf16 %v10954_v41, %v10953_v24 }
 0x610   : > { %v10710_v59 = vpop.f32.mrb[44].mxu0 }
 0x611   : > { %v14219_v60 = vadd.f32 %v10710_v59, %v9984_v29  ;;  %v10712_v54 = vpop.f32.mrb[45].mxu0  ;;  %v11006_v30 = vrot.slane %v13953_v53, %v15055_v10 }
 0x612   : > { %v14220_v62 = vadd.f32 %v10712_v54, %v9984_v29  ;;  %v10714_v44 = vpop.f32.mrb[46].mxu0 }
 0x613   : > { %v10889_v18 = vmax.f32 %v14219_v60, 0.0  ;;  %v10715_v7 = vpop.f32.mrb[47].mxu0  ;;  %v14921_v6 = vcombine.low %v11006_v30, %v11006_v30 }
 0x614   : > { %v10890_v45 = vmax.f32 %v14220_v62, 0.0  ;;  %v14922_v7 = vcombine.low %v17504_v23, %v17504_v23 }
 0x615   : > { %v10947_v0 = vmul.f32 %v10889_v18, %v17338_v5  ;;  %v11377_v52 = vrot.slane %v14921_v6, %v15055_v10 }
 0x616   : > { %v10948_v40 = vmul.f32 %v10890_v45, %v17341_v36  ;;  %v11342_v45 = vpop.permute.xlu1 %11341 }
 0x617   : > { %v11379_v24 = vcombine.high %v11377_v52, %v11377_v52  ;;  %v11409_v59 = vsel %vm354_vm2, %v11377_v52, 0 }
 0x618   : > { %v13950_v20 = vpack.c.bf16 %v10948_v40, %v10947_v0  ;;  %v10792_v2 = vpop.f32.mrb[48].mxu0  ;;  %v11360_v0 = vrot.slane %v14922_v7, %v15055_v10 }
 0x619   : > { %v14223_v38 = vadd.f32 %v10792_v2, %v9984_v29  ;;  %v10794_v31 = vpop.f32.mrb[49].mxu0 }
 0x61a   : > { %v10982_v56 = vrot.slane %v13950_v20, %v15055_v10  ;;  %v14224_v63 = vadd.f32 %v10794_v31, %v9984_v29  ;;  %v10796_v43 = vpop.f32.mrb[50].mxu0  ;;  %v11362_v2 = vcombine.high %v11360_v0, %v11360_v0  ;;  %v11643_v31 = vpop.permute.xlu1 %11642 }
 0x61b   : > { %v10893_v58 = vmax.f32 %v14223_v38, 0.0  ;;  %v10797_v57 = vpop.f32.mrb[51].mxu0 }
 0x61c   : > { %v17508_v4 = vcombine.low %v10982_v56, %v17504_v23  ;;  %v10894_v48 = vmax.f32 %v14224_v63, 0.0  ;;  %v11397_v23 = vsel %vm354_vm2, %v11360_v0, 0 }
 0x61d   : > { %v10951_v5 = vmul.f32 %v10893_v58, %v17358_v27 }
 0x61e   : > { %11018 = vst [vmem:[#allocation3 + $0x6] sm:$0xff] %v17508_v4  ;;  %v10952_v36 = vmul.f32 %v10894_v48, %v17361_v1  ;;  %v11353_v54 = vrot.slane %v17508_v4, %v15055_v10 }
 0x620   : > { %v13952_v47 = vpack.c.bf16 %v10952_v36, %v10951_v5  ;;  %v10874_v50 = vpop.f32.mrb[52].mxu0  ;;  %v11361_v18 = vcombine.high %v11353_v54, %v11353_v54  ;;  %v11391_v20 = vsel %vm354_vm2, %v11353_v54, 0 }
 0x621   : > { %v14227_v61 = vadd.f32 %v10874_v50, %v9984_v29  ;;  %v14163_v39 = vpop.f32.mrb[53].mxu0 }
 0x622   : > { %v10999_v33 = vrot.slane %v13952_v47, %v15055_v10  ;;  %v10877_v14 = vpop.f32.mrb[54].mxu0 }
 0x623   : > { %v10897_v55 = vmax.f32 %v14227_v61, 0.0  ;;  %v14164_v11 = vpop.f32.mrb[55].mxu0  ;;  %v14969_v14 = vmov 1966171168  }
 0x624   : > { %v17518_v27 = vcombine.low %v10999_v33, %v11006_v30 }
 0x625   : > { %v10955_v21 = vmul.f32 %v13949_v3, %v10897_v55  ;;  %v11029_v15 = vld [vmem:[#allocation3] sm:$0xff]  ;;  %v11933_v55 = vunpack.c.l.s4 %v14969_v14 }
 0x626   : > { %11019 = vst [vmem:[#allocation3 + $0xe] sm:$0xff] %v17518_v27  ;;  %v11052_v1 = vrot.slane %v11029_v15, %v15055_v10  ;;  %v11045_v29 = vcombine.high %v11029_v15, %v11029_v15  ;;  %v11370_v38 = vrot.slane %v17518_v27, %v15055_v10  ;;  %v14970_v27 = vmov 286326784   ;;  %v17603_v15 = vpop.permute.xlu0 %11025 }
 0x627   : > { %v10964_v22 = vpack.c.bf16 %v10955_v21, %v10955_v21  ;;  %v11934_v11 = vunpack.c.0.s8 %v11933_v55  ;;  %v11957_v21 = vunpack.c.l.s4 %v14970_v27 }
 0x628   : > { %v11060_v25 = vcombine.high %v11052_v1, %v11052_v1  ;;  %v11059_v19 = vrot.slane %v11045_v29, %v15055_v10  ;;  %v11090_v16 = vsel %vm354_vm2, %v11052_v1, 0  ;;  %v11378_v56 = vcombine.high %v11370_v38, %v11370_v38 }
 0x629   : > { %13954 = vst.sshfl [vmem:[#allocation3 + $0x16] sm:$0x3 pattern:$0x76325410] %v10964_v22  ;;  %v11403_v63 = vsel %vm354_vm2, %v11370_v38, 0  ;;  %v11958_v1 = vunpack.c.0.s8 %v11957_v21 }
 0x62a   : > { %13957 = vmatprep.subr.msk.bf16.mxu1 %vm354_vm2, %v11060_v25  ;;  %v11061_v37 = vcombine.high %v11059_v19, %v11059_v19  ;;  %v11096_v28 = vsel %vm354_vm2, %v11059_v19, 0 }
 0x62b   : > { %11117 = vmatpush1.bf16.msra.mxu1 %v11090_v16  ;;  %v17613_v16 = vsub.s32 %v11958_v1, %v15050_v8 }
 0x62c   : > { %13959 = vmatprep.subr.msk.bf16.mxu1 %vm354_vm2, %v11061_v37 }
 0x62d   : > { %v11030_v51 = vld [vmem:[#allocation3 + $0x8] sm:$0xff]  ;;  %v13956_v62 = vld.sshfl [vmem:[#allocation3 + $0x10] sm:$0x3 pattern:$0x76325410] }
 0x62e   : > { %13958 = vmatmul.mubr.msk.bf16.vlgmr.msra.gmra.mrb[40].mxu1 %vm350_vm3, %v11041_v12  ;;  %v11069_v13 = vrot.slane %v11030_v51, %v15055_v10  ;;  %v11062_v9 = vcombine.high %v11030_v51, %v11030_v51  ;;  %v11114_v44 = vsel %vm354_vm2, %v13956_v62, 0  ;;  %v11631_v43 = vld [vmem:[#allocation3 + $0xc] sm:$0xff] }
 0x62f   : > { %11158 = vmatpush1.bf16.msra.mxu1 %v11096_v28  ;;  %11189 = vmatprep.mubr.bf16.mxu1 %v15686_v17  ;;  %v11654_v58 = vrot.slane %v11631_v43, %v15055_v10  ;;  %v11647_v5 = vcombine.high %v11631_v43, %v11631_v43 }
 0x630   : > { %v11077_v42 = vcombine.high %v11069_v13, %v11069_v13  ;;  %v11076_v46 = vrot.slane %v11062_v9, %v15055_v10  ;;  %v17532_v32 = vld [vmem:[#allocation3 + $0x14] sm:$0xff]  ;;  %v11102_v53 = vsel %vm354_vm2, %v11069_v13, 0 }
 0x631   : > { %v11664_v49 = vcombine.high %v17532_v32, %v17532_v32  ;;  %v13967_v57 = vld.sshfl [vmem:[#allocation3 + $0x16] sm:$0x3 pattern:$0x76325410]  ;;  %v11662_v48 = vcombine.high %v11654_v58, %v11654_v58  ;;  %v11661_v36 = vrot.slane %v11647_v5, %v15055_v10  ;;  %v11692_v47 = vsel %vm354_vm2, %v11654_v58, 0 }
 0x632   : > { %13961 = vmatprep.subr.msk.bf16.mxu1 %vm354_vm2, %v11077_v42  ;;  %v11078_v35 = vcombine.high %v11076_v46, %v11076_v46  ;;  %v11108_v26 = vsel %vm354_vm2, %v11076_v46, 0  ;;  %v11415_v4 = vsel %vm354_vm2, %v13967_v57, 0  ;;  %v11671_v61 = vrot.slane %v17532_v32, %v15055_v10 }
 0x633   : > { %v11678_v41 = vrot.slane %v11664_v49, %v15055_v10  ;;  %v11663_v50 = vcombine.high %v11661_v36, %v11661_v36  ;;  %v11698_v39 = vsel %vm354_vm2, %v11661_v36, 0  ;;  %v13978_v10 = vld.sshfl [vmem:[#allocation3 + $0x1c] sm:$0x3 pattern:$0x76325410] }
 0x634   : > { %13963 = vmatprep.subr.msk.bf16.mxu0 %vm354_vm2, %v11078_v35  ;;  %v11679_v30 = vcombine.high %v11671_v61, %v11671_v61  ;;  %v11704_v33 = vsel %vm354_vm2, %v11671_v61, 0  ;;  %v11716_v3 = vsel %vm354_vm2, %v13978_v10, 0 }
 0x635   : > { %11240 = vmatpush1.bf16.msra.mxu0 %v11108_v26  ;;  %v11680_v60 = vcombine.high %v11678_v41, %v11678_v41  ;;  %v11710_v40 = vsel %vm354_vm2, %v11678_v41, 0 }
 0x636   : > { %13960 = vmatmul.mubr.msk.bf16.vlgmr.msra.gmra.mrb[44].mxu1 %vm350_vm3, %v11041_v12  ;;  %13974 = vmatprep.subr.msk.bf16.mxu0 %vm354_vm2, %v11379_v24 }
 0x637   : > { %11199 = vmatpush1.bf16.msra.mxu1 %v11102_v53  ;;  %11230 = vmatprep.mubr.bf16.mxu1 %v15686_v17 }
 0x638   : > { %13964 = vmatmul.mubr.msk.bf16.vlgmr.msra.gmra.mrb[56].mxu0 %vm350_vm3, %v11041_v12  ;;  %14165 = vmatprep.subr.bf16.mxu1 %v14934_v34 }
 0x639   : > { %11541 = vmatpush1.bf16.msra.mxu0 %v11409_v59  ;;  %11572 = vmatprep.mubr.bf16.mxu0 %v15686_v17 }
 0x63a   : > { %13985 = vmatprep.subr.msk.bf16.mxu0 %vm354_vm2, %v11680_v60 }
 0x63e   : > { %13962 = vmatmul.mubr.msk.bf16.vlgmr.msra.gmra.mrb[48].mxu1 %vm350_vm3, %v11041_v12 }
 0x63f   : > { %14166 = vmatpush3.bf16.msra.mxu1 %v11114_v44  ;;  %14167 = vmatprep.mubr.msk.bf16.mxu1 %vm14935_vm0, %v14934_v34 }
 0x640   : > { %13968 = vmatprep.subr.msk.bf16.mxu1 %vm354_vm2, %v11361_v18 }
 0x644   : > { %13975 = vmatmul.mubr.msk.bf16.vlgmr.msra.gmra.mrb[56].mxu0 %vm350_vm3, %v11342_v45 }
 0x645   : > { %11842 = vmatpush1.bf16.msra.mxu0 %v11710_v40  ;;  %11873 = vmatprep.mubr.bf16.mxu0 %v15686_v17 }
 0x646   : > { %14168 = vmatmul.mubr.msk.bf16.vlgmr.msra.gmra.mrb[52].mxu1 %vm350_vm3, %v11041_v12 }
 0x647   : > { %11418 = vmatpush1.bf16.msra.mxu1 %v11391_v20  ;;  %11449 = vmatprep.mubr.bf16.mxu1 %v15686_v17 }
 0x648   : > { %13970 = vmatprep.subr.msk.bf16.mxu1 %vm354_vm2, %v11362_v2 }
 0x64e   : > { %13969 = vmatmul.mubr.msk.bf16.vlgmr.msra.gmra.mrb[40].mxu1 %vm350_vm3, %v11342_v45 }
 0x64f   : > { %11459 = vmatpush1.bf16.msra.mxu1 %v11397_v23  ;;  %11490 = vmatprep.mubr.bf16.mxu1 %v15686_v17 }
 0x650   : > { %13972 = vmatprep.subr.msk.bf16.mxu1 %vm354_vm2, %v11378_v56  ;;  %13986 = vmatmul.mubr.msk.bf16.vlgmr.msra.gmra.mrb[56].mxu0 %vm350_vm3, %v11643_v31 }
 0x656   : > { %13971 = vmatmul.mubr.msk.bf16.vlgmr.msra.gmra.mrb[44].mxu1 %vm350_vm3, %v11342_v45 }
 0x657   : > { %11500 = vmatpush1.bf16.msra.mxu1 %v11403_v63  ;;  %11531 = vmatprep.mubr.bf16.mxu1 %v15686_v17 }
 0x658   : > { %14171 = vmatprep.subr.bf16.mxu1 %v14934_v34 }
 0x65e   : > { %13973 = vmatmul.mubr.msk.bf16.vlgmr.msra.gmra.mrb[48].mxu1 %vm350_vm3, %v11342_v45 }
 0x65f   : > { %14172 = vmatpush3.bf16.msra.mxu1 %v11415_v4  ;;  %14173 = vmatprep.mubr.msk.bf16.mxu1 %vm14935_vm0, %v14934_v34 }
 0x660   : > { %13979 = vmatprep.subr.msk.bf16.mxu1 %vm354_vm2, %v11662_v48 }
 0x666   : > { %14174 = vmatmul.mubr.msk.bf16.vlgmr.msra.gmra.mrb[52].mxu1 %vm350_vm3, %v11342_v45 }
 0x667   : > { %11719 = vmatpush1.bf16.msra.mxu1 %v11692_v47  ;;  %11750 = vmatprep.mubr.bf16.mxu1 %v15686_v17 }
 0x668   : > { %13981 = vmatprep.subr.msk.bf16.mxu1 %vm354_vm2, %v11663_v50 }
 0x66e   : > { %13980 = vmatmul.mubr.msk.bf16.vlgmr.msra.gmra.mrb[40].mxu1 %vm350_vm3, %v11643_v31 }
 0x66f   : > { %11760 = vmatpush1.bf16.msra.mxu1 %v11698_v39  ;;  %11791 = vmatprep.mubr.bf16.mxu1 %v15686_v17 }
 0x670   : > { %13983 = vmatprep.subr.msk.bf16.mxu1 %vm354_vm2, %v11679_v30  ;;  %vm12161_vm2 = vcmask 910080  }
 0x676   : > { %13982 = vmatmul.mubr.msk.bf16.vlgmr.msra.gmra.mrb[44].mxu1 %vm350_vm3, %v11643_v31 }
 0x677   : > { %11801 = vmatpush1.bf16.msra.mxu1 %v11704_v33  ;;  %11832 = vmatprep.mubr.bf16.mxu1 %v15686_v17  ;;  %v17606_v17 = vsub.s32 %v11934_v11, %v15050_v8 }
 0x678   : > { %14177 = vmatprep.subr.bf16.mxu1 %v14934_v34 }
 0x67e   : > { %13984 = vmatmul.mubr.msk.bf16.vlgmr.msra.gmra.mrb[48].mxu1 %vm350_vm3, %v11643_v31 }
 0x67f   : > { %14178 = vmatpush3.bf16.msra.mxu1 %v11716_v3  ;;  %14179 = vmatprep.mubr.msk.bf16.mxu1 %vm14935_vm0, %v14934_v34  ;;  %vm12081_vm0 = vcmask 778880  }
 0x686   : > { %14180 = vmatmul.mubr.msk.bf16.vlgmr.msra.gmra.mrb[52].mxu1 %vm350_vm3, %v11643_v31  ;;  %vm12230_vm3 = vcmask 1041280  }
 0x723   : > { %v11875_v29 = vpop.f32.mrb[56].mxu0 }
 0x724   : > { %v14234_v22 = vadd.f32 %v11875_v29, %v17603_v15  ;;  %v11877_v25 = vpop.f32.mrb[57].mxu0 }
 0x725   : > { %v17610_v19 = vadd.f32 %v11877_v25, %v17603_v15  ;;  %v11879_v34 = vpop.f32.mrb[58].mxu0 }
 0x726   : > { %v13022_v37 = vrot.slane %v14234_v22, %v17606_v17  ;;  %v11880_v12 = vpop.f32.mrb[59].mxu0 }
 0x727   : > { %v13165_v6 = vcombine.low %v14234_v22, %v17610_v19  ;;  %v13248_v51 = vrot.slane %v17610_v19, %v17606_v17 }
 0x728   : > { %v13023_v28 = vcombine.high %v13022_v37, %v13022_v37  ;;  %v13030_v13 = vrot.slane %v13022_v37, %v17606_v17 }
 0x729   : > { %v13172_v9 = vrot.slane %v13165_v6, %v17606_v17  ;;  %v13249_v42 = vcombine.high %v13248_v51, %v13248_v51  ;;  %v17622_v46 = vrot.slane %v13248_v51, %v17606_v17 }
 0x72a   : > { %v13037_v8 = vrot.slane %v13023_v28, %v17606_v17  ;;  %v13046_v52 = vrot.slane %v13030_v13, %v17613_v16  ;;  %v13038_v40 = vcombine.high %v13030_v13, %v13030_v13 }
 0x72b   : > { %v13173_v32 = vcombine.high %v13172_v9, %v13172_v9  ;;  %v17627_v49 = vrot.slane %v13172_v9, %v17606_v17  ;;  %v17630_v35 = vrot.slane %v13249_v42, %v17606_v17  ;;  %v13272_v24 = vrot.slane %v17622_v46, %v17613_v16 }
 0x72c   : > { %v13039_v26 = vcombine.high %v13037_v8, %v13037_v8  ;;  %13068 = vrot.lane.b32.xlu1 %v13046_v52, %s14949_s14  ;;  %v17668_v45 = vrot.slane %v13037_v8, %v17613_v16  ;;  %v17679_v58 = vrot.slane %v13038_v40, %v17613_v16 }
 0x72d   : > { %v13265_v41 = vcombine.high %v17630_v35, %v17630_v35  ;;  %13310 = vrot.lane.b32.xlu0 %v13272_v24, %s14971_s12  ;;  %v13188_v59 = vcombine.high %v17627_v49, %v17627_v49  ;;  %v17644_v60 = vrot.slane %v13173_v32, %v17606_v17 }
 0x72e   : > { %v17638_v53 = vrot.slane %v13039_v26, %v17613_v16 }
 0x72f   : > { %v17647_v54 = vrot.slane %v13265_v41, %v17613_v16  ;;  %v17651_v62 = vrot.slane %v13188_v59, %v17613_v16  ;;  %v13203_v44 = vrot.slane %v17644_v60, %v17613_v16  ;;  %v13189_v18 = vcombine.high %v17644_v60, %v17644_v60 }
 0x730   : > { %13084 = vrot.lane.b32.xlu1 %v13046_v52, %s14972_s13 }
 0x731   : > { %13326 = vrot.lane.b32.xlu0 %v13272_v24, %s14973_s17  ;;  %v17659_v7 = vrot.slane %v13189_v18, %v17613_v16 }
 0x734   : > { %13100 = vrot.lane.b32.xlu1 %v13046_v52, %s14974_s18 }
 0x735   : > { %13342 = vrot.lane.b32.xlu0 %v13272_v24, %s14975_s19 }
 0x738   : > { %13116 = vrot.lane.b32.xlu1 %v13046_v52, %s14976_s20 }
 0x739   : > { %13358 = vrot.lane.b32.xlu0 %v13272_v24, %s14977_s21 }
 0x73c   : > { %13132 = vrot.lane.b32.xlu1 %v13046_v52, %s14978_s24 }
 0x73d   : > { %13374 = vrot.lane.b32.xlu0 %v13272_v24, %s14979_s25 }
 0x740   : > { %13148 = vrot.lane.b32.xlu1 %v13046_v52, %s14980_s26  ;;  %v13264_v52 = vcombine.high %v17622_v46, %v17622_v46 }
 0x741   : > { %v11752_v0 = vpop.f32.mrb[40].mxu1  ;;  %13070 = vrot.lane.b32.xlu0 %v17668_v45, %s14949_s14 }
 0x742   : > { %v14228_v20 = vadd.f32 %v11752_v0, %v17603_v15  ;;  %v11754_v2 = vpop.f32.mrb[41].mxu1 }
 0x743   : > { %v14229_v38 = vadd.f32 %v11754_v2, %v17603_v15  ;;  %v11756_v31 = vpop.f32.mrb[42].mxu1  ;;  %v17755_v2 = vrot.slane %v17630_v35, %v17613_v16 }
 0x744   : > { %v11938_v23 = vrot.slane %v14228_v20, %v17606_v17  ;;  %13294 = vrot.lane.b32.xlu1 %v13272_v24, %s14981_s28  ;;  %v11757_v56 = vpop.f32.mrb[43].mxu1 }
 0x745   : > { %v12087_v63 = vcombine.low %v14228_v20, %v14229_v38  ;;  %v12172_v43 = vrot.slane %v14229_v38, %v17606_v17  ;;  %13086 = vrot.lane.b32.xlu0 %v17668_v45, %s14972_s13 }
 0x746   : > { %v11939_v57 = vcombine.high %v11938_v23, %v11938_v23  ;;  %v11946_v4 = vrot.slane %v11938_v23, %v17606_v17 }
 0x747   : > { %v12094_v48 = vrot.slane %v12087_v63, %v17606_v17  ;;  %v12173_v5 = vcombine.high %v12172_v43, %v12172_v43  ;;  %v12180_v36 = vrot.slane %v12172_v43, %v17606_v17 }
 0x748   : > { %v11953_v47 = vrot.slane %v11939_v57, %v17606_v17  ;;  %v11954_v50 = vcombine.high %v11946_v4, %v11946_v4  ;;  %v17688_v61 = vrot.slane %v11946_v4, %v17613_v16  ;;  %13072 = vrot.lane.b32.xlu1 %v17679_v58, %s14949_s14 }
 0x749   : > { %v12095_v39 = vcombine.high %v12094_v48, %v12094_v48  ;;  %v17693_v30 = vrot.slane %v12094_v48, %v17606_v17  ;;  %v12187_v33 = vrot.slane %v12173_v5, %v17606_v17  ;;  %v12188_v10 = vcombine.high %v12180_v36, %v12180_v36  ;;  %v11793_v3 = vpop.f32.mrb[44].mxu1  ;;  %13102 = vrot.lane.b32.xlu0 %v17668_v45, %s14974_s18 }
 0x74a   : > { %v11955_v14 = vcombine.high %v11953_v47, %v11953_v47  ;;  %v17697_v55 = vrot.slane %v11953_v47, %v17613_v16  ;;  %v17700_v11 = vrot.slane %v11954_v50, %v17613_v16  ;;  %v17703_v27 = vrot.slane %v12180_v36, %v17613_v16  ;;  %v11795_v21 = vpop.f32.mrb[45].mxu1 }
 0x74b   : > { %v12189_v1 = vcombine.high %v12187_v33, %v12187_v33  ;;  %v17708_v29 = vrot.slane %v12187_v33, %v17613_v16  ;;  %v17711_v22 = vrot.slane %v12188_v10, %v17613_v16  ;;  %v14230_v25 = vadd.f32 %v11793_v3, %v17603_v15  ;;  %v11797_v34 = vpop.f32.mrb[46].mxu1 }
 0x74c   : > { %v17715_v37 = vrot.slane %v11955_v14, %v17613_v16  ;;  %v14231_v12 = vadd.f32 %v11795_v21, %v17603_v15  ;;  %13088 = vrot.lane.b32.xlu1 %v17679_v58, %s14972_s13  ;;  %v11798_v6 = vpop.f32.mrb[47].mxu1  ;;  %v12118_v51 = vrot.slane %v17693_v30, %v17613_v16  ;;  %v17723_v28 = vrot.slane %v12095_v39, %v17606_v17 }
 0x74d   : > { %v17726_v13 = vrot.slane %v12189_v1, %v17613_v16  ;;  %v12316_v9 = vcombine.low %v14229_v38, %v14230_v25  ;;  %v12400_v42 = vrot.slane %v14230_v25, %v17606_v17  ;;  %v12110_v8 = vcombine.high %v17693_v30, %v17693_v30  ;;  %13118 = vrot.lane.b32.xlu0 %v17668_v45, %s14976_s20 }
 0x74e   : > { %v12485_v32 = vrot.slane %v14231_v12, %v17606_v17  ;;  %v12111_v24 = vcombine.high %v17723_v28, %v17723_v28  ;;  %v17774_v48 = vrot.slane %v13264_v52, %v17613_v16  ;;  %v13196_v50 = vrot.slane %v17627_v49, %v17613_v16 }
 0x74f   : > { %v12323_v41 = vrot.slane %v12316_v9, %v17606_v17  ;;  %v12401_v59 = vcombine.high %v12400_v42, %v12400_v42  ;;  %v17742_v18 = vrot.slane %v12400_v42, %v17606_v17  ;;  %v17745_v0 = vrot.slane %v12110_v8, %v17613_v16 }
 0x750   : > { %v12486_v46 = vcombine.high %v12485_v32, %v12485_v32  ;;  %v12493_v40 = vrot.slane %v12485_v32, %v17606_v17  ;;  %13104 = vrot.lane.b32.xlu1 %v17679_v58, %s14974_s18  ;;  %v17751_v20 = vrot.slane %v12111_v24, %v17613_v16 }
 0x751   : > { %v12324_v38 = vcombine.high %v12323_v41, %v12323_v41  ;;  %v17758_v31 = vrot.slane %v12323_v41, %v17606_v17  ;;  %v17761_v23 = vrot.slane %v12401_v59, %v17606_v17  ;;  %v11834_v56 = vpop.f32.mrb[48].mxu1  ;;  %v17765_v63 = vrot.slane %v17742_v18, %v17613_v16  ;;  %13134 = vrot.lane.b32.xlu0 %v17668_v45, %s14978_s24 }
 0x752   : > { %v12500_v43 = vrot.slane %v12486_v46, %v17606_v17  ;;  %v12501_v57 = vcombine.high %v12493_v40, %v12493_v40  ;;  %v17769_v4 = vrot.slane %v12493_v40, %v17613_v16  ;;  %v11836_v35 = vpop.f32.mrb[49].mxu1  ;;  %v14232_v36 = vadd.f32 %v11834_v56, %v17603_v15 }
 0x753   : > { %v17777_v5 = vrot.slane %v12324_v38, %v17606_v17  ;;  %v11838_v47 = vpop.f32.mrb[50].mxu1  ;;  %v14233_v3 = vadd.f32 %v11836_v35, %v17603_v15  ;;  %v12339_v21 = vcombine.high %v17758_v31, %v17758_v31  ;;  %v12416_v1 = vcombine.high %v17742_v18, %v17742_v18 }
 0x754   : > { %v12502_v39 = vcombine.high %v12500_v43, %v12500_v43  ;;  %v17783_v33 = vrot.slane %v12500_v43, %v17613_v16  ;;  %v17786_v10 = vrot.slane %v12501_v57, %v17613_v16  ;;  %13120 = vrot.lane.b32.xlu1 %v17679_v58, %s14976_s20  ;;  %v11839_v14 = vpop.f32.mrb[51].mxu1  ;;  %v12628_v49 = vcombine.low %v14231_v12, %v14232_v36 }
 0x755   : > { %v12711_v25 = vrot.slane %v14232_v36, %v17606_v17  ;;  %v12417_v34 = vcombine.high %v17761_v23, %v17761_v23  ;;  %v12854_v9 = vcombine.low %v14232_v36, %v14233_v3  ;;  %v12937_v42 = vrot.slane %v14233_v3, %v17606_v17  ;;  %13150 = vrot.lane.b32.xlu0 %v17668_v45, %s14980_s26 }
 0x756   : > { %v17799_v6 = vrot.slane %v12502_v39, %v17613_v16  ;;  %v12635_v8 = vrot.slane %v12628_v49, %v17606_v17  ;;  %v17808_v12 = vrot.slane %v17761_v23, %v17613_v16 }
 0x757   : > { %v12712_v52 = vcombine.high %v12711_v25, %v12711_v25  ;;  %v12719_v32 = vrot.slane %v12711_v25, %v17606_v17  ;;  %v12861_v24 = vrot.slane %v12854_v9, %v17606_v17  ;;  %v12938_v41 = vcombine.high %v12937_v42, %v12937_v42 }
 0x758   : > { %v12945_v59 = vrot.slane %v12937_v42, %v17606_v17  ;;  %13136 = vrot.lane.b32.xlu1 %v17679_v58, %s14978_s24  ;;  %v12636_v18 = vcombine.high %v12635_v8, %v12635_v8  ;;  %v17817_v46 = vrot.slane %v12635_v8, %v17606_v17 }
 0x759   : > { %v12726_v40 = vrot.slane %v12712_v52, %v17606_v17  ;;  %v12727_v38 = vcombine.high %v12719_v32, %v12719_v32  ;;  %v11916_v23 = vpop.f32.mrb[52].mxu1  ;;  %v17821_v56 = vrot.slane %v12719_v32, %v17613_v16  ;;  %v12862_v43 = vcombine.high %v12861_v24, %v12861_v24  ;;  %13296 = vrot.lane.b32.xlu0 %v17755_v2, %s14981_s28 }
 0x75a   : > { %v17824_v57 = vrot.slane %v12861_v24, %v17606_v17  ;;  %v12952_v35 = vrot.slane %v12938_v41, %v17606_v17  ;;  %v14181_v36 = vpop.f32.mrb[53].mxu1  ;;  %v12953_v14 = vcombine.high %v12945_v59, %v12945_v59  ;;  %v17841_v8 = vrot.slane %v12945_v59, %v17613_v16 }
 0x75b   : > { %v12728_v47 = vcombine.high %v12726_v40, %v12726_v40  ;;  %v17830_v39 = vrot.slane %v12726_v40, %v17613_v16  ;;  %v17833_v3 = vrot.slane %v12727_v38, %v17613_v16  ;;  %v11919_v49 = vpop.f32.mrb[54].mxu1  ;;  %v17836_v25 = vrot.slane %v12862_v43, %v17606_v17 }
 0x75c   : > { %v12877_v9 = vcombine.high %v17824_v57, %v17824_v57  ;;  %v12954_v42 = vcombine.high %v12952_v35, %v12952_v35  ;;  %13152 = vrot.lane.b32.xlu1 %v17679_v58, %s14980_s26  ;;  %v14182_v52 = vpop.f32.mrb[55].mxu1  ;;  %v14236_v24 = vadd.f32 %v11916_v23, %v17603_v15  ;;  %v17852_v40 = vrot.slane %v12416_v1, %v17613_v16 }
 0x75d   : > { %v17846_v32 = vrot.slane %v12728_v47, %v17613_v16  ;;  %13314 = vrot.lane.b32.xlu0 %v17774_v48, %s14971_s12  ;;  %v17857_v59 = vrot.slane %v12417_v34, %v17613_v16  ;;  %v17860_v58 = vrot.slane %v12339_v21, %v17613_v16  ;;  %v12340_v38 = vcombine.high %v17777_v5, %v17777_v5 }
 0x75e   : > { %v17865_v15 = vrot.slane %v12952_v35, %v17613_v16  ;;  %v13391_v23 = vcombine.low %v17610_v19, %v14236_v24  ;;  %v13474_v1 = vrot.slane %v14236_v24, %v17606_v17  ;;  %v17872_v36 = vrot.slane %v12636_v18, %v17606_v17 }
 0x75f   : > { %v17876_v21 = vrot.slane %v12340_v38, %v17613_v16  ;;  %v17883_v35 = vrot.slane %v12953_v14, %v17613_v16  ;;  %v17892_v52 = vrot.slane %v12954_v42, %v17613_v16  ;;  %v12651_v24 = vcombine.high %v17817_v46, %v17817_v46 }
 0x760   : > { %13218 = vrot.lane.b32.xlu1 %v13196_v50, %s14982_s30  ;;  %v13398_v47 = vrot.slane %v13391_v23, %v17606_v17  ;;  %v13475_v49 = vcombine.high %v13474_v1, %v13474_v1  ;;  %v13482_v18 = vrot.slane %v13474_v1, %v17606_v17  ;;  %v12652_v14 = vcombine.high %v17872_v36, %v17872_v36 }
 0x761   : > { %13330 = vrot.lane.b32.xlu0 %v17774_v48, %s14973_s17  ;;  %v17899_v38 = vrot.slane %v12877_v9, %v17613_v16  ;;  %v17911_v42 = vrot.slane %v12651_v24, %v17613_v16  ;;  %v12878_v9 = vcombine.high %v17836_v25, %v17836_v25 }
 0x762   : > { %v13399_v23 = vcombine.high %v13398_v47, %v13398_v47  ;;  %v17902_v1 = vrot.slane %v13398_v47, %v17606_v17  ;;  %v13489_v19 = vrot.slane %v13475_v49, %v17606_v17  ;;  %v13490_v34 = vcombine.high %v13482_v18, %v13482_v18 }
 0x763   : > { %v17906_v50 = vrot.slane %v13482_v18, %v17613_v16  ;;  %v17914_v43 = vrot.slane %v12652_v14, %v17613_v16  ;;  %v17929_v24 = vrot.slane %v12878_v9, %v17613_v16 }
 0x764   : > { %13298 = vrot.lane.b32.xlu1 %v17774_v48, %s14981_s28  ;;  %v17919_v47 = vrot.slane %v13399_v23, %v17606_v17  ;;  %v13414_v49 = vcombine.high %v17902_v1, %v17902_v1  ;;  %v13491_v18 = vcombine.high %v13489_v19, %v13489_v19  ;;  %v17924_v41 = vrot.slane %v13489_v19, %v17613_v16 }
 0x765   : > { %13346 = vrot.lane.b32.xlu0 %v17774_v48, %s14975_s19  ;;  %v13422_v14 = vrot.slane %v17902_v1, %v17613_v16  ;;  %v17934_v45 = vrot.slane %v13490_v34, %v17613_v16 }
 0x766   : > { %v13429_v17 = vrot.slane %v17919_v47, %v17613_v16  ;;  %v17939_v23 = vrot.slane %v13491_v18, %v17613_v16  ;;  %v13415_v19 = vcombine.high %v17919_v47, %v17919_v47  ;;  %v17944_v26 = vrot.slane %v13414_v49, %v17613_v16 }
 0x768   : > { %13312 = vrot.lane.b32.xlu1 %v17755_v2, %s14971_s12  ;;  %v17949_v9 = vrot.slane %v13415_v19, %v17613_v16 }
 0x769   : > { %13362 = vrot.lane.b32.xlu0 %v17774_v48, %s14977_s21 }
 0x76c   : > { %13328 = vrot.lane.b32.xlu1 %v17755_v2, %s14973_s17 }
 0x76d   : > { %13378 = vrot.lane.b32.xlu0 %v17774_v48, %s14979_s25 }
 0x770   : > { %13344 = vrot.lane.b32.xlu1 %v17755_v2, %s14975_s19 }
 0x771   : > { %13074 = vrot.lane.b32.xlu0 %v17638_v53, %s14949_s14 }
 0x774   : > { %13360 = vrot.lane.b32.xlu1 %v17755_v2, %s14977_s21 }
 0x775   : > { %13090 = vrot.lane.b32.xlu0 %v17638_v53, %s14972_s13 }
 0x778   : > { %13376 = vrot.lane.b32.xlu1 %v17755_v2, %s14979_s25 }
 0x779   : > { %13106 = vrot.lane.b32.xlu0 %v17638_v53, %s14974_s18 }
 0x77c   : > { %13222 = vrot.lane.b32.xlu1 %v17651_v62, %s14982_s30 }
 0x77d   : > { %13122 = vrot.lane.b32.xlu0 %v17638_v53, %s14976_s20 }
 0x780   : > { %13316 = vrot.lane.b32.xlu1 %v17647_v54, %s14971_s12 }
 0x781   : > { %13138 = vrot.lane.b32.xlu0 %v17638_v53, %s14978_s24 }
 0x784   : > { %13332 = vrot.lane.b32.xlu1 %v17647_v54, %s14973_s17 }
 0x785   : > { %13154 = vrot.lane.b32.xlu0 %v17638_v53, %s14980_s26 }
 0x788   : > { %13348 = vrot.lane.b32.xlu1 %v17647_v54, %s14975_s19 }
 0x789   : > { %13220 = vrot.lane.b32.xlu0 %v13203_v44, %s14982_s30 }
 0x78c   : > { %13364 = vrot.lane.b32.xlu1 %v17647_v54, %s14977_s21 }
 0x78d   : > { %13300 = vrot.lane.b32.xlu0 %v17647_v54, %s14981_s28 }
 0x790   : > { %13380 = vrot.lane.b32.xlu1 %v17647_v54, %s14979_s25 }
 0x791   : > { %13224 = vrot.lane.b32.xlu0 %v17659_v7, %s14982_s30 }
 0x794   : > { %11984 = vrot.lane.b32.xlu1 %v17688_v61, %s14949_s14 }
 0x795   : > { %11986 = vrot.lane.b32.xlu0 %v17697_v55, %s14949_s14 }
 0x798   : > { %12001 = vrot.lane.b32.xlu1 %v17688_v61, %s14972_s13 }
 0x799   : > { %12003 = vrot.lane.b32.xlu0 %v17697_v55, %s14972_s13 }
 0x79c   : > { %12018 = vrot.lane.b32.xlu1 %v17688_v61, %s14974_s18 }
 0x79d   : > { %12020 = vrot.lane.b32.xlu0 %v17697_v55, %s14974_s18 }
 0x79e   : > { %v13069_v53 = vpop.permute.xlu1 %13068 }
 0x79f   : > { %13080 = vst.msk [vmem:[%s18007_s22 + $0x2] sm:$0x1] %vm11996_vm11, %v13069_v53  ;;  %v13311_v60 = vpop.permute.xlu0 %13310 }
 0x7a0   : > { %12035 = vrot.lane.b32.xlu1 %v17688_v61, %s14976_s20  ;;  %13322 = vst.msk [vmem:[%s18007_s22 + $0x6] sm:$0x1] %vm11996_vm11, %v13311_v60 }
 0x7a1   : > { %12037 = vrot.lane.b32.xlu0 %v17697_v55, %s14976_s20 }
 0x7a2   : > { %v13085_v54 = vpop.permute.xlu1 %13084 }
 0x7a3   : > { %13096 = vst.msk [vmem:[%s18007_s22 + $0x2] sm:$0x1] %vm12013_vm12, %v13085_v54  ;;  %v13327_v62 = vpop.permute.xlu0 %13326 }
 0x7a4   : > { %12052 = vrot.lane.b32.xlu1 %v17688_v61, %s14978_s24  ;;  %13338 = vst.msk [vmem:[%s18007_s22 + $0x6] sm:$0x1] %vm12013_vm12, %v13327_v62 }
 0x7a5   : > { %12054 = vrot.lane.b32.xlu0 %v17697_v55, %s14978_s24 }
 0x7a6   : > { %v13101_v44 = vpop.permute.xlu1 %13100 }
 0x7a7   : > { %13112 = vst.msk [vmem:[%s18007_s22 + $0x2] sm:$0x1] %vm12030_vm13, %v13101_v44  ;;  %v13343_v7 = vpop.permute.xlu0 %13342 }
 0x7a8   : > { %12069 = vrot.lane.b32.xlu1 %v17688_v61, %s14980_s26  ;;  %13354 = vst.msk [vmem:[%s18007_s22 + $0x6] sm:$0x1] %vm12030_vm13, %v13343_v7 }
 0x7a9   : > { %12071 = vrot.lane.b32.xlu0 %v17697_v55, %s14980_s26 }
 0x7aa   : > { %v13117_v2 = vpop.permute.xlu1 %13116 }
 0x7ab   : > { %13128 = vst.msk [vmem:[%s18007_s22 + $0x2] sm:$0x1] %vm12047_vm14, %v13117_v2  ;;  %v13359_v48 = vpop.permute.xlu0 %13358 }
 0x7ac   : > { %12218 = vrot.lane.b32.xlu1 %v17703_v27, %s14981_s28  ;;  %13370 = vst.msk [vmem:[%s18007_s22 + $0x6] sm:$0x1] %vm12047_vm14, %v13359_v48 }
 0x7ad   : > { %12220 = vrot.lane.b32.xlu0 %v17708_v29, %s14981_s28 }
 0x7ae   : > { %v13133_v61 = vpop.permute.xlu1 %13132 }
 0x7af   : > { %13144 = vst.msk [vmem:[%s18007_s22 + $0x2] sm:$0x1] %vm12064_vm15, %v13133_v61  ;;  %v13375_v55 = vpop.permute.xlu0 %13374 }
 0x7b0   : > { %12235 = vrot.lane.b32.xlu1 %v17703_v27, %s14971_s12  ;;  %13386 = vst.msk [vmem:[%s18007_s22 + $0x6] sm:$0x1] %vm12064_vm15, %v13375_v55 }
 0x7b1   : > { %12237 = vrot.lane.b32.xlu0 %v17708_v29, %s14971_s12 }
 0x7b2   : > { %v13149_v34 = vpop.permute.xlu1 %13148 }
 0x7b3   : > { %13160 = vst.msk [vmem:[%s18007_s22 + $0x2] sm:$0x1] %vm12081_vm0, %v13149_v34  ;;  %v13071_v49 = vpop.permute.xlu0 %13070 }
 0x7b4   : > { %12251 = vrot.lane.b32.xlu1 %v17703_v27, %s14973_s17  ;;  %13081 = vst.msk [vmem:[%s18007_s22 + $0xa] sm:$0x1] %vm11996_vm11, %v13071_v49 }
 0x7b5   : > { %12253 = vrot.lane.b32.xlu0 %v17708_v29, %s14973_s17 }
 0x7b6   : > { %v13295_v18 = vpop.permute.xlu1 %13294 }
 0x7b7   : > { %v13087_v19 = vpop.permute.xlu0 %13086 }
 0x7b8   : > { %12267 = vrot.lane.b32.xlu1 %v17703_v27, %s14975_s19  ;;  %13097 = vst.msk [vmem:[%s18007_s22 + $0xa] sm:$0x1] %vm12013_vm12, %v13087_v19 }
 0x7b9   : > { %12269 = vrot.lane.b32.xlu0 %v17708_v29, %s14975_s19 }
 0x7ba   : > { %v13073_v53 = vpop.permute.xlu1 %13072 }
 0x7bb   : > { %13082 = vst.msk [vmem:[%s18007_s22 + $0x12] sm:$0x1] %vm11996_vm11, %v13073_v53  ;;  %v13103_v60 = vpop.permute.xlu0 %13102 }
 0x7bc   : > { %12283 = vrot.lane.b32.xlu1 %v17703_v27, %s14977_s21  ;;  %13113 = vst.msk [vmem:[%s18007_s22 + $0xa] sm:$0x1] %vm12030_vm13, %v13103_v60 }
 0x7bd   : > { %12285 = vrot.lane.b32.xlu0 %v17708_v29, %s14977_s21 }
 0x7be   : > { %v13089_v54 = vpop.permute.xlu1 %13088 }
 0x7bf   : > { %13098 = vst.msk [vmem:[%s18007_s22 + $0x12] sm:$0x1] %vm12013_vm12, %v13089_v54  ;;  %v13119_v62 = vpop.permute.xlu0 %13118 }
 0x7c0   : > { %12299 = vrot.lane.b32.xlu1 %v17703_v27, %s14979_s25  ;;  %13129 = vst.msk [vmem:[%s18007_s22 + $0xa] sm:$0x1] %vm12047_vm14, %v13119_v62 }
 0x7c1   : > { %12301 = vrot.lane.b32.xlu0 %v17708_v29, %s14979_s25 }
 0x7c2   : > { %v13105_v44 = vpop.permute.xlu1 %13104 }
 0x7c3   : > { %13114 = vst.msk [vmem:[%s18007_s22 + $0x12] sm:$0x1] %vm12030_vm13, %v13105_v44  ;;  %v13135_v7 = vpop.permute.xlu0 %13134 }
 0x7c4   : > { %11988 = vrot.lane.b32.xlu1 %v17700_v11, %s14949_s14  ;;  %13145 = vst.msk [vmem:[%s18007_s22 + $0xa] sm:$0x1] %vm12064_vm15, %v13135_v7 }
 0x7c5   : > { %11990 = vrot.lane.b32.xlu0 %v17715_v37, %s14949_s14 }
 0x7c6   : > { %v13121_v27 = vpop.permute.xlu1 %13120 }
 0x7c7   : > { %13130 = vst.msk [vmem:[%s18007_s22 + $0x12] sm:$0x1] %vm12047_vm14, %v13121_v27  ;;  %v13151_v2 = vpop.permute.xlu0 %13150 }
 0x7c8   : > { %12005 = vrot.lane.b32.xlu1 %v17700_v11, %s14972_s13  ;;  %13161 = vst.msk [vmem:[%s18007_s22 + $0xa] sm:$0x1] %vm12081_vm0, %v13151_v2 }
 0x7c9   : > { %12007 = vrot.lane.b32.xlu0 %v17715_v37, %s14972_s13 }
 0x7ca   : > { %v13137_v29 = vpop.permute.xlu1 %13136 }
 0x7cb   : > { %13146 = vst.msk [vmem:[%s18007_s22 + $0x12] sm:$0x1] %vm12064_vm15, %v13137_v29  ;;  %v18101_v48 = vpop.permute.xlu0 %13296 }
 0x7cc   : > { %12022 = vrot.lane.b32.xlu1 %v17700_v11, %s14974_s18 }
 0x7cd   : > { %12024 = vrot.lane.b32.xlu0 %v17715_v37, %s14974_s18 }
 0x7ce   : > { %v13153_v61 = vpop.permute.xlu1 %13152 }
 0x7cf   : > { %13162 = vst.msk [vmem:[%s18007_s22 + $0x12] sm:$0x1] %vm12081_vm0, %v13153_v61  ;;  %v13315_v55 = vpop.permute.xlu0 %13314 }
 0x7d0   : > { %12039 = vrot.lane.b32.xlu1 %v17700_v11, %s14976_s20  ;;  %13324 = vst.msk [vmem:[%s18007_s22 + $0x16] sm:$0x1] %vm11996_vm11, %v13315_v55 }
 0x7d1   : > { %12041 = vrot.lane.b32.xlu0 %v17715_v37, %s14976_s20 }
 0x7d2   : > { %v13219_v34 = vpop.permute.xlu1 %13218 }
 0x7d3   : > { %v13226_v49 = vrot.slane %v13219_v34, 4  ;;  %v13331_v19 = vpop.permute.xlu0 %13330 }
 0x7d4   : > { %12056 = vrot.lane.b32.xlu1 %v17700_v11, %s14978_s24  ;;  %13340 = vst.msk [vmem:[%s18007_s22 + $0x16] sm:$0x1] %vm12013_vm12, %v13331_v19 }
 0x7d5   : > { %v13230_v53 = vsel %vm12152_vm1, %v13219_v34, %v13226_v49  ;;  %12058 = vrot.lane.b32.xlu0 %v17715_v37, %s14978_s24 }
 0x7d6   : > { %13238 = vst.msk [vmem:[%s18007_s22 + $0x2] sm:$0x1] %vm12161_vm2, %v13230_v53  ;;  %v13299_v60 = vpop.permute.xlu1 %13298 }
 0x7d7   : > { %13306 = vst.msk [vmem:[%s18007_s22 + $0x2] sm:$0x1] %vm12230_vm3, %v13295_v18  ;;  %v13347_v54 = vpop.permute.xlu0 %13346 }
 0x7d8   : > { %12073 = vrot.lane.b32.xlu1 %v17700_v11, %s14980_s26  ;;  %13356 = vst.msk [vmem:[%s18007_s22 + $0x16] sm:$0x1] %vm12030_vm13, %v13347_v54  ;;  %v18727_v11 = vrot.slane %v17723_v28, %v17613_v16 }
 0x7d9   : > { %12075 = vrot.lane.b32.xlu0 %v17715_v37, %s14980_s26 }
 0x7da   : > { %v13313_v62 = vpop.permute.xlu1 %13312 }
 0x7db   : > { %13323 = vst.msk [vmem:[%s18007_s22 + $0xe] sm:$0x1] %vm11996_vm11, %v13313_v62  ;;  %v13363_v44 = vpop.permute.xlu0 %13362 }
 0x7dc   : > { %12140 = vrot.lane.b32.xlu1 %v12118_v51, %s14982_s30  ;;  %13372 = vst.msk [vmem:[%s18007_s22 + $0x16] sm:$0x1] %vm12047_vm14, %v13363_v44 }
 0x7dd   : > { %12142 = vrot.lane.b32.xlu0 %v18727_v11, %s14982_s30 }
 0x7de   : > { %v13329_v18 = vpop.permute.xlu1 %13328 }
 0x7df   : > { %13339 = vst.msk [vmem:[%s18007_s22 + $0xe] sm:$0x1] %vm12013_vm12, %v13329_v18  ;;  %v13379_v37 = vpop.permute.xlu0 %13378 }
 0x7e0   : > { %12222 = vrot.lane.b32.xlu1 %v17711_v22, %s14981_s28  ;;  %13388 = vst.msk [vmem:[%s18007_s22 + $0x16] sm:$0x1] %vm12064_vm15, %v13379_v37 }
 0x7e1   : > { %12224 = vrot.lane.b32.xlu0 %v17726_v13, %s14981_s28 }
 0x7e2   : > { %v13345_v30 = vpop.permute.xlu1 %13344 }
 0x7e3   : > { %13355 = vst.msk [vmem:[%s18007_s22 + $0xe] sm:$0x1] %vm12030_vm13, %v13345_v30  ;;  %v13075_v51 = vpop.permute.xlu0 %13074 }
 0x7e4   : > { %12239 = vrot.lane.b32.xlu1 %v17711_v22, %s14971_s12  ;;  %13083 = vst.msk [vmem:[%s18007_s22 + $0x1a] sm:$0x1] %vm11996_vm11, %v13075_v51 }
 0x7e5   : > { %12241 = vrot.lane.b32.xlu0 %v17726_v13, %s14971_s12 }
 0x7e6   : > { %v13361_v28 = vpop.permute.xlu1 %13360 }
 0x7e7   : > { %13371 = vst.msk [vmem:[%s18007_s22 + $0xe] sm:$0x1] %vm12047_vm14, %v13361_v28  ;;  %v13091_v7 = vpop.permute.xlu0 %13090 }
 0x7e8   : > { %12255 = vrot.lane.b32.xlu1 %v17711_v22, %s14973_s17  ;;  %13099 = vst.msk [vmem:[%s18007_s22 + $0x1a] sm:$0x1] %vm12013_vm12, %v13091_v7 }
 0x7e9   : > { %12257 = vrot.lane.b32.xlu0 %v17726_v13, %s14973_s17 }
 0x7ea   : > { %v13377_v27 = vpop.permute.xlu1 %13376 }
 0x7eb   : > { %13387 = vst.msk [vmem:[%s18007_s22 + $0xe] sm:$0x1] %vm12064_vm15, %v13377_v27  ;;  %v13107_v2 = vpop.permute.xlu0 %13106 }
 0x7ec   : > { %12271 = vrot.lane.b32.xlu1 %v17711_v22, %s14975_s19  ;;  %13115 = vst.msk [vmem:[%s18007_s22 + $0x1a] sm:$0x1] %vm12030_vm13, %v13107_v2 }
 0x7ed   : > { %12273 = vrot.lane.b32.xlu0 %v17726_v13, %s14975_s19 }
 0x7ee   : > { %v13223_v29 = vpop.permute.xlu1 %13222 }
 0x7ef   : > { %v13228_v61 = vrot.slane %v13223_v29, 4  ;;  %v13123_v55 = vpop.permute.xlu0 %13122 }
 0x7f0   : > { %12287 = vrot.lane.b32.xlu1 %v17711_v22, %s14977_s21  ;;  %13131 = vst.msk [vmem:[%s18007_s22 + $0x1a] sm:$0x1] %vm12047_vm14, %v13123_v55 }
 0x7f1   : > { %v13232_v34 = vsel %vm12152_vm1, %v13223_v29, %v13228_v61  ;;  %12289 = vrot.lane.b32.xlu0 %v17726_v13, %s14977_s21 }
 0x7f2   : > { %13240 = vst.msk [vmem:[%s18007_s22 + $0x12] sm:$0x1] %vm12161_vm2, %v13232_v34  ;;  %v13317_v49 = vpop.permute.xlu1 %13316  ;;  %v18728_v34 = vrot.slane %v17758_v31, %v17613_v16 }
 0x7f3   : > { %13308 = vst.msk [vmem:[%s18007_s22 + $0x12] sm:$0x1] %vm12230_vm3, %v13299_v60  ;;  %v13139_v19 = vpop.permute.xlu0 %13138 }
 0x7f4   : > { %13325 = vst.msk [vmem:[%s18007_s22 + $0x1e] sm:$0x1] %vm11996_vm11, %v13317_v49  ;;  %12303 = vrot.lane.b32.xlu1 %v17711_v22, %s14979_s25 }
 0x7f5   : > { %13147 = vst.msk [vmem:[%s18007_s22 + $0x1a] sm:$0x1] %vm12064_vm15, %v13139_v19  ;;  %12305 = vrot.lane.b32.xlu0 %v17726_v13, %s14979_s25 }
 0x7f6   : > { %v13333_v53 = vpop.permute.xlu1 %13332 }
 0x7f7   : > { %13341 = vst.msk [vmem:[%s18007_s22 + $0x1e] sm:$0x1] %vm12013_vm12, %v13333_v53  ;;  %v13155_v54 = vpop.permute.xlu0 %13154 }
 0x7f8   : > { %12144 = vrot.lane.b32.xlu1 %v17745_v0, %s14982_s30  ;;  %13163 = vst.msk [vmem:[%s18007_s22 + $0x1a] sm:$0x1] %vm12081_vm0, %v13155_v54 }
 0x7f9   : > { %12146 = vrot.lane.b32.xlu0 %v17751_v20, %s14982_s30 }
 0x7fa   : > { %v13349_v22 = vpop.permute.xlu1 %13348 }
 0x7fb   : > { %13357 = vst.msk [vmem:[%s18007_s22 + $0x1e] sm:$0x1] %vm12030_vm13, %v13349_v22  ;;  %v13221_v13 = vpop.permute.xlu0 %13220 }
 0x7fc   : > { %12446 = vrot.lane.b32.xlu1 %v17765_v63, %s14983_s16  ;;  %v13227_v60 = vrot.slane %v13221_v13, 4 }
 0x7fd   : > { %12448 = vrot.lane.b32.xlu0 %v17808_v12, %s14983_s16 }
 0x7fe   : > { %v13365_v0 = vpop.permute.xlu1 %13364  ;;  %v13231_v62 = vsel %vm12152_vm1, %v13221_v13, %v13227_v60 }
 0x7ff   : > { %13373 = vst.msk [vmem:[%s18007_s22 + $0x1e] sm:$0x1] %vm12047_vm14, %v13365_v0  ;;  %v13301_v20 = vpop.permute.xlu0 %13300 }
 0x800   : > { %13239 = vst.msk [vmem:[%s18007_s22 + $0xa] sm:$0x1] %vm12161_vm2, %v13231_v62  ;;  %12462 = vrot.lane.b32.xlu1 %v17765_v63, %s14984_s23 }
 0x801   : > { %13307 = vst.msk [vmem:[%s18007_s22 + $0xa] sm:$0x1] %vm12230_vm3, %v18101_v48  ;;  %12464 = vrot.lane.b32.xlu0 %v17808_v12, %s14984_s23 }
 0x802   : > { %v13381_v44 = vpop.permute.xlu1 %13380 }
 0x803   : > { %13389 = vst.msk [vmem:[%s18007_s22 + $0x1e] sm:$0x1] %vm12064_vm15, %v13381_v44  ;;  %v13225_v11 = vpop.permute.xlu0 %13224 }
 0x804   : > { %12531 = vrot.lane.b32.xlu1 %v17769_v4, %s14949_s14  ;;  %v13229_v18 = vrot.slane %v13225_v11, 4 }
 0x805   : > { %12533 = vrot.lane.b32.xlu0 %v17783_v33, %s14949_s14 }
 0x806   : > { %v11985_v63 = vpop.permute.xlu1 %11984  ;;  %v13233_v48 = vsel %vm12152_vm1, %v13225_v11, %v13229_v18 }
 0x807   : > { %11997 = vst.msk [vmem:[%s18007_s22] sm:$0x1] %vm11996_vm11, %v11985_v63  ;;  %v11987_v12 = vpop.permute.xlu0 %11986 }
 0x808   : > { %13241 = vst.msk [vmem:[%s18007_s22 + $0x1a] sm:$0x1] %vm12161_vm2, %v13233_v48  ;;  %12547 = vrot.lane.b32.xlu1 %v17769_v4, %s14972_s13 }
 0x809   : > { %13309 = vst.msk [vmem:[%s18007_s22 + $0x1a] sm:$0x1] %vm12230_vm3, %v13301_v20  ;;  %12549 = vrot.lane.b32.xlu0 %v17783_v33, %s14972_s13 }
 0x80a   : > { %11998 = vst.msk [vmem:[%s18007_s22 + $0x8] sm:$0x1] %vm11996_vm11, %v11987_v12  ;;  %v12002_v37 = vpop.permute.xlu1 %12001 }
 0x80b   : > { %12014 = vst.msk [vmem:[%s18007_s22] sm:$0x1] %vm12013_vm12, %v12002_v37  ;;  %v12004_v30 = vpop.permute.xlu0 %12003 }
 0x80c   : > { %12563 = vrot.lane.b32.xlu1 %v17769_v4, %s14974_s18  ;;  %12015 = vst.msk [vmem:[%s18007_s22 + $0x8] sm:$0x1] %vm12013_vm12, %v12004_v30 }
 0x80d   : > { %12565 = vrot.lane.b32.xlu0 %v17783_v33, %s14974_s18 }
 0x80e   : > { %v12019_v51 = vpop.permute.xlu1 %12018 }
 0x80f   : > { %12031 = vst.msk [vmem:[%s18007_s22] sm:$0x1] %vm12030_vm13, %v12019_v51  ;;  %v12021_v28 = vpop.permute.xlu0 %12020 }
 0x810   : > { %12579 = vrot.lane.b32.xlu1 %v17769_v4, %s14976_s20  ;;  %12032 = vst.msk [vmem:[%s18007_s22 + $0x8] sm:$0x1] %vm12030_vm13, %v12021_v28 }
 0x811   : > { %12581 = vrot.lane.b32.xlu0 %v17783_v33, %s14976_s20 }
 0x812   : > { %v12036_v7 = vpop.permute.xlu1 %12035 }
 0x813   : > { %12048 = vst.msk [vmem:[%s18007_s22] sm:$0x1] %vm12047_vm14, %v12036_v7  ;;  %v12038_v27 = vpop.permute.xlu0 %12037 }
 0x814   : > { %12595 = vrot.lane.b32.xlu1 %v17769_v4, %s14978_s24  ;;  %12049 = vst.msk [vmem:[%s18007_s22 + $0x8] sm:$0x1] %vm12047_vm14, %v12038_v27 }
 0x815   : > { %12597 = vrot.lane.b32.xlu0 %v17783_v33, %s14978_s24 }
 0x816   : > { %v12053_v2 = vpop.permute.xlu1 %12052 }
 0x817   : > { %12065 = vst.msk [vmem:[%s18007_s22] sm:$0x1] %vm12064_vm15, %v12053_v2  ;;  %v12055_v29 = vpop.permute.xlu0 %12054 }
 0x818   : > { %12611 = vrot.lane.b32.xlu1 %v17769_v4, %s14980_s26  ;;  %12066 = vst.msk [vmem:[%s18007_s22 + $0x8] sm:$0x1] %vm12064_vm15, %v12055_v29  ;;  %v18729_v4 = vrot.slane %v17777_v5, %v17613_v16 }
 0x819   : > { %12613 = vrot.lane.b32.xlu0 %v17783_v33, %s14980_s26 }
 0x81a   : > { %v12070_v61 = vpop.permute.xlu1 %12069 }
 0x81b   : > { %12082 = vst.msk [vmem:[%s18007_s22] sm:$0x1] %vm12081_vm0, %v12070_v61  ;;  %v12072_v55 = vpop.permute.xlu0 %12071 }
 0x81c   : > { %12369 = vrot.lane.b32.xlu1 %v18728_v34, %s14985_s27  ;;  %12083 = vst.msk [vmem:[%s18007_s22 + $0x8] sm:$0x1] %vm12081_vm0, %v12072_v55 }
 0x81d   : > { %12371 = vrot.lane.b32.xlu0 %v18729_v4, %s14985_s27 }
 0x81e   : > { %v18284_v33 = vpop.permute.xlu1 %12218 }
 0x81f   : > { %v18286_v49 = vpop.permute.xlu0 %12220 }
 0x820   : > { %12450 = vrot.lane.b32.xlu1 %v17852_v40, %s14983_s16 }
 0x821   : > { %12452 = vrot.lane.b32.xlu0 %v17857_v59, %s14983_s16 }
 0x822   : > { %v12236_v31 = vpop.permute.xlu1 %12235 }
 0x823   : > { %12247 = vst.msk [vmem:[%s18007_s22 + $0x4] sm:$0x1] %vm11996_vm11, %v12236_v31  ;;  %v12238_v19 = vpop.permute.xlu0 %12237 }
 0x824   : > { %12466 = vrot.lane.b32.xlu1 %v17852_v40, %s14984_s23  ;;  %12248 = vst.msk [vmem:[%s18007_s22 + $0xc] sm:$0x1] %vm11996_vm11, %v12238_v19 }
 0x825   : > { %12468 = vrot.lane.b32.xlu0 %v17857_v59, %s14984_s23 }
 0x826   : > { %v12252_v5 = vpop.permute.xlu1 %12251 }
 0x827   : > { %12263 = vst.msk [vmem:[%s18007_s22 + $0x4] sm:$0x1] %vm12013_vm12, %v12252_v5  ;;  %v12254_v53 = vpop.permute.xlu0 %12253 }
 0x828   : > { %12535 = vrot.lane.b32.xlu1 %v17786_v10, %s14949_s14  ;;  %12264 = vst.msk [vmem:[%s18007_s22 + $0xc] sm:$0x1] %vm12013_vm12, %v12254_v53 }
 0x829   : > { %12537 = vrot.lane.b32.xlu0 %v17799_v6, %s14949_s14 }
 0x82a   : > { %v12268_v40 = vpop.permute.xlu1 %12267 }
 0x82b   : > { %12279 = vst.msk [vmem:[%s18007_s22 + $0x4] sm:$0x1] %vm12030_vm13, %v12268_v40  ;;  %v12270_v54 = vpop.permute.xlu0 %12269 }
 0x82c   : > { %12551 = vrot.lane.b32.xlu1 %v17786_v10, %s14972_s13  ;;  %12280 = vst.msk [vmem:[%s18007_s22 + $0xc] sm:$0x1] %vm12030_vm13, %v12270_v54 }
 0x82d   : > { %12553 = vrot.lane.b32.xlu0 %v17799_v6, %s14972_s13 }
 0x82e   : > { %v12284_v59 = vpop.permute.xlu1 %12283 }
 0x82f   : > { %12295 = vst.msk [vmem:[%s18007_s22 + $0x4] sm:$0x1] %vm12047_vm14, %v12284_v59  ;;  %v12286_v22 = vpop.permute.xlu0 %12285 }
 0x830   : > { %12567 = vrot.lane.b32.xlu1 %v17786_v10, %s14974_s18  ;;  %12296 = vst.msk [vmem:[%s18007_s22 + $0xc] sm:$0x1] %vm12047_vm14, %v12286_v22 }
 0x831   : > { %12569 = vrot.lane.b32.xlu0 %v17799_v6, %s14974_s18 }
 0x832   : > { %v12300_v13 = vpop.permute.xlu1 %12299 }
 0x833   : > { %12311 = vst.msk [vmem:[%s18007_s22 + $0x4] sm:$0x1] %vm12064_vm15, %v12300_v13  ;;  %v12302_v60 = vpop.permute.xlu0 %12301 }
 0x834   : > { %12583 = vrot.lane.b32.xlu1 %v17786_v10, %s14976_s20  ;;  %12312 = vst.msk [vmem:[%s18007_s22 + $0xc] sm:$0x1] %vm12064_vm15, %v12302_v60 }
 0x835   : > { %12585 = vrot.lane.b32.xlu0 %v17799_v6, %s14976_s20 }
 0x836   : > { %v11989_v0 = vpop.permute.xlu1 %11988 }
 0x837   : > { %11999 = vst.msk [vmem:[%s18007_s22 + $0x10] sm:$0x1] %vm11996_vm11, %v11989_v0  ;;  %v11991_v62 = vpop.permute.xlu0 %11990 }
 0x838   : > { %12599 = vrot.lane.b32.xlu1 %v17786_v10, %s14978_s24  ;;  %12000 = vst.msk [vmem:[%s18007_s22 + $0x18] sm:$0x1] %vm11996_vm11, %v11991_v62 }
 0x839   : > { %12601 = vrot.lane.b32.xlu0 %v17799_v6, %s14978_s24 }
 0x83a   : > { %v12006_v20 = vpop.permute.xlu1 %12005 }
 0x83b   : > { %12016 = vst.msk [vmem:[%s18007_s22 + $0x10] sm:$0x1] %vm12013_vm12, %v12006_v20  ;;  %v12008_v44 = vpop.permute.xlu0 %12007 }
 0x83c   : > { %12615 = vrot.lane.b32.xlu1 %v17786_v10, %s14980_s26  ;;  %12017 = vst.msk [vmem:[%s18007_s22 + $0x18] sm:$0x1] %vm12013_vm12, %v12008_v44 }
 0x83d   : > { %12617 = vrot.lane.b32.xlu0 %v17799_v6, %s14980_s26 }
 0x83e   : > { %v12023_v11 = vpop.permute.xlu1 %12022 }
 0x83f   : > { %12033 = vst.msk [vmem:[%s18007_s22 + $0x10] sm:$0x1] %vm12030_vm13, %v12023_v11  ;;  %v12025_v18 = vpop.permute.xlu0 %12024 }
 0x840   : > { %12373 = vrot.lane.b32.xlu1 %v17860_v58, %s14985_s27  ;;  %12034 = vst.msk [vmem:[%s18007_s22 + $0x18] sm:$0x1] %vm12030_vm13, %v12025_v18  ;;  %v18732_v18 = vrot.slane %v17824_v57, %v17613_v16 }
 0x841   : > { %12375 = vrot.lane.b32.xlu0 %v17876_v21, %s14985_s27 }
 0x842   : > { %v12040_v10 = vpop.permute.xlu1 %12039 }
 0x843   : > { %12050 = vst.msk [vmem:[%s18007_s22 + $0x10] sm:$0x1] %vm12047_vm14, %v12040_v10  ;;  %v12042_v63 = vpop.permute.xlu0 %12041 }
 0x844   : > { %12757 = vrot.lane.b32.xlu1 %v17821_v56, %s14981_s28  ;;  %12051 = vst.msk [vmem:[%s18007_s22 + $0x18] sm:$0x1] %vm12047_vm14, %v12042_v63 }
 0x845   : > { %12759 = vrot.lane.b32.xlu0 %v17830_v39, %s14981_s28 }
 0x846   : > { %v12057_v6 = vpop.permute.xlu1 %12056 }
 0x847   : > { %12067 = vst.msk [vmem:[%s18007_s22 + $0x10] sm:$0x1] %vm12064_vm15, %v12057_v6  ;;  %v12059_v58 = vpop.permute.xlu0 %12058 }
 0x848   : > { %12773 = vrot.lane.b32.xlu1 %v17821_v56, %s14971_s12  ;;  %12068 = vst.msk [vmem:[%s18007_s22 + $0x18] sm:$0x1] %vm12064_vm15, %v12059_v58 }
 0x849   : > { %12775 = vrot.lane.b32.xlu0 %v17830_v39, %s14971_s12 }
 0x84a   : > { %v12074_v21 = vpop.permute.xlu1 %12073 }
 0x84b   : > { %12084 = vst.msk [vmem:[%s18007_s22 + $0x10] sm:$0x1] %vm12081_vm0, %v12074_v21  ;;  %v12076_v48 = vpop.permute.xlu0 %12075 }
 0x84c   : > { %12789 = vrot.lane.b32.xlu1 %v17821_v56, %s14973_s17  ;;  %12085 = vst.msk [vmem:[%s18007_s22 + $0x18] sm:$0x1] %vm12081_vm0, %v12076_v48 }
 0x84d   : > { %12791 = vrot.lane.b32.xlu0 %v17830_v39, %s14973_s17 }
 0x84e   : > { %v12141_v12 = vpop.permute.xlu1 %12140 }
 0x84f   : > { %v12148_v37 = vrot.slane %v12141_v12, 4  ;;  %v12143_v30 = vpop.permute.xlu0 %12142 }
 0x850   : > { %12805 = vrot.lane.b32.xlu1 %v17821_v56, %s14975_s19  ;;  %v12149_v28 = vrot.slane %v12143_v30, 4 }
 0x851   : > { %v12153_v51 = vsel %vm12152_vm1, %v12141_v12, %v12148_v37  ;;  %12807 = vrot.lane.b32.xlu0 %v17830_v39, %s14975_s19 }
 0x852   : > { %12162 = vst.msk [vmem:[%s18007_s22] sm:$0x1] %vm12161_vm2, %v12153_v51  ;;  %v12223_v7 = vpop.permute.xlu1 %12222  ;;  %v12154_v27 = vsel %vm12152_vm1, %v12143_v30, %v12149_v28 }
 0x853   : > { %12231 = vst.msk [vmem:[%s18007_s22] sm:$0x1] %vm12230_vm3, %v18284_v33  ;;  %v12225_v2 = vpop.permute.xlu0 %12224 }
 0x854   : > { %12163 = vst.msk [vmem:[%s18007_s22 + $0x8] sm:$0x1] %vm12161_vm2, %v12154_v27  ;;  %12821 = vrot.lane.b32.xlu1 %v17821_v56, %s14977_s21 }
 0x855   : > { %12232 = vst.msk [vmem:[%s18007_s22 + $0x8] sm:$0x1] %vm12230_vm3, %v18286_v49  ;;  %12823 = vrot.lane.b32.xlu0 %v17830_v39, %s14977_s21  ;;  %v18730_v49 = vrot.slane %v17817_v46, %v17613_v16 }
 0x856   : > { %v12240_v29 = vpop.permute.xlu1 %12239 }
 0x857   : > { %12249 = vst.msk [vmem:[%s18007_s22 + $0x14] sm:$0x1] %vm11996_vm11, %v12240_v29  ;;  %v12242_v61 = vpop.permute.xlu0 %12241 }
 0x858   : > { %12837 = vrot.lane.b32.xlu1 %v17821_v56, %s14979_s25  ;;  %12250 = vst.msk [vmem:[%s18007_s22 + $0x1c] sm:$0x1] %vm11996_vm11, %v12242_v61 }
 0x859   : > { %12839 = vrot.lane.b32.xlu0 %v17830_v39, %s14979_s25 }
 0x85a   : > { %v12256_v55 = vpop.permute.xlu1 %12255 }
 0x85b   : > { %12265 = vst.msk [vmem:[%s18007_s22 + $0x14] sm:$0x1] %vm12013_vm12, %v12256_v55  ;;  %v12258_v34 = vpop.permute.xlu0 %12257 }
 0x85c   : > { %12983 = vrot.lane.b32.xlu1 %v17841_v8, %s14983_s16  ;;  %12266 = vst.msk [vmem:[%s18007_s22 + $0x1c] sm:$0x1] %vm12013_vm12, %v12258_v34 }
 0x85d   : > { %12985 = vrot.lane.b32.xlu0 %v17865_v15, %s14983_s16 }
 0x85e   : > { %v12272_v56 = vpop.permute.xlu1 %12271 }
 0x85f   : > { %12281 = vst.msk [vmem:[%s18007_s22 + $0x14] sm:$0x1] %vm12030_vm13, %v12272_v56  ;;  %v12274_v4 = vpop.permute.xlu0 %12273 }
 0x860   : > { %12999 = vrot.lane.b32.xlu1 %v17841_v8, %s14984_s23  ;;  %12282 = vst.msk [vmem:[%s18007_s22 + $0x1c] sm:$0x1] %vm12030_vm13, %v12274_v4  ;;  %v18731_v8 = vrot.slane %v17872_v36, %v17613_v16 }
 0x861   : > { %13001 = vrot.lane.b32.xlu0 %v17865_v15, %s14984_s23 }
 0x862   : > { %v12288_v39 = vpop.permute.xlu1 %12287 }
 0x863   : > { %12297 = vst.msk [vmem:[%s18007_s22 + $0x14] sm:$0x1] %vm12047_vm14, %v12288_v39  ;;  %v12290_v33 = vpop.permute.xlu0 %12289 }
 0x864   : > { %12681 = vrot.lane.b32.xlu1 %v18730_v49, %s14982_s30  ;;  %12298 = vst.msk [vmem:[%s18007_s22 + $0x1c] sm:$0x1] %vm12047_vm14, %v12290_v33 }
 0x865   : > { %12683 = vrot.lane.b32.xlu0 %v18731_v8, %s14982_s30 }
 0x866   : > { %v12304_v31 = vpop.permute.xlu1 %12303 }
 0x867   : > { %12313 = vst.msk [vmem:[%s18007_s22 + $0x14] sm:$0x1] %vm12064_vm15, %v12304_v31  ;;  %v12306_v15 = vpop.permute.xlu0 %12305 }
 0x868   : > { %12761 = vrot.lane.b32.xlu1 %v17833_v3, %s14981_s28  ;;  %12314 = vst.msk [vmem:[%s18007_s22 + $0x1c] sm:$0x1] %vm12064_vm15, %v12306_v15 }
 0x869   : > { %12763 = vrot.lane.b32.xlu0 %v17846_v32, %s14981_s28 }
 0x86a   : > { %v12145_v46 = vpop.permute.xlu1 %12144 }
 0x86b   : > { %v12150_v19 = vrot.slane %v12145_v46, 4  ;;  %v12147_v5 = vpop.permute.xlu0 %12146 }
 0x86c   : > { %12777 = vrot.lane.b32.xlu1 %v17833_v3, %s14971_s12  ;;  %v12151_v53 = vrot.slane %v12147_v5, 4 }
 0x86d   : > { %v12155_v36 = vsel %vm12152_vm1, %v12145_v46, %v12150_v19  ;;  %12779 = vrot.lane.b32.xlu0 %v17846_v32, %s14971_s12 }
 0x86e   : > { %12164 = vst.msk [vmem:[%s18007_s22 + $0x10] sm:$0x1] %vm12161_vm2, %v12155_v36  ;;  %v12447_v40 = vpop.permute.xlu1 %12446  ;;  %v12156_v54 = vsel %vm12152_vm1, %v12147_v5, %v12151_v53 }
 0x86f   : > { %12233 = vst.msk [vmem:[%s18007_s22 + $0x10] sm:$0x1] %vm12230_vm3, %v12223_v7  ;;  %v12449_v59 = vpop.permute.xlu0 %12448 }
 0x870   : > { %12165 = vst.msk [vmem:[%s18007_s22 + $0x18] sm:$0x1] %vm12161_vm2, %v12156_v54  ;;  %12793 = vrot.lane.b32.xlu1 %v17833_v3, %s14973_s17 }
 0x871   : > { %12234 = vst.msk [vmem:[%s18007_s22 + $0x18] sm:$0x1] %vm12230_vm3, %v12225_v2  ;;  %12795 = vrot.lane.b32.xlu0 %v17846_v32, %s14973_s17 }
 0x872   : > { %v12463_v22 = vpop.permute.xlu1 %12462 }
 0x873   : > { %v12465_v13 = vpop.permute.xlu0 %12464 }
 0x874   : > { %12809 = vrot.lane.b32.xlu1 %v17833_v3, %s14975_s19 }
 0x875   : > { %12811 = vrot.lane.b32.xlu0 %v17846_v32, %s14975_s19 }
 0x876   : > { %v12532_v60 = vpop.permute.xlu1 %12531 }
 0x877   : > { %12543 = vst.msk [vmem:[%s18007_s22 + $0x1] sm:$0x1] %vm11996_vm11, %v12532_v60  ;;  %v12534_v0 = vpop.permute.xlu0 %12533 }
 0x878   : > { %12825 = vrot.lane.b32.xlu1 %v17833_v3, %s14977_s21  ;;  %12544 = vst.msk [vmem:[%s18007_s22 + $0x9] sm:$0x1] %vm11996_vm11, %v12534_v0 }
 0x879   : > { %12827 = vrot.lane.b32.xlu0 %v17846_v32, %s14977_s21 }
 0x87a   : > { %v12548_v62 = vpop.permute.xlu1 %12547 }
 0x87b   : > { %12559 = vst.msk [vmem:[%s18007_s22 + $0x1] sm:$0x1] %vm12013_vm12, %v12548_v62  ;;  %v12550_v20 = vpop.permute.xlu0 %12549 }
 0x87c   : > { %12841 = vrot.lane.b32.xlu1 %v17833_v3, %s14979_s25  ;;  %12560 = vst.msk [vmem:[%s18007_s22 + $0x9] sm:$0x1] %vm12013_vm12, %v12550_v20  ;;  %v18733_v3 = vrot.slane %v17836_v25, %v17613_v16 }
 0x87d   : > { %12843 = vrot.lane.b32.xlu0 %v17846_v32, %s14979_s25 }
 0x87e   : > { %v12564_v44 = vpop.permute.xlu1 %12563 }
 0x87f   : > { %12575 = vst.msk [vmem:[%s18007_s22 + $0x1] sm:$0x1] %vm12030_vm13, %v12564_v44  ;;  %v12566_v11 = vpop.permute.xlu0 %12565 }
 0x880   : > { %12907 = vrot.lane.b32.xlu1 %v18732_v18, %s14985_s27  ;;  %12576 = vst.msk [vmem:[%s18007_s22 + $0x9] sm:$0x1] %vm12030_vm13, %v12566_v11 }
 0x881   : > { %12909 = vrot.lane.b32.xlu0 %v18733_v3, %s14985_s27 }
 0x882   : > { %v12580_v10 = vpop.permute.xlu1 %12579 }
 0x883   : > { %12591 = vst.msk [vmem:[%s18007_s22 + $0x1] sm:$0x1] %vm12047_vm14, %v12580_v10  ;;  %v12582_v32 = vpop.permute.xlu0 %12581 }
 0x884   : > { %12987 = vrot.lane.b32.xlu1 %v17883_v35, %s14983_s16  ;;  %12592 = vst.msk [vmem:[%s18007_s22 + $0x9] sm:$0x1] %vm12047_vm14, %v12582_v32 }
 0x885   : > { %12989 = vrot.lane.b32.xlu0 %v17892_v52, %s14983_s16 }
 0x886   : > { %v12596_v57 = vpop.permute.xlu1 %12595 }
 0x887   : > { %12607 = vst.msk [vmem:[%s18007_s22 + $0x1] sm:$0x1] %vm12064_vm15, %v12596_v57  ;;  %v12598_v63 = vpop.permute.xlu0 %12597 }
 0x888   : > { %13003 = vrot.lane.b32.xlu1 %v17883_v35, %s14984_s23  ;;  %12608 = vst.msk [vmem:[%s18007_s22 + $0x9] sm:$0x1] %vm12064_vm15, %v12598_v63 }
 0x889   : > { %13005 = vrot.lane.b32.xlu0 %v17892_v52, %s14984_s23 }
 0x88a   : > { %v12612_v25 = vpop.permute.xlu1 %12611 }
 0x88b   : > { %12623 = vst.msk [vmem:[%s18007_s22 + $0x1] sm:$0x1] %vm12081_vm0, %v12612_v25  ;;  %v12614_v6 = vpop.permute.xlu0 %12613 }
 0x88c   : > { %12685 = vrot.lane.b32.xlu1 %v17911_v42, %s14982_s30  ;;  %12624 = vst.msk [vmem:[%s18007_s22 + $0x9] sm:$0x1] %vm12081_vm0, %v12614_v6 }
 0x88d   : > { %12687 = vrot.lane.b32.xlu0 %v17914_v43, %s14982_s30 }
 0x88e   : > { %v12370_v35 = vpop.permute.xlu1 %12369 }
 0x88f   : > { %v12377_v52 = vrot.slane %v12370_v35, 4  ;;  %v12372_v58 = vpop.permute.xlu0 %12371 }
 0x890   : > { %12911 = vrot.lane.b32.xlu1 %v17899_v38, %s14985_s27  ;;  %v12378_v48 = vrot.slane %v12372_v58, 4 }
 0x891   : > { %v12382_v21 = vsel %vm12381_vm4, %v12370_v35, %v12377_v52  ;;  %12913 = vrot.lane.b32.xlu0 %v17929_v24, %s14985_s27 }
 0x892   : > { %12390 = vst.msk [vmem:[%s18007_s22 + $0x4] sm:$0x1] %vm12081_vm0, %v12382_v21  ;;  %v12451_v42 = vpop.permute.xlu1 %12450  ;;  %v12383_v43 = vsel %vm12381_vm4, %v12372_v58, %v12378_v48 }
 0x893   : > { %12458 = vst.msk [vmem:[%s18007_s22 + $0x4] sm:$0x1] %vm12161_vm2, %v12447_v40  ;;  %v12453_v38 = vpop.permute.xlu0 %12452 }
 0x894   : > { %12474 = vst.msk [vmem:[%s18007_s22 + $0x4] sm:$0x1] %vm12230_vm3, %v12463_v22  ;;  %13522 = vrot.lane.b32.xlu1 %v17924_v41, %s14983_s16 }
 0x895   : > { %12391 = vst.msk [vmem:[%s18007_s22 + $0xc] sm:$0x1] %vm12081_vm0, %v12383_v43  ;;  %13520 = vrot.lane.b32.xlu0 %v17906_v50, %s14983_s16 }
 0x896   : > { %12459 = vst.msk [vmem:[%s18007_s22 + $0xc] sm:$0x1] %vm12161_vm2, %v12449_v59  ;;  %v12467_v24 = vpop.permute.xlu1 %12466 }
 0x897   : > { %12475 = vst.msk [vmem:[%s18007_s22 + $0xc] sm:$0x1] %vm12230_vm3, %v12465_v13  ;;  %v12469_v12 = vpop.permute.xlu0 %12468 }
 0x898   : > { %13446 = vrot.lane.b32.xlu1 %v13429_v17, %s14985_s27 }
 0x899   : > { %13444 = vrot.lane.b32.xlu0 %v13422_v14, %s14985_s27 }
 0x89a   : > { %v12536_v37 = vpop.permute.xlu1 %12535 }
 0x89b   : > { %12545 = vst.msk [vmem:[%s18007_s22 + $0x11] sm:$0x1] %vm11996_vm11, %v12536_v37  ;;  %v12538_v30 = vpop.permute.xlu0 %12537 }
 0x89c   : > { %13526 = vrot.lane.b32.xlu1 %v17939_v23, %s14983_s16  ;;  %12546 = vst.msk [vmem:[%s18007_s22 + $0x19] sm:$0x1] %vm11996_vm11, %v12538_v30 }
 0x89d   : > { %13524 = vrot.lane.b32.xlu0 %v17934_v45, %s14983_s16 }
 0x89e   : > { %v12552_v47 = vpop.permute.xlu1 %12551 }
 0x89f   : > { %12561 = vst.msk [vmem:[%s18007_s22 + $0x11] sm:$0x1] %vm12013_vm12, %v12552_v47  ;;  %v12554_v16 = vpop.permute.xlu0 %12553 }
 0x8a0   : > { %13450 = vrot.lane.b32.xlu1 %v17949_v9, %s14985_s27  ;;  %12562 = vst.msk [vmem:[%s18007_s22 + $0x19] sm:$0x1] %vm12013_vm12, %v12554_v16 }
 0x8a1   : > { %13448 = vrot.lane.b32.xlu0 %v17944_v26, %s14985_s27 }
 0x8a2   : > { %v12568_v1 = vpop.permute.xlu1 %12567 }
 0x8a3   : > { %12577 = vst.msk [vmem:[%s18007_s22 + $0x11] sm:$0x1] %vm12030_vm13, %v12568_v1  ;;  %v12570_v14 = vpop.permute.xlu0 %12569 }
 0x8a4   : > { %13536 = vrot.lane.b32.xlu1 %v17906_v50, %s14984_s23  ;;  %12578 = vst.msk [vmem:[%s18007_s22 + $0x19] sm:$0x1] %vm12030_vm13, %v12570_v14 }
 0x8a5   : > { %13538 = vrot.lane.b32.xlu0 %v17924_v41, %s14984_s23 }
 0x8a6   : > { %v12584_v17 = vpop.permute.xlu1 %12583 }
 0x8a7   : > { %12593 = vst.msk [vmem:[%s18007_s22 + $0x11] sm:$0x1] %vm12047_vm14, %v12584_v17  ;;  %v12586_v9 = vpop.permute.xlu0 %12585 }
 0x8a8   : > { %13540 = vrot.lane.b32.xlu1 %v17934_v45, %s14984_s23  ;;  %12594 = vst.msk [vmem:[%s18007_s22 + $0x19] sm:$0x1] %vm12047_vm14, %v12586_v9 }
 0x8a9   : > { %13542 = vrot.lane.b32.xlu0 %v17939_v23, %s14984_s23 }
 0x8aa   : > { %v12600_v26 = vpop.permute.xlu1 %12599 }
 0x8ab   : > { %12609 = vst.msk [vmem:[%s18007_s22 + $0x11] sm:$0x1] %vm12064_vm15, %v12600_v26  ;;  %v12602_v50 = vpop.permute.xlu0 %12601 }
 0x8ac   : > { %12610 = vst.msk [vmem:[%s18007_s22 + $0x19] sm:$0x1] %vm12064_vm15, %v12602_v50 }
 0x8ae   : > { %v12616_v41 = vpop.permute.xlu1 %12615 }
 0x8af   : > { %12625 = vst.msk [vmem:[%s18007_s22 + $0x11] sm:$0x1] %vm12081_vm0, %v12616_v41  ;;  %v12618_v45 = vpop.permute.xlu0 %12617 }
 0x8b0   : > { %12626 = vst.msk [vmem:[%s18007_s22 + $0x19] sm:$0x1] %vm12081_vm0, %v12618_v45 }
 0x8b2   : > { %v12374_v51 = vpop.permute.xlu1 %12373 }
 0x8b3   : > { %v12379_v23 = vrot.slane %v12374_v51, 4  ;;  %v12376_v28 = vpop.permute.xlu0 %12375 }
 0x8b4   : > { %v12380_v27 = vrot.slane %v12376_v28, 4 }
 0x8b5   : > { %v12384_v7 = vsel %vm12381_vm4, %v12374_v51, %v12379_v23 }
 0x8b6   : > { %12392 = vst.msk [vmem:[%s18007_s22 + $0x14] sm:$0x1] %vm12081_vm0, %v12384_v7  ;;  %v12758_v2 = vpop.permute.xlu1 %12757  ;;  %v12385_v29 = vsel %vm12381_vm4, %v12376_v28, %v12380_v27 }
 0x8b7   : > { %12460 = vst.msk [vmem:[%s18007_s22 + $0x14] sm:$0x1] %vm12161_vm2, %v12451_v42  ;;  %v12760_v61 = vpop.permute.xlu0 %12759 }
 0x8b8   : > { %12476 = vst.msk [vmem:[%s18007_s22 + $0x14] sm:$0x1] %vm12230_vm3, %v12467_v24 }
 0x8b9   : > { %12393 = vst.msk [vmem:[%s18007_s22 + $0x1c] sm:$0x1] %vm12081_vm0, %v12385_v29 }
 0x8ba   : > { %12461 = vst.msk [vmem:[%s18007_s22 + $0x1c] sm:$0x1] %vm12161_vm2, %v12453_v38  ;;  %v12774_v55 = vpop.permute.xlu1 %12773 }
 0x8bb   : > { %12477 = vst.msk [vmem:[%s18007_s22 + $0x1c] sm:$0x1] %vm12230_vm3, %v12469_v12  ;;  %v12776_v34 = vpop.permute.xlu0 %12775 }
 0x8bc   : > { %12785 = vst.msk [vmem:[%s18007_s22 + $0x5] sm:$0x1] %vm11996_vm11, %v12774_v55  ;;  %12786 = vst.msk [vmem:[%s18007_s22 + $0xd] sm:$0x1] %vm11996_vm11, %v12776_v34 }
 0x8be   : > { %v12790_v56 = vpop.permute.xlu1 %12789 }
 0x8bf   : > { %12801 = vst.msk [vmem:[%s18007_s22 + $0x5] sm:$0x1] %vm12013_vm12, %v12790_v56  ;;  %v12792_v4 = vpop.permute.xlu0 %12791 }
 0x8c0   : > { %12802 = vst.msk [vmem:[%s18007_s22 + $0xd] sm:$0x1] %vm12013_vm12, %v12792_v4 }
 0x8c2   : > { %v12806_v39 = vpop.permute.xlu1 %12805 }
 0x8c3   : > { %12817 = vst.msk [vmem:[%s18007_s22 + $0x5] sm:$0x1] %vm12030_vm13, %v12806_v39  ;;  %v12808_v33 = vpop.permute.xlu0 %12807 }
 0x8c4   : > { %12818 = vst.msk [vmem:[%s18007_s22 + $0xd] sm:$0x1] %vm12030_vm13, %v12808_v33 }
 0x8c6   : > { %v12822_v49 = vpop.permute.xlu1 %12821 }
 0x8c7   : > { %12833 = vst.msk [vmem:[%s18007_s22 + $0x5] sm:$0x1] %vm12047_vm14, %v12822_v49  ;;  %v12824_v8 = vpop.permute.xlu0 %12823 }
 0x8c8   : > { %12834 = vst.msk [vmem:[%s18007_s22 + $0xd] sm:$0x1] %vm12047_vm14, %v12824_v8 }
 0x8ca   : > { %v12838_v31 = vpop.permute.xlu1 %12837 }
 0x8cb   : > { %12849 = vst.msk [vmem:[%s18007_s22 + $0x5] sm:$0x1] %vm12064_vm15, %v12838_v31  ;;  %v12840_v15 = vpop.permute.xlu0 %12839 }
 0x8cc   : > { %12850 = vst.msk [vmem:[%s18007_s22 + $0xd] sm:$0x1] %vm12064_vm15, %v12840_v15 }
 0x8ce   : > { %v12984_v46 = vpop.permute.xlu1 %12983 }
 0x8cf   : > { %v12986_v19 = vpop.permute.xlu0 %12985 }
 0x8d2   : > { %v13000_v5 = vpop.permute.xlu1 %12999 }
 0x8d3   : > { %v13002_v36 = vpop.permute.xlu0 %13001 }
 0x8d6   : > { %v12682_v53 = vpop.permute.xlu1 %12681 }
 0x8d7   : > { %v12689_v40 = vrot.slane %v12682_v53, 4  ;;  %v12684_v54 = vpop.permute.xlu0 %12683 }
 0x8d8   : > { %v12690_v22 = vrot.slane %v12684_v54, 4 }
 0x8d9   : > { %v12693_v59 = vsel %vm12152_vm1, %v12682_v53, %v12689_v40 }
 0x8da   : > { %12701 = vst.msk [vmem:[%s18007_s22 + $0x1] sm:$0x1] %vm12161_vm2, %v12693_v59  ;;  %v12762_v13 = vpop.permute.xlu1 %12761  ;;  %v12694_v60 = vsel %vm12152_vm1, %v12684_v54, %v12690_v22 }
 0x8db   : > { %12769 = vst.msk [vmem:[%s18007_s22 + $0x1] sm:$0x1] %vm12230_vm3, %v12758_v2  ;;  %v12764_v0 = vpop.permute.xlu0 %12763 }
 0x8dc   : > { %12702 = vst.msk [vmem:[%s18007_s22 + $0x9] sm:$0x1] %vm12161_vm2, %v12694_v60 }
 0x8dd   : > { %12770 = vst.msk [vmem:[%s18007_s22 + $0x9] sm:$0x1] %vm12230_vm3, %v12760_v61 }
 0x8de   : > { %v12778_v62 = vpop.permute.xlu1 %12777 }
 0x8df   : > { %12787 = vst.msk [vmem:[%s18007_s22 + $0x15] sm:$0x1] %vm11996_vm11, %v12778_v62  ;;  %v12780_v20 = vpop.permute.xlu0 %12779 }
 0x8e0   : > { %12788 = vst.msk [vmem:[%s18007_s22 + $0x1d] sm:$0x1] %vm11996_vm11, %v12780_v20 }
 0x8e2   : > { %v12794_v44 = vpop.permute.xlu1 %12793 }
 0x8e3   : > { %12803 = vst.msk [vmem:[%s18007_s22 + $0x15] sm:$0x1] %vm12013_vm12, %v12794_v44  ;;  %v12796_v11 = vpop.permute.xlu0 %12795 }
 0x8e4   : > { %12804 = vst.msk [vmem:[%s18007_s22 + $0x1d] sm:$0x1] %vm12013_vm12, %v12796_v11 }
 0x8e6   : > { %v12810_v18 = vpop.permute.xlu1 %12809 }
 0x8e7   : > { %12819 = vst.msk [vmem:[%s18007_s22 + $0x15] sm:$0x1] %vm12030_vm13, %v12810_v18  ;;  %v12812_v3 = vpop.permute.xlu0 %12811 }
 0x8e8   : > { %12820 = vst.msk [vmem:[%s18007_s22 + $0x1d] sm:$0x1] %vm12030_vm13, %v12812_v3 }
 0x8ea   : > { %v12826_v10 = vpop.permute.xlu1 %12825 }
 0x8eb   : > { %12835 = vst.msk [vmem:[%s18007_s22 + $0x15] sm:$0x1] %vm12047_vm14, %v12826_v10  ;;  %v12828_v32 = vpop.permute.xlu0 %12827 }
 0x8ec   : > { %12836 = vst.msk [vmem:[%s18007_s22 + $0x1d] sm:$0x1] %vm12047_vm14, %v12828_v32 }
 0x8ee   : > { %v12842_v57 = vpop.permute.xlu1 %12841 }
 0x8ef   : > { %12851 = vst.msk [vmem:[%s18007_s22 + $0x15] sm:$0x1] %vm12064_vm15, %v12842_v57  ;;  %v12844_v63 = vpop.permute.xlu0 %12843 }
 0x8f0   : > { %12852 = vst.msk [vmem:[%s18007_s22 + $0x1d] sm:$0x1] %vm12064_vm15, %v12844_v63 }
 0x8f2   : > { %v12908_v25 = vpop.permute.xlu1 %12907 }
 0x8f3   : > { %v12915_v6 = vrot.slane %v12908_v25, 4  ;;  %v12910_v35 = vpop.permute.xlu0 %12909 }
 0x8f4   : > { %v12916_v58 = vrot.slane %v12910_v35, 4 }
 0x8f5   : > { %v12919_v52 = vsel %vm12381_vm4, %v12908_v25, %v12915_v6 }
 0x8f6   : > { %12927 = vst.msk [vmem:[%s18007_s22 + $0x5] sm:$0x1] %vm12081_vm0, %v12919_v52  ;;  %v12988_v21 = vpop.permute.xlu1 %12987  ;;  %v12920_v48 = vsel %vm12381_vm4, %v12910_v35, %v12916_v58 }
 0x8f7   : > { %12995 = vst.msk [vmem:[%s18007_s22 + $0x5] sm:$0x1] %vm12161_vm2, %v12984_v46  ;;  %v12990_v42 = vpop.permute.xlu0 %12989 }
 0x8f8   : > { %13011 = vst.msk [vmem:[%s18007_s22 + $0x5] sm:$0x1] %vm12230_vm3, %v13000_v5 }
 0x8f9   : > { %12928 = vst.msk [vmem:[%s18007_s22 + $0xd] sm:$0x1] %vm12081_vm0, %v12920_v48 }
 0x8fa   : > { %12996 = vst.msk [vmem:[%s18007_s22 + $0xd] sm:$0x1] %vm12161_vm2, %v12986_v19  ;;  %v13004_v43 = vpop.permute.xlu1 %13003 }
 0x8fb   : > { %13012 = vst.msk [vmem:[%s18007_s22 + $0xd] sm:$0x1] %vm12230_vm3, %v13002_v36  ;;  %v13006_v38 = vpop.permute.xlu0 %13005 }
 0x8fe   : > { %v12686_v24 = vpop.permute.xlu1 %12685 }
 0x8ff   : > { %v12691_v12 = vrot.slane %v12686_v24, 4  ;;  %v12688_v37 = vpop.permute.xlu0 %12687 }
 0x900   : > { %v12692_v47 = vrot.slane %v12688_v37, 4 }
 0x901   : > { %v12695_v30 = vsel %vm12152_vm1, %v12686_v24, %v12691_v12 }
 0x902   : > { %12703 = vst.msk [vmem:[%s18007_s22 + $0x11] sm:$0x1] %vm12161_vm2, %v12695_v30  ;;  %v12912_v16 = vpop.permute.xlu1 %12911  ;;  %v12696_v1 = vsel %vm12152_vm1, %v12688_v37, %v12692_v47 }
 0x903   : > { %12771 = vst.msk [vmem:[%s18007_s22 + $0x11] sm:$0x1] %vm12230_vm3, %v12762_v13  ;;  %v12917_v14 = vrot.slane %v12912_v16, 4  ;;  %v12914_v17 = vpop.permute.xlu0 %12913 }
 0x904   : > { %12704 = vst.msk [vmem:[%s18007_s22 + $0x19] sm:$0x1] %vm12161_vm2, %v12696_v1  ;;  %v12918_v26 = vrot.slane %v12914_v17, 4 }
 0x905   : > { %12772 = vst.msk [vmem:[%s18007_s22 + $0x19] sm:$0x1] %vm12230_vm3, %v12764_v0  ;;  %v12921_v9 = vsel %vm12381_vm4, %v12912_v16, %v12917_v14 }
 0x906   : > { %12929 = vst.msk [vmem:[%s18007_s22 + $0x15] sm:$0x1] %vm12081_vm0, %v12921_v9  ;;  %v13523_v50 = vpop.permute.xlu1 %13522  ;;  %v12922_v41 = vsel %vm12381_vm4, %v12914_v17, %v12918_v26 }
 0x907   : > { %12997 = vst.msk [vmem:[%s18007_s22 + $0x15] sm:$0x1] %vm12161_vm2, %v12988_v21  ;;  %v13521_v45 = vpop.permute.xlu0 %13520 }
 0x908   : > { %13013 = vst.msk [vmem:[%s18007_s22 + $0x15] sm:$0x1] %vm12230_vm3, %v13004_v43 }
 0x909   : > { %12930 = vst.msk [vmem:[%s18007_s22 + $0x1d] sm:$0x1] %vm12081_vm0, %v12922_v41 }
 0x90a   : > { %12998 = vst.msk [vmem:[%s18007_s22 + $0x1d] sm:$0x1] %vm12161_vm2, %v12990_v42  ;;  %v13447_v51 = vpop.permute.xlu1 %13446 }
 0x90b   : > { %13014 = vst.msk [vmem:[%s18007_s22 + $0x1d] sm:$0x1] %vm12230_vm3, %v13006_v38  ;;  %v13453_v23 = vrot.slane %v13447_v51, 4  ;;  %v13445_v28 = vpop.permute.xlu0 %13444 }
 0x90c   : > { %v13452_v27 = vrot.slane %v13445_v28, 4 }
 0x90d   : > { %v13457_v7 = vsel %vm12381_vm4, %v13447_v51, %v13453_v23 }
 0x90e   : > { %13465 = vst.msk [vmem:[%s18007_s22 + $0xe] sm:$0x1] %vm12081_vm0, %v13457_v7  ;;  %v13527_v2 = vpop.permute.xlu1 %13526  ;;  %v13456_v29 = vsel %vm12381_vm4, %v13445_v28, %v13452_v27 }
 0x90f   : > { %13533 = vst.msk [vmem:[%s18007_s22 + $0xe] sm:$0x1] %vm12161_vm2, %v13523_v50  ;;  %v13525_v61 = vpop.permute.xlu0 %13524 }
 0x910   : > { %13464 = vst.msk [vmem:[%s18007_s22 + $0x6] sm:$0x1] %vm12081_vm0, %v13456_v29 }
 0x911   : > { %13532 = vst.msk [vmem:[%s18007_s22 + $0x6] sm:$0x1] %vm12161_vm2, %v13521_v45 }
 0x912   : > { %v13451_v55 = vpop.permute.xlu1 %13450 }
 0x913   : > { %v13455_v34 = vrot.slane %v13451_v55, 4  ;;  %v13449_v56 = vpop.permute.xlu0 %13448 }
 0x914   : > { %v13454_v39 = vrot.slane %v13449_v56, 4 }
 0x915   : > { %v13459_v4 = vsel %vm12381_vm4, %v13451_v55, %v13455_v34 }
 0x916   : > { %13467 = vst.msk [vmem:[%s18007_s22 + $0x1e] sm:$0x1] %vm12081_vm0, %v13459_v4  ;;  %v13537_v33 = vpop.permute.xlu1 %13536  ;;  %v13458_v49 = vsel %vm12381_vm4, %v13449_v56, %v13454_v39 }
 0x917   : > { %13535 = vst.msk [vmem:[%s18007_s22 + $0x1e] sm:$0x1] %vm12161_vm2, %v13527_v2  ;;  %v13539_v8 = vpop.permute.xlu0 %13538 }
 0x918   : > { %13548 = vst.msk [vmem:[%s18007_s22 + $0x6] sm:$0x1] %vm12230_vm3, %v13537_v33  ;;  %13549 = vst.msk [vmem:[%s18007_s22 + $0xe] sm:$0x1] %vm12230_vm3, %v13539_v8 }
 0x919   : > { %13466 = vst.msk [vmem:[%s18007_s22 + $0x16] sm:$0x1] %vm12081_vm0, %v13458_v49 }
 0x91a   : > { %13534 = vst.msk [vmem:[%s18007_s22 + $0x16] sm:$0x1] %vm12161_vm2, %v13525_v61  ;;  %v13541_v31 = vpop.permute.xlu1 %13540 }
 0x91b   : > { %13550 = vst.msk [vmem:[%s18007_s22 + $0x16] sm:$0x1] %vm12230_vm3, %v13541_v31  ;;  %v13543_v15 = vpop.permute.xlu0 %13542 }
 0x91c   : > { %13551 = vst.msk [vmem:[%s18007_s22 + $0x1e] sm:$0x1] %vm12230_vm3, %v13543_v15 }
 0x91d PF: > { %s14_s15 = sadd.s32 1, %s14929_s15  }
 0x91e   : > { %p11_p4 = scmp.ge.s32.totalorder %s14_s15, 4  }
 0x920   :  { %13 = sbr.rel (!%p11_p4) target bundleno = 1 (0x1), region = 66 }

</bundles_post_ra>
